<compile_context>
chip_gen: v6e
topology: v6e:2x2x1
jax: 0.10.0
libtpu: 0.0.40
codegen_flags: <defaults>
</compile_context>

<pallas_src>
import functools
import numpy as np
import jax
import jax.numpy as jnp
from jax.experimental import pallas as pl
from jax.experimental.pallas import tpu as pltpu

F32 = jnp.float32
BF16 = jnp.bfloat16
VMEM = pl.BlockSpec(memory_space=pltpu.MemorySpace.VMEM)


# ----------------- GIN branch: 5x (A_hat @ h -> MLP -> ReLU -> BN) + pool + fc1_xd ---
def _gin_branch_kernel(x_ref, a_ref, pool_ref, *refs):
    out_ref = refs[-1]
    prm = refs[:-1]
    a = a_ref[...]                                      # bf16 [N, N]  (= A + I)
    h = x_ref[...]                                      # f32  [N, F0]
    idx = 0
    for _ in range(5):
        w1, b1, w2, b2, sc, sh = prm[idx:idx + 6]
        idx += 6
        agg = jnp.dot(a, h.astype(BF16), preferred_element_type=F32)
        h1 = jnp.maximum(
            jnp.dot(agg.astype(BF16), w1[...], preferred_element_type=F32) + b1[...],
            0.0)
        h2 = jnp.dot(h1.astype(BF16), w2[...], preferred_element_type=F32) + b2[...]
        h = jnp.maximum(h2, 0.0) * sc[...] + sh[...]    # ReLU then folded BatchNorm
    fcw, fcb = prm[idx], prm[idx + 1]
    pooled = jnp.dot(pool_ref[...], h.astype(BF16), preferred_element_type=F32)
    out_ref[...] = jnp.maximum(
        jnp.dot(pooled.astype(BF16), fcw[...], preferred_element_type=F32) + fcb[...],
        0.0)


def gin_branch(x, a_hat, pool_mat, p):
    args = [x.astype(F32), a_hat.astype(BF16), pool_mat.astype(BF16)]
    for l in range(5):
        args += [p[f'gin{l}_w1'], p[f'gin{l}_b1'],
                 p[f'gin{l}_w2'], p[f'gin{l}_b2'],
                 p[f'bn{l}_scale'], p[f'bn{l}_shift']]
    args += [p['fc1_xd_w'], p['fc1_xd_b']]
    B = pool_mat.shape[0]
    return pl.pallas_call(
        _gin_branch_kernel,
        out_shape=jax.ShapeDtypeStruct((B, 128), F32),
        in_specs=[VMEM] * len(args),
        out_specs=VMEM,
    )(*args)


# ----------------- bidirectional GRU (hidden 100), both directions in one kernel -----
# Seq-major quirk preserved from the PyTorch model: dim0 of smile_vectors (= batch of
# graphs) is the GRU time axis, dim1 (= SMILES length) is the GRU batch.
def _gru_bidir_kernel(T, xf_ref, xb_ref, wif_ref, wib_ref, bif_ref, bib_ref,
                      whf_ref, whb_ref, bhf_ref, bhb_ref,
                      mf_ref, mb_ref, hf_scr, hb_scr):
    t = pl.program_id(0)
    H = 100

    @pl.when(t == 0)
    def _():
        hf_scr[...] = jnp.zeros_like(hf_scr)
        hb_scr[...] = jnp.zeros_like(hb_scr)

    def cell(x, wih, bih, whh, bhh, h_prev):
        xg = jnp.dot(x.astype(BF16), wih, preferred_element_type=F32) + bih
        hg = jnp.dot(h_prev.astype(BF16), whh, preferred_element_type=F32) + bhh
        r = jax.nn.sigmoid(xg[:, 0:H] + hg[:, 0:H])
        z = jax.nn.sigmoid(xg[:, H:2 * H] + hg[:, H:2 * H])
        n = jnp.tanh(xg[:, 2 * H:3 * H] + r * hg[:, 2 * H:3 * H])
        return (1.0 - z) * n + z * h_prev

    h_f = cell(xf_ref[0], wif_ref[...], bif_ref[...], whf_ref[...], bhf_ref[...],
               hf_scr[...])
    h_b = cell(xb_ref[0], wib_ref[...], bib_ref[...], whb_ref[...], bhb_ref[...],
               hb_scr[...])
    hf_scr[...] = h_f
    hb_scr[...] = h_b
    # fused ReLU + mean over the GRU "batch" (= SMILES length) dimension
    mf_ref[pl.ds(t, 1), :] = jnp.mean(jnp.maximum(h_f, 0.0), axis=0, keepdims=True)
    mb_ref[pl.ds(T - 1 - t, 1), :] = jnp.mean(jnp.maximum(h_b, 0.0), axis=0,
                                              keepdims=True)


def gru_bidir(sv, p):
    # sv: [T, L, 100]  (T = graph-batch acting as sequence, L = SMILES length)
    T, L, E = sv.shape
    H = 100
    kern = functools.partial(_gru_bidir_kernel, T)
    mf, mb = pl.pallas_call(
        kern,
        grid=(T,),
        in_specs=[
            pl.BlockSpec((1, L, E), lambda t: (t, 0, 0)),
            pl.BlockSpec((1, L, E), lambda t: (T - 1 - t, 0, 0)),
            pl.BlockSpec((E, 3 * H), lambda t: (0, 0)),
            pl.BlockSpec((E, 3 * H), lambda t: (0, 0)),
            pl.BlockSpec((1, 3 * H), lambda t: (0, 0)),
            pl.BlockSpec((1, 3 * H), lambda t: (0, 0)),
            pl.BlockSpec((H, 3 * H), lambda t: (0, 0)),
            pl.BlockSpec((H, 3 * H), lambda t: (0, 0)),
            pl.BlockSpec((1, 3 * H), lambda t: (0, 0)),
            pl.BlockSpec((1, 3 * H), lambda t: (0, 0)),
        ],
        out_specs=[pl.BlockSpec((T, H), lambda t: (0, 0)),
                   pl.BlockSpec((T, H), lambda t: (0, 0))],
        out_shape=[jax.ShapeDtypeStruct((T, H), F32),
                   jax.ShapeDtypeStruct((T, H), F32)],
        scratch_shapes=[pltpu.VMEM((L, H), F32)] * 2,
        compiler_params=pltpu.CompilerParams(dimension_semantics=("arbitrary",)),
    )(sv, sv,
      p['gru_wih_f'], p['gru_wih_b'], p['gru_bih_f'], p['gru_bih_b'],
      p['gru_whh_f'], p['gru_whh_b'], p['gru_bhh_f'], p['gru_bhh_b'])
    return jnp.concatenate([mf, mb], axis=-1)            # [T, 200]


# ----------------- bidirectional LSTM layer (hidden 32), both directions fused -------
def _lstm_bidir_kernel(xf_ref, xb_ref, wif_ref, wib_ref, bf_ref, bb_ref,
                       whf_ref, whb_ref,
                       of_ref, ob_ref, hnf_ref, hnb_ref,
                       hf_scr, cf_scr, hb_scr, cb_scr):
    t = pl.program_id(0)
    H = 32

    @pl.when(t == 0)
    def _():
        for s in (hf_scr, cf_scr, hb_scr, cb_scr):
            s[...] = jnp.zeros_like(s)

    def cell(x, wih, bias, whh, h_prev, c_prev):
        g = (jnp.dot(x.astype(BF16), wih, preferred_element_type=F32) + bias +
             jnp.dot(h_prev.astype(BF16), whh, preferred_element_type=F32))
        i = jax.nn.sigmoid(g[:, 0:H])
        f = jax.nn.sigmoid(g[:, H:2 * H])
        gg = jnp.tanh(g[:, 2 * H:3 * H])
        o = jax.nn.sigmoid(g[:, 3 * H:4 * H])
        c_new = f * c_prev + i * gg
        return o * jnp.tanh(c_new), c_new

    h_f, c_f = cell(xf_ref[0], wif_ref[...], bf_ref[...], whf_ref[...],
                    hf_scr[...], cf_scr[...])
    h_b, c_b = cell(xb_ref[0], wib_ref[...], bb_ref[...], whb_ref[...],
                    hb_scr[...], cb_scr[...])
    hf_scr[...] = h_f
    cf_scr[...] = c_f
    hb_scr[...] = h_b
    cb_scr[...] = c_b
    of_ref[0] = h_f
    ob_ref[0] = h_b
    hnf_ref[...] = h_f           # last grid step's write (final state) persists
    hnb_ref[...] = h_b


def lstm_bidir_layer(layer_in, p, l):
    # layer_in: [T, B, Fin] time-major
    T, B, Fin = layer_in.shape
    H = 32
    return pl.pallas_call(
        _lstm_bidir_kernel,
        grid=(T,),
        in_specs=[
            pl.BlockSpec((1, B, Fin), lambda t: (t, 0, 0)),
            pl.BlockSpec((1, B, Fin), lambda t: (T - 1 - t, 0, 0)),
            pl.BlockSpec((Fin, 4 * H), lambda t: (0, 0)),
            pl.BlockSpec((Fin, 4 * H), lambda t: (0, 0)),
            pl.BlockSpec((1, 4 * H), lambda t: (0, 0)),
            pl.BlockSpec((1, 4 * H), lambda t: (0, 0)),
            pl.BlockSpec((H, 4 * H), lambda t: (0, 0)),
            pl.BlockSpec((H, 4 * H), lambda t: (0, 0)),
        ],
        out_specs=[
            pl.BlockSpec((1, B, H), lambda t: (t, 0, 0)),
            pl.BlockSpec((1, B, H), lambda t: (T - 1 - t, 0, 0)),
            pl.BlockSpec((B, H), lambda t: (0, 0)),
            pl.BlockSpec((B, H), lambda t: (0, 0)),
        ],
        out_shape=[
            jax.ShapeDtypeStruct((T, B, H), F32),
            jax.ShapeDtypeStruct((T, B, H), F32),
            jax.ShapeDtypeStruct((B, H), F32),
            jax.ShapeDtypeStruct((B, H), F32),
        ],
        scratch_shapes=[pltpu.VMEM((B, H), F32)] * 4,
        compiler_params=pltpu.CompilerParams(dimension_semantics=("arbitrary",)),
    )(layer_in, layer_in,
      p[f'lstm{l}_wih_f'], p[f'lstm{l}_wih_b'],
      p[f'lstm{l}_bias_f'], p[f'lstm{l}_bias_b'],
      p[f'lstm{l}_whh_f'], p[f'lstm{l}_whh_b'])


# ----------------- attention_net: per-batch bmm + softmax(T) + bmm --------------------
def _attn_kernel(lstm_ref, hid_ref, ctx_ref):
    lo = lstm_ref[0]                                               # [T, 64]
    hd = hid_ref[0]                                                # [64, 3]
    s = jnp.dot(lo, hd, preferred_element_type=F32)                # [T, 3]
    m = jnp.max(s, axis=0, keepdims=True)
    e = jnp.exp(s - m)
    soft = e / jnp.sum(e, axis=0, keepdims=True)                   # softmax over T
    ctx = jax.lax.dot_general(lo, soft, (((0,), (0,)), ((), ())),
                              preferred_element_type=F32)          # [64, 3]
    ctx_ref[0] = ctx


def attention(lstm_output, hidden):
    B, T, D = lstm_output.shape
    return pl.pallas_call(
        _attn_kernel,
        grid=(B,),
        in_specs=[pl.BlockSpec((1, T, D), lambda b: (b, 0, 0)),
                  pl.BlockSpec((1, D, 3), lambda b: (b, 0, 0))],
        out_specs=pl.BlockSpec((1, D, 3), lambda b: (b, 0, 0)),
        out_shape=jax.ShapeDtypeStruct((B, D, 3), F32),
        compiler_params=pltpu.CompilerParams(dimension_semantics=("parallel",)),
    )(lstm_output, hidden)


# ----------------- fused fc1 -> relu -> fc2 -> relu -> out head ----------------------
def _head_kernel(x_ref, w1, b1, w2, b2, w3, b3, o_ref):
    h = jnp.maximum(jnp.dot(x_ref[...].astype(BF16), w1[...],
                            preferred_element_type=F32) + b1[...], 0.0)
    h = jnp.maximum(jnp.dot(h.astype(BF16), w2[...],
                            preferred_element_type=F32) + b2[...], 0.0)
    o_ref[...] = jnp.dot(h.astype(BF16), w3[...],
                         preferred_element_type=F32) + b3[...]


def fc_head(xc, p):
    B = xc.shape[0]
    return pl.pallas_call(
        _head_kernel,
        out_shape=jax.ShapeDtypeStruct((B, 1), F32),
        in_specs=[VMEM] * 7,
        out_specs=VMEM,
    )(xc, p['fc1_w'], p['fc1_b'], p['fc2_w'], p['fc2_b'], p['out_w'], p['out_b'])


# ----------------------------------- parameters --------------------------------------
def init_params(key):
    p = {}
    kit = iter(jax.random.split(key, 80))

    def nrm(shape, scale=0.1):
        return scale * jax.random.normal(next(kit), shape, dtype=F32)

    dim, bn_eps = 32, 1e-5
    in_dims = [78, dim, dim, dim, dim]
    for l, ind in enumerate(in_dims):
        p[f'gin{l}_w1'] = nrm((ind, dim)).astype(BF16)
        p[f'gin{l}_b1'] = nrm((1, dim))
        p[f'gin{l}_w2'] = nrm((dim, dim)).astype(BF16)
        p[f'gin{l}_b2'] = nrm((1, dim))
        gamma = jnp.ones((1, dim), F32)
        beta = jnp.zeros((1, dim), F32)
        rmean = jnp.zeros((1, dim), F32)
        rvar = jnp.ones((1, dim), F32)
        scale = gamma / jnp.sqrt(rvar + bn_eps)
        p[f'bn{l}_scale'] = scale
        p[f'bn{l}_shift'] = beta - rmean * scale
    p['fc1_xd_w'] = nrm((dim, 128)).astype(BF16)
    p['fc1_xd_b'] = nrm((1, 128))

    # embedding tables (gathered, not one-hot matmul'd)
    p['embed_smile'] = nrm((100, 100), 1.0)
    p['embed_xt'] = nrm((26, 128), 1.0)                  # num_features_xt + 1 = 26

    # bidirectional GRU, hidden 100 (weights stored [in, out] = transposed vs torch)
    Hs = 100
    p['gru_wih_f'] = nrm((Hs, 3 * Hs)).astype(BF16)
    p['gru_wih_b'] = nrm((Hs, 3 * Hs)).astype(BF16)
    p['gru_bih_f'] = nrm((1, 3 * Hs))
    p['gru_bih_b'] = nrm((1, 3 * Hs))
    p['gru_whh_f'] = nrm((Hs, 3 * Hs)).astype(BF16)
    p['gru_whh_b'] = nrm((Hs, 3 * Hs)).astype(BF16)
    p['gru_bhh_f'] = nrm((1, 3 * Hs))
    p['gru_bhh_b'] = nrm((1, 3 * Hs))

    # 3-layer bidirectional LSTM, hidden 32  (b_ih + b_hh folded into one bias)
    Hl = 32
    for l in range(3):
        ind = 128 if l == 0 else 64
        p[f'lstm{l}_wih_f'] = nrm((ind, 4 * Hl)).astype(BF16)
        p[f'lstm{l}_wih_b'] = nrm((ind, 4 * Hl)).astype(BF16)
        p[f'lstm{l}_whh_f'] = nrm((Hl, 4 * Hl)).astype(BF16)
        p[f'lstm{l}_whh_b'] = nrm((Hl, 4 * Hl)).astype(BF16)
        p[f'lstm{l}_bias_f'] = (nrm((4 * Hl,)) + nrm((4 * Hl,))).reshape(1, 4 * Hl)
        p[f'lstm{l}_bias_b'] = (nrm((4 * Hl,)) + nrm((4 * Hl,))).reshape(1, 4 * Hl)

    p['fc1_w'] = nrm((520, 1024), 0.05).astype(BF16)
    p['fc1_b'] = nrm((1, 1024), 0.05)
    p['fc2_w'] = nrm((1024, 512), 0.05).astype(BF16)
    p['fc2_b'] = nrm((1, 512), 0.05)
    p['out_w'] = nrm((512, 1), 0.05).astype(BF16)
    p['out_b'] = nrm((1, 1), 0.05)
    return p


# ------------------------------------- forward ----------------------------------------
@jax.jit
def ginconvnet_forward(params, x, a_hat, pool_mat, smile, target):
    # --- graph (GIN) branch: one fused kernel (5 conv+bn layers, add-pool, fc1_xd) ---
    xg = gin_branch(x, a_hat, pool_mat, params)                    # [B, 128]

    # --- SMILES branch: gather embedding + merged bidirectional GRU (ReLU+mean fused)
    sv = jnp.take(params['embed_smile'], smile, axis=0)            # [B, Ls, 100]
    after_smile = gru_bidir(sv, params)                            # [B, 200]

    # --- protein branch: gather embedding directly in time-major order, 3 LSTM layers
    layer_in = jnp.take(params['embed_xt'], target.T, axis=0)      # [Tt, B, 128]
    hn_parts = []
    for l in range(3):
        of, ob, hn_f, hn_b = lstm_bidir_layer(layer_in, params, l)
        hn_parts += [hn_f, hn_b]                                   # torch order: fwd, bwd
        layer_in = jnp.concatenate([of, ob], axis=-1)              # [Tt, B, 64]
    lstm_output = jnp.transpose(layer_in, (1, 0, 2))               # [B, Tt, 64]
    hn_all = jnp.stack(hn_parts, axis=0)                           # [6, B, 32]
    hidden = hn_all.reshape(-1, 64, 3)                             # torch: hn.view(-1,64,3)
    ctx = attention(lstm_output, hidden)                           # [B, 64, 3]
    xt = ctx.reshape(ctx.shape[0], -1)                             # [B, 192]

    # --- fusion head (dropout = identity at inference): one fused kernel ---
    xc = jnp.concatenate([xg, after_smile, xt], axis=1)            # [B, 520]
    return fc_head(xc, params)                                     # [B, 1]


if __name__ == "__main__":
    key = jax.random.PRNGKey(0)
    kp, kx, ks, kt = jax.random.split(key, 4)
    params = init_params(kp)

    B = 2                      # graphs / batch size
    nodes_per_graph = 8
    N = B * nodes_per_graph    # total nodes
    Ls = 8                     # SMILES length
    Tt = 10                    # protein sequence length

    x = jax.random.normal(kx, (N, 78), dtype=jnp.float32)

    # dense adjacency (A + I): ring within each graph, both directions
    A = np.zeros((N, N), dtype=np.float32)
    for g in range(B):
        base = g * nodes_per_graph
        for i in range(nodes_per_graph):
            j = base + i
            k = base + (i + 1) % nodes_per_graph
            A[j, k] = 1.0
            A[k, j] = 1.0
    a_hat = jnp.asarray(A + np.eye(N, dtype=np.float32))

    # global_add_pool as a dense pooling matrix [B, N]
    pool = np.zeros((B, N), dtype=np.float32)
    for g in range(B):
        pool[g, g * nodes_per_graph:(g + 1) * nodes_per_graph] = 1.0
    pool_mat = jnp.asarray(pool)

    smile = jax.random.randint(ks, (B, Ls), 0, 100, dtype=jnp.int32)
    target = jax.random.randint(kt, (B, Tt), 0, 26, dtype=jnp.int32)

    out = ginconvnet_forward(params, x, a_hat, pool_mat, smile, target)
    out = jax.block_until_ready(out)
    assert out.shape == (B, 1)
    print("KERNEL_OK")
</pallas_src>

<mosaic_0001>
module attributes {stable_mosaic.version = 11 : i64} {
  func.func @_lstm_bidir_kernel(%arg0: i32, %arg1: memref<1x2x128xf32, #tpu.memory_space<vmem>>, %arg2: memref<1x2x128xf32, #tpu.memory_space<vmem>>, %arg3: memref<128x128xbf16, #tpu.memory_space<vmem>>, %arg4: memref<128x128xbf16, #tpu.memory_space<vmem>>, %arg5: memref<1x128xf32, #tpu.memory_space<vmem>>, %arg6: memref<1x128xf32, #tpu.memory_space<vmem>>, %arg7: memref<32x128xbf16, #tpu.memory_space<vmem>>, %arg8: memref<32x128xbf16, #tpu.memory_space<vmem>>, %arg9: memref<1x2x32xf32, #tpu.memory_space<vmem>>, %arg10: memref<1x2x32xf32, #tpu.memory_space<vmem>>, %arg11: memref<2x32xf32, #tpu.memory_space<vmem>>, %arg12: memref<2x32xf32, #tpu.memory_space<vmem>>, %arg13: memref<2x32xf32, #tpu.memory_space<vmem>>, %arg14: memref<2x32xf32, #tpu.memory_space<vmem>>, %arg15: memref<2x32xf32, #tpu.memory_space<vmem>>, %arg16: memref<2x32xf32, #tpu.memory_space<vmem>>) attributes {dimension_semantics = [#tpu.dimension_semantics<arbitrary>], iteration_bounds = array<i64: 10>, scalar_prefetch = 0 : i64, scratch_operands = 4 : i64, tpu.core_type = #tpu.core_type<tc>, window_params = [{transform_indices = @transform_0, window_bounds = array<i64: 1, 2, 128>}, {transform_indices = @transform_1, window_bounds = array<i64: 1, 2, 128>}, {pipeline_mode = #tpu.pipeline_mode<synchronous>, transform_indices = @transform_2, window_bounds = array<i64: 128, 128>}, {pipeline_mode = #tpu.pipeline_mode<synchronous>, transform_indices = @transform_3, window_bounds = array<i64: 128, 128>}, {pipeline_mode = #tpu.pipeline_mode<synchronous>, transform_indices = @transform_4, window_bounds = array<i64: 1, 128>}, {pipeline_mode = #tpu.pipeline_mode<synchronous>, transform_indices = @transform_5, window_bounds = array<i64: 1, 128>}, {pipeline_mode = #tpu.pipeline_mode<synchronous>, transform_indices = @transform_6, window_bounds = array<i64: 32, 128>}, {pipeline_mode = #tpu.pipeline_mode<synchronous>, transform_indices = @transform_7, window_bounds = array<i64: 32, 128>}, {transform_indices = @transform_8, window_bounds = array<i64: 1, 2, 32>}, {transform_indices = @transform_9, window_bounds = array<i64: 1, 2, 32>}, {pipeline_mode = #tpu.pipeline_mode<synchronous>, transform_indices = @transform_10, window_bounds = array<i64: 2, 32>}, {pipeline_mode = #tpu.pipeline_mode<synchronous>, transform_indices = @transform_11, window_bounds = array<i64: 2, 32>}]} {
    %c0_i32 = arith.constant 0 : i32
    %0 = arith.cmpi eq, %arg0, %c0_i32 : i32
    %1 = arith.extui %0 : i1 to i32
    %c0_i32_0 = arith.constant 0 : i32
    %2 = arith.cmpi ne, %1, %c0_i32_0 : i32
    scf.if %2 {
      %cst_53 = arith.constant 0.000000e+00 : f32
      %93 = vector.broadcast %cst_53 : f32 to vector<2x32xf32>
      %c0_54 = arith.constant 0 : index
      %c0_55 = arith.constant 0 : index
      %94 = vector.load %arg13[%c0_54, %c0_55] : memref<2x32xf32, #tpu.memory_space<vmem>>, vector<2x32xf32>
      tpu.vector_store %arg13[%c0_54, %c0_55], %93 {strides = array<i32>} : memref<2x32xf32, #tpu.memory_space<vmem>>, vector<2x32xf32>,
      %cst_56 = arith.constant 0.000000e+00 : f32
      %95 = vector.broadcast %cst_56 : f32 to vector<2x32xf32>
      %c0_57 = arith.constant 0 : index
      %c0_58 = arith.constant 0 : index
      %96 = vector.load %arg14[%c0_57, %c0_58] : memref<2x32xf32, #tpu.memory_space<vmem>>, vector<2x32xf32>
      tpu.vector_store %arg14[%c0_57, %c0_58], %95 {strides = array<i32>} : memref<2x32xf32, #tpu.memory_space<vmem>>, vector<2x32xf32>,
      %cst_59 = arith.constant 0.000000e+00 : f32
      %97 = vector.broadcast %cst_59 : f32 to vector<2x32xf32>
      %c0_60 = arith.constant 0 : index
      %c0_61 = arith.constant 0 : index
      %98 = vector.load %arg15[%c0_60, %c0_61] : memref<2x32xf32, #tpu.memory_space<vmem>>, vector<2x32xf32>
      tpu.vector_store %arg15[%c0_60, %c0_61], %97 {strides = array<i32>} : memref<2x32xf32, #tpu.memory_space<vmem>>, vector<2x32xf32>,
      %cst_62 = arith.constant 0.000000e+00 : f32
      %99 = vector.broadcast %cst_62 : f32 to vector<2x32xf32>
      %c0_63 = arith.constant 0 : index
      %c0_64 = arith.constant 0 : index
      %100 = vector.load %arg16[%c0_63, %c0_64] : memref<2x32xf32, #tpu.memory_space<vmem>>, vector<2x32xf32>
      tpu.vector_store %arg16[%c0_63, %c0_64], %99 {strides = array<i32>} : memref<2x32xf32, #tpu.memory_space<vmem>>, vector<2x32xf32>,
    } else {
    }
    %c0 = arith.constant 0 : index
    %c0_1 = arith.constant 0 : index
    %c0_2 = arith.constant 0 : index
    %3 = vector.load %arg1[%c0, %c0_1, %c0_2] : memref<1x2x128xf32, #tpu.memory_space<vmem>>, vector<1x2x128xf32>
    %4 = vector.shape_cast %3 : vector<1x2x128xf32> to vector<2x128xf32>
    %c0_3 = arith.constant 0 : index
    %c0_4 = arith.constant 0 : index
    %5 = vector.load %arg3[%c0_3, %c0_4] : memref<128x128xbf16, #tpu.memory_space<vmem>>, vector<128x128xbf16>
    %c0_5 = arith.constant 0 : index
    %c0_6 = arith.constant 0 : index
    %6 = vector.load %arg5[%c0_5, %c0_6] : memref<1x128xf32, #tpu.memory_space<vmem>>, vector<1x128xf32>
    %c0_7 = arith.constant 0 : index
    %c0_8 = arith.constant 0 : index
    %7 = vector.load %arg7[%c0_7, %c0_8] : memref<32x128xbf16, #tpu.memory_space<vmem>>, vector<32x128xbf16>
    %c0_9 = arith.constant 0 : index
    %c0_10 = arith.constant 0 : index
    %8 = vector.load %arg13[%c0_9, %c0_10] : memref<2x32xf32, #tpu.memory_space<vmem>>, vector<2x32xf32>
    %c0_11 = arith.constant 0 : index
    %c0_12 = arith.constant 0 : index
    %9 = vector.load %arg14[%c0_11, %c0_12] : memref<2x32xf32, #tpu.memory_space<vmem>>, vector<2x32xf32>
    %10 = arith.truncf %4 : vector<2x128xf32> to vector<2x128xbf16>
    %cst = arith.constant dense<0.000000e+00> : vector<2x128xf32>
    %11 = tpu.matmul %10, %5, %cst {dimension_numbers = #tpu.dot_dimension_numbers<[1], [0], [0], [1], [0, 0, 1, 1], [], []>} : vector<2x128xbf16>, vector<128x128xbf16>, vector<2x128xf32> -> vector<2x128xf32>
    %12 = vector.broadcast %6 : vector<1x128xf32> to vector<2x128xf32>
    %13 = arith.addf %11, %12 : vector<2x128xf32>
    %14 = arith.truncf %8 : vector<2x32xf32> to vector<2x32xbf16>
    %cst_13 = arith.constant dense<0.000000e+00> : vector<2x128xf32>
    %15 = tpu.matmul %14, %7, %cst_13 {dimension_numbers = #tpu.dot_dimension_numbers<[1], [0], [0], [1], [0, 0, 1, 1], [], []>} : vector<2x32xbf16>, vector<32x128xbf16>, vector<2x128xf32> -> vector<2x128xf32>
    %16 = arith.addf %13, %15 : vector<2x128xf32>
    %17 = vector.extract_strided_slice %16 {offsets = [0, 0], sizes = [2, 32], strides = [1, 1]} : vector<2x128xf32> to vector<2x32xf32>
    %18 = arith.negf %17 : vector<2x32xf32>
    %19 = math.exp %18 : vector<2x32xf32>
    %cst_14 = arith.constant 1.000000e+00 : f32
    %20 = vector.broadcast %cst_14 : f32 to vector<2x32xf32>
    %21 = arith.addf %20, %19 : vector<2x32xf32>
    %22 = arith.divf %20, %21 : vector<2x32xf32>
    %23 = vector.extract_strided_slice %16 {offsets = [0, 32], sizes = [2, 32], strides = [1, 1]} : vector<2x128xf32> to vector<2x32xf32>
    %24 = arith.negf %23 : vector<2x32xf32>
    %25 = math.exp %24 : vector<2x32xf32>
    %cst_15 = arith.constant 1.000000e+00 : f32
    %26 = vector.broadcast %cst_15 : f32 to vector<2x32xf32>
    %27 = arith.addf %26, %25 : vector<2x32xf32>
    %28 = arith.divf %26, %27 : vector<2x32xf32>
    %29 = vector.extract_strided_slice %16 {offsets = [0, 64], sizes = [2, 32], strides = [1, 1]} : vector<2x128xf32> to vector<2x32xf32>
    %30 = math.tanh %29 : vector<2x32xf32>
    %31 = vector.extract_strided_slice %16 {offsets = [0, 96], sizes = [2, 32], strides = [1, 1]} : vector<2x128xf32> to vector<2x32xf32>
    %32 = arith.negf %31 : vector<2x32xf32>
    %33 = math.exp %32 : vector<2x32xf32>
    %cst_16 = arith.constant 1.000000e+00 : f32
    %34 = vector.broadcast %cst_16 : f32 to vector<2x32xf32>
    %35 = arith.addf %34, %33 : vector<2x32xf32>
    %36 = arith.divf %34, %35 : vector<2x32xf32>
    %37 = arith.mulf %28, %9 : vector<2x32xf32>
    %38 = arith.mulf %22, %30 : vector<2x32xf32>
    %39 = arith.addf %37, %38 : vector<2x32xf32>
    %40 = math.tanh %39 : vector<2x32xf32>
    %41 = arith.mulf %36, %40 : vector<2x32xf32>
    %c0_17 = arith.constant 0 : index
    %c0_18 = arith.constant 0 : index
    %c0_19 = arith.constant 0 : index
    %42 = vector.load %arg2[%c0_17, %c0_18, %c0_19] : memref<1x2x128xf32, #tpu.memory_space<vmem>>, vector<1x2x128xf32>
    %43 = vector.shape_cast %42 : vector<1x2x128xf32> to vector<2x128xf32>
    %c0_20 = arith.constant 0 : index
    %c0_21 = arith.constant 0 : index
    %44 = vector.load %arg4[%c0_20, %c0_21] : memref<128x128xbf16, #tpu.memory_space<vmem>>, vector<128x128xbf16>
    %c0_22 = arith.constant 0 : index
    %c0_23 = arith.constant 0 : index
    %45 = vector.load %arg6[%c0_22, %c0_23] : memref<1x128xf32, #tpu.memory_space<vmem>>, vector<1x128xf32>
    %c0_24 = arith.constant 0 : index
    %c0_25 = arith.constant 0 : index
    %46 = vector.load %arg8[%c0_24, %c0_25] : memref<32x128xbf16, #tpu.memory_space<vmem>>, vector<32x128xbf16>
    %c0_26 = arith.constant 0 : index
    %c0_27 = arith.constant 0 : index
    %47 = vector.load %arg15[%c0_26, %c0_27] : memref<2x32xf32, #tpu.memory_space<vmem>>, vector<2x32xf32>
    %c0_28 = arith.constant 0 : index
    %c0_29 = arith.constant 0 : index
    %48 = vector.load %arg16[%c0_28, %c0_29] : memref<2x32xf32, #tpu.memory_space<vmem>>, vector<2x32xf32>
    %49 = arith.truncf %43 : vector<2x128xf32> to vector<2x128xbf16>
    %cst_30 = arith.constant dense<0.000000e+00> : vector<2x128xf32>
    %50 = tpu.matmul %49, %44, %cst_30 {dimension_numbers = #tpu.dot_dimension_numbers<[1], [0], [0], [1], [0, 0, 1, 1], [], []>} : vector<2x128xbf16>, vector<128x128xbf16>, vector<2x128xf32> -> vector<2x128xf32>
    %51 = vector.broadcast %45 : vector<1x128xf32> to vector<2x128xf32>
    %52 = arith.addf %50, %51 : vector<2x128xf32>
    %53 = arith.truncf %47 : vector<2x32xf32> to vector<2x32xbf16>
    %cst_31 = arith.constant dense<0.000000e+00> : vector<2x128xf32>
    %54 = tpu.matmul %53, %46, %cst_31 {dimension_numbers = #tpu.dot_dimension_numbers<[1], [0], [0], [1], [0, 0, 1, 1], [], []>} : vector<2x32xbf16>, vector<32x128xbf16>, vector<2x128xf32> -> vector<2x128xf32>
    %55 = arith.addf %52, %54 : vector<2x128xf32>
    %56 = vector.extract_strided_slice %55 {offsets = [0, 0], sizes = [2, 32], strides = [1, 1]} : vector<2x128xf32> to vector<2x32xf32>
    %57 = arith.negf %56 : vector<2x32xf32>
    %58 = math.exp %57 : vector<2x32xf32>
    %cst_32 = arith.constant 1.000000e+00 : f32
    %59 = vector.broadcast %cst_32 : f32 to vector<2x32xf32>
    %60 = arith.addf %59, %58 : vector<2x32xf32>
    %61 = arith.divf %59, %60 : vector<2x32xf32>
    %62 = vector.extract_strided_slice %55 {offsets = [0, 32], sizes = [2, 32], strides = [1, 1]} : vector<2x128xf32> to vector<2x32xf32>
    %63 = arith.negf %62 : vector<2x32xf32>
    %64 = math.exp %63 : vector<2x32xf32>
    %cst_33 = arith.constant 1.000000e+00 : f32
    %65 = vector.broadcast %cst_33 : f32 to vector<2x32xf32>
    %66 = arith.addf %65, %64 : vector<2x32xf32>
    %67 = arith.divf %65, %66 : vector<2x32xf32>
    %68 = vector.extract_strided_slice %55 {offsets = [0, 64], sizes = [2, 32], strides = [1, 1]} : vector<2x128xf32> to vector<2x32xf32>
    %69 = math.tanh %68 : vector<2x32xf32>
    %70 = vector.extract_strided_slice %55 {offsets = [0, 96], sizes = [2, 32], strides = [1, 1]} : vector<2x128xf32> to vector<2x32xf32>
    %71 = arith.negf %70 : vector<2x32xf32>
    %72 = math.exp %71 : vector<2x32xf32>
    %cst_34 = arith.constant 1.000000e+00 : f32
    %73 = vector.broadcast %cst_34 : f32 to vector<2x32xf32>
    %74 = arith.addf %73, %72 : vector<2x32xf32>
    %75 = arith.divf %73, %74 : vector<2x32xf32>
    %76 = arith.mulf %67, %48 : vector<2x32xf32>
    %77 = arith.mulf %61, %69 : vector<2x32xf32>
    %78 = arith.addf %76, %77 : vector<2x32xf32>
    %79 = math.tanh %78 : vector<2x32xf32>
    %80 = arith.mulf %75, %79 : vector<2x32xf32>
    %c0_35 = arith.constant 0 : index
    %c0_36 = arith.constant 0 : index
    %81 = vector.load %arg13[%c0_35, %c0_36] : memref<2x32xf32, #tpu.memory_space<vmem>>, vector<2x32xf32>
    tpu.vector_store %arg13[%c0_35, %c0_36], %41 {strides = array<i32>} : memref<2x32xf32, #tpu.memory_space<vmem>>, vector<2x32xf32>,
    %c0_37 = arith.constant 0 : index
    %c0_38 = arith.constant 0 : index
    %82 = vector.load %arg14[%c0_37, %c0_38] : memref<2x32xf32, #tpu.memory_space<vmem>>, vector<2x32xf32>
    tpu.vector_store %arg14[%c0_37, %c0_38], %39 {strides = array<i32>} : memref<2x32xf32, #tpu.memory_space<vmem>>, vector<2x32xf32>,
    %c0_39 = arith.constant 0 : index
    %c0_40 = arith.constant 0 : index
    %83 = vector.load %arg15[%c0_39, %c0_40] : memref<2x32xf32, #tpu.memory_space<vmem>>, vector<2x32xf32>
    tpu.vector_store %arg15[%c0_39, %c0_40], %80 {strides = array<i32>} : memref<2x32xf32, #tpu.memory_space<vmem>>, vector<2x32xf32>,
    %c0_41 = arith.constant 0 : index
    %c0_42 = arith.constant 0 : index
    %84 = vector.load %arg16[%c0_41, %c0_42] : memref<2x32xf32, #tpu.memory_space<vmem>>, vector<2x32xf32>
    tpu.vector_store %arg16[%c0_41, %c0_42], %78 {strides = array<i32>} : memref<2x32xf32, #tpu.memory_space<vmem>>, vector<2x32xf32>,
    %c0_43 = arith.constant 0 : index
    %c0_44 = arith.constant 0 : index
    %c0_45 = arith.constant 0 : index
    %85 = vector.load %arg9[%c0_43, %c0_44, %c0_45] : memref<1x2x32xf32, #tpu.memory_space<vmem>>, vector<1x2x32xf32>
    %86 = vector.shape_cast %85 : vector<1x2x32xf32> to vector<2x32xf32>
    %87 = vector.shape_cast %41 : vector<2x32xf32> to vector<1x2x32xf32>
    tpu.vector_store %arg9[%c0_43, %c0_44, %c0_45], %87 {strides = array<i32>} : memref<1x2x32xf32, #tpu.memory_space<vmem>>, vector<1x2x32xf32>,
    %c0_46 = arith.constant 0 : index
    %c0_47 = arith.constant 0 : index
    %c0_48 = arith.constant 0 : index
    %88 = vector.load %arg10[%c0_46, %c0_47, %c0_48] : memref<1x2x32xf32, #tpu.memory_space<vmem>>, vector<1x2x32xf32>
    %89 = vector.shape_cast %88 : vector<1x2x32xf32> to vector<2x32xf32>
    %90 = vector.shape_cast %80 : vector<2x32xf32> to vector<1x2x32xf32>
    tpu.vector_store %arg10[%c0_46, %c0_47, %c0_48], %90 {strides = array<i32>} : memref<1x2x32xf32, #tpu.memory_space<vmem>>, vector<1x2x32xf32>,
    %c0_49 = arith.constant 0 : index
    %c0_50 = arith.constant 0 : index
    %91 = vector.load %arg11[%c0_49, %c0_50] : memref<2x32xf32, #tpu.memory_space<vmem>>, vector<2x32xf32>
    tpu.vector_store %arg11[%c0_49, %c0_50], %41 {strides = array<i32>} : memref<2x32xf32, #tpu.memory_space<vmem>>, vector<2x32xf32>,
    %c0_51 = arith.constant 0 : index
    %c0_52 = arith.constant 0 : index
    %92 = vector.load %arg12[%c0_51, %c0_52] : memref<2x32xf32, #tpu.memory_space<vmem>>, vector<2x32xf32>
    tpu.vector_store %arg12[%c0_51, %c0_52], %80 {strides = array<i32>} : memref<2x32xf32, #tpu.memory_space<vmem>>, vector<2x32xf32>,
    return
  }
  func.func @transform_0(%arg0: i32) -> (i32, i32, i32) {
    %c0_i32 = arith.constant 0 : i32
    %c0_i32_0 = arith.constant 0 : i32
    %c0_i32_1 = arith.constant 0 : i32
    return %arg0, %c0_i32, %c0_i32_0 : i32, i32, i32
  }
  func.func @transform_1(%arg0: i32) -> (i32, i32, i32) {
    %c9_i32 = arith.constant 9 : i32
    %0 = arith.subi %c9_i32, %arg0 : i32
    %c0_i32 = arith.constant 0 : i32
    %c0_i32_0 = arith.constant 0 : i32
    %c0_i32_1 = arith.constant 0 : i32
    return %0, %c0_i32, %c0_i32_0 : i32, i32, i32
  }
  func.func @transform_2(%arg0: i32) -> (i32, i32) {
    %c0_i32 = arith.constant 0 : i32
    %c0_i32_0 = arith.constant 0 : i32
    %c0_i32_1 = arith.constant 0 : i32
    return %c0_i32, %c0_i32_0 : i32, i32
  }
  func.func @transform_3(%arg0: i32) -> (i32, i32) {
    %c0_i32 = arith.constant 0 : i32
    %c0_i32_0 = arith.constant 0 : i32
    %c0_i32_1 = arith.constant 0 : i32
    return %c0_i32, %c0_i32_0 : i32, i32
  }
  func.func @transform_4(%arg0: i32) -> (i32, i32) {
    %c0_i32 = arith.constant 0 : i32
    %c0_i32_0 = arith.constant 0 : i32
    %c0_i32_1 = arith.constant 0 : i32
    return %c0_i32, %c0_i32_0 : i32, i32
  }
  func.func @transform_5(%arg0: i32) -> (i32, i32) {
    %c0_i32 = arith.constant 0 : i32
    %c0_i32_0 = arith.constant 0 : i32
    %c0_i32_1 = arith.constant 0 : i32
    return %c0_i32, %c0_i32_0 : i32, i32
  }
  func.func @transform_6(%arg0: i32) -> (i32, i32) {
    %c0_i32 = arith.constant 0 : i32
    %c0_i32_0 = arith.constant 0 : i32
    %c0_i32_1 = arith.constant 0 : i32
    return %c0_i32, %c0_i32_0 : i32, i32
  }
  func.func @transform_7(%arg0: i32) -> (i32, i32) {
    %c0_i32 = arith.constant 0 : i32
    %c0_i32_0 = arith.constant 0 : i32
    %c0_i32_1 = arith.constant 0 : i32
    return %c0_i32, %c0_i32_0 : i32, i32
  }
  func.func @transform_8(%arg0: i32) -> (i32, i32, i32) {
    %c0_i32 = arith.constant 0 : i32
    %c0_i32_0 = arith.constant 0 : i32
    %c0_i32_1 = arith.constant 0 : i32
    return %arg0, %c0_i32, %c0_i32_0 : i32, i32, i32
  }
  func.func @transform_9(%arg0: i32) -> (i32, i32, i32) {
    %c9_i32 = arith.constant 9 : i32
    %0 = arith.subi %c9_i32, %arg0 : i32
    %c0_i32 = arith.constant 0 : i32
    %c0_i32_0 = arith.constant 0 : i32
    %c0_i32_1 = arith.constant 0 : i32
    return %0, %c0_i32, %c0_i32_0 : i32, i32, i32
  }
  func.func @transform_10(%arg0: i32) -> (i32, i32) {
    %c0_i32 = arith.constant 0 : i32
    %c0_i32_0 = arith.constant 0 : i32
    %c0_i32_1 = arith.constant 0 : i32
    return %c0_i32, %c0_i32_0 : i32, i32
  }
  func.func @transform_11(%arg0: i32) -> (i32, i32) {
    %c0_i32 = arith.constant 0 : i32
    %c0_i32_0 = arith.constant 0 : i32
    %c0_i32_1 = arith.constant 0 : i32
    return %c0_i32, %c0_i32_0 : i32, i32
  }
}

module attributes {stable_mosaic.version = 11 : i64} {
  func.func @_lstm_bidir_kernel(%arg0: i32, %arg1: memref<1x2x64xf32, #tpu.memory_space<vmem>>, %arg2: memref<1x2x64xf32, #tpu.memory_space<vmem>>, %arg3: memref<64x128xbf16, #tpu.memory_space<vmem>>, %arg4: memref<64x128xbf16, #tpu.memory_space<vmem>>, %arg5: memref<1x128xf32, #tpu.memory_space<vmem>>, %arg6: memref<1x128xf32, #tpu.memory_space<vmem>>, %arg7: memref<32x128xbf16, #tpu.memory_space<vmem>>, %arg8: memref<32x128xbf16, #tpu.memory_space<vmem>>, %arg9: memref<1x2x32xf32, #tpu.memory_space<vmem>>, %arg10: memref<1x2x32xf32, #tpu.memory_space<vmem>>, %arg11: memref<2x32xf32, #tpu.memory_space<vmem>>, %arg12: memref<2x32xf32, #tpu.memory_space<vmem>>, %arg13: memref<2x32xf32, #tpu.memory_space<vmem>>, %arg14: memref<2x32xf32, #tpu.memory_space<vmem>>, %arg15: memref<2x32xf32, #tpu.memory_space<vmem>>, %arg16: memref<2x32xf32, #tpu.memory_space<vmem>>) attributes {dimension_semantics = [#tpu.dimension_semantics<arbitrary>], iteration_bounds = array<i64: 10>, scalar_prefetch = 0 : i64, scratch_operands = 4 : i64, tpu.core_type = #tpu.core_type<tc>, window_params = [{transform_indices = @transform_0, window_bounds = array<i64: 1, 2, 64>}, {transform_indices = @transform_1, window_bounds = array<i64: 1, 2, 64>}, {pipeline_mode = #tpu.pipeline_mode<synchronous>, transform_indices = @transform_2, window_bounds = array<i64: 64, 128>}, {pipeline_mode = #tpu.pipeline_mode<synchronous>, transform_indices = @transform_3, window_bounds = array<i64: 64, 128>}, {pipeline_mode = #tpu.pipeline_mode<synchronous>, transform_indices = @transform_4, window_bounds = array<i64: 1, 128>}, {pipeline_mode = #tpu.pipeline_mode<synchronous>, transform_indices = @transform_5, window_bounds = array<i64: 1, 128>}, {pipeline_mode = #tpu.pipeline_mode<synchronous>, transform_indices = @transform_6, window_bounds = array<i64: 32, 128>}, {pipeline_mode = #tpu.pipeline_mode<synchronous>, transform_indices = @transform_7, window_bounds = array<i64: 32, 128>}, {transform_indices = @transform_8, window_bounds = array<i64: 1, 2, 32>}, {transform_indices = @transform_9, window_bounds = array<i64: 1, 2, 32>}, {pipeline_mode = #tpu.pipeline_mode<synchronous>, transform_indices = @transform_10, window_bounds = array<i64: 2, 32>}, {pipeline_mode = #tpu.pipeline_mode<synchronous>, transform_indices = @transform_11, window_bounds = array<i64: 2, 32>}]} {
    %c0_i32 = arith.constant 0 : i32
    %0 = arith.cmpi eq, %arg0, %c0_i32 : i32
    %1 = arith.extui %0 : i1 to i32
    %c0_i32_0 = arith.constant 0 : i32
    %2 = arith.cmpi ne, %1, %c0_i32_0 : i32
    scf.if %2 {
      %cst_53 = arith.constant 0.000000e+00 : f32
      %93 = vector.broadcast %cst_53 : f32 to vector<2x32xf32>
      %c0_54 = arith.constant 0 : index
      %c0_55 = arith.constant 0 : index
      %94 = vector.load %arg13[%c0_54, %c0_55] : memref<2x32xf32, #tpu.memory_space<vmem>>, vector<2x32xf32>
      tpu.vector_store %arg13[%c0_54, %c0_55], %93 {strides = array<i32>} : memref<2x32xf32, #tpu.memory_space<vmem>>, vector<2x32xf32>,
      %cst_56 = arith.constant 0.000000e+00 : f32
      %95 = vector.broadcast %cst_56 : f32 to vector<2x32xf32>
      %c0_57 = arith.constant 0 : index
      %c0_58 = arith.constant 0 : index
      %96 = vector.load %arg14[%c0_57, %c0_58] : memref<2x32xf32, #tpu.memory_space<vmem>>, vector<2x32xf32>
      tpu.vector_store %arg14[%c0_57, %c0_58], %95 {strides = array<i32>} : memref<2x32xf32, #tpu.memory_space<vmem>>, vector<2x32xf32>,
      %cst_59 = arith.constant 0.000000e+00 : f32
      %97 = vector.broadcast %cst_59 : f32 to vector<2x32xf32>
      %c0_60 = arith.constant 0 : index
      %c0_61 = arith.constant 0 : index
      %98 = vector.load %arg15[%c0_60, %c0_61] : memref<2x32xf32, #tpu.memory_space<vmem>>, vector<2x32xf32>
      tpu.vector_store %arg15[%c0_60, %c0_61], %97 {strides = array<i32>} : memref<2x32xf32, #tpu.memory_space<vmem>>, vector<2x32xf32>,
      %cst_62 = arith.constant 0.000000e+00 : f32
      %99 = vector.broadcast %cst_62 : f32 to vector<2x32xf32>
      %c0_63 = arith.constant 0 : index
      %c0_64 = arith.constant 0 : index
      %100 = vector.load %arg16[%c0_63, %c0_64] : memref<2x32xf32, #tpu.memory_space<vmem>>, vector<2x32xf32>
      tpu.vector_store %arg16[%c0_63, %c0_64], %99 {strides = array<i32>} : memref<2x32xf32, #tpu.memory_space<vmem>>, vector<2x32xf32>,
    } else {
    }
    %c0 = arith.constant 0 : index
    %c0_1 = arith.constant 0 : index
    %c0_2 = arith.constant 0 : index
    %3 = vector.load %arg1[%c0, %c0_1, %c0_2] : memref<1x2x64xf32, #tpu.memory_space<vmem>>, vector<1x2x64xf32>
    %4 = vector.shape_cast %3 : vector<1x2x64xf32> to vector<2x64xf32>
    %c0_3 = arith.constant 0 : index
    %c0_4 = arith.constant 0 : index
    %5 = vector.load %arg3[%c0_3, %c0_4] : memref<64x128xbf16, #tpu.memory_space<vmem>>, vector<64x128xbf16>
    %c0_5 = arith.constant 0 : index
    %c0_6 = arith.constant 0 : index
    %6 = vector.load %arg5[%c0_5, %c0_6] : memref<1x128xf32, #tpu.memory_space<vmem>>, vector<1x128xf32>
    %c0_7 = arith.constant 0 : index
    %c0_8 = arith.constant 0 : index
    %7 = vector.load %arg7[%c0_7, %c0_8] : memref<32x128xbf16, #tpu.memory_space<vmem>>, vector<32x128xbf16>
    %c0_9 = arith.constant 0 : index
    %c0_10 = arith.constant 0 : index
    %8 = vector.load %arg13[%c0_9, %c0_10] : memref<2x32xf32, #tpu.memory_space<vmem>>, vector<2x32xf32>
    %c0_11 = arith.constant 0 : index
    %c0_12 = arith.constant 0 : index
    %9 = vector.load %arg14[%c0_11, %c0_12] : memref<2x32xf32, #tpu.memory_space<vmem>>, vector<2x32xf32>
    %10 = arith.truncf %4 : vector<2x64xf32> to vector<2x64xbf16>
    %cst = arith.constant dense<0.000000e+00> : vector<2x128xf32>
    %11 = tpu.matmul %10, %5, %cst {dimension_numbers = #tpu.dot_dimension_numbers<[1], [0], [0], [1], [0, 0, 1, 1], [], []>} : vector<2x64xbf16>, vector<64x128xbf16>, vector<2x128xf32> -> vector<2x128xf32>
    %12 = vector.broadcast %6 : vector<1x128xf32> to vector<2x128xf32>
    %13 = arith.addf %11, %12 : vector<2x128xf32>
    %14 = arith.truncf %8 : vector<2x32xf32> to vector<2x32xbf16>
    %cst_13 = arith.constant dense<0.000000e+00> : vector<2x128xf32>
    %15 = tpu.matmul %14, %7, %cst_13 {dimension_numbers = #tpu.dot_dimension_numbers<[1], [0], [0], [1], [0, 0, 1, 1], [], []>} : vector<2x32xbf16>, vector<32x128xbf16>, vector<2x128xf32> -> vector<2x128xf32>
    %16 = arith.addf %13, %15 : vector<2x128xf32>
    %17 = vector.extract_strided_slice %16 {offsets = [0, 0], sizes = [2, 32], strides = [1, 1]} : vector<2x128xf32> to vector<2x32xf32>
    %18 = arith.negf %17 : vector<2x32xf32>
    %19 = math.exp %18 : vector<2x32xf32>
    %cst_14 = arith.constant 1.000000e+00 : f32
    %20 = vector.broadcast %cst_14 : f32 to vector<2x32xf32>
    %21 = arith.addf %20, %19 : vector<2x32xf32>
    %22 = arith.divf %20, %21 : vector<2x32xf32>
    %23 = vector.extract_strided_slice %16 {offsets = [0, 32], sizes = [2, 32], strides = [1, 1]} : vector<2x128xf32> to vector<2x32xf32>
    %24 = arith.negf %23 : vector<2x32xf32>
    %25 = math.exp %24 : vector<2x32xf32>
    %cst_15 = arith.constant 1.000000e+00 : f32
    %26 = vector.broadcast %cst_15 : f32 to vector<2x32xf32>
    %27 = arith.addf %26, %25 : vector<2x32xf32>
    %28 = arith.divf %26, %27 : vector<2x32xf32>
    %29 = vector.extract_strided_slice %16 {offsets = [0, 64], sizes = [2, 32], strides = [1, 1]} : vector<2x128xf32> to vector<2x32xf32>
    %30 = math.tanh %29 : vector<2x32xf32>
    %31 = vector.extract_strided_slice %16 {offsets = [0, 96], sizes = [2, 32], strides = [1, 1]} : vector<2x128xf32> to vector<2x32xf32>
    %32 = arith.negf %31 : vector<2x32xf32>
    %33 = math.exp %32 : vector<2x32xf32>
    %cst_16 = arith.constant 1.000000e+00 : f32
    %34 = vector.broadcast %cst_16 : f32 to vector<2x32xf32>
    %35 = arith.addf %34, %33 : vector<2x32xf32>
    %36 = arith.divf %34, %35 : vector<2x32xf32>
    %37 = arith.mulf %28, %9 : vector<2x32xf32>
    %38 = arith.mulf %22, %30 : vector<2x32xf32>
    %39 = arith.addf %37, %38 : vector<2x32xf32>
    %40 = math.tanh %39 : vector<2x32xf32>
    %41 = arith.mulf %36, %40 : vector<2x32xf32>
    %c0_17 = arith.constant 0 : index
    %c0_18 = arith.constant 0 : index
    %c0_19 = arith.constant 0 : index
    %42 = vector.load %arg2[%c0_17, %c0_18, %c0_19] : memref<1x2x64xf32, #tpu.memory_space<vmem>>, vector<1x2x64xf32>
    %43 = vector.shape_cast %42 : vector<1x2x64xf32> to vector<2x64xf32>
    %c0_20 = arith.constant 0 : index
    %c0_21 = arith.constant 0 : index
    %44 = vector.load %arg4[%c0_20, %c0_21] : memref<64x128xbf16, #tpu.memory_space<vmem>>, vector<64x128xbf16>
    %c0_22 = arith.constant 0 : index
    %c0_23 = arith.constant 0 : index
    %45 = vector.load %arg6[%c0_22, %c0_23] : memref<1x128xf32, #tpu.memory_space<vmem>>, vector<1x128xf32>
    %c0_24 = arith.constant 0 : index
    %c0_25 = arith.constant 0 : index
    %46 = vector.load %arg8[%c0_24, %c0_25] : memref<32x128xbf16, #tpu.memory_space<vmem>>, vector<32x128xbf16>
    %c0_26 = arith.constant 0 : index
    %c0_27 = arith.constant 0 : index
    %47 = vector.load %arg15[%c0_26, %c0_27] : memref<2x32xf32, #tpu.memory_space<vmem>>, vector<2x32xf32>
    %c0_28 = arith.constant 0 : index
    %c0_29 = arith.constant 0 : index
    %48 = vector.load %arg16[%c0_28, %c0_29] : memref<2x32xf32, #tpu.memory_space<vmem>>, vector<2x32xf32>
    %49 = arith.truncf %43 : vector<2x64xf32> to vector<2x64xbf16>
    %cst_30 = arith.constant dense<0.000000e+00> : vector<2x128xf32>
    %50 = tpu.matmul %49, %44, %cst_30 {dimension_numbers = #tpu.dot_dimension_numbers<[1], [0], [0], [1], [0, 0, 1, 1], [], []>} : vector<2x64xbf16>, vector<64x128xbf16>, vector<2x128xf32> -> vector<2x128xf32>
    %51 = vector.broadcast %45 : vector<1x128xf32> to vector<2x128xf32>
    %52 = arith.addf %50, %51 : vector<2x128xf32>
    %53 = arith.truncf %47 : vector<2x32xf32> to vector<2x32xbf16>
    %cst_31 = arith.constant dense<0.000000e+00> : vector<2x128xf32>
    %54 = tpu.matmul %53, %46, %cst_31 {dimension_numbers = #tpu.dot_dimension_numbers<[1], [0], [0], [1], [0, 0, 1, 1], [], []>} : vector<2x32xbf16>, vector<32x128xbf16>, vector<2x128xf32> -> vector<2x128xf32>
    %55 = arith.addf %52, %54 : vector<2x128xf32>
    %56 = vector.extract_strided_slice %55 {offsets = [0, 0], sizes = [2, 32], strides = [1, 1]} : vector<2x128xf32> to vector<2x32xf32>
    %57 = arith.negf %56 : vector<2x32xf32>
    %58 = math.exp %57 : vector<2x32xf32>
    %cst_32 = arith.constant 1.000000e+00 : f32
    %59 = vector.broadcast %cst_32 : f32 to vector<2x32xf32>
    %60 = arith.addf %59, %58 : vector<2x32xf32>
    %61 = arith.divf %59, %60 : vector<2x32xf32>
    %62 = vector.extract_strided_slice %55 {offsets = [0, 32], sizes = [2, 32], strides = [1, 1]} : vector<2x128xf32> to vector<2x32xf32>
    %63 = arith.negf %62 : vector<2x32xf32>
    %64 = math.exp %63 : vector<2x32xf32>
    %cst_33 = arith.constant 1.000000e+00 : f32
    %65 = vector.broadcast %cst_33 : f32 to vector<2x32xf32>
    %66 = arith.addf %65, %64 : vector<2x32xf32>
    %67 = arith.divf %65, %66 : vector<2x32xf32>
    %68 = vector.extract_strided_slice %55 {offsets = [0, 64], sizes = [2, 32], strides = [1, 1]} : vector<2x128xf32> to vector<2x32xf32>
    %69 = math.tanh %68 : vector<2x32xf32>
    %70 = vector.extract_strided_slice %55 {offsets = [0, 96], sizes = [2, 32], strides = [1, 1]} : vector<2x128xf32> to vector<2x32xf32>
    %71 = arith.negf %70 : vector<2x32xf32>
    %72 = math.exp %71 : vector<2x32xf32>
    %cst_34 = arith.constant 1.000000e+00 : f32
    %73 = vector.broadcast %cst_34 : f32 to vector<2x32xf32>
    %74 = arith.addf %73, %72 : vector<2x32xf32>
    %75 = arith.divf %73, %74 : vector<2x32xf32>
    %76 = arith.mulf %67, %48 : vector<2x32xf32>
    %77 = arith.mulf %61, %69 : vector<2x32xf32>
    %78 = arith.addf %76, %77 : vector<2x32xf32>
    %79 = math.tanh %78 : vector<2x32xf32>
    %80 = arith.mulf %75, %79 : vector<2x32xf32>
    %c0_35 = arith.constant 0 : index
    %c0_36 = arith.constant 0 : index
    %81 = vector.load %arg13[%c0_35, %c0_36] : memref<2x32xf32, #tpu.memory_space<vmem>>, vector<2x32xf32>
    tpu.vector_store %arg13[%c0_35, %c0_36], %41 {strides = array<i32>} : memref<2x32xf32, #tpu.memory_space<vmem>>, vector<2x32xf32>,
    %c0_37 = arith.constant 0 : index
    %c0_38 = arith.constant 0 : index
    %82 = vector.load %arg14[%c0_37, %c0_38] : memref<2x32xf32, #tpu.memory_space<vmem>>, vector<2x32xf32>
    tpu.vector_store %arg14[%c0_37, %c0_38], %39 {strides = array<i32>} : memref<2x32xf32, #tpu.memory_space<vmem>>, vector<2x32xf32>,
    %c0_39 = arith.constant 0 : index
    %c0_40 = arith.constant 0 : index
    %83 = vector.load %arg15[%c0_39, %c0_40] : memref<2x32xf32, #tpu.memory_space<vmem>>, vector<2x32xf32>
    tpu.vector_store %arg15[%c0_39, %c0_40], %80 {strides = array<i32>} : memref<2x32xf32, #tpu.memory_space<vmem>>, vector<2x32xf32>,
    %c0_41 = arith.constant 0 : index
    %c0_42 = arith.constant 0 : index
    %84 = vector.load %arg16[%c0_41, %c0_42] : memref<2x32xf32, #tpu.memory_space<vmem>>, vector<2x32xf32>
    tpu.vector_store %arg16[%c0_41, %c0_42], %78 {strides = array<i32>} : memref<2x32xf32, #tpu.memory_space<vmem>>, vector<2x32xf32>,
    %c0_43 = arith.constant 0 : index
    %c0_44 = arith.constant 0 : index
    %c0_45 = arith.constant 0 : index
    %85 = vector.load %arg9[%c0_43, %c0_44, %c0_45] : memref<1x2x32xf32, #tpu.memory_space<vmem>>, vector<1x2x32xf32>
    %86 = vector.shape_cast %85 : vector<1x2x32xf32> to vector<2x32xf32>
    %87 = vector.shape_cast %41 : vector<2x32xf32> to vector<1x2x32xf32>
    tpu.vector_store %arg9[%c0_43, %c0_44, %c0_45], %87 {strides = array<i32>} : memref<1x2x32xf32, #tpu.memory_space<vmem>>, vector<1x2x32xf32>,
    %c0_46 = arith.constant 0 : index
    %c0_47 = arith.constant 0 : index
    %c0_48 = arith.constant 0 : index
    %88 = vector.load %arg10[%c0_46, %c0_47, %c0_48] : memref<1x2x32xf32, #tpu.memory_space<vmem>>, vector<1x2x32xf32>
    %89 = vector.shape_cast %88 : vector<1x2x32xf32> to vector<2x32xf32>
    %90 = vector.shape_cast %80 : vector<2x32xf32> to vector<1x2x32xf32>
    tpu.vector_store %arg10[%c0_46, %c0_47, %c0_48], %90 {strides = array<i32>} : memref<1x2x32xf32, #tpu.memory_space<vmem>>, vector<1x2x32xf32>,
    %c0_49 = arith.constant 0 : index
    %c0_50 = arith.constant 0 : index
    %91 = vector.load %arg11[%c0_49, %c0_50] : memref<2x32xf32, #tpu.memory_space<vmem>>, vector<2x32xf32>
    tpu.vector_store %arg11[%c0_49, %c0_50], %41 {strides = array<i32>} : memref<2x32xf32, #tpu.memory_space<vmem>>, vector<2x32xf32>,
    %c0_51 = arith.constant 0 : index
    %c0_52 = arith.constant 0 : index
    %92 = vector.load %arg12[%c0_51, %c0_52] : memref<2x32xf32, #tpu.memory_space<vmem>>, vector<2x32xf32>
    tpu.vector_store %arg12[%c0_51, %c0_52], %80 {strides = array<i32>} : memref<2x32xf32, #tpu.memory_space<vmem>>, vector<2x32xf32>,
    return
  }
  func.func @transform_0(%arg0: i32) -> (i32, i32, i32) {
    %c0_i32 = arith.constant 0 : i32
    %c0_i32_0 = arith.constant 0 : i32
    %c0_i32_1 = arith.constant 0 : i32
    return %arg0, %c0_i32, %c0_i32_0 : i32, i32, i32
  }
  func.func @transform_1(%arg0: i32) -> (i32, i32, i32) {
    %c9_i32 = arith.constant 9 : i32
    %0 = arith.subi %c9_i32, %arg0 : i32
    %c0_i32 = arith.constant 0 : i32
    %c0_i32_0 = arith.constant 0 : i32
    %c0_i32_1 = arith.constant 0 : i32
    return %0, %c0_i32, %c0_i32_0 : i32, i32, i32
  }
  func.func @transform_2(%arg0: i32) -> (i32, i32) {
    %c0_i32 = arith.constant 0 : i32
    %c0_i32_0 = arith.constant 0 : i32
    %c0_i32_1 = arith.constant 0 : i32
    return %c0_i32, %c0_i32_0 : i32, i32
  }
  func.func @transform_3(%arg0: i32) -> (i32, i32) {
    %c0_i32 = arith.constant 0 : i32
    %c0_i32_0 = arith.constant 0 : i32
    %c0_i32_1 = arith.constant 0 : i32
    return %c0_i32, %c0_i32_0 : i32, i32
  }
  func.func @transform_4(%arg0: i32) -> (i32, i32) {
    %c0_i32 = arith.constant 0 : i32
    %c0_i32_0 = arith.constant 0 : i32
    %c0_i32_1 = arith.constant 0 : i32
    return %c0_i32, %c0_i32_0 : i32, i32
  }
  func.func @transform_5(%arg0: i32) -> (i32, i32) {
    %c0_i32 = arith.constant 0 : i32
    %c0_i32_0 = arith.constant 0 : i32
    %c0_i32_1 = arith.constant 0 : i32
    return %c0_i32, %c0_i32_0 : i32, i32
  }
  func.func @transform_6(%arg0: i32) -> (i32, i32) {
    %c0_i32 = arith.constant 0 : i32
    %c0_i32_0 = arith.constant 0 : i32
    %c0_i32_1 = arith.constant 0 : i32
    return %c0_i32, %c0_i32_0 : i32, i32
  }
  func.func @transform_7(%arg0: i32) -> (i32, i32) {
    %c0_i32 = arith.constant 0 : i32
    %c0_i32_0 = arith.constant 0 : i32
    %c0_i32_1 = arith.constant 0 : i32
    return %c0_i32, %c0_i32_0 : i32, i32
  }
  func.func @transform_8(%arg0: i32) -> (i32, i32, i32) {
    %c0_i32 = arith.constant 0 : i32
    %c0_i32_0 = arith.constant 0 : i32
    %c0_i32_1 = arith.constant 0 : i32
    return %arg0, %c0_i32, %c0_i32_0 : i32, i32, i32
  }
  func.func @transform_9(%arg0: i32) -> (i32, i32, i32) {
    %c9_i32 = arith.constant 9 : i32
    %0 = arith.subi %c9_i32, %arg0 : i32
    %c0_i32 = arith.constant 0 : i32
    %c0_i32_0 = arith.constant 0 : i32
    %c0_i32_1 = arith.constant 0 : i32
    return %0, %c0_i32, %c0_i32_0 : i32, i32, i32
  }
  func.func @transform_10(%arg0: i32) -> (i32, i32) {
    %c0_i32 = arith.constant 0 : i32
    %c0_i32_0 = arith.constant 0 : i32
    %c0_i32_1 = arith.constant 0 : i32
    return %c0_i32, %c0_i32_0 : i32, i32
  }
  func.func @transform_11(%arg0: i32) -> (i32, i32) {
    %c0_i32 = arith.constant 0 : i32
    %c0_i32_0 = arith.constant 0 : i32
    %c0_i32_1 = arith.constant 0 : i32
    return %c0_i32, %c0_i32_0 : i32, i32
  }
}

module attributes {stable_mosaic.version = 11 : i64} {
  func.func @_lstm_bidir_kernel(%arg0: i32, %arg1: memref<1x2x64xf32, #tpu.memory_space<vmem>>, %arg2: memref<1x2x64xf32, #tpu.memory_space<vmem>>, %arg3: memref<64x128xbf16, #tpu.memory_space<vmem>>, %arg4: memref<64x128xbf16, #tpu.memory_space<vmem>>, %arg5: memref<1x128xf32, #tpu.memory_space<vmem>>, %arg6: memref<1x128xf32, #tpu.memory_space<vmem>>, %arg7: memref<32x128xbf16, #tpu.memory_space<vmem>>, %arg8: memref<32x128xbf16, #tpu.memory_space<vmem>>, %arg9: memref<1x2x32xf32, #tpu.memory_space<vmem>>, %arg10: memref<1x2x32xf32, #tpu.memory_space<vmem>>, %arg11: memref<2x32xf32, #tpu.memory_space<vmem>>, %arg12: memref<2x32xf32, #tpu.memory_space<vmem>>, %arg13: memref<2x32xf32, #tpu.memory_space<vmem>>, %arg14: memref<2x32xf32, #tpu.memory_space<vmem>>, %arg15: memref<2x32xf32, #tpu.memory_space<vmem>>, %arg16: memref<2x32xf32, #tpu.memory_space<vmem>>) attributes {dimension_semantics = [#tpu.dimension_semantics<arbitrary>], iteration_bounds = array<i64: 10>, scalar_prefetch = 0 : i64, scratch_operands = 4 : i64, tpu.core_type = #tpu.core_type<tc>, window_params = [{transform_indices = @transform_0, window_bounds = array<i64: 1, 2, 64>}, {transform_indices = @transform_1, window_bounds = array<i64: 1, 2, 64>}, {pipeline_mode = #tpu.pipeline_mode<synchronous>, transform_indices = @transform_2, window_bounds = array<i64: 64, 128>}, {pipeline_mode = #tpu.pipeline_mode<synchronous>, transform_indices = @transform_3, window_bounds = array<i64: 64, 128>}, {pipeline_mode = #tpu.pipeline_mode<synchronous>, transform_indices = @transform_4, window_bounds = array<i64: 1, 128>}, {pipeline_mode = #tpu.pipeline_mode<synchronous>, transform_indices = @transform_5, window_bounds = array<i64: 1, 128>}, {pipeline_mode = #tpu.pipeline_mode<synchronous>, transform_indices = @transform_6, window_bounds = array<i64: 32, 128>}, {pipeline_mode = #tpu.pipeline_mode<synchronous>, transform_indices = @transform_7, window_bounds = array<i64: 32, 128>}, {transform_indices = @transform_8, window_bounds = array<i64: 1, 2, 32>}, {transform_indices = @transform_9, window_bounds = array<i64: 1, 2, 32>}, {pipeline_mode = #tpu.pipeline_mode<synchronous>, transform_indices = @transform_10, window_bounds = array<i64: 2, 32>}, {pipeline_mode = #tpu.pipeline_mode<synchronous>, transform_indices = @transform_11, window_bounds = array<i64: 2, 32>}]} {
    %c0_i32 = arith.constant 0 : i32
    %0 = arith.cmpi eq, %arg0, %c0_i32 : i32
    %1 = arith.extui %0 : i1 to i32
    %c0_i32_0 = arith.constant 0 : i32
    %2 = arith.cmpi ne, %1, %c0_i32_0 : i32
    scf.if %2 {
      %cst_53 = arith.constant 0.000000e+00 : f32
      %93 = vector.broadcast %cst_53 : f32 to vector<2x32xf32>
      %c0_54 = arith.constant 0 : index
      %c0_55 = arith.constant 0 : index
      %94 = vector.load %arg13[%c0_54, %c0_55] : memref<2x32xf32, #tpu.memory_space<vmem>>, vector<2x32xf32>
      tpu.vector_store %arg13[%c0_54, %c0_55], %93 {strides = array<i32>} : memref<2x32xf32, #tpu.memory_space<vmem>>, vector<2x32xf32>,
      %cst_56 = arith.constant 0.000000e+00 : f32
      %95 = vector.broadcast %cst_56 : f32 to vector<2x32xf32>
      %c0_57 = arith.constant 0 : index
      %c0_58 = arith.constant 0 : index
      %96 = vector.load %arg14[%c0_57, %c0_58] : memref<2x32xf32, #tpu.memory_space<vmem>>, vector<2x32xf32>
      tpu.vector_store %arg14[%c0_57, %c0_58], %95 {strides = array<i32>} : memref<2x32xf32, #tpu.memory_space<vmem>>, vector<2x32xf32>,
      %cst_59 = arith.constant 0.000000e+00 : f32
      %97 = vector.broadcast %cst_59 : f32 to vector<2x32xf32>
      %c0_60 = arith.constant 0 : index
      %c0_61 = arith.constant 0 : index
      %98 = vector.load %arg15[%c0_60, %c0_61] : memref<2x32xf32, #tpu.memory_space<vmem>>, vector<2x32xf32>
      tpu.vector_store %arg15[%c0_60, %c0_61], %97 {strides = array<i32>} : memref<2x32xf32, #tpu.memory_space<vmem>>, vector<2x32xf32>,
      %cst_62 = arith.constant 0.000000e+00 : f32
      %99 = vector.broadcast %cst_62 : f32 to vector<2x32xf32>
      %c0_63 = arith.constant 0 : index
      %c0_64 = arith.constant 0 : index
      %100 = vector.load %arg16[%c0_63, %c0_64] : memref<2x32xf32, #tpu.memory_space<vmem>>, vector<2x32xf32>
      tpu.vector_store %arg16[%c0_63, %c0_64], %99 {strides = array<i32>} : memref<2x32xf32, #tpu.memory_space<vmem>>, vector<2x32xf32>,
    } else {
    }
    %c0 = arith.constant 0 : index
    %c0_1 = arith.constant 0 : index
    %c0_2 = arith.constant 0 : index
    %3 = vector.load %arg1[%c0, %c0_1, %c0_2] : memref<1x2x64xf32, #tpu.memory_space<vmem>>, vector<1x2x64xf32>
    %4 = vector.shape_cast %3 : vector<1x2x64xf32> to vector<2x64xf32>
    %c0_3 = arith.constant 0 : index
    %c0_4 = arith.constant 0 : index
    %5 = vector.load %arg3[%c0_3, %c0_4] : memref<64x128xbf16, #tpu.memory_space<vmem>>, vector<64x128xbf16>
    %c0_5 = arith.constant 0 : index
    %c0_6 = arith.constant 0 : index
    %6 = vector.load %arg5[%c0_5, %c0_6] : memref<1x128xf32, #tpu.memory_space<vmem>>, vector<1x128xf32>
    %c0_7 = arith.constant 0 : index
    %c0_8 = arith.constant 0 : index
    %7 = vector.load %arg7[%c0_7, %c0_8] : memref<32x128xbf16, #tpu.memory_space<vmem>>, vector<32x128xbf16>
    %c0_9 = arith.constant 0 : index
    %c0_10 = arith.constant 0 : index
    %8 = vector.load %arg13[%c0_9, %c0_10] : memref<2x32xf32, #tpu.memory_space<vmem>>, vector<2x32xf32>
    %c0_11 = arith.constant 0 : index
    %c0_12 = arith.constant 0 : index
    %9 = vector.load %arg14[%c0_11, %c0_12] : memref<2x32xf32, #tpu.memory_space<vmem>>, vector<2x32xf32>
    %10 = arith.truncf %4 : vector<2x64xf32> to vector<2x64xbf16>
    %cst = arith.constant dense<0.000000e+00> : vector<2x128xf32>
    %11 = tpu.matmul %10, %5, %cst {dimension_numbers = #tpu.dot_dimension_numbers<[1], [0], [0], [1], [0, 0, 1, 1], [], []>} : vector<2x64xbf16>, vector<64x128xbf16>, vector<2x128xf32> -> vector<2x128xf32>
    %12 = vector.broadcast %6 : vector<1x128xf32> to vector<2x128xf32>
    %13 = arith.addf %11, %12 : vector<2x128xf32>
    %14 = arith.truncf %8 : vector<2x32xf32> to vector<2x32xbf16>
    %cst_13 = arith.constant dense<0.000000e+00> : vector<2x128xf32>
    %15 = tpu.matmul %14, %7, %cst_13 {dimension_numbers = #tpu.dot_dimension_numbers<[1], [0], [0], [1], [0, 0, 1, 1], [], []>} : vector<2x32xbf16>, vector<32x128xbf16>, vector<2x128xf32> -> vector<2x128xf32>
    %16 = arith.addf %13, %15 : vector<2x128xf32>
    %17 = vector.extract_strided_slice %16 {offsets = [0, 0], sizes = [2, 32], strides = [1, 1]} : vector<2x128xf32> to vector<2x32xf32>
    %18 = arith.negf %17 : vector<2x32xf32>
    %19 = math.exp %18 : vector<2x32xf32>
    %cst_14 = arith.constant 1.000000e+00 : f32
    %20 = vector.broadcast %cst_14 : f32 to vector<2x32xf32>
    %21 = arith.addf %20, %19 : vector<2x32xf32>
    %22 = arith.divf %20, %21 : vector<2x32xf32>
    %23 = vector.extract_strided_slice %16 {offsets = [0, 32], sizes = [2, 32], strides = [1, 1]} : vector<2x128xf32> to vector<2x32xf32>
    %24 = arith.negf %23 : vector<2x32xf32>
    %25 = math.exp %24 : vector<2x32xf32>
    %cst_15 = arith.constant 1.000000e+00 : f32
    %26 = vector.broadcast %cst_15 : f32 to vector<2x32xf32>
    %27 = arith.addf %26, %25 : vector<2x32xf32>
    %28 = arith.divf %26, %27 : vector<2x32xf32>
    %29 = vector.extract_strided_slice %16 {offsets = [0, 64], sizes = [2, 32], strides = [1, 1]} : vector<2x128xf32> to vector<2x32xf32>
    %30 = math.tanh %29 : vector<2x32xf32>
    %31 = vector.extract_strided_slice %16 {offsets = [0, 96], sizes = [2, 32], strides = [1, 1]} : vector<2x128xf32> to vector<2x32xf32>
    %32 = arith.negf %31 : vector<2x32xf32>
    %33 = math.exp %32 : vector<2x32xf32>
    %cst_16 = arith.constant 1.000000e+00 : f32
    %34 = vector.broadcast %cst_16 : f32 to vector<2x32xf32>
    %35 = arith.addf %34, %33 : vector<2x32xf32>
    %36 = arith.divf %34, %35 : vector<2x32xf32>
    %37 = arith.mulf %28, %9 : vector<2x32xf32>
    %38 = arith.mulf %22, %30 : vector<2x32xf32>
    %39 = arith.addf %37, %38 : vector<2x32xf32>
    %40 = math.tanh %39 : vector<2x32xf32>
    %41 = arith.mulf %36, %40 : vector<2x32xf32>
    %c0_17 = arith.constant 0 : index
    %c0_18 = arith.constant 0 : index
    %c0_19 = arith.constant 0 : index
    %42 = vector.load %arg2[%c0_17, %c0_18, %c0_19] : memref<1x2x64xf32, #tpu.memory_space<vmem>>, vector<1x2x64xf32>
    %43 = vector.shape_cast %42 : vector<1x2x64xf32> to vector<2x64xf32>
    %c0_20 = arith.constant 0 : index
    %c0_21 = arith.constant 0 : index
    %44 = vector.load %arg4[%c0_20, %c0_21] : memref<64x128xbf16, #tpu.memory_space<vmem>>, vector<64x128xbf16>
    %c0_22 = arith.constant 0 : index
    %c0_23 = arith.constant 0 : index
    %45 = vector.load %arg6[%c0_22, %c0_23] : memref<1x128xf32, #tpu.memory_space<vmem>>, vector<1x128xf32>
    %c0_24 = arith.constant 0 : index
    %c0_25 = arith.constant 0 : index
    %46 = vector.load %arg8[%c0_24, %c0_25] : memref<32x128xbf16, #tpu.memory_space<vmem>>, vector<32x128xbf16>
    %c0_26 = arith.constant 0 : index
    %c0_27 = arith.constant 0 : index
    %47 = vector.load %arg15[%c0_26, %c0_27] : memref<2x32xf32, #tpu.memory_space<vmem>>, vector<2x32xf32>
    %c0_28 = arith.constant 0 : index
    %c0_29 = arith.constant 0 : index
    %48 = vector.load %arg16[%c0_28, %c0_29] : memref<2x32xf32, #tpu.memory_space<vmem>>, vector<2x32xf32>
    %49 = arith.truncf %43 : vector<2x64xf32> to vector<2x64xbf16>
    %cst_30 = arith.constant dense<0.000000e+00> : vector<2x128xf32>
    %50 = tpu.matmul %49, %44, %cst_30 {dimension_numbers = #tpu.dot_dimension_numbers<[1], [0], [0], [1], [0, 0, 1, 1], [], []>} : vector<2x64xbf16>, vector<64x128xbf16>, vector<2x128xf32> -> vector<2x128xf32>
    %51 = vector.broadcast %45 : vector<1x128xf32> to vector<2x128xf32>
    %52 = arith.addf %50, %51 : vector<2x128xf32>
    %53 = arith.truncf %47 : vector<2x32xf32> to vector<2x32xbf16>
    %cst_31 = arith.constant dense<0.000000e+00> : vector<2x128xf32>
    %54 = tpu.matmul %53, %46, %cst_31 {dimension_numbers = #tpu.dot_dimension_numbers<[1], [0], [0], [1], [0, 0, 1, 1], [], []>} : vector<2x32xbf16>, vector<32x128xbf16>, vector<2x128xf32> -> vector<2x128xf32>
    %55 = arith.addf %52, %54 : vector<2x128xf32>
    %56 = vector.extract_strided_slice %55 {offsets = [0, 0], sizes = [2, 32], strides = [1, 1]} : vector<2x128xf32> to vector<2x32xf32>
    %57 = arith.negf %56 : vector<2x32xf32>
    %58 = math.exp %57 : vector<2x32xf32>
    %cst_32 = arith.constant 1.000000e+00 : f32
    %59 = vector.broadcast %cst_32 : f32 to vector<2x32xf32>
    %60 = arith.addf %59, %58 : vector<2x32xf32>
    %61 = arith.divf %59, %60 : vector<2x32xf32>
    %62 = vector.extract_strided_slice %55 {offsets = [0, 32], sizes = [2, 32], strides = [1, 1]} : vector<2x128xf32> to vector<2x32xf32>
    %63 = arith.negf %62 : vector<2x32xf32>
    %64 = math.exp %63 : vector<2x32xf32>
    %cst_33 = arith.constant 1.000000e+00 : f32
    %65 = vector.broadcast %cst_33 : f32 to vector<2x32xf32>
    %66 = arith.addf %65, %64 : vector<2x32xf32>
    %67 = arith.divf %65, %66 : vector<2x32xf32>
    %68 = vector.extract_strided_slice %55 {offsets = [0, 64], sizes = [2, 32], strides = [1, 1]} : vector<2x128xf32> to vector<2x32xf32>
    %69 = math.tanh %68 : vector<2x32xf32>
    %70 = vector.extract_strided_slice %55 {offsets = [0, 96], sizes = [2, 32], strides = [1, 1]} : vector<2x128xf32> to vector<2x32xf32>
    %71 = arith.negf %70 : vector<2x32xf32>
    %72 = math.exp %71 : vector<2x32xf32>
    %cst_34 = arith.constant 1.000000e+00 : f32
    %73 = vector.broadcast %cst_34 : f32 to vector<2x32xf32>
    %74 = arith.addf %73, %72 : vector<2x32xf32>
    %75 = arith.divf %73, %74 : vector<2x32xf32>
    %76 = arith.mulf %67, %48 : vector<2x32xf32>
    %77 = arith.mulf %61, %69 : vector<2x32xf32>
    %78 = arith.addf %76, %77 : vector<2x32xf32>
    %79 = math.tanh %78 : vector<2x32xf32>
    %80 = arith.mulf %75, %79 : vector<2x32xf32>
    %c0_35 = arith.constant 0 : index
    %c0_36 = arith.constant 0 : index
    %81 = vector.load %arg13[%c0_35, %c0_36] : memref<2x32xf32, #tpu.memory_space<vmem>>, vector<2x32xf32>
    tpu.vector_store %arg13[%c0_35, %c0_36], %41 {strides = array<i32>} : memref<2x32xf32, #tpu.memory_space<vmem>>, vector<2x32xf32>,
    %c0_37 = arith.constant 0 : index
    %c0_38 = arith.constant 0 : index
    %82 = vector.load %arg14[%c0_37, %c0_38] : memref<2x32xf32, #tpu.memory_space<vmem>>, vector<2x32xf32>
    tpu.vector_store %arg14[%c0_37, %c0_38], %39 {strides = array<i32>} : memref<2x32xf32, #tpu.memory_space<vmem>>, vector<2x32xf32>,
    %c0_39 = arith.constant 0 : index
    %c0_40 = arith.constant 0 : index
    %83 = vector.load %arg15[%c0_39, %c0_40] : memref<2x32xf32, #tpu.memory_space<vmem>>, vector<2x32xf32>
    tpu.vector_store %arg15[%c0_39, %c0_40], %80 {strides = array<i32>} : memref<2x32xf32, #tpu.memory_space<vmem>>, vector<2x32xf32>,
    %c0_41 = arith.constant 0 : index
    %c0_42 = arith.constant 0 : index
    %84 = vector.load %arg16[%c0_41, %c0_42] : memref<2x32xf32, #tpu.memory_space<vmem>>, vector<2x32xf32>
    tpu.vector_store %arg16[%c0_41, %c0_42], %78 {strides = array<i32>} : memref<2x32xf32, #tpu.memory_space<vmem>>, vector<2x32xf32>,
    %c0_43 = arith.constant 0 : index
    %c0_44 = arith.constant 0 : index
    %c0_45 = arith.constant 0 : index
    %85 = vector.load %arg9[%c0_43, %c0_44, %c0_45] : memref<1x2x32xf32, #tpu.memory_space<vmem>>, vector<1x2x32xf32>
    %86 = vector.shape_cast %85 : vector<1x2x32xf32> to vector<2x32xf32>
    %87 = vector.shape_cast %41 : vector<2x32xf32> to vector<1x2x32xf32>
    tpu.vector_store %arg9[%c0_43, %c0_44, %c0_45], %87 {strides = array<i32>} : memref<1x2x32xf32, #tpu.memory_space<vmem>>, vector<1x2x32xf32>,
    %c0_46 = arith.constant 0 : index
    %c0_47 = arith.constant 0 : index
    %c0_48 = arith.constant 0 : index
    %88 = vector.load %arg10[%c0_46, %c0_47, %c0_48] : memref<1x2x32xf32, #tpu.memory_space<vmem>>, vector<1x2x32xf32>
    %89 = vector.shape_cast %88 : vector<1x2x32xf32> to vector<2x32xf32>
    %90 = vector.shape_cast %80 : vector<2x32xf32> to vector<1x2x32xf32>
    tpu.vector_store %arg10[%c0_46, %c0_47, %c0_48], %90 {strides = array<i32>} : memref<1x2x32xf32, #tpu.memory_space<vmem>>, vector<1x2x32xf32>,
    %c0_49 = arith.constant 0 : index
    %c0_50 = arith.constant 0 : index
    %91 = vector.load %arg11[%c0_49, %c0_50] : memref<2x32xf32, #tpu.memory_space<vmem>>, vector<2x32xf32>
    tpu.vector_store %arg11[%c0_49, %c0_50], %41 {strides = array<i32>} : memref<2x32xf32, #tpu.memory_space<vmem>>, vector<2x32xf32>,
    %c0_51 = arith.constant 0 : index
    %c0_52 = arith.constant 0 : index
    %92 = vector.load %arg12[%c0_51, %c0_52] : memref<2x32xf32, #tpu.memory_space<vmem>>, vector<2x32xf32>
    tpu.vector_store %arg12[%c0_51, %c0_52], %80 {strides = array<i32>} : memref<2x32xf32, #tpu.memory_space<vmem>>, vector<2x32xf32>,
    return
  }
  func.func @transform_0(%arg0: i32) -> (i32, i32, i32) {
    %c0_i32 = arith.constant 0 : i32
    %c0_i32_0 = arith.constant 0 : i32
    %c0_i32_1 = arith.constant 0 : i32
    return %arg0, %c0_i32, %c0_i32_0 : i32, i32, i32
  }
  func.func @transform_1(%arg0: i32) -> (i32, i32, i32) {
    %c9_i32 = arith.constant 9 : i32
    %0 = arith.subi %c9_i32, %arg0 : i32
    %c0_i32 = arith.constant 0 : i32
    %c0_i32_0 = arith.constant 0 : i32
    %c0_i32_1 = arith.constant 0 : i32
    return %0, %c0_i32, %c0_i32_0 : i32, i32, i32
  }
  func.func @transform_2(%arg0: i32) -> (i32, i32) {
    %c0_i32 = arith.constant 0 : i32
    %c0_i32_0 = arith.constant 0 : i32
    %c0_i32_1 = arith.constant 0 : i32
    return %c0_i32, %c0_i32_0 : i32, i32
  }
  func.func @transform_3(%arg0: i32) -> (i32, i32) {
    %c0_i32 = arith.constant 0 : i32
    %c0_i32_0 = arith.constant 0 : i32
    %c0_i32_1 = arith.constant 0 : i32
    return %c0_i32, %c0_i32_0 : i32, i32
  }
  func.func @transform_4(%arg0: i32) -> (i32, i32) {
    %c0_i32 = arith.constant 0 : i32
    %c0_i32_0 = arith.constant 0 : i32
    %c0_i32_1 = arith.constant 0 : i32
    return %c0_i32, %c0_i32_0 : i32, i32
  }
  func.func @transform_5(%arg0: i32) -> (i32, i32) {
    %c0_i32 = arith.constant 0 : i32
    %c0_i32_0 = arith.constant 0 : i32
    %c0_i32_1 = arith.constant 0 : i32
    return %c0_i32, %c0_i32_0 : i32, i32
  }
  func.func @transform_6(%arg0: i32) -> (i32, i32) {
    %c0_i32 = arith.constant 0 : i32
    %c0_i32_0 = arith.constant 0 : i32
    %c0_i32_1 = arith.constant 0 : i32
    return %c0_i32, %c0_i32_0 : i32, i32
  }
  func.func @transform_7(%arg0: i32) -> (i32, i32) {
    %c0_i32 = arith.constant 0 : i32
    %c0_i32_0 = arith.constant 0 : i32
    %c0_i32_1 = arith.constant 0 : i32
    return %c0_i32, %c0_i32_0 : i32, i32
  }
  func.func @transform_8(%arg0: i32) -> (i32, i32, i32) {
    %c0_i32 = arith.constant 0 : i32
    %c0_i32_0 = arith.constant 0 : i32
    %c0_i32_1 = arith.constant 0 : i32
    return %arg0, %c0_i32, %c0_i32_0 : i32, i32, i32
  }
  func.func @transform_9(%arg0: i32) -> (i32, i32, i32) {
    %c9_i32 = arith.constant 9 : i32
    %0 = arith.subi %c9_i32, %arg0 : i32
    %c0_i32 = arith.constant 0 : i32
    %c0_i32_0 = arith.constant 0 : i32
    %c0_i32_1 = arith.constant 0 : i32
    return %0, %c0_i32, %c0_i32_0 : i32, i32, i32
  }
  func.func @transform_10(%arg0: i32) -> (i32, i32) {
    %c0_i32 = arith.constant 0 : i32
    %c0_i32_0 = arith.constant 0 : i32
    %c0_i32_1 = arith.constant 0 : i32
    return %c0_i32, %c0_i32_0 : i32, i32
  }
  func.func @transform_11(%arg0: i32) -> (i32, i32) {
    %c0_i32 = arith.constant 0 : i32
    %c0_i32_0 = arith.constant 0 : i32
    %c0_i32_1 = arith.constant 0 : i32
    return %c0_i32, %c0_i32_0 : i32, i32
  }
}

module attributes {stable_mosaic.version = 11 : i64} {
  func.func @_attn_kernel(%arg0: i32, %arg1: memref<1x10x64xf32, #tpu.memory_space<vmem>>, %arg2: memref<1x64x3xf32, #tpu.memory_space<vmem>>, %arg3: memref<1x64x3xf32, #tpu.memory_space<vmem>>) attributes {dimension_semantics = [#tpu.dimension_semantics<parallel>], iteration_bounds = array<i64: 2>, scalar_prefetch = 0 : i64, scratch_operands = 0 : i64, tpu.core_type = #tpu.core_type<tc>, window_params = [{transform_indices = @transform_0, window_bounds = array<i64: 1, 10, 64>}, {transform_indices = @transform_1, window_bounds = array<i64: 1, 64, 3>}, {transform_indices = @transform_2, window_bounds = array<i64: 1, 64, 3>}]} {
    %c0 = arith.constant 0 : index
    %c0_0 = arith.constant 0 : index
    %c0_1 = arith.constant 0 : index
    %0 = vector.load %arg1[%c0, %c0_0, %c0_1] : memref<1x10x64xf32, #tpu.memory_space<vmem>>, vector<1x10x64xf32>
    %1 = vector.shape_cast %0 : vector<1x10x64xf32> to vector<10x64xf32>
    %c0_2 = arith.constant 0 : index
    %c0_3 = arith.constant 0 : index
    %c0_4 = arith.constant 0 : index
    %2 = vector.load %arg2[%c0_2, %c0_3, %c0_4] : memref<1x64x3xf32, #tpu.memory_space<vmem>>, vector<1x64x3xf32>
    %3 = vector.shape_cast %2 : vector<1x64x3xf32> to vector<64x3xf32>
    %cst = arith.constant dense<0.000000e+00> : vector<10x3xf32>
    %4 = tpu.matmul %1, %3, %cst {dimension_numbers = #tpu.dot_dimension_numbers<[1], [0], [0], [1], [0, 0, 1, 1], [], []>} : vector<10x64xf32>, vector<64x3xf32>, vector<10x3xf32> -> vector<10x3xf32>
    %cst_5 = arith.constant dense<0xFF800000> : vector<3xf32>
    %5 = vector.multi_reduction <maximumf>, %4, %cst_5 [0] : vector<10x3xf32> to vector<3xf32>
    %6 = vector.shape_cast %5 : vector<3xf32> to vector<1x3xf32>
    %7 = vector.broadcast %6 : vector<1x3xf32> to vector<10x3xf32>
    %8 = arith.subf %4, %7 : vector<10x3xf32>
    %9 = math.exp %8 : vector<10x3xf32>
    %cst_6 = arith.constant dense<0.000000e+00> : vector<3xf32>
    %10 = vector.multi_reduction <add>, %9, %cst_6 [0] : vector<10x3xf32> to vector<3xf32>
    %11 = vector.shape_cast %10 : vector<3xf32> to vector<1x3xf32>
    %12 = vector.broadcast %11 : vector<1x3xf32> to vector<10x3xf32>
    %13 = arith.divf %9, %12 : vector<10x3xf32>
    %cst_7 = arith.constant dense<0.000000e+00> : vector<64x3xf32>
    %14 = tpu.matmul %1, %13, %cst_7 {dimension_numbers = #tpu.dot_dimension_numbers<[0], [0], [1], [1], [0, 1, 1, 1], [], []>} : vector<10x64xf32>, vector<10x3xf32>, vector<64x3xf32> -> vector<64x3xf32>
    %c0_8 = arith.constant 0 : index
    %c0_9 = arith.constant 0 : index
    %c0_10 = arith.constant 0 : index
    %15 = vector.load %arg3[%c0_8, %c0_9, %c0_10] : memref<1x64x3xf32, #tpu.memory_space<vmem>>, vector<1x64x3xf32>
    %16 = vector.shape_cast %15 : vector<1x64x3xf32> to vector<64x3xf32>
    %17 = vector.shape_cast %14 : vector<64x3xf32> to vector<1x64x3xf32>
    tpu.vector_store %arg3[%c0_8, %c0_9, %c0_10], %17 {strides = array<i32>} : memref<1x64x3xf32, #tpu.memory_space<vmem>>, vector<1x64x3xf32>,
    return
  }
  func.func @transform_0(%arg0: i32) -> (i32, i32, i32) {
    %c0_i32 = arith.constant 0 : i32
    %c0_i32_0 = arith.constant 0 : i32
    %c0_i32_1 = arith.constant 0 : i32
    return %arg0, %c0_i32, %c0_i32_0 : i32, i32, i32
  }
  func.func @transform_1(%arg0: i32) -> (i32, i32, i32) {
    %c0_i32 = arith.constant 0 : i32
    %c0_i32_0 = arith.constant 0 : i32
    %c0_i32_1 = arith.constant 0 : i32
    return %arg0, %c0_i32, %c0_i32_0 : i32, i32, i32
  }
  func.func @transform_2(%arg0: i32) -> (i32, i32, i32) {
    %c0_i32 = arith.constant 0 : i32
    %c0_i32_0 = arith.constant 0 : i32
    %c0_i32_1 = arith.constant 0 : i32
    return %arg0, %c0_i32, %c0_i32_0 : i32, i32, i32
  }
}

module attributes {stable_mosaic.version = 11 : i64} {
  func.func @_gru_bidir_kernel(%arg0: i32, %arg1: memref<1x8x100xf32, #tpu.memory_space<vmem>>, %arg2: memref<1x8x100xf32, #tpu.memory_space<vmem>>, %arg3: memref<100x300xbf16, #tpu.memory_space<vmem>>, %arg4: memref<100x300xbf16, #tpu.memory_space<vmem>>, %arg5: memref<1x300xf32, #tpu.memory_space<vmem>>, %arg6: memref<1x300xf32, #tpu.memory_space<vmem>>, %arg7: memref<100x300xbf16, #tpu.memory_space<vmem>>, %arg8: memref<100x300xbf16, #tpu.memory_space<vmem>>, %arg9: memref<1x300xf32, #tpu.memory_space<vmem>>, %arg10: memref<1x300xf32, #tpu.memory_space<vmem>>, %arg11: memref<2x100xf32, #tpu.memory_space<vmem>>, %arg12: memref<2x100xf32, #tpu.memory_space<vmem>>, %arg13: memref<8x100xf32, #tpu.memory_space<vmem>>, %arg14: memref<8x100xf32, #tpu.memory_space<vmem>>) attributes {dimension_semantics = [#tpu.dimension_semantics<arbitrary>], iteration_bounds = array<i64: 2>, scalar_prefetch = 0 : i64, scratch_operands = 2 : i64, tpu.core_type = #tpu.core_type<tc>, window_params = [{transform_indices = @transform_0, window_bounds = array<i64: 1, 8, 100>}, {transform_indices = @transform_1, window_bounds = array<i64: 1, 8, 100>}, {pipeline_mode = #tpu.pipeline_mode<synchronous>, transform_indices = @transform_2, window_bounds = array<i64: 100, 300>}, {pipeline_mode = #tpu.pipeline_mode<synchronous>, transform_indices = @transform_3, window_bounds = array<i64: 100, 300>}, {pipeline_mode = #tpu.pipeline_mode<synchronous>, transform_indices = @transform_4, window_bounds = array<i64: 1, 300>}, {pipeline_mode = #tpu.pipeline_mode<synchronous>, transform_indices = @transform_5, window_bounds = array<i64: 1, 300>}, {pipeline_mode = #tpu.pipeline_mode<synchronous>, transform_indices = @transform_6, window_bounds = array<i64: 100, 300>}, {pipeline_mode = #tpu.pipeline_mode<synchronous>, transform_indices = @transform_7, window_bounds = array<i64: 100, 300>}, {pipeline_mode = #tpu.pipeline_mode<synchronous>, transform_indices = @transform_8, window_bounds = array<i64: 1, 300>}, {pipeline_mode = #tpu.pipeline_mode<synchronous>, transform_indices = @transform_9, window_bounds = array<i64: 1, 300>}, {pipeline_mode = #tpu.pipeline_mode<synchronous>, transform_indices = @transform_10, window_bounds = array<i64: 2, 100>}, {pipeline_mode = #tpu.pipeline_mode<synchronous>, transform_indices = @transform_11, window_bounds = array<i64: 2, 100>}]} {
    %c0_i32 = arith.constant 0 : i32
    %0 = arith.cmpi eq, %arg0, %c0_i32 : i32
    %1 = arith.extui %0 : i1 to i32
    %c0_i32_0 = arith.constant 0 : i32
    %2 = arith.cmpi ne, %1, %c0_i32_0 : i32
    scf.if %2 {
      %cst_47 = arith.constant 0.000000e+00 : f32
      %104 = vector.broadcast %cst_47 : f32 to vector<8x100xf32>
      %c0_48 = arith.constant 0 : index
      %c0_49 = arith.constant 0 : index
      %105 = vector.load %arg13[%c0_48, %c0_49] : memref<8x100xf32, #tpu.memory_space<vmem>>, vector<8x100xf32>
      tpu.vector_store %arg13[%c0_48, %c0_49], %104 {strides = array<i32>} : memref<8x100xf32, #tpu.memory_space<vmem>>, vector<8x100xf32>,
      %cst_50 = arith.constant 0.000000e+00 : f32
      %106 = vector.broadcast %cst_50 : f32 to vector<8x100xf32>
      %c0_51 = arith.constant 0 : index
      %c0_52 = arith.constant 0 : index
      %107 = vector.load %arg14[%c0_51, %c0_52] : memref<8x100xf32, #tpu.memory_space<vmem>>, vector<8x100xf32>
      tpu.vector_store %arg14[%c0_51, %c0_52], %106 {strides = array<i32>} : memref<8x100xf32, #tpu.memory_space<vmem>>, vector<8x100xf32>,
    } else {
    }
    %c0 = arith.constant 0 : index
    %c0_1 = arith.constant 0 : index
    %c0_2 = arith.constant 0 : index
    %3 = vector.load %arg1[%c0, %c0_1, %c0_2] : memref<1x8x100xf32, #tpu.memory_space<vmem>>, vector<1x8x100xf32>
    %4 = vector.shape_cast %3 : vector<1x8x100xf32> to vector<8x100xf32>
    %c0_3 = arith.constant 0 : index
    %c0_4 = arith.constant 0 : index
    %5 = vector.load %arg3[%c0_3, %c0_4] : memref<100x300xbf16, #tpu.memory_space<vmem>>, vector<100x300xbf16>
    %c0_5 = arith.constant 0 : index
    %c0_6 = arith.constant 0 : index
    %6 = vector.load %arg5[%c0_5, %c0_6] : memref<1x300xf32, #tpu.memory_space<vmem>>, vector<1x300xf32>
    %c0_7 = arith.constant 0 : index
    %c0_8 = arith.constant 0 : index
    %7 = vector.load %arg7[%c0_7, %c0_8] : memref<100x300xbf16, #tpu.memory_space<vmem>>, vector<100x300xbf16>
    %c0_9 = arith.constant 0 : index
    %c0_10 = arith.constant 0 : index
    %8 = vector.load %arg9[%c0_9, %c0_10] : memref<1x300xf32, #tpu.memory_space<vmem>>, vector<1x300xf32>
    %c0_11 = arith.constant 0 : index
    %c0_12 = arith.constant 0 : index
    %9 = vector.load %arg13[%c0_11, %c0_12] : memref<8x100xf32, #tpu.memory_space<vmem>>, vector<8x100xf32>
    %10 = arith.truncf %4 : vector<8x100xf32> to vector<8x100xbf16>
    %cst = arith.constant dense<0.000000e+00> : vector<8x300xf32>
    %11 = tpu.matmul %10, %5, %cst {dimension_numbers = #tpu.dot_dimension_numbers<[1], [0], [0], [1], [0, 0, 1, 1], [], []>} : vector<8x100xbf16>, vector<100x300xbf16>, vector<8x300xf32> -> vector<8x300xf32>
    %12 = vector.broadcast %6 : vector<1x300xf32> to vector<8x300xf32>
    %13 = arith.addf %11, %12 : vector<8x300xf32>
    %14 = arith.truncf %9 : vector<8x100xf32> to vector<8x100xbf16>
    %cst_13 = arith.constant dense<0.000000e+00> : vector<8x300xf32>
    %15 = tpu.matmul %14, %7, %cst_13 {dimension_numbers = #tpu.dot_dimension_numbers<[1], [0], [0], [1], [0, 0, 1, 1], [], []>} : vector<8x100xbf16>, vector<100x300xbf16>, vector<8x300xf32> -> vector<8x300xf32>
    %16 = vector.broadcast %8 : vector<1x300xf32> to vector<8x300xf32>
    %17 = arith.addf %15, %16 : vector<8x300xf32>
    %18 = vector.extract_strided_slice %13 {offsets = [0, 0], sizes = [8, 100], strides = [1, 1]} : vector<8x300xf32> to vector<8x100xf32>
    %19 = vector.extract_strided_slice %17 {offsets = [0, 0], sizes = [8, 100], strides = [1, 1]} : vector<8x300xf32> to vector<8x100xf32>
    %20 = arith.addf %18, %19 : vector<8x100xf32>
    %21 = arith.negf %20 : vector<8x100xf32>
    %22 = math.exp %21 : vector<8x100xf32>
    %cst_14 = arith.constant 1.000000e+00 : f32
    %23 = vector.broadcast %cst_14 : f32 to vector<8x100xf32>
    %24 = arith.addf %23, %22 : vector<8x100xf32>
    %25 = arith.divf %23, %24 : vector<8x100xf32>
    %26 = vector.extract_strided_slice %13 {offsets = [0, 100], sizes = [8, 100], strides = [1, 1]} : vector<8x300xf32> to vector<8x100xf32>
    %27 = vector.extract_strided_slice %17 {offsets = [0, 100], sizes = [8, 100], strides = [1, 1]} : vector<8x300xf32> to vector<8x100xf32>
    %28 = arith.addf %26, %27 : vector<8x100xf32>
    %29 = arith.negf %28 : vector<8x100xf32>
    %30 = math.exp %29 : vector<8x100xf32>
    %cst_15 = arith.constant 1.000000e+00 : f32
    %31 = vector.broadcast %cst_15 : f32 to vector<8x100xf32>
    %32 = arith.addf %31, %30 : vector<8x100xf32>
    %33 = arith.divf %31, %32 : vector<8x100xf32>
    %34 = vector.extract_strided_slice %13 {offsets = [0, 200], sizes = [8, 100], strides = [1, 1]} : vector<8x300xf32> to vector<8x100xf32>
    %35 = vector.extract_strided_slice %17 {offsets = [0, 200], sizes = [8, 100], strides = [1, 1]} : vector<8x300xf32> to vector<8x100xf32>
    %36 = arith.mulf %25, %35 : vector<8x100xf32>
    %37 = arith.addf %34, %36 : vector<8x100xf32>
    %38 = math.tanh %37 : vector<8x100xf32>
    %cst_16 = arith.constant 1.000000e+00 : f32
    %39 = vector.broadcast %cst_16 : f32 to vector<8x100xf32>
    %40 = arith.subf %39, %33 : vector<8x100xf32>
    %41 = arith.mulf %40, %38 : vector<8x100xf32>
    %42 = arith.mulf %33, %9 : vector<8x100xf32>
    %43 = arith.addf %41, %42 : vector<8x100xf32>
    %c0_17 = arith.constant 0 : index
    %c0_18 = arith.constant 0 : index
    %c0_19 = arith.constant 0 : index
    %44 = vector.load %arg2[%c0_17, %c0_18, %c0_19] : memref<1x8x100xf32, #tpu.memory_space<vmem>>, vector<1x8x100xf32>
    %45 = vector.shape_cast %44 : vector<1x8x100xf32> to vector<8x100xf32>
    %c0_20 = arith.constant 0 : index
    %c0_21 = arith.constant 0 : index
    %46 = vector.load %arg4[%c0_20, %c0_21] : memref<100x300xbf16, #tpu.memory_space<vmem>>, vector<100x300xbf16>
    %c0_22 = arith.constant 0 : index
    %c0_23 = arith.constant 0 : index
    %47 = vector.load %arg6[%c0_22, %c0_23] : memref<1x300xf32, #tpu.memory_space<vmem>>, vector<1x300xf32>
    %c0_24 = arith.constant 0 : index
    %c0_25 = arith.constant 0 : index
    %48 = vector.load %arg8[%c0_24, %c0_25] : memref<100x300xbf16, #tpu.memory_space<vmem>>, vector<100x300xbf16>
    %c0_26 = arith.constant 0 : index
    %c0_27 = arith.constant 0 : index
    %49 = vector.load %arg10[%c0_26, %c0_27] : memref<1x300xf32, #tpu.memory_space<vmem>>, vector<1x300xf32>
    %c0_28 = arith.constant 0 : index
    %c0_29 = arith.constant 0 : index
    %50 = vector.load %arg14[%c0_28, %c0_29] : memref<8x100xf32, #tpu.memory_space<vmem>>, vector<8x100xf32>
    %51 = arith.truncf %45 : vector<8x100xf32> to vector<8x100xbf16>
    %cst_30 = arith.constant dense<0.000000e+00> : vector<8x300xf32>
    %52 = tpu.matmul %51, %46, %cst_30 {dimension_numbers = #tpu.dot_dimension_numbers<[1], [0], [0], [1], [0, 0, 1, 1], [], []>} : vector<8x100xbf16>, vector<100x300xbf16>, vector<8x300xf32> -> vector<8x300xf32>
    %53 = vector.broadcast %47 : vector<1x300xf32> to vector<8x300xf32>
    %54 = arith.addf %52, %53 : vector<8x300xf32>
    %55 = arith.truncf %50 : vector<8x100xf32> to vector<8x100xbf16>
    %cst_31 = arith.constant dense<0.000000e+00> : vector<8x300xf32>
    %56 = tpu.matmul %55, %48, %cst_31 {dimension_numbers = #tpu.dot_dimension_numbers<[1], [0], [0], [1], [0, 0, 1, 1], [], []>} : vector<8x100xbf16>, vector<100x300xbf16>, vector<8x300xf32> -> vector<8x300xf32>
    %57 = vector.broadcast %49 : vector<1x300xf32> to vector<8x300xf32>
    %58 = arith.addf %56, %57 : vector<8x300xf32>
    %59 = vector.extract_strided_slice %54 {offsets = [0, 0], sizes = [8, 100], strides = [1, 1]} : vector<8x300xf32> to vector<8x100xf32>
    %60 = vector.extract_strided_slice %58 {offsets = [0, 0], sizes = [8, 100], strides = [1, 1]} : vector<8x300xf32> to vector<8x100xf32>
    %61 = arith.addf %59, %60 : vector<8x100xf32>
    %62 = arith.negf %61 : vector<8x100xf32>
    %63 = math.exp %62 : vector<8x100xf32>
    %cst_32 = arith.constant 1.000000e+00 : f32
    %64 = vector.broadcast %cst_32 : f32 to vector<8x100xf32>
    %65 = arith.addf %64, %63 : vector<8x100xf32>
    %66 = arith.divf %64, %65 : vector<8x100xf32>
    %67 = vector.extract_strided_slice %54 {offsets = [0, 100], sizes = [8, 100], strides = [1, 1]} : vector<8x300xf32> to vector<8x100xf32>
    %68 = vector.extract_strided_slice %58 {offsets = [0, 100], sizes = [8, 100], strides = [1, 1]} : vector<8x300xf32> to vector<8x100xf32>
    %69 = arith.addf %67, %68 : vector<8x100xf32>
    %70 = arith.negf %69 : vector<8x100xf32>
    %71 = math.exp %70 : vector<8x100xf32>
    %cst_33 = arith.constant 1.000000e+00 : f32
    %72 = vector.broadcast %cst_33 : f32 to vector<8x100xf32>
    %73 = arith.addf %72, %71 : vector<8x100xf32>
    %74 = arith.divf %72, %73 : vector<8x100xf32>
    %75 = vector.extract_strided_slice %54 {offsets = [0, 200], sizes = [8, 100], strides = [1, 1]} : vector<8x300xf32> to vector<8x100xf32>
    %76 = vector.extract_strided_slice %58 {offsets = [0, 200], sizes = [8, 100], strides = [1, 1]} : vector<8x300xf32> to vector<8x100xf32>
    %77 = arith.mulf %66, %76 : vector<8x100xf32>
    %78 = arith.addf %75, %77 : vector<8x100xf32>
    %79 = math.tanh %78 : vector<8x100xf32>
    %cst_34 = arith.constant 1.000000e+00 : f32
    %80 = vector.broadcast %cst_34 : f32 to vector<8x100xf32>
    %81 = arith.subf %80, %74 : vector<8x100xf32>
    %82 = arith.mulf %81, %79 : vector<8x100xf32>
    %83 = arith.mulf %74, %50 : vector<8x100xf32>
    %84 = arith.addf %82, %83 : vector<8x100xf32>
    %c0_35 = arith.constant 0 : index
    %c0_36 = arith.constant 0 : index
    %85 = vector.load %arg13[%c0_35, %c0_36] : memref<8x100xf32, #tpu.memory_space<vmem>>, vector<8x100xf32>
    tpu.vector_store %arg13[%c0_35, %c0_36], %43 {strides = array<i32>} : memref<8x100xf32, #tpu.memory_space<vmem>>, vector<8x100xf32>,
    %c0_37 = arith.constant 0 : index
    %c0_38 = arith.constant 0 : index
    %86 = vector.load %arg14[%c0_37, %c0_38] : memref<8x100xf32, #tpu.memory_space<vmem>>, vector<8x100xf32>
    tpu.vector_store %arg14[%c0_37, %c0_38], %84 {strides = array<i32>} : memref<8x100xf32, #tpu.memory_space<vmem>>, vector<8x100xf32>,
    %cst_39 = arith.constant 0.000000e+00 : f32
    %87 = vector.broadcast %cst_39 : f32 to vector<8x100xf32>
    %88 = arith.maximumf %43, %87 : vector<8x100xf32>
    %cst_40 = arith.constant dense<0.000000e+00> : vector<100xf32>
    %89 = vector.multi_reduction <add>, %88, %cst_40 [0] : vector<8x100xf32> to vector<100xf32>
    %90 = vector.shape_cast %89 : vector<100xf32> to vector<1x100xf32>
    %cst_41 = arith.constant 8.000000e+00 : f32
    %91 = vector.broadcast %cst_41 : f32 to vector<1x100xf32>
    %92 = arith.divf %90, %91 : vector<1x100xf32>
    %93 = arith.index_cast %arg0 : i32 to index
    %c0_42 = arith.constant 0 : index
    %94 = vector.load %arg11[%93, %c0_42] : memref<2x100xf32, #tpu.memory_space<vmem>>, vector<1x100xf32>
    tpu.vector_store %arg11[%93, %c0_42], %92 {strides = array<i32>} : memref<2x100xf32, #tpu.memory_space<vmem>>, vector<1x100xf32>,
    %cst_43 = arith.constant 0.000000e+00 : f32
    %95 = vector.broadcast %cst_43 : f32 to vector<8x100xf32>
    %96 = arith.maximumf %84, %95 : vector<8x100xf32>
    %cst_44 = arith.constant dense<0.000000e+00> : vector<100xf32>
    %97 = vector.multi_reduction <add>, %96, %cst_44 [0] : vector<8x100xf32> to vector<100xf32>
    %98 = vector.shape_cast %97 : vector<100xf32> to vector<1x100xf32>
    %cst_45 = arith.constant 8.000000e+00 : f32
    %99 = vector.broadcast %cst_45 : f32 to vector<1x100xf32>
    %100 = arith.divf %98, %99 : vector<1x100xf32>
    %c1_i32 = arith.constant 1 : i32
    %101 = arith.subi %c1_i32, %arg0 : i32
    %102 = arith.index_cast %101 : i32 to index
    %c0_46 = arith.constant 0 : index
    %103 = vector.load %arg12[%102, %c0_46] : memref<2x100xf32, #tpu.memory_space<vmem>>, vector<1x100xf32>
    tpu.vector_store %arg12[%102, %c0_46], %100 {strides = array<i32>} : memref<2x100xf32, #tpu.memory_space<vmem>>, vector<1x100xf32>,
    return
  }
  func.func @transform_0(%arg0: i32) -> (i32, i32, i32) {
    %c0_i32 = arith.constant 0 : i32
    %c0_i32_0 = arith.constant 0 : i32
    %c0_i32_1 = arith.constant 0 : i32
    return %arg0, %c0_i32, %c0_i32_0 : i32, i32, i32
  }
  func.func @transform_1(%arg0: i32) -> (i32, i32, i32) {
    %c1_i32 = arith.constant 1 : i32
    %0 = arith.subi %c1_i32, %arg0 : i32
    %c0_i32 = arith.constant 0 : i32
    %c0_i32_0 = arith.constant 0 : i32
    %c0_i32_1 = arith.constant 0 : i32
    return %0, %c0_i32, %c0_i32_0 : i32, i32, i32
  }
  func.func @transform_2(%arg0: i32) -> (i32, i32) {
    %c0_i32 = arith.constant 0 : i32
    %c0_i32_0 = arith.constant 0 : i32
    %c0_i32_1 = arith.constant 0 : i32
    return %c0_i32, %c0_i32_0 : i32, i32
  }
  func.func @transform_3(%arg0: i32) -> (i32, i32) {
    %c0_i32 = arith.constant 0 : i32
    %c0_i32_0 = arith.constant 0 : i32
    %c0_i32_1 = arith.constant 0 : i32
    return %c0_i32, %c0_i32_0 : i32, i32
  }
  func.func @transform_4(%arg0: i32) -> (i32, i32) {
    %c0_i32 = arith.constant 0 : i32
    %c0_i32_0 = arith.constant 0 : i32
    %c0_i32_1 = arith.constant 0 : i32
    return %c0_i32, %c0_i32_0 : i32, i32
  }
  func.func @transform_5(%arg0: i32) -> (i32, i32) {
    %c0_i32 = arith.constant 0 : i32
    %c0_i32_0 = arith.constant 0 : i32
    %c0_i32_1 = arith.constant 0 : i32
    return %c0_i32, %c0_i32_0 : i32, i32
  }
  func.func @transform_6(%arg0: i32) -> (i32, i32) {
    %c0_i32 = arith.constant 0 : i32
    %c0_i32_0 = arith.constant 0 : i32
    %c0_i32_1 = arith.constant 0 : i32
    return %c0_i32, %c0_i32_0 : i32, i32
  }
  func.func @transform_7(%arg0: i32) -> (i32, i32) {
    %c0_i32 = arith.constant 0 : i32
    %c0_i32_0 = arith.constant 0 : i32
    %c0_i32_1 = arith.constant 0 : i32
    return %c0_i32, %c0_i32_0 : i32, i32
  }
  func.func @transform_8(%arg0: i32) -> (i32, i32) {
    %c0_i32 = arith.constant 0 : i32
    %c0_i32_0 = arith.constant 0 : i32
    %c0_i32_1 = arith.constant 0 : i32
    return %c0_i32, %c0_i32_0 : i32, i32
  }
  func.func @transform_9(%arg0: i32) -> (i32, i32) {
    %c0_i32 = arith.constant 0 : i32
    %c0_i32_0 = arith.constant 0 : i32
    %c0_i32_1 = arith.constant 0 : i32
    return %c0_i32, %c0_i32_0 : i32, i32
  }
  func.func @transform_10(%arg0: i32) -> (i32, i32) {
    %c0_i32 = arith.constant 0 : i32
    %c0_i32_0 = arith.constant 0 : i32
    %c0_i32_1 = arith.constant 0 : i32
    return %c0_i32, %c0_i32_0 : i32, i32
  }
  func.func @transform_11(%arg0: i32) -> (i32, i32) {
    %c0_i32 = arith.constant 0 : i32
    %c0_i32_0 = arith.constant 0 : i32
    %c0_i32_1 = arith.constant 0 : i32
    return %c0_i32, %c0_i32_0 : i32, i32
  }
}

module attributes {stable_mosaic.version = 11 : i64} {
  func.func @_gin_branch_kernel(%arg0: memref<16x78xf32, #tpu.memory_space<vmem>>, %arg1: memref<16x16xbf16, #tpu.memory_space<vmem>>, %arg2: memref<2x16xbf16, #tpu.memory_space<vmem>>, %arg3: memref<78x32xbf16, #tpu.memory_space<vmem>>, %arg4: memref<1x32xf32, #tpu.memory_space<vmem>>, %arg5: memref<32x32xbf16, #tpu.memory_space<vmem>>, %arg6: memref<1x32xf32, #tpu.memory_space<vmem>>, %arg7: memref<1x32xf32, #tpu.memory_space<vmem>>, %arg8: memref<1x32xf32, #tpu.memory_space<vmem>>, %arg9: memref<32x32xbf16, #tpu.memory_space<vmem>>, %arg10: memref<1x32xf32, #tpu.memory_space<vmem>>, %arg11: memref<32x32xbf16, #tpu.memory_space<vmem>>, %arg12: memref<1x32xf32, #tpu.memory_space<vmem>>, %arg13: memref<1x32xf32, #tpu.memory_space<vmem>>, %arg14: memref<1x32xf32, #tpu.memory_space<vmem>>, %arg15: memref<32x32xbf16, #tpu.memory_space<vmem>>, %arg16: memref<1x32xf32, #tpu.memory_space<vmem>>, %arg17: memref<32x32xbf16, #tpu.memory_space<vmem>>, %arg18: memref<1x32xf32, #tpu.memory_space<vmem>>, %arg19: memref<1x32xf32, #tpu.memory_space<vmem>>, %arg20: memref<1x32xf32, #tpu.memory_space<vmem>>, %arg21: memref<32x32xbf16, #tpu.memory_space<vmem>>, %arg22: memref<1x32xf32, #tpu.memory_space<vmem>>, %arg23: memref<32x32xbf16, #tpu.memory_space<vmem>>, %arg24: memref<1x32xf32, #tpu.memory_space<vmem>>, %arg25: memref<1x32xf32, #tpu.memory_space<vmem>>, %arg26: memref<1x32xf32, #tpu.memory_space<vmem>>, %arg27: memref<32x32xbf16, #tpu.memory_space<vmem>>, %arg28: memref<1x32xf32, #tpu.memory_space<vmem>>, %arg29: memref<32x32xbf16, #tpu.memory_space<vmem>>, %arg30: memref<1x32xf32, #tpu.memory_space<vmem>>, %arg31: memref<1x32xf32, #tpu.memory_space<vmem>>, %arg32: memref<1x32xf32, #tpu.memory_space<vmem>>, %arg33: memref<32x128xbf16, #tpu.memory_space<vmem>>, %arg34: memref<1x128xf32, #tpu.memory_space<vmem>>, %arg35: memref<2x128xf32, #tpu.memory_space<vmem>>) attributes {dimension_semantics = [], scalar_prefetch = 0 : i64, scratch_operands = 0 : i64, tpu.core_type = #tpu.core_type<tc>} {
    %c0 = arith.constant 0 : index
    %c0_0 = arith.constant 0 : index
    %0 = vector.load %arg1[%c0, %c0_0] : memref<16x16xbf16, #tpu.memory_space<vmem>>, vector<16x16xbf16>
    %c0_1 = arith.constant 0 : index
    %c0_2 = arith.constant 0 : index
    %1 = vector.load %arg0[%c0_1, %c0_2] : memref<16x78xf32, #tpu.memory_space<vmem>>, vector<16x78xf32>
    %2 = arith.truncf %1 : vector<16x78xf32> to vector<16x78xbf16>
    %cst = arith.constant dense<0.000000e+00> : vector<16x78xf32>
    %3 = tpu.matmul %0, %2, %cst {dimension_numbers = #tpu.dot_dimension_numbers<[1], [0], [0], [1], [0, 0, 1, 1], [], []>} : vector<16x16xbf16>, vector<16x78xbf16>, vector<16x78xf32> -> vector<16x78xf32>
    %4 = arith.truncf %3 : vector<16x78xf32> to vector<16x78xbf16>
    %c0_3 = arith.constant 0 : index
    %c0_4 = arith.constant 0 : index
    %5 = vector.load %arg3[%c0_3, %c0_4] : memref<78x32xbf16, #tpu.memory_space<vmem>>, vector<78x32xbf16>
    %cst_5 = arith.constant dense<0.000000e+00> : vector<16x32xf32>
    %6 = tpu.matmul %4, %5, %cst_5 {dimension_numbers = #tpu.dot_dimension_numbers<[1], [0], [0], [1], [0, 0, 1, 1], [], []>} : vector<16x78xbf16>, vector<78x32xbf16>, vector<16x32xf32> -> vector<16x32xf32>
    %c0_6 = arith.constant 0 : index
    %c0_7 = arith.constant 0 : index
    %7 = vector.load %arg4[%c0_6, %c0_7] : memref<1x32xf32, #tpu.memory_space<vmem>>, vector<1x32xf32>
    %8 = vector.broadcast %7 : vector<1x32xf32> to vector<16x32xf32>
    %9 = arith.addf %6, %8 : vector<16x32xf32>
    %cst_8 = arith.constant 0.000000e+00 : f32
    %10 = vector.broadcast %cst_8 : f32 to vector<16x32xf32>
    %11 = arith.maximumf %9, %10 : vector<16x32xf32>
    %12 = arith.truncf %11 : vector<16x32xf32> to vector<16x32xbf16>
    %c0_9 = arith.constant 0 : index
    %c0_10 = arith.constant 0 : index
    %13 = vector.load %arg5[%c0_9, %c0_10] : memref<32x32xbf16, #tpu.memory_space<vmem>>, vector<32x32xbf16>
    %cst_11 = arith.constant dense<0.000000e+00> : vector<16x32xf32>
    %14 = tpu.matmul %12, %13, %cst_11 {dimension_numbers = #tpu.dot_dimension_numbers<[1], [0], [0], [1], [0, 0, 1, 1], [], []>} : vector<16x32xbf16>, vector<32x32xbf16>, vector<16x32xf32> -> vector<16x32xf32>
    %c0_12 = arith.constant 0 : index
    %c0_13 = arith.constant 0 : index
    %15 = vector.load %arg6[%c0_12, %c0_13] : memref<1x32xf32, #tpu.memory_space<vmem>>, vector<1x32xf32>
    %16 = vector.broadcast %15 : vector<1x32xf32> to vector<16x32xf32>
    %17 = arith.addf %14, %16 : vector<16x32xf32>
    %cst_14 = arith.constant 0.000000e+00 : f32
    %18 = vector.broadcast %cst_14 : f32 to vector<16x32xf32>
    %19 = arith.maximumf %17, %18 : vector<16x32xf32>
    %c0_15 = arith.constant 0 : index
    %c0_16 = arith.constant 0 : index
    %20 = vector.load %arg7[%c0_15, %c0_16] : memref<1x32xf32, #tpu.memory_space<vmem>>, vector<1x32xf32>
    %21 = vector.broadcast %20 : vector<1x32xf32> to vector<16x32xf32>
    %22 = arith.mulf %19, %21 : vector<16x32xf32>
    %c0_17 = arith.constant 0 : index
    %c0_18 = arith.constant 0 : index
    %23 = vector.load %arg8[%c0_17, %c0_18] : memref<1x32xf32, #tpu.memory_space<vmem>>, vector<1x32xf32>
    %24 = vector.broadcast %23 : vector<1x32xf32> to vector<16x32xf32>
    %25 = arith.addf %22, %24 : vector<16x32xf32>
    %26 = arith.truncf %25 : vector<16x32xf32> to vector<16x32xbf16>
    %cst_19 = arith.constant dense<0.000000e+00> : vector<16x32xf32>
    %27 = tpu.matmul %0, %26, %cst_19 {dimension_numbers = #tpu.dot_dimension_numbers<[1], [0], [0], [1], [0, 0, 1, 1], [], []>} : vector<16x16xbf16>, vector<16x32xbf16>, vector<16x32xf32> -> vector<16x32xf32>
    %28 = arith.truncf %27 : vector<16x32xf32> to vector<16x32xbf16>
    %c0_20 = arith.constant 0 : index
    %c0_21 = arith.constant 0 : index
    %29 = vector.load %arg9[%c0_20, %c0_21] : memref<32x32xbf16, #tpu.memory_space<vmem>>, vector<32x32xbf16>
    %cst_22 = arith.constant dense<0.000000e+00> : vector<16x32xf32>
    %30 = tpu.matmul %28, %29, %cst_22 {dimension_numbers = #tpu.dot_dimension_numbers<[1], [0], [0], [1], [0, 0, 1, 1], [], []>} : vector<16x32xbf16>, vector<32x32xbf16>, vector<16x32xf32> -> vector<16x32xf32>
    %c0_23 = arith.constant 0 : index
    %c0_24 = arith.constant 0 : index
    %31 = vector.load %arg10[%c0_23, %c0_24] : memref<1x32xf32, #tpu.memory_space<vmem>>, vector<1x32xf32>
    %32 = vector.broadcast %31 : vector<1x32xf32> to vector<16x32xf32>
    %33 = arith.addf %30, %32 : vector<16x32xf32>
    %cst_25 = arith.constant 0.000000e+00 : f32
    %34 = vector.broadcast %cst_25 : f32 to vector<16x32xf32>
    %35 = arith.maximumf %33, %34 : vector<16x32xf32>
    %36 = arith.truncf %35 : vector<16x32xf32> to vector<16x32xbf16>
    %c0_26 = arith.constant 0 : index
    %c0_27 = arith.constant 0 : index
    %37 = vector.load %arg11[%c0_26, %c0_27] : memref<32x32xbf16, #tpu.memory_space<vmem>>, vector<32x32xbf16>
    %cst_28 = arith.constant dense<0.000000e+00> : vector<16x32xf32>
    %38 = tpu.matmul %36, %37, %cst_28 {dimension_numbers = #tpu.dot_dimension_numbers<[1], [0], [0], [1], [0, 0, 1, 1], [], []>} : vector<16x32xbf16>, vector<32x32xbf16>, vector<16x32xf32> -> vector<16x32xf32>
    %c0_29 = arith.constant 0 : index
    %c0_30 = arith.constant 0 : index
    %39 = vector.load %arg12[%c0_29, %c0_30] : memref<1x32xf32, #tpu.memory_space<vmem>>, vector<1x32xf32>
    %40 = vector.broadcast %39 : vector<1x32xf32> to vector<16x32xf32>
    %41 = arith.addf %38, %40 : vector<16x32xf32>
    %cst_31 = arith.constant 0.000000e+00 : f32
    %42 = vector.broadcast %cst_31 : f32 to vector<16x32xf32>
    %43 = arith.maximumf %41, %42 : vector<16x32xf32>
    %c0_32 = arith.constant 0 : index
    %c0_33 = arith.constant 0 : index
    %44 = vector.load %arg13[%c0_32, %c0_33] : memref<1x32xf32, #tpu.memory_space<vmem>>, vector<1x32xf32>
    %45 = vector.broadcast %44 : vector<1x32xf32> to vector<16x32xf32>
    %46 = arith.mulf %43, %45 : vector<16x32xf32>
    %c0_34 = arith.constant 0 : index
    %c0_35 = arith.constant 0 : index
    %47 = vector.load %arg14[%c0_34, %c0_35] : memref<1x32xf32, #tpu.memory_space<vmem>>, vector<1x32xf32>
    %48 = vector.broadcast %47 : vector<1x32xf32> to vector<16x32xf32>
    %49 = arith.addf %46, %48 : vector<16x32xf32>
    %50 = arith.truncf %49 : vector<16x32xf32> to vector<16x32xbf16>
    %cst_36 = arith.constant dense<0.000000e+00> : vector<16x32xf32>
    %51 = tpu.matmul %0, %50, %cst_36 {dimension_numbers = #tpu.dot_dimension_numbers<[1], [0], [0], [1], [0, 0, 1, 1], [], []>} : vector<16x16xbf16>, vector<16x32xbf16>, vector<16x32xf32> -> vector<16x32xf32>
    %52 = arith.truncf %51 : vector<16x32xf32> to vector<16x32xbf16>
    %c0_37 = arith.constant 0 : index
    %c0_38 = arith.constant 0 : index
    %53 = vector.load %arg15[%c0_37, %c0_38] : memref<32x32xbf16, #tpu.memory_space<vmem>>, vector<32x32xbf16>
    %cst_39 = arith.constant dense<0.000000e+00> : vector<16x32xf32>
    %54 = tpu.matmul %52, %53, %cst_39 {dimension_numbers = #tpu.dot_dimension_numbers<[1], [0], [0], [1], [0, 0, 1, 1], [], []>} : vector<16x32xbf16>, vector<32x32xbf16>, vector<16x32xf32> -> vector<16x32xf32>
    %c0_40 = arith.constant 0 : index
    %c0_41 = arith.constant 0 : index
    %55 = vector.load %arg16[%c0_40, %c0_41] : memref<1x32xf32, #tpu.memory_space<vmem>>, vector<1x32xf32>
    %56 = vector.broadcast %55 : vector<1x32xf32> to vector<16x32xf32>
    %57 = arith.addf %54, %56 : vector<16x32xf32>
    %cst_42 = arith.constant 0.000000e+00 : f32
    %58 = vector.broadcast %cst_42 : f32 to vector<16x32xf32>
    %59 = arith.maximumf %57, %58 : vector<16x32xf32>
    %60 = arith.truncf %59 : vector<16x32xf32> to vector<16x32xbf16>
    %c0_43 = arith.constant 0 : index
    %c0_44 = arith.constant 0 : index
    %61 = vector.load %arg17[%c0_43, %c0_44] : memref<32x32xbf16, #tpu.memory_space<vmem>>, vector<32x32xbf16>
    %cst_45 = arith.constant dense<0.000000e+00> : vector<16x32xf32>
    %62 = tpu.matmul %60, %61, %cst_45 {dimension_numbers = #tpu.dot_dimension_numbers<[1], [0], [0], [1], [0, 0, 1, 1], [], []>} : vector<16x32xbf16>, vector<32x32xbf16>, vector<16x32xf32> -> vector<16x32xf32>
    %c0_46 = arith.constant 0 : index
    %c0_47 = arith.constant 0 : index
    %63 = vector.load %arg18[%c0_46, %c0_47] : memref<1x32xf32, #tpu.memory_space<vmem>>, vector<1x32xf32>
    %64 = vector.broadcast %63 : vector<1x32xf32> to vector<16x32xf32>
    %65 = arith.addf %62, %64 : vector<16x32xf32>
    %cst_48 = arith.constant 0.000000e+00 : f32
    %66 = vector.broadcast %cst_48 : f32 to vector<16x32xf32>
    %67 = arith.maximumf %65, %66 : vector<16x32xf32>
    %c0_49 = arith.constant 0 : index
    %c0_50 = arith.constant 0 : index
    %68 = vector.load %arg19[%c0_49, %c0_50] : memref<1x32xf32, #tpu.memory_space<vmem>>, vector<1x32xf32>
    %69 = vector.broadcast %68 : vector<1x32xf32> to vector<16x32xf32>
    %70 = arith.mulf %67, %69 : vector<16x32xf32>
    %c0_51 = arith.constant 0 : index
    %c0_52 = arith.constant 0 : index
    %71 = vector.load %arg20[%c0_51, %c0_52] : memref<1x32xf32, #tpu.memory_space<vmem>>, vector<1x32xf32>
    %72 = vector.broadcast %71 : vector<1x32xf32> to vector<16x32xf32>
    %73 = arith.addf %70, %72 : vector<16x32xf32>
    %74 = arith.truncf %73 : vector<16x32xf32> to vector<16x32xbf16>
    %cst_53 = arith.constant dense<0.000000e+00> : vector<16x32xf32>
    %75 = tpu.matmul %0, %74, %cst_53 {dimension_numbers = #tpu.dot_dimension_numbers<[1], [0], [0], [1], [0, 0, 1, 1], [], []>} : vector<16x16xbf16>, vector<16x32xbf16>, vector<16x32xf32> -> vector<16x32xf32>
    %76 = arith.truncf %75 : vector<16x32xf32> to vector<16x32xbf16>
    %c0_54 = arith.constant 0 : index
    %c0_55 = arith.constant 0 : index
    %77 = vector.load %arg21[%c0_54, %c0_55] : memref<32x32xbf16, #tpu.memory_space<vmem>>, vector<32x32xbf16>
    %cst_56 = arith.constant dense<0.000000e+00> : vector<16x32xf32>
    %78 = tpu.matmul %76, %77, %cst_56 {dimension_numbers = #tpu.dot_dimension_numbers<[1], [0], [0], [1], [0, 0, 1, 1], [], []>} : vector<16x32xbf16>, vector<32x32xbf16>, vector<16x32xf32> -> vector<16x32xf32>
    %c0_57 = arith.constant 0 : index
    %c0_58 = arith.constant 0 : index
    %79 = vector.load %arg22[%c0_57, %c0_58] : memref<1x32xf32, #tpu.memory_space<vmem>>, vector<1x32xf32>
    %80 = vector.broadcast %79 : vector<1x32xf32> to vector<16x32xf32>
    %81 = arith.addf %78, %80 : vector<16x32xf32>
    %cst_59 = arith.constant 0.000000e+00 : f32
    %82 = vector.broadcast %cst_59 : f32 to vector<16x32xf32>
    %83 = arith.maximumf %81, %82 : vector<16x32xf32>
    %84 = arith.truncf %83 : vector<16x32xf32> to vector<16x32xbf16>
    %c0_60 = arith.constant 0 : index
    %c0_61 = arith.constant 0 : index
    %85 = vector.load %arg23[%c0_60, %c0_61] : memref<32x32xbf16, #tpu.memory_space<vmem>>, vector<32x32xbf16>
    %cst_62 = arith.constant dense<0.000000e+00> : vector<16x32xf32>
    %86 = tpu.matmul %84, %85, %cst_62 {dimension_numbers = #tpu.dot_dimension_numbers<[1], [0], [0], [1], [0, 0, 1, 1], [], []>} : vector<16x32xbf16>, vector<32x32xbf16>, vector<16x32xf32> -> vector<16x32xf32>
    %c0_63 = arith.constant 0 : index
    %c0_64 = arith.constant 0 : index
    %87 = vector.load %arg24[%c0_63, %c0_64] : memref<1x32xf32, #tpu.memory_space<vmem>>, vector<1x32xf32>
    %88 = vector.broadcast %87 : vector<1x32xf32> to vector<16x32xf32>
    %89 = arith.addf %86, %88 : vector<16x32xf32>
    %cst_65 = arith.constant 0.000000e+00 : f32
    %90 = vector.broadcast %cst_65 : f32 to vector<16x32xf32>
    %91 = arith.maximumf %89, %90 : vector<16x32xf32>
    %c0_66 = arith.constant 0 : index
    %c0_67 = arith.constant 0 : index
    %92 = vector.load %arg25[%c0_66, %c0_67] : memref<1x32xf32, #tpu.memory_space<vmem>>, vector<1x32xf32>
    %93 = vector.broadcast %92 : vector<1x32xf32> to vector<16x32xf32>
    %94 = arith.mulf %91, %93 : vector<16x32xf32>
    %c0_68 = arith.constant 0 : index
    %c0_69 = arith.constant 0 : index
    %95 = vector.load %arg26[%c0_68, %c0_69] : memref<1x32xf32, #tpu.memory_space<vmem>>, vector<1x32xf32>
    %96 = vector.broadcast %95 : vector<1x32xf32> to vector<16x32xf32>
    %97 = arith.addf %94, %96 : vector<16x32xf32>
    %98 = arith.truncf %97 : vector<16x32xf32> to vector<16x32xbf16>
    %cst_70 = arith.constant dense<0.000000e+00> : vector<16x32xf32>
    %99 = tpu.matmul %0, %98, %cst_70 {dimension_numbers = #tpu.dot_dimension_numbers<[1], [0], [0], [1], [0, 0, 1, 1], [], []>} : vector<16x16xbf16>, vector<16x32xbf16>, vector<16x32xf32> -> vector<16x32xf32>
    %100 = arith.truncf %99 : vector<16x32xf32> to vector<16x32xbf16>
    %c0_71 = arith.constant 0 : index
    %c0_72 = arith.constant 0 : index
    %101 = vector.load %arg27[%c0_71, %c0_72] : memref<32x32xbf16, #tpu.memory_space<vmem>>, vector<32x32xbf16>
    %cst_73 = arith.constant dense<0.000000e+00> : vector<16x32xf32>
    %102 = tpu.matmul %100, %101, %cst_73 {dimension_numbers = #tpu.dot_dimension_numbers<[1], [0], [0], [1], [0, 0, 1, 1], [], []>} : vector<16x32xbf16>, vector<32x32xbf16>, vector<16x32xf32> -> vector<16x32xf32>
    %c0_74 = arith.constant 0 : index
    %c0_75 = arith.constant 0 : index
    %103 = vector.load %arg28[%c0_74, %c0_75] : memref<1x32xf32, #tpu.memory_space<vmem>>, vector<1x32xf32>
    %104 = vector.broadcast %103 : vector<1x32xf32> to vector<16x32xf32>
    %105 = arith.addf %102, %104 : vector<16x32xf32>
    %cst_76 = arith.constant 0.000000e+00 : f32
    %106 = vector.broadcast %cst_76 : f32 to vector<16x32xf32>
    %107 = arith.maximumf %105, %106 : vector<16x32xf32>
    %108 = arith.truncf %107 : vector<16x32xf32> to vector<16x32xbf16>
    %c0_77 = arith.constant 0 : index
    %c0_78 = arith.constant 0 : index
    %109 = vector.load %arg29[%c0_77, %c0_78] : memref<32x32xbf16, #tpu.memory_space<vmem>>, vector<32x32xbf16>
    %cst_79 = arith.constant dense<0.000000e+00> : vector<16x32xf32>
    %110 = tpu.matmul %108, %109, %cst_79 {dimension_numbers = #tpu.dot_dimension_numbers<[1], [0], [0], [1], [0, 0, 1, 1], [], []>} : vector<16x32xbf16>, vector<32x32xbf16>, vector<16x32xf32> -> vector<16x32xf32>
    %c0_80 = arith.constant 0 : index
    %c0_81 = arith.constant 0 : index
    %111 = vector.load %arg30[%c0_80, %c0_81] : memref<1x32xf32, #tpu.memory_space<vmem>>, vector<1x32xf32>
    %112 = vector.broadcast %111 : vector<1x32xf32> to vector<16x32xf32>
    %113 = arith.addf %110, %112 : vector<16x32xf32>
    %cst_82 = arith.constant 0.000000e+00 : f32
    %114 = vector.broadcast %cst_82 : f32 to vector<16x32xf32>
    %115 = arith.maximumf %113, %114 : vector<16x32xf32>
    %c0_83 = arith.constant 0 : index
    %c0_84 = arith.constant 0 : index
    %116 = vector.load %arg31[%c0_83, %c0_84] : memref<1x32xf32, #tpu.memory_space<vmem>>, vector<1x32xf32>
    %117 = vector.broadcast %116 : vector<1x32xf32> to vector<16x32xf32>
    %118 = arith.mulf %115, %117 : vector<16x32xf32>
    %c0_85 = arith.constant 0 : index
    %c0_86 = arith.constant 0 : index
    %119 = vector.load %arg32[%c0_85, %c0_86] : memref<1x32xf32, #tpu.memory_space<vmem>>, vector<1x32xf32>
    %120 = vector.broadcast %119 : vector<1x32xf32> to vector<16x32xf32>
    %121 = arith.addf %118, %120 : vector<16x32xf32>
    %c0_87 = arith.constant 0 : index
    %c0_88 = arith.constant 0 : index
    %122 = vector.load %arg2[%c0_87, %c0_88] : memref<2x16xbf16, #tpu.memory_space<vmem>>, vector<2x16xbf16>
    %123 = arith.truncf %121 : vector<16x32xf32> to vector<16x32xbf16>
    %cst_89 = arith.constant dense<0.000000e+00> : vector<2x32xf32>
    %124 = tpu.matmul %122, %123, %cst_89 {dimension_numbers = #tpu.dot_dimension_numbers<[1], [0], [0], [1], [0, 0, 1, 1], [], []>} : vector<2x16xbf16>, vector<16x32xbf16>, vector<2x32xf32> -> vector<2x32xf32>
    %125 = arith.truncf %124 : vector<2x32xf32> to vector<2x32xbf16>
    %c0_90 = arith.constant 0 : index
    %c0_91 = arith.constant 0 : index
    %126 = vector.load %arg33[%c0_90, %c0_91] : memref<32x128xbf16, #tpu.memory_space<vmem>>, vector<32x128xbf16>
    %cst_92 = arith.constant dense<0.000000e+00> : vector<2x128xf32>
    %127 = tpu.matmul %125, %126, %cst_92 {dimension_numbers = #tpu.dot_dimension_numbers<[1], [0], [0], [1], [0, 0, 1, 1], [], []>} : vector<2x32xbf16>, vector<32x128xbf16>, vector<2x128xf32> -> vector<2x128xf32>
    %c0_93 = arith.constant 0 : index
    %c0_94 = arith.constant 0 : index
    %128 = vector.load %arg34[%c0_93, %c0_94] : memref<1x128xf32, #tpu.memory_space<vmem>>, vector<1x128xf32>
    %129 = vector.broadcast %128 : vector<1x128xf32> to vector<2x128xf32>
    %130 = arith.addf %127, %129 : vector<2x128xf32>
    %cst_95 = arith.constant 0.000000e+00 : f32
    %131 = vector.broadcast %cst_95 : f32 to vector<2x128xf32>
    %132 = arith.maximumf %130, %131 : vector<2x128xf32>
    %c0_96 = arith.constant 0 : index
    %c0_97 = arith.constant 0 : index
    %133 = vector.load %arg35[%c0_96, %c0_97] : memref<2x128xf32, #tpu.memory_space<vmem>>, vector<2x128xf32>
    tpu.vector_store %arg35[%c0_96, %c0_97], %132 {strides = array<i32>} : memref<2x128xf32, #tpu.memory_space<vmem>>, vector<2x128xf32>,
    return
  }
}

module attributes {stable_mosaic.version = 11 : i64} {
  func.func @_head_kernel(%arg0: memref<2x520xf32, #tpu.memory_space<vmem>>, %arg1: memref<520x1024xbf16, #tpu.memory_space<vmem>>, %arg2: memref<1x1024xf32, #tpu.memory_space<vmem>>, %arg3: memref<1024x512xbf16, #tpu.memory_space<vmem>>, %arg4: memref<1x512xf32, #tpu.memory_space<vmem>>, %arg5: memref<512x1xbf16, #tpu.memory_space<vmem>>, %arg6: memref<1x1xf32, #tpu.memory_space<vmem>>, %arg7: memref<2x1xf32, #tpu.memory_space<vmem>>) attributes {dimension_semantics = [], scalar_prefetch = 0 : i64, scratch_operands = 0 : i64, tpu.core_type = #tpu.core_type<tc>} {
    %c0 = arith.constant 0 : index
    %c0_0 = arith.constant 0 : index
    %0 = vector.load %arg0[%c0, %c0_0] : memref<2x520xf32, #tpu.memory_space<vmem>>, vector<2x520xf32>
    %1 = arith.truncf %0 : vector<2x520xf32> to vector<2x520xbf16>
    %c0_1 = arith.constant 0 : index
    %c0_2 = arith.constant 0 : index
    %2 = vector.load %arg1[%c0_1, %c0_2] : memref<520x1024xbf16, #tpu.memory_space<vmem>>, vector<520x1024xbf16>
    %cst = arith.constant dense<0.000000e+00> : vector<2x1024xf32>
    %3 = tpu.matmul %1, %2, %cst {dimension_numbers = #tpu.dot_dimension_numbers<[1], [0], [0], [1], [0, 0, 1, 1], [], []>} : vector<2x520xbf16>, vector<520x1024xbf16>, vector<2x1024xf32> -> vector<2x1024xf32>
    %c0_3 = arith.constant 0 : index
    %c0_4 = arith.constant 0 : index
    %4 = vector.load %arg2[%c0_3, %c0_4] : memref<1x1024xf32, #tpu.memory_space<vmem>>, vector<1x1024xf32>
    %5 = vector.broadcast %4 : vector<1x1024xf32> to vector<2x1024xf32>
    %6 = arith.addf %3, %5 : vector<2x1024xf32>
    %cst_5 = arith.constant 0.000000e+00 : f32
    %7 = vector.broadcast %cst_5 : f32 to vector<2x1024xf32>
    %8 = arith.maximumf %6, %7 : vector<2x1024xf32>
    %9 = arith.truncf %8 : vector<2x1024xf32> to vector<2x1024xbf16>
    %c0_6 = arith.constant 0 : index
    %c0_7 = arith.constant 0 : index
    %10 = vector.load %arg3[%c0_6, %c0_7] : memref<1024x512xbf16, #tpu.memory_space<vmem>>, vector<1024x512xbf16>
    %cst_8 = arith.constant dense<0.000000e+00> : vector<2x512xf32>
    %11 = tpu.matmul %9, %10, %cst_8 {dimension_numbers = #tpu.dot_dimension_numbers<[1], [0], [0], [1], [0, 0, 1, 1], [], []>} : vector<2x1024xbf16>, vector<1024x512xbf16>, vector<2x512xf32> -> vector<2x512xf32>
    %c0_9 = arith.constant 0 : index
    %c0_10 = arith.constant 0 : index
    %12 = vector.load %arg4[%c0_9, %c0_10] : memref<1x512xf32, #tpu.memory_space<vmem>>, vector<1x512xf32>
    %13 = vector.broadcast %12 : vector<1x512xf32> to vector<2x512xf32>
    %14 = arith.addf %11, %13 : vector<2x512xf32>
    %cst_11 = arith.constant 0.000000e+00 : f32
    %15 = vector.broadcast %cst_11 : f32 to vector<2x512xf32>
    %16 = arith.maximumf %14, %15 : vector<2x512xf32>
    %17 = arith.truncf %16 : vector<2x512xf32> to vector<2x512xbf16>
    %c0_12 = arith.constant 0 : index
    %c0_13 = arith.constant 0 : index
    %18 = vector.load %arg5[%c0_12, %c0_13] : memref<512x1xbf16, #tpu.memory_space<vmem>>, vector<512x1xbf16>
    %cst_14 = arith.constant dense<0.000000e+00> : vector<2x1xf32>
    %19 = tpu.matmul %17, %18, %cst_14 {dimension_numbers = #tpu.dot_dimension_numbers<[1], [0], [0], [1], [0, 0, 1, 1], [], []>} : vector<2x512xbf16>, vector<512x1xbf16>, vector<2x1xf32> -> vector<2x1xf32>
    %c0_15 = arith.constant 0 : index
    %c0_16 = arith.constant 0 : index
    %20 = vector.load %arg6[%c0_15, %c0_16] : memref<1x1xf32, #tpu.memory_space<vmem>>, vector<1x1xf32>
    %21 = vector.broadcast %20 : vector<1x1xf32> to vector<2x1xf32>
    %22 = arith.addf %19, %21 : vector<2x1xf32>
    %c0_17 = arith.constant 0 : index
    %c0_18 = arith.constant 0 : index
    %23 = vector.load %arg7[%c0_17, %c0_18] : memref<2x1xf32, #tpu.memory_space<vmem>>, vector<2x1xf32>
    tpu.vector_store %arg7[%c0_17, %c0_18], %22 {strides = array<i32>} : memref<2x1xf32, #tpu.memory_space<vmem>>, vector<2x1xf32>,
    return
  }
}

</mosaic_0001>

<bundles_post_ra>
// kernel: ginconvnet_forward.11
= control target key start
LH: loop header
LB: loop body
LE: loop exit
PB: predicated region body
PF: predicated region fallthrough
CT: control target
= control target key end

     0   :  { %17 = vsyncpa [#allocation7], 0  ;;  %s1693_s0 = inlined_call_operand.vmem [shape: f32[10,2,64], index: 0, kind: input, shape index: {}, may-alias: {0,1}]   ;;  %s1694_s1 = inlined_call_operand.vmem [shape: f32[10,2,64], index: 1, kind: input, shape index: {}, may-alias: {0,1}]   ;;  %s1695_s2 = inlined_call_operand.hbm [shape: bf16[64,128], index: 2, kind: input, shape index: {}]   ;;  %s1696_s3 = inlined_call_operand.hbm [shape: bf16[64,128], index: 3, kind: input, shape index: {}]   ;;  %s1697_s4 = inlined_call_operand.hbm [shape: f32[1,128], index: 4, kind: input, shape index: {}]   ;;  %s1698_s5 = inlined_call_operand.hbm [shape: f32[1,128], index: 5, kind: input, shape index: {}]   ;;  %s1699_s6 = inlined_call_operand.hbm [shape: bf16[32,128], index: 6, kind: input, shape index: {}]   ;;  %s1700_s7 = inlined_call_operand.hbm [shape: bf16[32,128], index: 7, kind: input, shape index: {}]   ;;  %s1701_s8 = inlined_call_operand.vmem [shape: f32[10,2,32], index: 8, kind: output, shape index: {0}]   ;;  %s1702_s9 = inlined_call_operand.vmem [shape: f32[10,2,32], index: 9, kind: output, shape index: {1}]   ;;  %s1703_s10 = inlined_call_operand.vmem [shape: f32[2,32], index: 10, kind: output, shape index: {2}]   ;;  %s1704_s11 = inlined_call_operand.vmem [shape: f32[2,32], index: 11, kind: output, shape index: {3}]  }
   0x1   :  { %18 = vsyncpa [#allocation9], 0 }
   0x2   :  { %19 = vsyncpa [#allocation12], 0 }
   0x3   :  { %20 = vsyncpa [#allocation15], 0  ;;  %s1517_s17 = smov 0  }
   0x4 LB: > { %s1523_s18 = sadd.s32 4294967295, %s1441_s17   ;;  %p1060_p0 = scmp.ge.s32.totalorder %s1441_s17, 1  ;;  %s1441_s17 = sphi %s1517_s17, %s26_s17  }
   0x5   : > { %p307_p1 = scmp.lt.s32.totalorder %s1441_s17, 11  ;;  %p1061_p2 = scmp.ne.s32.totalorder %s1523_s18, 0 }
   0x6   : > { %p1201_p3 = scmp.eq.s32.totalorder %s1523_s18, 0  ;;  %s1443_s20 = smov [#allocation8]  }
   0x7   : > { %p1529_p4 = pnand %p1060_p0, %p307_p1  ;;  %s332_s21 = sshll.u32 %s1443_s20, 4  ;;  %s333_s21 = int_to_ptr.vmem [resolvable:$true] %s332_s21 }
   0x8   : > { %s1444_s22 = smov [#allocation11]   ;;  %s1445_s25 = smov [#allocation6]  }
   0x9   : > { %p1182_p5 = pneg %p1529_p4  ;;  %s357_s23 = sshll.u32 %s1444_s22, 4  ;;  %s1535_s23 = int_to_ptr.vmem [resolvable:$true] %s357_s23 }
   0xa   : > { %s319_s26 = sshll.u32 %s1445_s25, 4  ;;  %s1446_s27 = smov [#allocation10]   ;;  %s1543_s26 = int_to_ptr.vmem [resolvable:$true] %s319_s26 }
   0xb   : > { %p1539_p6 = pnand %p1201_p3, %p1182_p5  ;;  %s1545_s28 = sshll.u32 %s1446_s27, 4  ;;  %s347_s28 = int_to_ptr.vmem [resolvable:$true] %s1545_s28 }
   0xc   : > { %s1274_s30 = scalar_lea.vmem %s333_s21, 512  ;;  %p1282_p11 = scmp.lt.s32.totalorder %s333_s21, %s333_s21 }
   0xd   : > { %p1549_p7 = pneg %p1539_p6  ;;  %p1275_p8 = scmp.ne.s32.totalorder %s333_s21, %s1274_s30 }
   0xe   : > { %p1283_p12 = scmp.lt.s32.totalorder %s1274_s30, %s1274_s30 }
   0xf   : > { %p1277_p9 = pnand %p1275_p8, %p1549_p7 }
  0x10   : > { %p1284_p13 = por %p1283_p12, %p1282_p11 }
  0x11   : > { %p1278_p10 = pneg %p1277_p9 }
  0x13   : > { %p1285_p0 = pnand %p1284_p13, %p1278_p10 }
  0x15   : > { %1288 = shalt.err (!%p1285_p0)
}
  0x16   : > { %s1447_s12 = smov 64   ;;  %s1448_s13 = smov 4  }
  0x17   : > { %1188 = dma.hbm_to_vmem [thread:$0]  (!%p1539_p6), %s1696_s3, 512, %s333_s21, [#allocation9], %s1447_s12, %s1447_s12, %s1448_s13  }
  0x18   : > { %s1300_s16 = scalar_lea.vmem %s1535_s23, 16  ;;  %s1307_s20 = scalar_lea.vmem %s1535_s23, 32 }
  0x19   : > { %p1301_p1 = scmp.ne.s32.totalorder %s1535_s23, %s1300_s16  ;;  %p1308_p9 = scmp.lt.s32.totalorder %s1535_s23, %s1535_s23 }
  0x1a   : > { %p1309_p10 = scmp.lt.s32.totalorder %s1307_s20, %s1300_s16 }
  0x1b   : > { %p1303_p5 = pnand %p1301_p1, %p1549_p7 }
  0x1c   : > { %p1310_p11 = por %p1309_p10, %p1308_p9 }
  0x1d   : > { %p1304_p8 = pneg %p1303_p5 }
  0x1f   : > { %p1311_p12 = pnand %p1310_p11, %p1304_p8 }
  0x21   : > { %1314 = shalt.err (!%p1311_p12)
}
  0x22   : > { %1194 = dma.hbm_to_vmem [thread:$0]  (!%p1539_p6), %s1698_s5, 16, %s1535_s23, [#allocation12]  }
  0x23   : > { %s1326_s21 = scalar_lea.vmem %s1543_s26, 512  ;;  %p1334_p5 = scmp.lt.s32.totalorder %s1543_s26, %s1543_s26 }
  0x24   : > { %p1327_p13 = scmp.ne.s32.totalorder %s1543_s26, %s1326_s21  ;;  %p1335_p8 = scmp.lt.s32.totalorder %s1326_s21, %s1326_s21 }
  0x26   : > { %p1329_p0 = pnand %p1327_p13, %p1549_p7  ;;  %p1336_p9 = por %p1335_p8, %p1334_p5 }
  0x28   : > { %p1330_p1 = pneg %p1329_p0 }
  0x2a   : > { %p1337_p10 = pnand %p1336_p9, %p1330_p1 }
  0x2c   : > { %1340 = shalt.err (!%p1337_p10)
}
  0x2d   : > { %1185 = dma.hbm_to_vmem [thread:$0]  (!%p1539_p6), %s1695_s2, 512, %s1543_s26, [#allocation7], %s1447_s12, %s1447_s12, %s1448_s13  }
  0x2e   : > { %s1352_s23 = scalar_lea.vmem %s347_s28, 16  ;;  %s1359_s14 = scalar_lea.vmem %s347_s28, 32 }
  0x2f   : > { %p1353_p11 = scmp.ne.s32.totalorder %s347_s28, %s1352_s23  ;;  %p1360_p0 = scmp.lt.s32.totalorder %s347_s28, %s347_s28 }
  0x30   : > { %p1361_p1 = scmp.lt.s32.totalorder %s1359_s14, %s1352_s23 }
  0x31   : > { %p1355_p12 = pnand %p1353_p11, %p1549_p7 }
  0x32   : > { %p1362_p5 = por %p1361_p1, %p1360_p0 }
  0x33   : > { %p1356_p13 = pneg %p1355_p12 }
  0x35   : > { %p1363_p8 = pnand %p1362_p5, %p1356_p13 }
  0x37   : > { %1366 = shalt.err (!%p1363_p8)
}
  0x38   : > { %1191 = dma.hbm_to_vmem [thread:$0]  (!%p1539_p6), %s1697_s4, 16, %s347_s28, [#allocation9]  }
  0x39   : > { %s1449_s26 = smov [#allocation13]   ;;  %s1450_s22 = smov [#allocation14]  }
  0x3a   : > { %s367_s20 = sshll.u32 %s1449_s26, 4  ;;  %s380_s25 = sshll.u32 %s1450_s22, 4  ;;  %s368_s20 = int_to_ptr.vmem [resolvable:$true] %s367_s20  ;;  %s381_s25 = int_to_ptr.vmem [resolvable:$true] %s380_s25 }
  0x3b   : > { %s1378_s21 = scalar_lea.vmem %s368_s20, 256  ;;  %p1386_p12 = scmp.lt.s32.totalorder %s368_s20, %s368_s20 }
  0x3c   : > { %p1379_p9 = scmp.ne.s32.totalorder %s368_s20, %s1378_s21  ;;  %p1387_p13 = scmp.lt.s32.totalorder %s1378_s21, %s1378_s21 }
  0x3e   : > { %p1381_p10 = pnand %p1379_p9, %p1549_p7  ;;  %p1388_p0 = por %p1387_p13, %p1386_p12 }
  0x40   : > { %p1382_p11 = pneg %p1381_p10 }
  0x42   : > { %p1389_p1 = pnand %p1388_p0, %p1382_p11 }
  0x44   : > { %1392 = shalt.err (!%p1389_p1)
}
  0x45   : > { %1197 = dma.hbm_to_vmem [thread:$0]  (!%p1539_p6), %s1699_s6, 256, %s368_s20, [#allocation12], %s1447_s12, %s1447_s12, %s1448_s13  }
  0x46   : > { %s1404_s30 = scalar_lea.vmem %s381_s25, 256  ;;  %p1412_p10 = scmp.lt.s32.totalorder %s381_s25, %s381_s25 }
  0x47   : > { %p1405_p5 = scmp.ne.s32.totalorder %s381_s25, %s1404_s30  ;;  %p1413_p12 = scmp.lt.s32.totalorder %s1404_s30, %s1404_s30 }
  0x49   : > { %p1407_p8 = pnand %p1405_p5, %p1549_p7  ;;  %p1414_p11 = por %p1413_p12, %p1412_p10 }
  0x4b   : > { %p1408_p9 = pneg %p1407_p8 }
  0x4d   : > { %p1415_p13 = pnand %p1414_p11, %p1408_p9 }
  0x4f   : > { %1418 = shalt.err (!%p1415_p13)
}
  0x50   : > { %1200 = dma.hbm_to_vmem [thread:$0]  (!%p1539_p6), %s1700_s7, 256, %s381_s25, [#allocation15], %s1447_s12, %s1447_s12, %s1448_s13  }
  0x51   : > { %412 = sbr.rel (%p1529_p4) target bundleno = 823 (0x337), region = 52 }
  0x56   : > { %1424 = dma.done.wait (%p1201_p3), [#allocation7], 512  }
  0x57   : > { %1426 = vsyncadd (%p1201_p3), [#allocation7], 4294966784 }
  0x58   : > { %1428 = dma.done.wait (%p1201_p3), [#allocation9], 528  }
  0x59   : > { %1430 = vsyncadd (%p1201_p3), [#allocation9], 4294966768 }
  0x5a   : > { %1432 = dma.done.wait (%p1201_p3), [#allocation12], 272  }
  0x5b   : > { %1434 = vsyncadd (%p1201_p3), [#allocation12], 4294967024 }
  0x5c   : > { %1436 = dma.done.wait (%p1201_p3), [#allocation15], 256  }
  0x5d   : > { %1438 = vsyncadd (%p1201_p3), [#allocation15], 4294967040  ;;  %p480_p4 = scmp.lt.s32.totalorder %s1523_s18, 9  ;;  %s484_s19 = ssub.s32 9, %s1523_s18 }
  0x5e   : > { %p485_p6 = scmp.lt.s32.totalorder %s484_s19, 9 }
  0x5f   : > { %s481_s24 = scalar_select %p480_p4, %s1523_s18, 9 }
  0x60   : > { %s1709_s19 = smov (!%p485_p6, %s484_s19), 9  ;;  %504 = sbr.rel (%p1061_p2) target bundleno = 104 (0x68), region = 80 }
  0x61   : > { %s1075_s29 = sshll.u32 %s481_s24, 1  ;;  %s1076_s16 = sshll.u32 %s1709_s19, 1 }
  0x62   : > { %s1643_s15 = scalar_lea.vmem %s1693_s0, %s1075_s29  ;;  %s1648_s22 = scalar_lea.vmem %s1694_s1, %s1076_s16 }
  0x63   : > { %s1653_s28 = scalar_lea.vmem %s1701_s8, %s1075_s29  ;;  %s1658_s23 = scalar_lea.vmem %s1702_s9, %s1076_s16 }
  0x65   : > { %vm505_vm0 = vcmask 254976   ;;  %v1451_v0 = vmov 0.0  }
  0x66   : > { %506 = vst.msk [vmem:[#allocation2] sm:$0x3] %vm505_vm0, %v1451_v0  ;;  %507 = vst.msk [vmem:[#allocation3] sm:$0x3] %vm505_vm0, %v1451_v0 }
  0x67   : > { %508 = vst.msk [vmem:[#allocation4] sm:$0x3] %vm505_vm0, %v1451_v0  ;;  %509 = vst.msk [vmem:[#allocation5] sm:$0x3] %vm505_vm0, %v1451_v0 }
  0x68 PF: > { %v1235_v1 = vld [vmem:[#allocation6 + $0x18] sm:$0xff]   ;;  %v1452_v2 = vmov 0.0   ;;  %v1236_v3 = vld [vmem:[#allocation13 + $0x8] sm:$0xff]   ;;  %vm1453_vm1 = vmmov 0   ;;  %v1238_v5 = vld [vmem:[#allocation13] sm:$0xff]   ;;  %vm614_vm2 = vcmask 261120  }
  0x69   : > { %1118 = vmatprep.subr.bf16.mxu0 %v1452_v2  ;;  %1130 = vmatprep.subr.bf16.mxu1 %v1452_v2  ;;  %v1237_v4 = vld [vmem:[#allocation6 + $0x10] sm:$0xff]   ;;  %v1239_v8 = vld [vmem:[#allocation6 + $0x8] sm:$0xff]   ;;  %v1240_v9 = vld [vmem:[#allocation8 + $0x18] sm:$0xff]   ;;  %vm557_vm3 = vcmask 523264   ;;  %s1454_s18 = smov 32   ;;  %s1455_s14 = smov 64  }
  0x6a   : > { %1119 = vmatpush3.bf16.msra.mxu0 %v1235_v1  ;;  %1134 = vmatprep.mubr.msk.bf16.mxu1 %vm1453_vm1, %v1452_v2  ;;  %v1241_v10 = vld [vmem:[#allocation6] sm:$0xff]   ;;  %v510_v11 = vld [vmem:[%s1643_s15] sm:$0x3]  ;;  %v1242_v12 = vld [vmem:[#allocation8 + $0x10] sm:$0xff]   ;;  %s1456_s19 = smov 96   ;;  %vm866_vm4 = vcmask 254976  }
  0x6b   : > { %1131 = vmatpush3.bf16.msra.mxu1 %v1236_v3  ;;  %1120 = vmatprep.subr.bf16.mxu0 %v1452_v2  ;;  %v526_v13 = vpack.c.bf16 %v510_v11, %v510_v11  ;;  %v1244_v15 = vld [vmem:[#allocation14 + $0x8] sm:$0xff]   ;;  %v1243_v16 = vld [vmem:[#allocation8 + $0x8] sm:$0xff]   ;;  %v1246_v18 = vld [vmem:[#allocation14] sm:$0xff]  }
  0x6c   : > { %1132 = vmatprep.subr.bf16.mxu1 %v1452_v2  ;;  %1126 = vmatprep.mubr.msk.bf16.mxu0 %vm1453_vm1, %v1452_v2  ;;  %v1245_v20 = vld [vmem:[#allocation8] sm:$0xff]   ;;  %v687_v21 = vld [vmem:[%s1648_s22] sm:$0x3] }
  0x6d   : > { %v524_v6 = vld [vmem:[#allocation2] sm:$0x3]  ;;  %v525_v14 = vld [vmem:[#allocation3] sm:$0x3]  ;;  %v703_v23 = vpack.c.bf16 %v687_v21, %v687_v21  ;;  %v1080_v27 = vld [vmem:[#allocation10] ss:$0 sm:$0xff] }
  0x6e   : > { %1121 = vmatpush3.bf16.msra.mxu0 %v1237_v4  ;;  %v601_v7 = vpack.c.bf16 %v524_v6, %v524_v6  ;;  %667 = vrot.lane.b32.xlu1 %v525_v14, %s1454_s18  ;;  %v702_v17 = vld [vmem:[#allocation5] sm:$0x3]  ;;  %v701_v19 = vld [vmem:[#allocation4] sm:$0x3]  ;;  %v1090_v35 = vld [vmem:[#allocation11] ss:$0 sm:$0xff] }
  0x6f   : > { %1133 = vmatpush3.bf16.msra.mxu1 %v1238_v5  ;;  %1122 = vmatprep.subr.bf16.mxu0 %v1452_v2  ;;  %v777_v22 = vpack.c.bf16 %v701_v19, %v701_v19 }
  0x70   : > { %1138 = vmatprep.subr.bf16.mxu1 %v1452_v2 }
  0x72   : > { %1135 = vmatmul.mubr.msk.bf16.vlgmr.msra.gmra.mxu1 %vm614_vm2, %v601_v7  ;;  %1123 = vmatpush3.bf16.msra.mxu0 %v1239_v8 }
  0x73   : > { %1139 = vmatpush3.bf16.msra.mxu1 %v1240_v9  ;;  %1124 = vmatprep.subr.bf16.mxu0 %v1452_v2 }
  0x74   : > { %1140 = vmatprep.subr.bf16.mxu1 %v1452_v2  ;;  %1146 = vmatprep.mubr.msk.bf16.mxu1 %vm1453_vm1, %v1452_v2 }
  0x75   : > { %842 = vrot.lane.b32.xlu1 %v702_v17, %s1454_s18 }
  0x76   : > { %1125 = vmatpush3.bf16.msra.mxu0 %v1241_v10 }
  0x77   : > { %1141 = vmatpush3.bf16.msra.mxu1 %v1242_v12  ;;  %1150 = vmatprep.subr.bf16.mxu0 %v1452_v2 }
  0x78   : > { %1142 = vmatprep.subr.bf16.mxu1 %v1452_v2 }
  0x79   : > { %1127 = vmatmul.mubr.msk.bf16.vlgmr.msra.gmra.mxu0 %vm557_vm3, %v526_v13 }
  0x7a   : > { %1151 = vmatpush3.bf16.msra.mxu0 %v1244_v15  ;;  %1154 = vmatprep.mubr.msk.bf16.mxu0 %vm1453_vm1, %v1452_v2 }
  0x7b   : > { %1143 = vmatpush3.bf16.msra.mxu1 %v1243_v16  ;;  %1152 = vmatprep.subr.bf16.mxu0 %v1452_v2 }
  0x7c   : > { %1144 = vmatprep.subr.bf16.mxu1 %v1452_v2 }
  0x7e   : > { %1153 = vmatpush3.bf16.msra.mxu0 %v1246_v18 }
  0x7f   : > { %1145 = vmatpush3.bf16.msra.mxu1 %v1245_v20 }
  0x81   : > { %1155 = vmatmul.mubr.msk.bf16.vlgmr.msra.gmra.mxu0 %vm614_vm2, %v777_v22 }
  0x82   : > { %1147 = vmatmul.mubr.msk.bf16.vlgmr.msra.gmra.mxu1 %vm557_vm3, %v703_v23 }
  0xe0   : > { %v668_v60 = vpop.permute.xlu1 %667 }
  0xe7   : > { %v843_v0 = vpop.permute.xlu1 %842 }
 0x132   : > { %v652_v24 = vpop.f32.mrf.mxu1 }
 0x134   : > { %v1136_v25 = vpop.f32.mrf.mxu1 }
 0x136   : > { %v655_v26 = vpop.f32.mrf.mxu1 }
 0x138   : > { %v1137_v28 = vpop.f32.mrf.mxu1 }
 0x139   : > { %v595_v29 = vpop.f32.mrf.mxu0 }
 0x13a   : > { %v596_v30 = vadd.f32 %v1080_v27, %v595_v29 }
 0x13b   : > { %v1128_v31 = vpop.f32.mrf.mxu0 }
 0x13c   : > { %v658_v32 = vadd.f32 %v652_v24, %v596_v30 }
 0x13d   : > { %v598_v33 = vpop.f32.mrf.mxu0 }
 0x13e   : > { %1247 = vtanh.f32 %v658_v32  ;;  %v1089_v48 = vmul.f32 -1.442695, %v658_v32 }
 0x13f   : > { %v1129_v34 = vpop.f32.mrf.mxu0 }
 0x141   : > { %v827_v36 = vpop.f32.mrf.mxu0 }
 0x142   : > { %v771_v37 = vpop.f32.mrf.mxu1 }
 0x143   : > { %v772_v38 = vadd.f32 %v1090_v35, %v771_v37  ;;  %v1156_v39 = vpop.f32.mrf.mxu0 }
 0x144   : > { %v1148_v40 = vpop.f32.mrf.mxu1 }
 0x145   : > { %v833_v41 = vadd.f32 %v827_v36, %v772_v38  ;;  %v830_v42 = vpop.f32.mrf.mxu0 }
 0x146   : > { %v774_v43 = vpop.f32.mrf.mxu1 }
 0x147   : > { %1249 = vtanh.f32 %v833_v41  ;;  %v1157_v44 = vpop.f32.mrf.mxu0  ;;  %v1099_v49 = vmul.f32 -1.442695, %v833_v41 }
 0x148   : > { %v1149_v45 = vpop.f32.mrf.mxu1  ;;  %1251 = vpow2.f32 %v1089_v48 }
 0x149   : > { %1253 = vpow2.f32 %v1099_v49 }
 0x14b   : > { %v1248_v46 = vpop.eup %1247 }
 0x14c   : > { %672 = vrot.lane.b32.xlu0 %v1248_v46, %s1455_s14 }
 0x154   : > { %v1250_v47 = vpop.eup %1249 }
 0x155   : > { %847 = vrot.lane.b32.xlu0 %v1250_v47, %s1455_s14  ;;  %v1252_v50 = vpop.eup %1251 }
 0x156   : > { %v662_v51 = vadd.f32 1.0, %v1252_v50  ;;  %v1254_v52 = vpop.eup %1253 }
 0x157   : > { %v837_v53 = vadd.f32 1.0, %v1254_v52 }
 0x158   : > { %1255 = vrcp.f32 %v662_v51 }
 0x159   : > { %1257 = vrcp.f32 %v837_v53 }
 0x165   : > { %v1256_v54 = vpop.eup %1255 }
 0x166   : > { %v1258_v57 = vpop.eup %1257  ;;  %v670_v61 = vmul.f32 %v1256_v54, %v668_v60 }
 0x167   : > { %v845_v1 = vmul.f32 %v1258_v57, %v843_v0 }
 0x1be   : > { %v673_v55 = vpop.permute.xlu0 %672 }
 0x1bf   : > { %v675_v56 = vmul.f32 %v1256_v54, %v673_v55 }
 0x1c1   : > { %677 = vrot.lane.b32.xlu0 %v675_v56, %s1454_s18 }
 0x1c7   : > { %v848_v58 = vpop.permute.xlu0 %847 }
 0x1c8   : > { %v850_v59 = vmul.f32 %v1258_v57, %v848_v58 }
 0x1ca   : > { %852 = vrot.lane.b32.xlu1 %v850_v59, %s1454_s18 }
 0x233   : > { %v678_v62 = vpop.permute.xlu0 %677 }
 0x234   : > { %v680_v63 = vadd.f32 %v678_v62, %v670_v61 }
 0x236   : > { %1259 = vtanh.f32 %v680_v63 }
 0x23c   : > { %v853_v2 = vpop.permute.xlu1 %852 }
 0x23d   : > { %v855_v3 = vadd.f32 %v853_v2, %v845_v1 }
 0x23f   : > { %1261 = vtanh.f32 %v855_v3 }
 0x243   : > { %v1260_v4 = vpop.eup %1259 }
 0x244   : > { %683 = vrot.lane.b32.xlu0 %v1260_v4, %s1455_s14 }
 0x24c   : > { %v1262_v5 = vpop.eup %1261 }
 0x24d   : > { %858 = vrot.lane.b32.xlu1 %v1262_v5, %s1455_s14 }
 0x251   : > { %869 = vrot.lane.b32.xlu1 %v680_v63, %s1456_s19 }
 0x255   : > { %879 = vrot.lane.b32.xlu1 %v855_v3, %s1456_s19 }
 0x2b6   : > { %v684_v6 = vpop.permute.xlu0 %683 }
 0x2b7   : > { %v686_v7 = vmul.f32 %v1256_v54, %v684_v6 }
 0x2b9   : > { %863 = vrot.lane.b32.xlu0 %v686_v7, %s1454_s18 }
 0x2bf   : > { %v859_v8 = vpop.permute.xlu1 %858 }
 0x2c0   : > { %v861_v9 = vmul.f32 %v1258_v57, %v859_v8 }
 0x2c2   : > { %874 = vrot.lane.b32.xlu0 %v861_v9, %s1454_s18 }
 0x2c3   : > { %v870_v10 = vpop.permute.xlu1 %869 }
 0x2c4   : > { %872 = vst.msk [vmem:[#allocation3] sm:$0x3] %vm866_vm4, %v870_v10 }
 0x2c7   : > { %v880_v11 = vpop.permute.xlu1 %879 }
 0x2c8   : > { %882 = vst.msk [vmem:[#allocation5] sm:$0x3] %vm866_vm4, %v880_v11 }
 0x32b   : > { %v864_v12 = vpop.permute.xlu0 %863 }
 0x32c   : > { %867 = vst.msk [vmem:[#allocation2] sm:$0x3] %vm866_vm4, %v864_v12  ;;  %883 = vst.msk [vmem:[%s1653_s28] sm:$0x3] %vm866_vm4, %v864_v12 }
 0x32d   : > { %885 = vst.msk [vmem:[%s1703_s10] sm:$0x3] %vm866_vm4, %v864_v12 }
 0x334   : > { %v875_v13 = vpop.permute.xlu0 %874 }
 0x335   : > { %877 = vst.msk [vmem:[#allocation4] sm:$0x3] %vm866_vm4, %v875_v13  ;;  %884 = vst.msk [vmem:[%s1658_s23] sm:$0x3] %vm866_vm4, %v875_v13 }
 0x336   : > { %886 = vst.msk [vmem:[%s1704_s11] sm:$0x3] %vm866_vm4, %v875_v13 }
 0x337 PF: > { %s26_s17 = sadd.s32 1, %s1441_s17  }
 0x338   : > { %p23_p2 = scmp.ge.s32.totalorder %s26_s17, 12  }
 0x33a   :  { %25 = sbr.rel (!%p23_p2) target bundleno = 4 (0x4), region = 142 }
 0x33f   :  { %935 = vsyncpa [#allocation7], 1 }
 0x340   :  { %937 = vsyncpa [#allocation7 + $0x1], 1 }
 0x341   :  { %938 = vsyncpa [#allocation9], 1 }
 0x342   :  { %939 = vsyncpa [#allocation12], 1 }
 0x343   :  { %940 = vsyncpa [#allocation15], 1 }

// kernel: ginconvnet_forward.10
= control target key start
LH: loop header
LB: loop body
LE: loop exit
PB: predicated region body
PF: predicated region fallthrough
CT: control target
= control target key end

     0   :  { %17 = vsyncpa [#allocation7], 0  ;;  %s1810_s0 = inlined_call_operand.vmem [shape: f32[10,2,128], index: 0, kind: input, shape index: {}, may-alias: {0,1}]   ;;  %s1811_s1 = inlined_call_operand.vmem [shape: f32[10,2,128], index: 1, kind: input, shape index: {}, may-alias: {0,1}]   ;;  %s1812_s2 = inlined_call_operand.hbm [shape: bf16[128,128], index: 2, kind: input, shape index: {}]   ;;  %s1813_s3 = inlined_call_operand.hbm [shape: bf16[128,128], index: 3, kind: input, shape index: {}]   ;;  %s1814_s4 = inlined_call_operand.hbm [shape: f32[1,128], index: 4, kind: input, shape index: {}]   ;;  %s1815_s5 = inlined_call_operand.hbm [shape: f32[1,128], index: 5, kind: input, shape index: {}]   ;;  %s1816_s6 = inlined_call_operand.hbm [shape: bf16[32,128], index: 6, kind: input, shape index: {}]   ;;  %s1817_s7 = inlined_call_operand.hbm [shape: bf16[32,128], index: 7, kind: input, shape index: {}]   ;;  %s1818_s8 = inlined_call_operand.vmem [shape: f32[10,2,32], index: 8, kind: output, shape index: {0}]   ;;  %s1819_s9 = inlined_call_operand.vmem [shape: f32[10,2,32], index: 9, kind: output, shape index: {1}]   ;;  %s1820_s10 = inlined_call_operand.vmem [shape: f32[2,32], index: 10, kind: output, shape index: {2}]   ;;  %s1821_s11 = inlined_call_operand.vmem [shape: f32[2,32], index: 11, kind: output, shape index: {3}]  }
   0x1   :  { %18 = vsyncpa [#allocation9], 0 }
   0x2   :  { %19 = vsyncpa [#allocation12], 0 }
   0x3   :  { %20 = vsyncpa [#allocation15], 0  ;;  %s1612_s17 = smov 0  }
   0x4 LB: > { %s1618_s18 = sadd.s32 4294967295, %s1536_s17   ;;  %p1117_p0 = scmp.ge.s32.totalorder %s1536_s17, 1  ;;  %s1536_s17 = sphi %s1612_s17, %s26_s17  }
   0x5   : > { %p307_p1 = scmp.lt.s32.totalorder %s1536_s17, 11  ;;  %p1118_p2 = scmp.ne.s32.totalorder %s1618_s18, 0 }
   0x6   : > { %p1288_p3 = scmp.eq.s32.totalorder %s1618_s18, 0  ;;  %s1538_s20 = smov [#allocation8]  }
   0x7   : > { %p1624_p4 = pnand %p1117_p0, %p307_p1  ;;  %s332_s21 = sshll.u32 %s1538_s20, 4  ;;  %s333_s21 = int_to_ptr.vmem [resolvable:$true] %s332_s21 }
   0x8   : > { %s1539_s22 = smov [#allocation11]   ;;  %s1540_s25 = smov [#allocation6]  }
   0x9   : > { %p1269_p5 = pneg %p1624_p4  ;;  %s357_s23 = sshll.u32 %s1539_s22, 4  ;;  %s1630_s23 = int_to_ptr.vmem [resolvable:$true] %s357_s23 }
   0xa   : > { %s319_s26 = sshll.u32 %s1540_s25, 4  ;;  %s1541_s27 = smov [#allocation10]   ;;  %s1638_s26 = int_to_ptr.vmem [resolvable:$true] %s319_s26 }
   0xb   : > { %p1634_p6 = pnand %p1288_p3, %p1269_p5  ;;  %s1640_s28 = sshll.u32 %s1541_s27, 4  ;;  %s347_s28 = int_to_ptr.vmem [resolvable:$true] %s1640_s28 }
   0xc   : > { %s1369_s30 = scalar_lea.vmem %s333_s21, 1024  ;;  %p1377_p11 = scmp.lt.s32.totalorder %s333_s21, %s333_s21 }
   0xd   : > { %p1644_p7 = pneg %p1634_p6  ;;  %p1370_p8 = scmp.ne.s32.totalorder %s333_s21, %s1369_s30 }
   0xe   : > { %p1378_p12 = scmp.lt.s32.totalorder %s1369_s30, %s1369_s30 }
   0xf   : > { %p1372_p9 = pnand %p1370_p8, %p1644_p7 }
  0x10   : > { %p1379_p13 = por %p1378_p12, %p1377_p11 }
  0x11   : > { %p1373_p10 = pneg %p1372_p9 }
  0x13   : > { %p1380_p0 = pnand %p1379_p13, %p1373_p10 }
  0x15   : > { %1383 = shalt.err (!%p1380_p0)
}
  0x16   : > { %s1542_s12 = smov 64   ;;  %s1543_s13 = smov 4  }
  0x17   : > { %1275 = dma.hbm_to_vmem [thread:$0]  (!%p1634_p6), %s1813_s3, 1024, %s333_s21, [#allocation9], %s1542_s12, %s1542_s12, %s1543_s13  }
  0x18   : > { %s1395_s16 = scalar_lea.vmem %s1630_s23, 16  ;;  %s1402_s20 = scalar_lea.vmem %s1630_s23, 32 }
  0x19   : > { %p1396_p1 = scmp.ne.s32.totalorder %s1630_s23, %s1395_s16  ;;  %p1403_p9 = scmp.lt.s32.totalorder %s1630_s23, %s1630_s23 }
  0x1a   : > { %p1404_p10 = scmp.lt.s32.totalorder %s1402_s20, %s1395_s16 }
  0x1b   : > { %p1398_p5 = pnand %p1396_p1, %p1644_p7 }
  0x1c   : > { %p1405_p11 = por %p1404_p10, %p1403_p9 }
  0x1d   : > { %p1399_p8 = pneg %p1398_p5 }
  0x1f   : > { %p1406_p12 = pnand %p1405_p11, %p1399_p8 }
  0x21   : > { %1409 = shalt.err (!%p1406_p12)
}
  0x22   : > { %1281 = dma.hbm_to_vmem [thread:$0]  (!%p1634_p6), %s1815_s5, 16, %s1630_s23, [#allocation12]  }
  0x23   : > { %s1421_s21 = scalar_lea.vmem %s1638_s26, 1024  ;;  %p1429_p5 = scmp.lt.s32.totalorder %s1638_s26, %s1638_s26 }
  0x24   : > { %p1422_p13 = scmp.ne.s32.totalorder %s1638_s26, %s1421_s21  ;;  %p1430_p8 = scmp.lt.s32.totalorder %s1421_s21, %s1421_s21 }
  0x26   : > { %p1424_p0 = pnand %p1422_p13, %p1644_p7  ;;  %p1431_p9 = por %p1430_p8, %p1429_p5 }
  0x28   : > { %p1425_p1 = pneg %p1424_p0 }
  0x2a   : > { %p1432_p10 = pnand %p1431_p9, %p1425_p1 }
  0x2c   : > { %1435 = shalt.err (!%p1432_p10)
}
  0x2d   : > { %1272 = dma.hbm_to_vmem [thread:$0]  (!%p1634_p6), %s1812_s2, 1024, %s1638_s26, [#allocation7], %s1542_s12, %s1542_s12, %s1543_s13  }
  0x2e   : > { %s1447_s23 = scalar_lea.vmem %s347_s28, 16  ;;  %s1454_s14 = scalar_lea.vmem %s347_s28, 32 }
  0x2f   : > { %p1448_p11 = scmp.ne.s32.totalorder %s347_s28, %s1447_s23  ;;  %p1455_p0 = scmp.lt.s32.totalorder %s347_s28, %s347_s28 }
  0x30   : > { %p1456_p1 = scmp.lt.s32.totalorder %s1454_s14, %s1447_s23 }
  0x31   : > { %p1450_p12 = pnand %p1448_p11, %p1644_p7 }
  0x32   : > { %p1457_p5 = por %p1456_p1, %p1455_p0 }
  0x33   : > { %p1451_p13 = pneg %p1450_p12 }
  0x35   : > { %p1458_p8 = pnand %p1457_p5, %p1451_p13 }
  0x37   : > { %1461 = shalt.err (!%p1458_p8)
}
  0x38   : > { %1278 = dma.hbm_to_vmem [thread:$0]  (!%p1634_p6), %s1814_s4, 16, %s347_s28, [#allocation9]  }
  0x39   : > { %s1544_s26 = smov [#allocation13]   ;;  %s1545_s22 = smov [#allocation14]  }
  0x3a   : > { %s367_s20 = sshll.u32 %s1544_s26, 4  ;;  %s380_s25 = sshll.u32 %s1545_s22, 4  ;;  %s368_s20 = int_to_ptr.vmem [resolvable:$true] %s367_s20  ;;  %s381_s25 = int_to_ptr.vmem [resolvable:$true] %s380_s25 }
  0x3b   : > { %s1473_s21 = scalar_lea.vmem %s368_s20, 256  ;;  %p1481_p12 = scmp.lt.s32.totalorder %s368_s20, %s368_s20 }
  0x3c   : > { %p1474_p9 = scmp.ne.s32.totalorder %s368_s20, %s1473_s21  ;;  %p1482_p13 = scmp.lt.s32.totalorder %s1473_s21, %s1473_s21 }
  0x3e   : > { %p1476_p10 = pnand %p1474_p9, %p1644_p7  ;;  %p1483_p0 = por %p1482_p13, %p1481_p12 }
  0x40   : > { %p1477_p11 = pneg %p1476_p10 }
  0x42   : > { %p1484_p1 = pnand %p1483_p0, %p1477_p11 }
  0x44   : > { %1487 = shalt.err (!%p1484_p1)
}
  0x45   : > { %1284 = dma.hbm_to_vmem [thread:$0]  (!%p1634_p6), %s1816_s6, 256, %s368_s20, [#allocation12], %s1542_s12, %s1542_s12, %s1543_s13  }
  0x46   : > { %s1499_s30 = scalar_lea.vmem %s381_s25, 256  ;;  %p1507_p10 = scmp.lt.s32.totalorder %s381_s25, %s381_s25 }
  0x47   : > { %p1500_p5 = scmp.ne.s32.totalorder %s381_s25, %s1499_s30  ;;  %p1508_p12 = scmp.lt.s32.totalorder %s1499_s30, %s1499_s30 }
  0x49   : > { %p1502_p8 = pnand %p1500_p5, %p1644_p7  ;;  %p1509_p11 = por %p1508_p12, %p1507_p10 }
  0x4b   : > { %p1503_p9 = pneg %p1502_p8 }
  0x4d   : > { %p1510_p13 = pnand %p1509_p11, %p1503_p9 }
  0x4f   : > { %1513 = shalt.err (!%p1510_p13)
}
  0x50   : > { %1287 = dma.hbm_to_vmem [thread:$0]  (!%p1634_p6), %s1817_s7, 256, %s381_s25, [#allocation15], %s1542_s12, %s1542_s12, %s1543_s13  }
  0x51   : > { %412 = sbr.rel (%p1624_p4) target bundleno = 839 (0x347), region = 52 }
  0x56   : > { %1519 = dma.done.wait (%p1288_p3), [#allocation7], 1024  }
  0x57   : > { %1521 = vsyncadd (%p1288_p3), [#allocation7], 4294966272 }
  0x58   : > { %1523 = dma.done.wait (%p1288_p3), [#allocation9], 1040  }
  0x59   : > { %1525 = vsyncadd (%p1288_p3), [#allocation9], 4294966256 }
  0x5a   : > { %1527 = dma.done.wait (%p1288_p3), [#allocation12], 272  }
  0x5b   : > { %1529 = vsyncadd (%p1288_p3), [#allocation12], 4294967024 }
  0x5c   : > { %1531 = dma.done.wait (%p1288_p3), [#allocation15], 256  }
  0x5d   : > { %1533 = vsyncadd (%p1288_p3), [#allocation15], 4294967040  ;;  %p480_p4 = scmp.lt.s32.totalorder %s1618_s18, 9  ;;  %s484_s19 = ssub.s32 9, %s1618_s18 }
  0x5e   : > { %p485_p6 = scmp.lt.s32.totalorder %s484_s19, 9 }
  0x5f   : > { %s481_s24 = scalar_select %p480_p4, %s1618_s18, 9 }
  0x60   : > { %s1826_s19 = smov (!%p485_p6, %s484_s19), 9  ;;  %504 = sbr.rel (%p1118_p2) target bundleno = 104 (0x68), region = 80 }
  0x61   : > { %s1132_s29 = sshll.u32 %s481_s24, 1  ;;  %s1133_s16 = sshll.u32 %s1826_s19, 1 }
  0x62   : > { %s1738_s15 = scalar_lea.vmem %s1810_s0, %s1132_s29  ;;  %s1743_s22 = scalar_lea.vmem %s1811_s1, %s1133_s16 }
  0x63   : > { %s1748_s28 = scalar_lea.vmem %s1818_s8, %s1132_s29  ;;  %s1753_s23 = scalar_lea.vmem %s1819_s9, %s1133_s16 }
  0x65   : > { %vm505_vm0 = vcmask 254976   ;;  %v1546_v0 = vmov 0.0  }
  0x66   : > { %506 = vst.msk [vmem:[#allocation2] sm:$0x3] %vm505_vm0, %v1546_v0  ;;  %507 = vst.msk [vmem:[#allocation3] sm:$0x3] %vm505_vm0, %v1546_v0 }
  0x67   : > { %508 = vst.msk [vmem:[#allocation4] sm:$0x3] %vm505_vm0, %v1546_v0  ;;  %509 = vst.msk [vmem:[#allocation5] sm:$0x3] %vm505_vm0, %v1546_v0 }
  0x68 PF: > { %v1322_v1 = vld [vmem:[#allocation6 + $0x38] sm:$0xff]   ;;  %v1547_v2 = vmov 0.0   ;;  %v1323_v3 = vld [vmem:[#allocation13 + $0x8] sm:$0xff]   ;;  %vm1548_vm1 = vmmov 0   ;;  %v1325_v5 = vld [vmem:[#allocation13] sm:$0xff]   ;;  %vm642_vm2 = vcmask 261120  }
  0x69   : > { %1189 = vmatprep.subr.bf16.mxu0 %v1547_v2  ;;  %1209 = vmatprep.subr.bf16.mxu1 %v1547_v2  ;;  %v1324_v4 = vld [vmem:[#allocation6 + $0x30] sm:$0xff]   ;;  %v1326_v8 = vld [vmem:[#allocation6 + $0x28] sm:$0xff]   ;;  %v1327_v9 = vld [vmem:[#allocation8 + $0x38] sm:$0xff]   ;;  %s1549_s18 = smov 32   ;;  %s1550_s14 = smov 64   ;;  %vm923_vm3 = vcmask 254976  }
  0x6a   : > { %1190 = vmatpush3.bf16.msra.mxu0 %v1322_v1  ;;  %1213 = vmatprep.mubr.msk.bf16.mxu1 %vm1548_vm1, %v1547_v2  ;;  %v1328_v10 = vld [vmem:[#allocation6 + $0x20] sm:$0xff]   ;;  %v1329_v11 = vld [vmem:[#allocation8 + $0x30] sm:$0xff]   ;;  %v1330_v12 = vld [vmem:[#allocation6 + $0x18] sm:$0xff]   ;;  %s1551_s19 = smov 96  }
  0x6b   : > { %1210 = vmatpush3.bf16.msra.mxu1 %v1323_v3  ;;  %1191 = vmatprep.subr.bf16.mxu0 %v1547_v2  ;;  %v1331_v13 = vld [vmem:[#allocation8 + $0x28] sm:$0xff]   ;;  %v1332_v14 = vld [vmem:[#allocation6 + $0x10] sm:$0xff]   ;;  %v1333_v15 = vld [vmem:[#allocation8 + $0x20] sm:$0xff]  }
  0x6c   : > { %1211 = vmatprep.subr.bf16.mxu1 %v1547_v2  ;;  %1205 = vmatprep.mubr.msk.bf16.mxu0 %vm1548_vm1, %v1547_v2  ;;  %v1334_v17 = vld [vmem:[#allocation6 + $0x8] sm:$0xff]   ;;  %v1335_v18 = vld [vmem:[#allocation8 + $0x18] sm:$0xff]   ;;  %v1336_v20 = vld [vmem:[#allocation6] sm:$0xff]  }
  0x6d   : > { %v532_v6 = vld [vmem:[#allocation2] sm:$0x3]  ;;  %v533_v16 = vld [vmem:[#allocation3] sm:$0x3]  ;;  %v1337_v22 = vld [vmem:[#allocation8 + $0x10] sm:$0xff]  }
  0x6e   : > { %1192 = vmatpush3.bf16.msra.mxu0 %v1324_v4  ;;  %v629_v7 = vpack.c.bf16 %v532_v6, %v532_v6  ;;  %695 = vrot.lane.b32.xlu1 %v533_v16, %s1549_s18  ;;  %v738_v19 = vld [vmem:[#allocation5] sm:$0x3]  ;;  %v510_v21 = vld [vmem:[%s1738_s15] sm:$0x3]  ;;  %v1338_v25 = vld [vmem:[#allocation8 + $0x8] sm:$0xff]  }
  0x6f   : > { %1212 = vmatpush3.bf16.msra.mxu1 %v1325_v5  ;;  %1193 = vmatprep.subr.bf16.mxu0 %v1547_v2  ;;  %v534_v23 = vpack.c.bf16 %v510_v21, %v510_v21  ;;  %v1339_v24 = vld [vmem:[#allocation14 + $0x8] sm:$0xff]   ;;  %v1341_v26 = vld [vmem:[#allocation14] sm:$0xff]  }
  0x70   : > { %1217 = vmatprep.subr.bf16.mxu1 %v1547_v2  ;;  %v737_v27 = vld [vmem:[#allocation4] sm:$0x3]  ;;  %v1340_v28 = vld [vmem:[#allocation8] sm:$0xff]   ;;  %v715_v29 = vld [vmem:[%s1743_s22] sm:$0x3] }
  0x71   : > { %v834_v30 = vpack.c.bf16 %v737_v27, %v737_v27  ;;  %v739_v31 = vpack.c.bf16 %v715_v29, %v715_v29  ;;  %v1137_v36 = vld [vmem:[#allocation10] ss:$0 sm:$0xff]  ;;  %v1150_v43 = vld [vmem:[#allocation11] ss:$0 sm:$0xff] }
  0x72   : > { %1214 = vmatmul.mubr.msk.bf16.vlgmr.msra.gmra.mxu1 %vm642_vm2, %v629_v7  ;;  %1194 = vmatpush3.bf16.msra.mxu0 %v1326_v8 }
  0x73   : > { %1218 = vmatpush3.bf16.msra.mxu1 %v1327_v9  ;;  %1195 = vmatprep.subr.bf16.mxu0 %v1547_v2 }
  0x74   : > { %1219 = vmatprep.subr.bf16.mxu1 %v1547_v2  ;;  %1233 = vmatprep.mubr.msk.bf16.mxu1 %vm1548_vm1, %v1547_v2 }
  0x75   : > { %899 = vrot.lane.b32.xlu1 %v738_v19, %s1549_s18 }
  0x76   : > { %1196 = vmatpush3.bf16.msra.mxu0 %v1328_v10 }
  0x77   : > { %1220 = vmatpush3.bf16.msra.mxu1 %v1329_v11  ;;  %1197 = vmatprep.subr.bf16.mxu0 %v1547_v2 }
  0x78   : > { %1221 = vmatprep.subr.bf16.mxu1 %v1547_v2 }
  0x7a   : > { %1198 = vmatpush3.bf16.msra.mxu0 %v1330_v12 }
  0x7b   : > { %1222 = vmatpush3.bf16.msra.mxu1 %v1331_v13  ;;  %1199 = vmatprep.subr.bf16.mxu0 %v1547_v2 }
  0x7c   : > { %1223 = vmatprep.subr.bf16.mxu1 %v1547_v2 }
  0x7e   : > { %1200 = vmatpush3.bf16.msra.mxu0 %v1332_v14 }
  0x7f   : > { %1224 = vmatpush3.bf16.msra.mxu1 %v1333_v15  ;;  %1201 = vmatprep.subr.bf16.mxu0 %v1547_v2 }
  0x80   : > { %1225 = vmatprep.subr.bf16.mxu1 %v1547_v2 }
  0x82   : > { %1202 = vmatpush3.bf16.msra.mxu0 %v1334_v17 }
  0x83   : > { %1226 = vmatpush3.bf16.msra.mxu1 %v1335_v18  ;;  %1203 = vmatprep.subr.bf16.mxu0 %v1547_v2 }
  0x84   : > { %1227 = vmatprep.subr.bf16.mxu1 %v1547_v2 }
  0x86   : > { %1204 = vmatpush3.bf16.msra.mxu0 %v1336_v20 }
  0x87   : > { %1228 = vmatpush3.bf16.msra.mxu1 %v1337_v22  ;;  %1237 = vmatprep.subr.bf16.mxu0 %v1547_v2 }
  0x88   : > { %1229 = vmatprep.subr.bf16.mxu1 %v1547_v2 }
  0x89   : > { %1206 = vmatmul.mubr.bf16.vlgmr.msra.gmra.mxu0 %v534_v23 }
  0x8a   : > { %1238 = vmatpush3.bf16.msra.mxu0 %v1339_v24  ;;  %1241 = vmatprep.mubr.msk.bf16.mxu0 %vm1548_vm1, %v1547_v2 }
  0x8b   : > { %1230 = vmatpush3.bf16.msra.mxu1 %v1338_v25  ;;  %1239 = vmatprep.subr.bf16.mxu0 %v1547_v2 }
  0x8c   : > { %1231 = vmatprep.subr.bf16.mxu1 %v1547_v2 }
  0x8e   : > { %1240 = vmatpush3.bf16.msra.mxu0 %v1341_v26 }
  0x8f   : > { %1232 = vmatpush3.bf16.msra.mxu1 %v1340_v28 }
  0x91   : > { %1242 = vmatmul.mubr.msk.bf16.vlgmr.msra.gmra.mxu0 %vm642_vm2, %v834_v30 }
  0x92   : > { %1234 = vmatmul.mubr.bf16.vlgmr.msra.gmra.mxu1 %v739_v31 }
  0xe0   : > { %v696_v4 = vpop.permute.xlu1 %695 }
  0xe7   : > { %v900_v8 = vpop.permute.xlu1 %899 }
 0x132   : > { %v680_v32 = vpop.f32.mrf.mxu1 }
 0x134   : > { %v1215_v33 = vpop.f32.mrf.mxu1 }
 0x136   : > { %v683_v34 = vpop.f32.mrf.mxu1 }
 0x138   : > { %v1216_v35 = vpop.f32.mrf.mxu1 }
 0x149   : > { %v623_v37 = vpop.f32.mrf.mxu0 }
 0x14a   : > { %v624_v38 = vadd.f32 %v1137_v36, %v623_v37 }
 0x14b   : > { %v1207_v39 = vpop.f32.mrf.mxu0 }
 0x14c   : > { %v686_v40 = vadd.f32 %v680_v32, %v624_v38 }
 0x14d   : > { %v626_v41 = vpop.f32.mrf.mxu0 }
 0x14e   : > { %1342 = vtanh.f32 %v686_v40  ;;  %v1149_v56 = vmul.f32 -1.442695, %v686_v40 }
 0x14f   : > { %v1208_v42 = vpop.f32.mrf.mxu0 }
 0x151   : > { %v884_v44 = vpop.f32.mrf.mxu0 }
 0x152   : > { %v828_v45 = vpop.f32.mrf.mxu1 }
 0x153   : > { %v829_v46 = vadd.f32 %v1150_v43, %v828_v45  ;;  %v1243_v47 = vpop.f32.mrf.mxu0 }
 0x154   : > { %v1235_v48 = vpop.f32.mrf.mxu1 }
 0x155   : > { %v890_v49 = vadd.f32 %v884_v44, %v829_v46  ;;  %v887_v50 = vpop.f32.mrf.mxu0 }
 0x156   : > { %v831_v51 = vpop.f32.mrf.mxu1 }
 0x157   : > { %1344 = vtanh.f32 %v890_v49  ;;  %v1244_v52 = vpop.f32.mrf.mxu0  ;;  %v1162_v57 = vmul.f32 -1.442695, %v890_v49 }
 0x158   : > { %v1236_v53 = vpop.f32.mrf.mxu1  ;;  %1346 = vpow2.f32 %v1149_v56 }
 0x159   : > { %1348 = vpow2.f32 %v1162_v57 }
 0x15b   : > { %v1343_v54 = vpop.eup %1342 }
 0x15c   : > { %700 = vrot.lane.b32.xlu0 %v1343_v54, %s1550_s14 }
 0x164   : > { %v1345_v55 = vpop.eup %1344 }
 0x165   : > { %904 = vrot.lane.b32.xlu0 %v1345_v55, %s1550_s14  ;;  %v1347_v58 = vpop.eup %1346 }
 0x166   : > { %v690_v59 = vadd.f32 1.0, %v1347_v58  ;;  %v1349_v60 = vpop.eup %1348 }
 0x167   : > { %v894_v61 = vadd.f32 1.0, %v1349_v60 }
 0x168   : > { %1350 = vrcp.f32 %v690_v59 }
 0x169   : > { %1352 = vrcp.f32 %v894_v61 }
 0x175   : > { %v1351_v62 = vpop.eup %1350 }
 0x176   : > { %v1353_v1 = vpop.eup %1352  ;;  %v698_v5 = vmul.f32 %v1351_v62, %v696_v4 }
 0x177   : > { %v902_v9 = vmul.f32 %v1353_v1, %v900_v8 }
 0x1ce   : > { %v701_v63 = vpop.permute.xlu0 %700 }
 0x1cf   : > { %v703_v0 = vmul.f32 %v1351_v62, %v701_v63 }
 0x1d1   : > { %705 = vrot.lane.b32.xlu0 %v703_v0, %s1549_s18 }
 0x1d7   : > { %v905_v2 = vpop.permute.xlu0 %904 }
 0x1d8   : > { %v907_v3 = vmul.f32 %v1353_v1, %v905_v2 }
 0x1da   : > { %909 = vrot.lane.b32.xlu1 %v907_v3, %s1549_s18 }
 0x243   : > { %v706_v6 = vpop.permute.xlu0 %705 }
 0x244   : > { %v708_v7 = vadd.f32 %v706_v6, %v698_v5 }
 0x246   : > { %1354 = vtanh.f32 %v708_v7 }
 0x24c   : > { %v910_v10 = vpop.permute.xlu1 %909 }
 0x24d   : > { %v912_v11 = vadd.f32 %v910_v10, %v902_v9 }
 0x24f   : > { %1356 = vtanh.f32 %v912_v11 }
 0x253   : > { %v1355_v12 = vpop.eup %1354 }
 0x254   : > { %711 = vrot.lane.b32.xlu0 %v1355_v12, %s1550_s14 }
 0x25c   : > { %v1357_v13 = vpop.eup %1356 }
 0x25d   : > { %915 = vrot.lane.b32.xlu1 %v1357_v13, %s1550_s14 }
 0x261   : > { %926 = vrot.lane.b32.xlu1 %v708_v7, %s1551_s19 }
 0x265   : > { %936 = vrot.lane.b32.xlu1 %v912_v11, %s1551_s19 }
 0x2c6   : > { %v712_v14 = vpop.permute.xlu0 %711 }
 0x2c7   : > { %v714_v15 = vmul.f32 %v1351_v62, %v712_v14 }
 0x2c9   : > { %920 = vrot.lane.b32.xlu0 %v714_v15, %s1549_s18 }
 0x2cf   : > { %v916_v16 = vpop.permute.xlu1 %915 }
 0x2d0   : > { %v918_v17 = vmul.f32 %v1353_v1, %v916_v16 }
 0x2d2   : > { %931 = vrot.lane.b32.xlu0 %v918_v17, %s1549_s18 }
 0x2d3   : > { %v927_v18 = vpop.permute.xlu1 %926 }
 0x2d4   : > { %929 = vst.msk [vmem:[#allocation3] sm:$0x3] %vm923_vm3, %v927_v18 }
 0x2d7   : > { %v937_v19 = vpop.permute.xlu1 %936 }
 0x2d8   : > { %939 = vst.msk [vmem:[#allocation5] sm:$0x3] %vm923_vm3, %v937_v19 }
 0x33b   : > { %v921_v20 = vpop.permute.xlu0 %920 }
 0x33c   : > { %924 = vst.msk [vmem:[#allocation2] sm:$0x3] %vm923_vm3, %v921_v20  ;;  %940 = vst.msk [vmem:[%s1748_s28] sm:$0x3] %vm923_vm3, %v921_v20 }
 0x33d   : > { %942 = vst.msk [vmem:[%s1820_s10] sm:$0x3] %vm923_vm3, %v921_v20 }
 0x344   : > { %v932_v21 = vpop.permute.xlu0 %931 }
 0x345   : > { %934 = vst.msk [vmem:[#allocation4] sm:$0x3] %vm923_vm3, %v932_v21  ;;  %941 = vst.msk [vmem:[%s1753_s23] sm:$0x3] %vm923_vm3, %v932_v21 }
 0x346   : > { %943 = vst.msk [vmem:[%s1821_s11] sm:$0x3] %vm923_vm3, %v932_v21 }
 0x347 PF: > { %s26_s17 = sadd.s32 1, %s1536_s17  }
 0x348   : > { %p23_p2 = scmp.ge.s32.totalorder %s26_s17, 12  }
 0x34a   :  { %25 = sbr.rel (!%p23_p2) target bundleno = 4 (0x4), region = 142 }
 0x34f   :  { %992 = vsyncpa [#allocation7], 1 }
 0x350   :  { %994 = vsyncpa [#allocation7 + $0x1], 1 }
 0x351   :  { %995 = vsyncpa [#allocation9], 1 }
 0x352   :  { %996 = vsyncpa [#allocation12], 1 }
 0x353   :  { %997 = vsyncpa [#allocation15], 1 }

// kernel: ginconvnet_forward.14
= control target key start
LH: loop header
LB: loop body
LE: loop exit
PB: predicated region body
PF: predicated region fallthrough
CT: control target
= control target key end

     0   :  { %18 = vsyncpa [#allocation7], 0  ;;  %s1740_s0 = inlined_call_operand.vmem [shape: f32[6,2,32], index: 0, kind: input, shape index: {}, may-alias: {0,8}]   ;;  %s1741_s1 = inlined_call_operand.vmem [shape: f32[10,2,64], index: 1, kind: input, shape index: {}]   ;;  %s1742_s2 = inlined_call_operand.hbm [shape: bf16[64,128], index: 2, kind: input, shape index: {}]   ;;  %s1743_s3 = inlined_call_operand.hbm [shape: bf16[64,128], index: 3, kind: input, shape index: {}]   ;;  %s1744_s4 = inlined_call_operand.hbm [shape: f32[1,128], index: 4, kind: input, shape index: {}]   ;;  %s1745_s5 = inlined_call_operand.hbm [shape: f32[1,128], index: 5, kind: input, shape index: {}]   ;;  %s1746_s6 = inlined_call_operand.hbm [shape: bf16[32,128], index: 6, kind: input, shape index: {}]   ;;  %s1747_s7 = inlined_call_operand.hbm [shape: bf16[32,128], index: 7, kind: input, shape index: {}]   ;;  %s1748_s8 = inlined_call_operand.vmem [shape: f32[6,2,32], index: 8, kind: output, shape index: {0}, may-alias: {0,8}]   ;;  %s1749_s9 = inlined_call_operand.vmem [shape: f32[10,2,32], index: 9, kind: output, shape index: {1}]   ;;  %s1750_s10 = inlined_call_operand.vmem [shape: f32[10,2,32], index: 10, kind: output, shape index: {2}]   ;;  %s1751_s11 = inlined_call_operand.vmem [shape: f32[2,32], index: 11, kind: output, shape index: {3}]  }
   0x1   :  { %19 = vsyncpa [#allocation9], 0 }
   0x2   :  { %20 = vsyncpa [#allocation12], 0 }
   0x3   :  { %21 = vsyncpa [#allocation15], 0  ;;  %s1563_s16 = smov 0  }
   0x4 LB: > { %s1569_s17 = sadd.s32 4294967295, %s1487_s16   ;;  %p1104_p0 = scmp.ge.s32.totalorder %s1487_s16, 1  ;;  %s1487_s16 = sphi %s1563_s16, %s27_s16  }
   0x5   : > { %p308_p1 = scmp.lt.s32.totalorder %s1487_s16, 11  ;;  %p1105_p2 = scmp.ne.s32.totalorder %s1569_s17, 0 }
   0x6   : > { %p1247_p3 = scmp.eq.s32.totalorder %s1569_s17, 0  ;;  %s1489_s19 = smov [#allocation8]  }
   0x7   : > { %p1575_p4 = pnand %p1104_p0, %p308_p1  ;;  %s333_s20 = sshll.u32 %s1489_s19, 4  ;;  %s334_s20 = int_to_ptr.vmem [resolvable:$true] %s333_s20 }
   0x8   : > { %s1490_s21 = smov [#allocation11]   ;;  %s1491_s24 = smov [#allocation6]  }
   0x9   : > { %p1228_p5 = pneg %p1575_p4  ;;  %s358_s22 = sshll.u32 %s1490_s21, 4  ;;  %s1581_s22 = int_to_ptr.vmem [resolvable:$true] %s358_s22 }
   0xa   : > { %s320_s25 = sshll.u32 %s1491_s24, 4  ;;  %s1492_s26 = smov [#allocation10]   ;;  %s1589_s25 = int_to_ptr.vmem [resolvable:$true] %s320_s25 }
   0xb   : > { %p1585_p6 = pnand %p1247_p3, %p1228_p5  ;;  %s1591_s0 = sshll.u32 %s1492_s26, 4  ;;  %s348_s0 = int_to_ptr.vmem [resolvable:$true] %s1591_s0 }
   0xc   : > { %s1320_s28 = scalar_lea.vmem %s334_s20, 512  ;;  %p1328_p11 = scmp.lt.s32.totalorder %s334_s20, %s334_s20 }
   0xd   : > { %p1595_p7 = pneg %p1585_p6  ;;  %p1321_p8 = scmp.ne.s32.totalorder %s334_s20, %s1320_s28 }
   0xe   : > { %p1329_p12 = scmp.lt.s32.totalorder %s1320_s28, %s1320_s28 }
   0xf   : > { %p1323_p9 = pnand %p1321_p8, %p1595_p7 }
  0x10   : > { %p1330_p13 = por %p1329_p12, %p1328_p11 }
  0x11   : > { %p1324_p10 = pneg %p1323_p9 }
  0x13   : > { %p1331_p0 = pnand %p1330_p13, %p1324_p10 }
  0x15   : > { %1334 = shalt.err (!%p1331_p0)
}
  0x16   : > { %s1493_s29 = smov 64   ;;  %s1494_s30 = smov 4  }
  0x17   : > { %1234 = dma.hbm_to_vmem [thread:$0]  (!%p1585_p6), %s1743_s3, 512, %s334_s20, [#allocation9], %s1493_s29, %s1493_s29, %s1494_s30  }
  0x18   : > { %s1346_s14 = scalar_lea.vmem %s1581_s22, 16  ;;  %s1353_s15 = scalar_lea.vmem %s1581_s22, 32 }
  0x19   : > { %p1347_p1 = scmp.ne.s32.totalorder %s1581_s22, %s1346_s14  ;;  %p1354_p9 = scmp.lt.s32.totalorder %s1581_s22, %s1581_s22 }
  0x1a   : > { %p1355_p10 = scmp.lt.s32.totalorder %s1353_s15, %s1346_s14 }
  0x1b   : > { %p1349_p5 = pnand %p1347_p1, %p1595_p7 }
  0x1c   : > { %p1356_p11 = por %p1355_p10, %p1354_p9 }
  0x1d   : > { %p1350_p8 = pneg %p1349_p5 }
  0x1f   : > { %p1357_p12 = pnand %p1356_p11, %p1350_p8 }
  0x21   : > { %1360 = shalt.err (!%p1357_p12)
}
  0x22   : > { %1240 = dma.hbm_to_vmem [thread:$0]  (!%p1585_p6), %s1745_s5, 16, %s1581_s22, [#allocation12]  }
  0x23   : > { %s1372_s20 = scalar_lea.vmem %s1589_s25, 512  ;;  %p1380_p5 = scmp.lt.s32.totalorder %s1589_s25, %s1589_s25 }
  0x24   : > { %p1373_p13 = scmp.ne.s32.totalorder %s1589_s25, %s1372_s20  ;;  %p1381_p8 = scmp.lt.s32.totalorder %s1372_s20, %s1372_s20 }
  0x26   : > { %p1375_p0 = pnand %p1373_p13, %p1595_p7  ;;  %p1382_p9 = por %p1381_p8, %p1380_p5 }
  0x28   : > { %p1376_p1 = pneg %p1375_p0 }
  0x2a   : > { %p1383_p10 = pnand %p1382_p9, %p1376_p1 }
  0x2c   : > { %1386 = shalt.err (!%p1383_p10)
}
  0x2d   : > { %1231 = dma.hbm_to_vmem [thread:$0]  (!%p1585_p6), %s1742_s2, 512, %s1589_s25, [#allocation7], %s1493_s29, %s1493_s29, %s1494_s30  }
  0x2e   : > { %s1398_s22 = scalar_lea.vmem %s348_s0, 16  ;;  %s1405_s28 = scalar_lea.vmem %s348_s0, 32 }
  0x2f   : > { %p1399_p11 = scmp.ne.s32.totalorder %s348_s0, %s1398_s22  ;;  %p1406_p0 = scmp.lt.s32.totalorder %s348_s0, %s348_s0 }
  0x30   : > { %p1407_p1 = scmp.lt.s32.totalorder %s1405_s28, %s1398_s22 }
  0x31   : > { %p1401_p12 = pnand %p1399_p11, %p1595_p7 }
  0x32   : > { %p1408_p5 = por %p1407_p1, %p1406_p0 }
  0x33   : > { %p1402_p13 = pneg %p1401_p12 }
  0x35   : > { %p1409_p8 = pnand %p1408_p5, %p1402_p13 }
  0x37   : > { %1412 = shalt.err (!%p1409_p8)
}
  0x38   : > { %1237 = dma.hbm_to_vmem [thread:$0]  (!%p1585_p6), %s1744_s4, 16, %s348_s0, [#allocation9]  }
  0x39   : > { %s1495_s25 = smov [#allocation13]   ;;  %s1496_s15 = smov [#allocation14]  }
  0x3a   : > { %s368_s14 = sshll.u32 %s1495_s25, 4  ;;  %s381_s19 = sshll.u32 %s1496_s15, 4  ;;  %s369_s14 = int_to_ptr.vmem [resolvable:$true] %s368_s14  ;;  %s382_s19 = int_to_ptr.vmem [resolvable:$true] %s381_s19 }
  0x3b   : > { %s1424_s21 = scalar_lea.vmem %s369_s14, 256  ;;  %p1432_p12 = scmp.lt.s32.totalorder %s369_s14, %s369_s14 }
  0x3c   : > { %p1425_p9 = scmp.ne.s32.totalorder %s369_s14, %s1424_s21  ;;  %p1433_p13 = scmp.lt.s32.totalorder %s1424_s21, %s1424_s21 }
  0x3e   : > { %p1427_p10 = pnand %p1425_p9, %p1595_p7  ;;  %p1434_p0 = por %p1433_p13, %p1432_p12 }
  0x40   : > { %p1428_p11 = pneg %p1427_p10 }
  0x42   : > { %p1435_p1 = pnand %p1434_p0, %p1428_p11 }
  0x44   : > { %1438 = shalt.err (!%p1435_p1)
}
  0x45   : > { %1243 = dma.hbm_to_vmem [thread:$0]  (!%p1585_p6), %s1746_s6, 256, %s369_s14, [#allocation12], %s1493_s29, %s1493_s29, %s1494_s30  }
  0x46   : > { %s1450_s24 = scalar_lea.vmem %s382_s19, 256  ;;  %p1458_p10 = scmp.lt.s32.totalorder %s382_s19, %s382_s19 }
  0x47   : > { %p1451_p5 = scmp.ne.s32.totalorder %s382_s19, %s1450_s24  ;;  %p1459_p12 = scmp.lt.s32.totalorder %s1450_s24, %s1450_s24 }
  0x49   : > { %p1453_p8 = pnand %p1451_p5, %p1595_p7  ;;  %p1460_p11 = por %p1459_p12, %p1458_p10 }
  0x4b   : > { %p1454_p9 = pneg %p1453_p8 }
  0x4d   : > { %p1461_p13 = pnand %p1460_p11, %p1454_p9 }
  0x4f   : > { %1464 = shalt.err (!%p1461_p13)
}
  0x50   : > { %1246 = dma.hbm_to_vmem [thread:$0]  (!%p1585_p6), %s1747_s7, 256, %s382_s19, [#allocation15], %s1493_s29, %s1493_s29, %s1494_s30  }
  0x51   : > { %413 = sbr.rel (%p1575_p4) target bundleno = 825 (0x339), region = 52 }
  0x56   : > { %1470 = dma.done.wait (%p1247_p3), [#allocation7], 512  }
  0x57   : > { %1472 = vsyncadd (%p1247_p3), [#allocation7], 4294966784 }
  0x58   : > { %1474 = dma.done.wait (%p1247_p3), [#allocation9], 528  }
  0x59   : > { %1476 = vsyncadd (%p1247_p3), [#allocation9], 4294966768 }
  0x5a   : > { %1478 = dma.done.wait (%p1247_p3), [#allocation12], 272  }
  0x5b   : > { %1480 = vsyncadd (%p1247_p3), [#allocation12], 4294967024 }
  0x5c   : > { %1482 = dma.done.wait (%p1247_p3), [#allocation15], 256  }
  0x5d   : > { %1484 = vsyncadd (%p1247_p3), [#allocation15], 4294967040  ;;  %p481_p4 = scmp.lt.s32.totalorder %s1569_s17, 9  ;;  %s485_s18 = ssub.s32 9, %s1569_s17 }
  0x5e   : > { %p486_p6 = scmp.lt.s32.totalorder %s485_s18, 9 }
  0x5f   : > { %s482_s23 = scalar_select %p481_p4, %s1569_s17, 9 }
  0x60   : > { %s1756_s18 = smov (!%p486_p6, %s485_s18), 9  ;;  %505 = sbr.rel (%p1105_p2) target bundleno = 104 (0x68), region = 80 }
  0x61   : > { %s1119_s27 = sshll.u32 %s482_s23, 1  ;;  %s1120_s12 = sshll.u32 %s1756_s18, 1 }
  0x62   : > { %s1689_s28 = scalar_lea.vmem %s1741_s1, %s1119_s27  ;;  %s1694_s14 = scalar_lea.vmem %s1741_s1, %s1120_s12 }
  0x63   : > { %s1699_s21 = scalar_lea.vmem %s1749_s9, %s1119_s27  ;;  %s1704_s24 = scalar_lea.vmem %s1750_s10, %s1120_s12 }
  0x65   : > { %vm506_vm0 = vcmask 254976   ;;  %v1497_v0 = vmov 0.0  }
  0x66   : > { %507 = vst.msk [vmem:[#allocation2] sm:$0x3] %vm506_vm0, %v1497_v0  ;;  %508 = vst.msk [vmem:[#allocation3] sm:$0x3] %vm506_vm0, %v1497_v0 }
  0x67   : > { %509 = vst.msk [vmem:[#allocation4] sm:$0x3] %vm506_vm0, %v1497_v0  ;;  %510 = vst.msk [vmem:[#allocation5] sm:$0x3] %vm506_vm0, %v1497_v0 }
  0x68 PF: > { %v1281_v1 = vld [vmem:[#allocation6 + $0x18] sm:$0xff]   ;;  %v1498_v2 = vmov 0.0   ;;  %v1282_v3 = vld [vmem:[#allocation13 + $0x8] sm:$0xff]   ;;  %vm1499_vm1 = vmmov 0   ;;  %v1284_v5 = vld [vmem:[#allocation13] sm:$0xff]   ;;  %vm615_vm2 = vcmask 261120  }
  0x69   : > { %1164 = vmatprep.subr.bf16.mxu0 %v1498_v2  ;;  %1176 = vmatprep.subr.bf16.mxu1 %v1498_v2  ;;  %v1283_v4 = vld [vmem:[#allocation6 + $0x10] sm:$0xff]   ;;  %v1285_v8 = vld [vmem:[#allocation6 + $0x8] sm:$0xff]   ;;  %v1286_v9 = vld [vmem:[#allocation8 + $0x18] sm:$0xff]   ;;  %vm558_vm3 = vcmask 523264   ;;  %s1500_s26 = smov 32   ;;  %s1501_s22 = smov 64  }
  0x6a   : > { %1165 = vmatpush3.bf16.msra.mxu0 %v1281_v1  ;;  %1180 = vmatprep.mubr.msk.bf16.mxu1 %vm1499_vm1, %v1498_v2  ;;  %v1287_v10 = vld [vmem:[#allocation6] sm:$0xff]   ;;  %v511_v11 = vld [vmem:[%s1689_s28] sm:$0x3]  ;;  %v1288_v12 = vld [vmem:[#allocation8 + $0x10] sm:$0xff]   ;;  %s1502_s18 = smov 96   ;;  %vm867_vm4 = vcmask 254976  }
  0x6b   : > { %1177 = vmatpush3.bf16.msra.mxu1 %v1282_v3  ;;  %1166 = vmatprep.subr.bf16.mxu0 %v1498_v2  ;;  %v527_v13 = vpack.c.bf16 %v511_v11, %v511_v11  ;;  %v1290_v15 = vld [vmem:[#allocation14 + $0x8] sm:$0xff]   ;;  %v1289_v16 = vld [vmem:[#allocation8 + $0x8] sm:$0xff]   ;;  %v1292_v18 = vld [vmem:[#allocation14] sm:$0xff]   ;;  %p1144_p2 = scmp.ne.s32.totalorder %s1569_s17, 9 }
  0x6c   : > { %1178 = vmatprep.subr.bf16.mxu1 %v1498_v2  ;;  %1172 = vmatprep.mubr.msk.bf16.mxu0 %vm1499_vm1, %v1498_v2  ;;  %v1291_v20 = vld [vmem:[#allocation8] sm:$0xff]   ;;  %v688_v21 = vld [vmem:[%s1694_s14] sm:$0x3] }
  0x6d   : > { %v525_v6 = vld [vmem:[#allocation2] sm:$0x3]  ;;  %v526_v14 = vld [vmem:[#allocation3] sm:$0x3]  ;;  %v704_v23 = vpack.c.bf16 %v688_v21, %v688_v21  ;;  %v1124_v27 = vld [vmem:[#allocation10] ss:$0 sm:$0xff] }
  0x6e   : > { %1167 = vmatpush3.bf16.msra.mxu0 %v1283_v4  ;;  %v602_v7 = vpack.c.bf16 %v525_v6, %v525_v6  ;;  %668 = vrot.lane.b32.xlu1 %v526_v14, %s1500_s26  ;;  %v703_v17 = vld [vmem:[#allocation5] sm:$0x3]  ;;  %v702_v19 = vld [vmem:[#allocation4] sm:$0x3]  ;;  %v1134_v35 = vld [vmem:[#allocation11] ss:$0 sm:$0xff] }
  0x6f   : > { %1179 = vmatpush3.bf16.msra.mxu1 %v1284_v5  ;;  %1168 = vmatprep.subr.bf16.mxu0 %v1498_v2  ;;  %v778_v22 = vpack.c.bf16 %v702_v19, %v702_v19 }
  0x70   : > { %1184 = vmatprep.subr.bf16.mxu1 %v1498_v2 }
  0x72   : > { %1181 = vmatmul.mubr.msk.bf16.vlgmr.msra.gmra.mxu1 %vm615_vm2, %v602_v7  ;;  %1169 = vmatpush3.bf16.msra.mxu0 %v1285_v8 }
  0x73   : > { %1185 = vmatpush3.bf16.msra.mxu1 %v1286_v9  ;;  %1170 = vmatprep.subr.bf16.mxu0 %v1498_v2 }
  0x74   : > { %1186 = vmatprep.subr.bf16.mxu1 %v1498_v2  ;;  %1192 = vmatprep.mubr.msk.bf16.mxu1 %vm1499_vm1, %v1498_v2 }
  0x75   : > { %843 = vrot.lane.b32.xlu1 %v703_v17, %s1500_s26 }
  0x76   : > { %1171 = vmatpush3.bf16.msra.mxu0 %v1287_v10 }
  0x77   : > { %1187 = vmatpush3.bf16.msra.mxu1 %v1288_v12  ;;  %1196 = vmatprep.subr.bf16.mxu0 %v1498_v2 }
  0x78   : > { %1188 = vmatprep.subr.bf16.mxu1 %v1498_v2 }
  0x79   : > { %1173 = vmatmul.mubr.msk.bf16.vlgmr.msra.gmra.mxu0 %vm558_vm3, %v527_v13 }
  0x7a   : > { %1197 = vmatpush3.bf16.msra.mxu0 %v1290_v15  ;;  %1200 = vmatprep.mubr.msk.bf16.mxu0 %vm1499_vm1, %v1498_v2 }
  0x7b   : > { %1189 = vmatpush3.bf16.msra.mxu1 %v1289_v16  ;;  %1198 = vmatprep.subr.bf16.mxu0 %v1498_v2 }
  0x7c   : > { %1190 = vmatprep.subr.bf16.mxu1 %v1498_v2 }
  0x7e   : > { %1199 = vmatpush3.bf16.msra.mxu0 %v1292_v18 }
  0x7f   : > { %1191 = vmatpush3.bf16.msra.mxu1 %v1291_v20 }
  0x81   : > { %1201 = vmatmul.mubr.msk.bf16.vlgmr.msra.gmra.mxu0 %vm615_vm2, %v778_v22 }
  0x82   : > { %1193 = vmatmul.mubr.msk.bf16.vlgmr.msra.gmra.mxu1 %vm558_vm3, %v704_v23 }
  0xe0   : > { %v669_v60 = vpop.permute.xlu1 %668 }
  0xe7   : > { %v844_v0 = vpop.permute.xlu1 %843 }
 0x132   : > { %v653_v24 = vpop.f32.mrf.mxu1 }
 0x134   : > { %v1182_v25 = vpop.f32.mrf.mxu1 }
 0x136   : > { %v656_v26 = vpop.f32.mrf.mxu1 }
 0x138   : > { %v1183_v28 = vpop.f32.mrf.mxu1 }
 0x139   : > { %v596_v29 = vpop.f32.mrf.mxu0 }
 0x13a   : > { %v597_v30 = vadd.f32 %v1124_v27, %v596_v29 }
 0x13b   : > { %v1174_v31 = vpop.f32.mrf.mxu0 }
 0x13c   : > { %v659_v32 = vadd.f32 %v653_v24, %v597_v30 }
 0x13d   : > { %v599_v33 = vpop.f32.mrf.mxu0 }
 0x13e   : > { %1293 = vtanh.f32 %v659_v32  ;;  %v1133_v48 = vmul.f32 -1.442695, %v659_v32 }
 0x13f   : > { %v1175_v34 = vpop.f32.mrf.mxu0 }
 0x141   : > { %v828_v36 = vpop.f32.mrf.mxu0 }
 0x142   : > { %v772_v37 = vpop.f32.mrf.mxu1 }
 0x143   : > { %v773_v38 = vadd.f32 %v1134_v35, %v772_v37  ;;  %v1202_v39 = vpop.f32.mrf.mxu0 }
 0x144   : > { %v1194_v40 = vpop.f32.mrf.mxu1 }
 0x145   : > { %v834_v41 = vadd.f32 %v828_v36, %v773_v38  ;;  %v831_v42 = vpop.f32.mrf.mxu0 }
 0x146   : > { %v775_v43 = vpop.f32.mrf.mxu1 }
 0x147   : > { %1295 = vtanh.f32 %v834_v41  ;;  %v1203_v44 = vpop.f32.mrf.mxu0  ;;  %v1143_v49 = vmul.f32 -1.442695, %v834_v41 }
 0x148   : > { %v1195_v45 = vpop.f32.mrf.mxu1  ;;  %1297 = vpow2.f32 %v1133_v48 }
 0x149   : > { %1299 = vpow2.f32 %v1143_v49 }
 0x14b   : > { %v1294_v46 = vpop.eup %1293 }
 0x14c   : > { %673 = vrot.lane.b32.xlu0 %v1294_v46, %s1501_s22 }
 0x154   : > { %v1296_v47 = vpop.eup %1295 }
 0x155   : > { %848 = vrot.lane.b32.xlu0 %v1296_v47, %s1501_s22  ;;  %v1298_v50 = vpop.eup %1297 }
 0x156   : > { %v663_v51 = vadd.f32 1.0, %v1298_v50  ;;  %v1300_v52 = vpop.eup %1299 }
 0x157   : > { %v838_v53 = vadd.f32 1.0, %v1300_v52 }
 0x158   : > { %1301 = vrcp.f32 %v663_v51 }
 0x159   : > { %1303 = vrcp.f32 %v838_v53 }
 0x165   : > { %v1302_v54 = vpop.eup %1301 }
 0x166   : > { %v1304_v57 = vpop.eup %1303  ;;  %v671_v61 = vmul.f32 %v1302_v54, %v669_v60 }
 0x167   : > { %v846_v1 = vmul.f32 %v1304_v57, %v844_v0 }
 0x1be   : > { %v674_v55 = vpop.permute.xlu0 %673 }
 0x1bf   : > { %v676_v56 = vmul.f32 %v1302_v54, %v674_v55 }
 0x1c1   : > { %678 = vrot.lane.b32.xlu0 %v676_v56, %s1500_s26 }
 0x1c7   : > { %v849_v58 = vpop.permute.xlu0 %848 }
 0x1c8   : > { %v851_v59 = vmul.f32 %v1304_v57, %v849_v58 }
 0x1ca   : > { %853 = vrot.lane.b32.xlu1 %v851_v59, %s1500_s26 }
 0x233   : > { %v679_v62 = vpop.permute.xlu0 %678 }
 0x234   : > { %v681_v63 = vadd.f32 %v679_v62, %v671_v61 }
 0x236   : > { %1305 = vtanh.f32 %v681_v63 }
 0x23c   : > { %v854_v2 = vpop.permute.xlu1 %853 }
 0x23d   : > { %v856_v3 = vadd.f32 %v854_v2, %v846_v1 }
 0x23f   : > { %1307 = vtanh.f32 %v856_v3 }
 0x243   : > { %v1306_v4 = vpop.eup %1305 }
 0x244   : > { %684 = vrot.lane.b32.xlu0 %v1306_v4, %s1501_s22 }
 0x24c   : > { %v1308_v5 = vpop.eup %1307 }
 0x24d   : > { %859 = vrot.lane.b32.xlu1 %v1308_v5, %s1501_s22 }
 0x251   : > { %870 = vrot.lane.b32.xlu1 %v681_v63, %s1502_s18 }
 0x255   : > { %880 = vrot.lane.b32.xlu1 %v856_v3, %s1502_s18 }
 0x2b6   : > { %v685_v6 = vpop.permute.xlu0 %684 }
 0x2b7   : > { %v687_v7 = vmul.f32 %v1302_v54, %v685_v6 }
 0x2b9   : > { %864 = vrot.lane.b32.xlu0 %v687_v7, %s1500_s26 }
 0x2bf   : > { %v860_v8 = vpop.permute.xlu1 %859 }
 0x2c0   : > { %v862_v9 = vmul.f32 %v1304_v57, %v860_v8 }
 0x2c2   : > { %875 = vrot.lane.b32.xlu0 %v862_v9, %s1500_s26 }
 0x2c3   : > { %v871_v10 = vpop.permute.xlu1 %870 }
 0x2c4   : > { %873 = vst.msk [vmem:[#allocation3] sm:$0x3] %vm867_vm4, %v871_v10 }
 0x2c7   : > { %v881_v11 = vpop.permute.xlu1 %880 }
 0x2c8   : > { %883 = vst.msk [vmem:[#allocation5] sm:$0x3] %vm867_vm4, %v881_v11 }
 0x32b   : > { %v865_v12 = vpop.permute.xlu0 %864 }
 0x32c   : > { %868 = vst.msk [vmem:[#allocation2] sm:$0x3] %vm867_vm4, %v865_v12  ;;  %884 = vst.msk [vmem:[%s1699_s21] sm:$0x3] %vm867_vm4, %v865_v12 }
 0x32d   : > { %886 = vst.msk [vmem:[#allocation16] sm:$0x3] %vm867_vm4, %v865_v12 }
 0x332   : > { %906 = sbr.rel (%p1144_p2) target bundleno = 825 (0x339), region = 92 }
 0x334   : > { %v876_v13 = vpop.permute.xlu0 %875 }
 0x335   : > { %878 = vst.msk [vmem:[#allocation4] sm:$0x3] %vm867_vm4, %v876_v13  ;;  %885 = vst.msk [vmem:[%s1704_s24] sm:$0x3] %vm867_vm4, %v876_v13 }
 0x336   : > { %887 = vst.msk [vmem:[%s1751_s11] sm:$0x3] %vm867_vm4, %v876_v13 }
 0x337   : > { %v923_v14 = vld [vmem:[#allocation16] sm:$0x3] }
 0x338   : > { %1145 = vst [vmem:[%s1748_s8 + $0x8] sm:$0x3] %v923_v14 }
 0x339 PF: > { %s27_s16 = sadd.s32 1, %s1487_s16  }
 0x33a   : > { %p24_p3 = scmp.ge.s32.totalorder %s27_s16, 12  }
 0x33c   :  { %26 = sbr.rel (!%p24_p3) target bundleno = 4 (0x4), region = 177 }
 0x341   :  { %969 = vsyncpa [#allocation7], 1 }
 0x342   :  { %971 = vsyncpa [#allocation7 + $0x1], 1 }
 0x343   :  { %972 = vsyncpa [#allocation9], 1 }
 0x344   :  { %973 = vsyncpa [#allocation12], 1 }
 0x345   :  { %974 = vsyncpa [#allocation15], 1 }

// kernel: ginconvnet_forward.12
= control target key start
LH: loop header
LB: loop body
LE: loop exit
PB: predicated region body
PF: predicated region fallthrough
CT: control target
= control target key end

     0   :  { %s646_s9 = smov 0   ;;  %s696_s0 = inlined_call_operand.vmem [shape: f32[2,10,64], index: 0, kind: input, shape index: {}]   ;;  %s697_s1 = inlined_call_operand.vmem [shape: f32[2,64,3], index: 1, kind: input, shape index: {}]   ;;  %s698_s2 = inlined_call_operand.vmem [shape: f32[2,64,3], index: 2, kind: output, shape index: {}]  }
   0x1 LB: > { %s526_s10 = sadd.s32 4294967295, %s629_s9   ;;  %p530_p0 = scmp.ge.s32.totalorder %s629_s9, 1  ;;  %s629_s9 = sphi %s646_s9, %s12_s9  }
   0x2   : > { %p122_p1 = scmp.lt.s32.totalorder %s629_s9, 3 }
   0x4   : > { %p123_p2 = pnand %p530_p0, %p122_p1 }
   0x5   : > { %p149_p3 = scmp.lt.s32.totalorder (!%p123_p2), %s526_s10, 1 }
   0x6   : > { %126 = sbr.rel (%p123_p2) target bundleno = 503 (0x1f7), region = 28 }
   0xb   : > { %s700_s10 = smov (!%p149_p3, %s526_s10), 1  ;;  %vm174_vm0 = vcmask 523264   ;;  %vm317_vm1 = vcmask 80896   ;;  %vm258_vm2 = vcmask 17408   ;;  %vm256_vm3 = vcmask 23552  }
   0xc   : > { %s551_s11 = sshll.u32 %s700_s10, 6  ;;  %s550_s12 = sshll.u32 %s700_s10, 4  ;;  %vm342_vm4 = vcmask 1041408  }
   0xd   : > { %s158_s15 = scalar_lea.vmem %s697_s1, %s551_s11  ;;  %s153_s18 = scalar_lea.vmem %s696_s0, %s550_s12 }
   0xe   : > { %v173_v0 = vld [vmem:[%s158_s15 + $0x38] sm:$0xff]  ;;  %v172_v1 = vld [vmem:[%s158_s15 + $0x30] sm:$0xff]  ;;  %v171_v2 = vld [vmem:[%s158_s15 + $0x28] sm:$0xff]  ;;  %s163_s21 = scalar_lea.vmem %s698_s2, %s551_s11 }
   0xf   : > { %573 = vmatprep.subr.mxu0 %v173_v0  ;;  %v164_v3 = vld [vmem:[%s153_s18] sm:$0xff]  ;;  %v169_v5 = vld [vmem:[%s158_s15 + $0x18] sm:$0xff]  ;;  %v165_v6 = vld [vmem:[%s153_s18 + $0x8] sm:$0x3] }
  0x10   : > { %574 = vmatpush3.msra.mxu0 %v173_v0  ;;  %589 = vmatprep.mubr.msk.f32.mxu0 %vm174_vm0, %v164_v3  ;;  %v170_v4 = vld [vmem:[%s158_s15 + $0x20] sm:$0xff]  ;;  %v168_v7 = vld [vmem:[%s158_s15 + $0x10] sm:$0xff]  ;;  %v167_v8 = vld [vmem:[%s158_s15 + $0x8] sm:$0xff] }
  0x11   : > { %575 = vmatprep.subr.mxu0 %v172_v1  ;;  %285 = vxpose.xlu0.b32.start [1/2] (short) (narrow) %v164_v3, 64  ;;  %v166_v9 = vld [vmem:[%s158_s15] sm:$0xff] }
  0x12   : > { %576 = vmatpush3.msra.mxu0 %v172_v1 }
  0x13   : > { %577 = vmatprep.subr.mxu0 %v171_v2 }
  0x14   : > { %578 = vmatpush3.msra.mxu0 %v171_v2 }
  0x15   : > { %579 = vmatprep.subr.mxu0 %v170_v4  ;;  %286 = vxpose.xlu0.b32.end [2/2] (short) (narrow) %v165_v6, 64 }
  0x16   : > { %580 = vmatpush3.msra.mxu0 %v170_v4 }
  0x17   : > { %581 = vmatprep.subr.mxu0 %v169_v5 }
  0x18   : > { %582 = vmatpush3.msra.mxu0 %v169_v5 }
  0x19   : > { %583 = vmatprep.subr.mxu0 %v168_v7 }
  0x1a   : > { %584 = vmatpush3.msra.mxu0 %v168_v7 }
  0x1b   : > { %585 = vmatprep.subr.mxu0 %v167_v8 }
  0x1c   : > { %586 = vmatpush3.msra.mxu0 %v167_v8 }
  0x1d   : > { %587 = vmatprep.subr.mxu0 %v166_v9 }
  0x1e   : > { %588 = vmatpush3.msra.mxu0 %v166_v9 }
  0x1f   : > { %590 = vmatmul.mubr.msk.f32.vlgmr.msra.gmra.mxu0 %vm174_vm0, %v165_v6 }
  0x8d   : > { %v301_v10 = vpop.trf.xlu0 }
  0x8e   : > { %596 = vmatprep.mubr.msk.f32.mxu1 %vm317_vm1, %v301_v10 }
  0x91   : > { %v302_v34 = vpop.trf.xlu0 }
  0x95   : > { %v303_v38 = vpop.trf.xlu0 }
  0x99   : > { %v304_v39 = vpop.trf.xlu0 }
  0x9d   : > { %v305_v40 = vpop.trf.xlu0 }
  0xa1   : > { %v306_v44 = vpop.trf.xlu0 }
  0xa5   : > { %v307_v45 = vpop.trf.xlu0 }
  0xa9   : > { %v308_v46 = vpop.trf.xlu0 }
  0xdf   : > { %v591_v11 = vpop.f32.mrf.mxu0 }
  0xe0   : > { %v259_v13 = vsel %vm258_vm2, %v591_v11, -inf }
  0xe1   : > { %v247_v12 = vpop.f32.mrf.mxu0 }
  0xe2   : > { %v257_v14 = vsel %vm256_vm3, %v247_v12, -inf }
  0xe3   : > { %v260_v15 = vmax.f32 %v257_v14, %v259_v13 }
  0xe5   : > { %v261_v16 = vrot.slane %v260_v15, 4 }
  0xe7   : > { %v262_v17 = vmax.f32 %v260_v15, %v261_v16 }
  0xe9   : > { %v263_v18 = vrot.slane %v262_v17, 2 }
  0xeb   : > { %v264_v19 = vmax.f32 %v262_v17, %v263_v18 }
  0xed   : > { %v265_v20 = vrot.slane %v264_v19, 1 }
  0xef   : > { %v266_v21 = vmax.f32 %v264_v19, %v265_v20 }
  0xf1   : > { %v267_v22 = vsub.f32 %v247_v12, %v266_v21  ;;  %v268_v23 = vsub.f32 %v591_v11, %v266_v21 }
  0xf3   : > { %v269_v24 = vmul.f32 1.442695, %v267_v22  ;;  %v271_v25 = vmul.f32 1.442695, %v268_v23 }
  0xf5   : > { %617 = vpow2.f32 %v269_v24 }
  0xf6   : > { %619 = vpow2.f32 %v271_v25 }
 0x102   : > { %v618_v26 = vpop.eup %617 }
 0x103   : > { %v620_v27 = vpop.eup %619  ;;  %v273_v28 = vsel %vm256_vm3, %v618_v26, 0.0 }
 0x104   : > { %v274_v29 = vsel %vm258_vm2, %v620_v27, 0.0 }
 0x105   : > { %v275_v30 = vadd.f32 %v274_v29, %v273_v28 }
 0x107   : > { %v276_v31 = vrot.slane %v275_v30, 4 }
 0x109   : > { %v277_v32 = vadd.f32 %v276_v31, %v275_v30 }
 0x10b   : > { %v278_v33 = vrot.slane %v277_v32, 2 }
 0x10d   : > { %v279_v35 = vadd.f32 %v278_v33, %v277_v32 }
 0x10f   : > { %v280_v36 = vrot.slane %v279_v35, 1 }
 0x111   : > { %v281_v37 = vadd.f32 %v280_v36, %v279_v35 }
 0x113   : > { %621 = vrcp.f32 %v281_v37 }
 0x120   : > { %v622_v41 = vpop.eup %621 }
 0x121   : > { %v284_v42 = vmul.f32 %v622_v41, %v620_v27  ;;  %v283_v43 = vmul.f32 %v622_v41, %v618_v26 }
 0x123   : > { %592 = vmatprep.subr.msk.mxu1 %vm342_vm4, %v284_v42 }
 0x124   : > { %593 = vmatpush3.msk.msra.mxu1 %vm342_vm4, %v284_v42 }
 0x125   : > { %594 = vmatprep.subr.mxu1 %v283_v43 }
 0x126   : > { %595 = vmatpush3.msra.mxu1 %v283_v43 }
 0x127   : > { %597 = vmatmul.mubr.msk.f32.vlgmr.msra.gmra.mxu1 %vm317_vm1, %v302_v34 }
 0x128   : > { %599 = vmatprep.mubr.msk.f32.mxu1 %vm317_vm1, %v303_v38 }
 0x12b   : > { %600 = vmatmul.mubr.msk.f32.gmra.mxu1 %vm317_vm1, %v304_v39 }
 0x12c   : > { %602 = vmatprep.mubr.msk.f32.mxu1 %vm317_vm1, %v305_v40 }
 0x12f   : > { %603 = vmatmul.mubr.msk.f32.gmra.mxu1 %vm317_vm1, %v306_v44 }
 0x130   : > { %605 = vmatprep.mubr.msk.f32.mxu1 %vm317_vm1, %v307_v45 }
 0x133   : > { %606 = vmatmul.mubr.msk.f32.gmra.mxu1 %vm317_vm1, %v308_v46 }
 0x1e7   : > { %v598_v47 = vpop.f32.mrf.mxu1 }
 0x1e8   : > { %452 = vst.msk [vmem:[%s163_s21 + $0x8] sm:$0xff] %vm256_vm3, %v598_v47 }
 0x1e9   : > { %v412_v48 = vpop.f32.mrf.mxu1 }
 0x1ea   : > { %451 = vst.msk [vmem:[%s163_s21] sm:$0xff] %vm256_vm3, %v412_v48 }
 0x1eb   : > { %v601_v49 = vpop.f32.mrf.mxu1 }
 0x1ec   : > { %454 = vst.msk [vmem:[%s163_s21 + $0x18] sm:$0xff] %vm256_vm3, %v601_v49 }
 0x1ed   : > { %v422_v50 = vpop.f32.mrf.mxu1 }
 0x1ee   : > { %453 = vst.msk [vmem:[%s163_s21 + $0x10] sm:$0xff] %vm256_vm3, %v422_v50 }
 0x1ef   : > { %v604_v51 = vpop.f32.mrf.mxu1 }
 0x1f0   : > { %456 = vst.msk [vmem:[%s163_s21 + $0x28] sm:$0xff] %vm256_vm3, %v604_v51 }
 0x1f1   : > { %v432_v52 = vpop.f32.mrf.mxu1 }
 0x1f2   : > { %455 = vst.msk [vmem:[%s163_s21 + $0x20] sm:$0xff] %vm256_vm3, %v432_v52 }
 0x1f3   : > { %v607_v53 = vpop.f32.mrf.mxu1 }
 0x1f4   : > { %458 = vst.msk [vmem:[%s163_s21 + $0x38] sm:$0xff] %vm256_vm3, %v607_v53 }
 0x1f5   : > { %v442_v54 = vpop.f32.mrf.mxu1 }
 0x1f6   : > { %457 = vst.msk [vmem:[%s163_s21 + $0x30] sm:$0xff] %vm256_vm3, %v442_v54 }
 0x1f7 PF: > { %s12_s9 = sadd.s32 1, %s629_s9  }
 0x1f8   : > { %p9_p4 = scmp.ge.s32.totalorder %s12_s9, 4  }
 0x1fa   :  { %11 = sbr.rel (!%p9_p4) target bundleno = 1 (0x1), region = 61 }

// kernel: ginconvnet_forward.9
= control target key start
LH: loop header
LB: loop body
LE: loop exit
PB: predicated region body
PF: predicated region fallthrough
CT: control target
= control target key end

     0   :  { %17 = vsyncpa [#allocation5], 0  ;;  %s2783_s0 = inlined_call_operand.vmem [shape: f32[2,8,100], index: 0, kind: input, shape index: {}, may-alias: {0,1}]   ;;  %s2784_s1 = inlined_call_operand.vmem [shape: f32[2,8,100], index: 1, kind: input, shape index: {}, may-alias: {0,1}]   ;;  %s2785_s2 = inlined_call_operand.vmem [shape: bf16[100,300], index: 2, kind: input, shape index: {}]   ;;  %s2786_s3 = inlined_call_operand.vmem [shape: bf16[100,300], index: 3, kind: input, shape index: {}]   ;;  %s2787_s4 = inlined_call_operand.hbm [shape: f32[1,300], index: 4, kind: input, shape index: {}]   ;;  %s2788_s5 = inlined_call_operand.hbm [shape: f32[1,300], index: 5, kind: input, shape index: {}]   ;;  %s2789_s6 = inlined_call_operand.vmem [shape: bf16[100,300], index: 6, kind: input, shape index: {}]   ;;  %s2790_s7 = inlined_call_operand.vmem [shape: bf16[100,300], index: 7, kind: input, shape index: {}]   ;;  %s2791_s8 = inlined_call_operand.hbm [shape: f32[1,300], index: 8, kind: input, shape index: {}]   ;;  %s2792_s9 = inlined_call_operand.hbm [shape: f32[1,300], index: 9, kind: input, shape index: {}]   ;;  %s2793_s10 = inlined_call_operand.vmem [shape: f32[2,100], index: 10, kind: output, shape index: {0}]   ;;  %s2794_s11 = inlined_call_operand.vmem [shape: f32[2,100], index: 11, kind: output, shape index: {1}]  }
   0x1   :  { %18 = vsyncpa [#allocation7], 0 }
   0x2   :  { %19 = vsyncpa [#allocation10], 0  ;;  %s2300_s17 = smov 0  }
   0x3 LB: > { %s2306_s18 = sadd.s32 4294967295, %s2226_s17   ;;  %p1695_p0 = scmp.ge.s32.totalorder %s2226_s17, 1  ;;  %s2226_s17 = sphi %s2300_s17, %s25_s17  }
   0x4   : > { %p294_p1 = scmp.lt.s32.totalorder %s2226_s17, 3  ;;  %p2795_p3 = scmp.eq.s32.totalorder %s2306_s18, 0 }
   0x5   : > { %s2228_s19 = smov [#allocation6]   ;;  %s2229_s22 = smov [#allocation4]  }
   0x6   : > { %s324_s20 = sshll.u32 %s2228_s19, 4  ;;  %p2312_p4 = pnand %p1695_p0, %p294_p1  ;;  %s325_s20 = int_to_ptr.vmem [resolvable:$true] %s324_s20 }
   0x7   : > { %s313_s23 = sshll.u32 %s2229_s22, 4  ;;  %s2230_s24 = smov [#allocation8]   ;;  %s314_s23 = int_to_ptr.vmem [resolvable:$true] %s313_s23 }
   0x8   : > { %p1931_p5 = pneg %p2312_p4  ;;  %s341_s25 = sshll.u32 %s2230_s24, 4  ;;  %s2324_s25 = int_to_ptr.vmem [resolvable:$true] %s341_s25 }
   0x9   : > { %s2231_s27 = smov [#allocation9]   ;;  %s2115_s29 = scalar_lea.vmem %s325_s20, 48 }
   0xa   : > { %p2320_p6 = pnand %p2795_p3, %p1931_p5  ;;  %s352_s28 = sshll.u32 %s2231_s27, 4  ;;  %s2326_s28 = int_to_ptr.vmem [resolvable:$true] %s352_s28 }
   0xb   : > { %p2116_p8 = scmp.ne.s32.totalorder %s325_s20, %s2115_s29  ;;  %s2122_s30 = scalar_lea.vmem %s325_s20, 64 }
   0xc   : > { %p2106_p7 = pneg %p2320_p6  ;;  %p2123_p11 = scmp.lt.s32.totalorder %s325_s20, %s325_s20 }
   0xd   : > { %p2124_p12 = scmp.lt.s32.totalorder %s2122_s30, %s2115_s29 }
   0xe   : > { %p2118_p9 = pnand %p2116_p8, %p2106_p7 }
   0xf   : > { %p2125_p13 = por %p2124_p12, %p2123_p11 }
  0x10   : > { %p2119_p10 = pneg %p2118_p9 }
  0x12   : > { %p2126_p0 = pnand %p2125_p13, %p2119_p10 }
  0x14   : > { %2129 = shalt.err (!%p2126_p0)
}
  0x15   : > { %1937 = dma.hbm_to_vmem [thread:$0]  (!%p2320_p6), %s2788_s5, 48, %s325_s20, [#allocation7]  }
  0x16   : > { %s2141_s14 = scalar_lea.vmem %s314_s23, 48  ;;  %s2148_s15 = scalar_lea.vmem %s314_s23, 64 }
  0x17   : > { %p2142_p1 = scmp.ne.s32.totalorder %s314_s23, %s2141_s14  ;;  %p2149_p9 = scmp.lt.s32.totalorder %s314_s23, %s314_s23 }
  0x18   : > { %p2150_p2 = scmp.lt.s32.totalorder %s2148_s15, %s2141_s14 }
  0x19   : > { %p2144_p5 = pnand %p2142_p1, %p2106_p7 }
  0x1a   : > { %p2151_p3 = por %p2150_p2, %p2149_p9 }
  0x1b   : > { %p2145_p8 = pneg %p2144_p5 }
  0x1d   : > { %p2152_p11 = pnand %p2151_p3, %p2145_p8 }
  0x1f   : > { %2155 = shalt.err (!%p2152_p11)
}
  0x20   : > { %1934 = dma.hbm_to_vmem [thread:$0]  (!%p2320_p6), %s2787_s4, 48, %s314_s23, [#allocation5]  }
  0x21   : > { %s2167_s20 = scalar_lea.vmem %s2324_s25, 48  ;;  %s2174_s22 = scalar_lea.vmem %s2324_s25, 64 }
  0x22   : > { %p2168_p10 = scmp.ne.s32.totalorder %s2324_s25, %s2167_s20  ;;  %p2175_p2 = scmp.lt.s32.totalorder %s2324_s25, %s2324_s25 }
  0x23   : > { %p2176_p3 = scmp.lt.s32.totalorder %s2174_s22, %s2167_s20 }
  0x24   : > { %p2170_p12 = pnand %p2168_p10, %p2106_p7 }
  0x25   : > { %p2177_p0 = por %p2176_p3, %p2175_p2 }
  0x26   : > { %p2171_p13 = pneg %p2170_p12 }
  0x28   : > { %p2178_p1 = pnand %p2177_p0, %p2171_p13 }
  0x2a   : > { %2181 = shalt.err (!%p2178_p1)
}
  0x2b   : > { %1940 = dma.hbm_to_vmem [thread:$0]  (!%p2320_p6), %s2791_s8, 48, %s2324_s25, [#allocation7]  }
  0x2c   : > { %s2193_s23 = scalar_lea.vmem %s2326_s28, 48  ;;  %s2200_s29 = scalar_lea.vmem %s2326_s28, 64 }
  0x2d   : > { %p2194_p5 = scmp.ne.s32.totalorder %s2326_s28, %s2193_s23  ;;  %p2201_p11 = scmp.lt.s32.totalorder %s2326_s28, %s2326_s28 }
  0x2e   : > { %p2202_p10 = scmp.lt.s32.totalorder %s2200_s29, %s2193_s23 }
  0x2f   : > { %p2196_p8 = pnand %p2194_p5, %p2106_p7 }
  0x30   : > { %p2203_p12 = por %p2202_p10, %p2201_p11 }
  0x31   : > { %p2197_p9 = pneg %p2196_p8 }
  0x33   : > { %p2204_p13 = pnand %p2203_p12, %p2197_p9 }
  0x35   : > { %2207 = shalt.err (!%p2204_p13)
}
  0x36   : > { %1943 = dma.hbm_to_vmem [thread:$0]  (!%p2320_p6), %s2792_s9, 48, %s2326_s28, [#allocation10]  }
  0x37   : > { %381 = sbr.rel (%p2312_p4) target bundleno = 909 (0x38d), region = 60  ;;  %p2798_p7 = scmp.eq.s32.totalorder (!%p2312_p4), %s2306_s18, 0 }
  0x3c   : > { %2213 = dma.done.wait (%p2798_p7), [#allocation5], 48   ;;  %p2799_p2 = pmov %p2798_p7 }
  0x3e   : > { %2215 = vsyncadd (%p2799_p2), [#allocation5], 4294967248  ;;  %p2800_p3 = pmov %p2799_p2 }
  0x3f   : > { %p2801_p0 = pmov %p2799_p2 }
  0x40   : > { %2217 = dma.done.wait (%p2800_p3), [#allocation7], 96  }
  0x41   : > { %2219 = vsyncadd (%p2801_p0), [#allocation7], 4294967200  ;;  %p2802_p1 = pmov %p2801_p0 }
  0x42   : > { %p2803_p6 = pmov %p2801_p0 }
  0x43   : > { %2221 = dma.done.wait (%p2802_p1), [#allocation10], 48  }
  0x44   : > { %2223 = vsyncadd (%p2803_p6), [#allocation10], 4294967248  ;;  %p432_p4 = scmp.lt.s32.totalorder %s2306_s18, 1  ;;  %s2390_s21 = ssub.s32 1, %s2306_s18 }
  0x45   : > { %p437_p5 = scmp.lt.s32.totalorder %s2390_s21, 1  ;;  %p2804_p8 = scmp.ne.s32.totalorder %s2306_s18, 0 }
  0x46   : > { %s433_s25 = scalar_select %p432_p4, %s2306_s18, 1 }
  0x47   : > { %s438_s26 = scalar_select %p437_p5, %s2390_s21, 1 }
  0x48   : > { %s1706_s28 = sshll.u32 %s433_s25, 3  ;;  %446 = sbr.rel (%p2804_p8) target bundleno = 79 (0x4f), region = 80 }
  0x49   : > { %s2398_s15 = scalar_lea.vmem %s2783_s0, %s1706_s28  ;;  %s1707_s16 = sshll.u32 %s438_s26, 3 }
  0x4a   : > { %s2403_s22 = scalar_lea.vmem %s2784_s1, %s1707_s16 }
  0x4d   : > { %vm447_vm0 = vcmask 818176   ;;  %v2232_v0 = vmov 0.0  }
  0x4e   : > { %448 = vst.msk [vmem:[#allocation2] sm:$0xff] %vm447_vm0, %v2232_v0  ;;  %449 = vst.msk [vmem:[#allocation3] sm:$0xff] %vm447_vm0, %v2232_v0 }
  0x4f PF: > { %v475_v1 = vld [vmem:[%s2785_s2 + $0x90] sm:$0x33]  ;;  %vm631_vm1 = vcmask 1041408   ;;  %v2233_v3 = vmov 0.0   ;;  %v1975_v6 = vld [vmem:[%s2785_s2 + $0x7c] ss:$12 sps:$4 sm:$0xff]   ;;  %s1573_s27 = scalar_lea.vmem %s2793_s10, %s2306_s18  ;;  %s1603_s29 = scalar_lea.vmem %s2794_s11, %s2390_s21 }
  0x50   : > { %v1728_v2 = vcombine.high %v475_v1, %v475_v1  ;;  %1843 = vmatprep.subr.bf16.mxu1 %v2233_v3  ;;  %v1727_v4 = vcombine.low %v475_v1, %v475_v1  ;;  %v1974_v5 = vld [vmem:[%s2785_s2 + $0x98] ss:$0 sps:$4 sm:$0x33]   ;;  %v2234_v7 = vmov 0   ;;  %v1978_v11 = vld [vmem:[%s2785_s2 + $0x80] ss:$12 sps:$4 sm:$0xff]  }
  0x51   : > { %673 = vmatprep.mubr.bf16.mxu0 %v2234_v7  ;;  %v639_v9 = vsel %vm631_vm1, %v1974_v5, 0  ;;  %v1977_v10 = vld [vmem:[%s2785_s2 + $0x78] ss:$12 sps:$4 sm:$0xff]   ;;  %vm2235_vm2 = vmmov 0   ;;  %v1981_v13 = vld [vmem:[%s2785_s2 + $0x60] ss:$12 sps:$4 sm:$0xff]  }
  0x52   : > { %1730 = vmatprep.subr.msk.bf16.mxu0 %vm631_vm1, %v1728_v2  ;;  %v633_v8 = vsel %vm631_vm1, %v1727_v4, 0  ;;  %1844 = vmatpush3.bf16.msra.mxu1 %v639_v9  ;;  %v1979_v12 = vld [vmem:[%s2785_s2 + $0x64] ss:$12 sps:$4 sm:$0xff]   ;;  %v1982_v14 = vld [vmem:[%s2785_s2 + $0x68] ss:$12 sps:$4 sm:$0xff]   ;;  %vm627_vm3 = vcmask 818176  }
  0x53   : > { %644 = vmatpush1.bf16.msra.mxu0 %v633_v8  ;;  %1845 = vmatprep.subr.bf16.mxu1 %v2233_v3  ;;  %v1983_v15 = vld [vmem:[%s2785_s2 + $0x4c] ss:$12 sps:$4 sm:$0xff]   ;;  %v1985_v16 = vld [vmem:[%s2785_s2 + $0x48] ss:$12 sps:$4 sm:$0xff]   ;;  %v1986_v17 = vld [vmem:[%s2785_s2 + $0x50] ss:$12 sps:$4 sm:$0xff]  }
  0x54   : > { %645 = vmatprep.subr.bf16.mxu0 %v1975_v6  ;;  %1857 = vmatprep.mubr.msk.bf16.mxu1 %vm2235_vm2, %v2233_v3  ;;  %v1987_v18 = vld [vmem:[%s2785_s2 + $0x34] ss:$12 sps:$4 sm:$0xff]   ;;  %v1989_v19 = vld [vmem:[%s2785_s2 + $0x30] ss:$12 sps:$4 sm:$0xff]   ;;  %v1990_v20 = vld [vmem:[%s2785_s2 + $0x38] ss:$12 sps:$4 sm:$0xff]  }
  0x55   : > { %v1991_v21 = vld [vmem:[%s2785_s2 + $0x1c] ss:$12 sps:$4 sm:$0xff]   ;;  %v1993_v22 = vld [vmem:[%s2785_s2 + $0x18] ss:$12 sps:$4 sm:$0xff]   ;;  %v1994_v23 = vld [vmem:[%s2785_s2 + $0x20] ss:$12 sps:$4 sm:$0xff]  }
  0x56   : > { %1846 = vmatpush3.bf16.msra.mxu1 %v1978_v11  ;;  %v1995_v24 = vld [vmem:[%s2785_s2 + $0x4] ss:$12 sps:$4 sm:$0xff]   ;;  %v1997_v25 = vld [vmem:[%s2785_s2] ss:$12 sps:$4 sm:$0xff]   ;;  %v1998_v26 = vld [vmem:[%s2785_s2 + $0x8] ss:$12 sps:$4 sm:$0xff]  }
  0x57   : > { %646 = vmatpush1.bf16.msra.mxu0 %v1977_v10  ;;  %1847 = vmatprep.subr.bf16.mxu1 %v2233_v3  ;;  %v502_v27 = vld [vmem:[%s2789_s6 + $0x90] sm:$0x33]  ;;  %v450_v28 = vld [vmem:[%s2398_s15] sm:$0xff]  ;;  %v2001_v29 = vld [vmem:[%s2789_s6 + $0x98] ss:$0 sps:$4 sm:$0x33]  }
  0x58   : > { %647 = vmatprep.subr.bf16.mxu0 %v1979_v12  ;;  %v1752_v30 = vcombine.high %v502_v27, %v502_v27  ;;  %v1751_v31 = vcombine.low %v502_v27, %v502_v27  ;;  %v506_v32 = vpack.c.bf16 %v450_v28, %v450_v28  ;;  %v853_v34 = vsel %vm631_vm1, %v2001_v29, 0  ;;  %v2004_v35 = vld [vmem:[%s2789_s6 + $0x7c] ss:$12 sps:$4 sm:$0xff]   ;;  %v2002_v36 = vld [vmem:[%s2789_s6 + $0x78] ss:$12 sps:$4 sm:$0xff]   ;;  %s2236_s13 = smov 56  }
  0x59   : > { %v2005_v37 = vld [vmem:[%s2789_s6 + $0x80] ss:$12 sps:$4 sm:$0xff]   ;;  %v2008_v38 = vld [vmem:[%s2789_s6 + $0x64] ss:$12 sps:$4 sm:$0xff]   ;;  %v2009_v40 = vld [vmem:[%s2789_s6 + $0x68] ss:$12 sps:$4 sm:$0xff]  }
  0x5a   : > { %1848 = vmatpush3.bf16.msra.mxu1 %v1982_v14  ;;  %v847_v33 = vsel %vm631_vm1, %v1751_v31, 0  ;;  %v2006_v39 = vld [vmem:[%s2789_s6 + $0x60] ss:$12 sps:$4 sm:$0xff]   ;;  %v2010_v42 = vld [vmem:[%s2789_s6 + $0x48] ss:$12 sps:$4 sm:$0xff]   ;;  %vm956_vm4 = vcmask 457728  }
  0x5b   : > { %648 = vmatpush1.bf16.msra.mxu0 %v1981_v13  ;;  %1849 = vmatprep.subr.bf16.mxu1 %v2233_v3  ;;  %v2012_v41 = vld [vmem:[%s2789_s6 + $0x4c] ss:$12 sps:$4 sm:$0xff]   ;;  %v2013_v43 = vld [vmem:[%s2789_s6 + $0x50] ss:$12 sps:$4 sm:$0xff]   ;;  %v2016_v44 = vld [vmem:[%s2789_s6 + $0x34] ss:$12 sps:$4 sm:$0xff]  }
  0x5c   : > { %649 = vmatprep.subr.bf16.mxu0 %v1983_v15  ;;  %v2014_v45 = vld [vmem:[%s2789_s6 + $0x30] ss:$12 sps:$4 sm:$0xff]   ;;  %v2017_v46 = vld [vmem:[%s2789_s6 + $0x38] ss:$12 sps:$4 sm:$0xff]   ;;  %v2021_v49 = vld [vmem:[%s2789_s6 + $0x20] ss:$12 sps:$4 sm:$0xff]  }
  0x5d   : > { %v2020_v47 = vld [vmem:[%s2789_s6 + $0x1c] ss:$12 sps:$4 sm:$0xff]   ;;  %v2018_v48 = vld [vmem:[%s2789_s6 + $0x18] ss:$12 sps:$4 sm:$0xff]   ;;  %v1015_v51 = vld [vmem:[%s2786_s3 + $0x90] sm:$0x33] }
  0x5e   : > { %1850 = vmatpush3.bf16.msra.mxu1 %v1986_v17  ;;  %v2024_v50 = vld [vmem:[%s2789_s6 + $0x4] ss:$12 sps:$4 sm:$0xff]   ;;  %v2022_v52 = vld [vmem:[%s2789_s6] ss:$12 sps:$4 sm:$0xff]   ;;  %v2025_v53 = vld [vmem:[%s2789_s6 + $0x8] ss:$12 sps:$4 sm:$0xff]   ;;  %v1778_v55 = vcombine.high %v1015_v51, %v1015_v51  ;;  %v1777_v56 = vcombine.low %v1015_v51, %v1015_v51 }
  0x5f   : > { %650 = vmatpush1.bf16.msra.mxu0 %v1985_v16  ;;  %1851 = vmatprep.subr.bf16.mxu1 %v2233_v3  ;;  %v2558_v54 = vld [vmem:[#allocation2] sm:$0xff]  ;;  %v2028_v57 = vld [vmem:[%s2786_s3 + $0x98] ss:$0 sps:$4 sm:$0x33]   ;;  %v2031_v61 = vld [vmem:[%s2786_s3 + $0x7c] ss:$12 sps:$4 sm:$0xff]  }
  0x60   : > { %651 = vmatprep.subr.bf16.mxu0 %v1987_v18  ;;  %v722_v58 = vpack.c.bf16 %v2558_v54, %v2558_v54  ;;  %v1171_v59 = vsel %vm631_vm1, %v1777_v56, 0  ;;  %v1177_v60 = vsel %vm631_vm1, %v2028_v57, 0  ;;  %v2029_v62 = vld [vmem:[%s2786_s3 + $0x78] ss:$12 sps:$4 sm:$0xff]   ;;  %v2032_v63 = vld [vmem:[%s2786_s3 + $0x80] ss:$12 sps:$4 sm:$0xff]  }
  0x61   : > { %v2035_v0 = vld [vmem:[%s2786_s3 + $0x64] ss:$12 sps:$4 sm:$0xff]   ;;  %v2033_v1 = vld [vmem:[%s2786_s3 + $0x60] ss:$12 sps:$4 sm:$0xff]   ;;  %v2036_v2 = vld [vmem:[%s2786_s3 + $0x68] ss:$12 sps:$4 sm:$0xff]  }
  0x62   : > { %1852 = vmatpush3.bf16.msra.mxu1 %v1990_v20  ;;  %v2039_v4 = vld [vmem:[%s2786_s3 + $0x4c] ss:$12 sps:$4 sm:$0xff]   ;;  %v2037_v5 = vld [vmem:[%s2786_s3 + $0x48] ss:$12 sps:$4 sm:$0xff]   ;;  %v2040_v6 = vld [vmem:[%s2786_s3 + $0x50] ss:$12 sps:$4 sm:$0xff]  }
  0x63   : > { %652 = vmatpush1.bf16.msra.mxu0 %v1989_v19  ;;  %1853 = vmatprep.subr.bf16.mxu1 %v2233_v3  ;;  %v2043_v8 = vld [vmem:[%s2786_s3 + $0x34] ss:$12 sps:$4 sm:$0xff]   ;;  %v2041_v9 = vld [vmem:[%s2786_s3 + $0x30] ss:$12 sps:$4 sm:$0xff]   ;;  %v2044_v10 = vld [vmem:[%s2786_s3 + $0x38] ss:$12 sps:$4 sm:$0xff]  }
  0x64   : > { %653 = vmatprep.subr.bf16.mxu0 %v1991_v21  ;;  %v2047_v11 = vld [vmem:[%s2786_s3 + $0x1c] ss:$12 sps:$4 sm:$0xff]   ;;  %v2045_v12 = vld [vmem:[%s2786_s3 + $0x18] ss:$12 sps:$4 sm:$0xff]   ;;  %v2048_v13 = vld [vmem:[%s2786_s3 + $0x20] ss:$12 sps:$4 sm:$0xff]  }
  0x65   : > { %v2051_v14 = vld [vmem:[%s2786_s3 + $0x4] ss:$12 sps:$4 sm:$0xff]   ;;  %v2049_v16 = vld [vmem:[%s2786_s3] ss:$12 sps:$4 sm:$0xff]   ;;  %v2052_v17 = vld [vmem:[%s2786_s3 + $0x8] ss:$12 sps:$4 sm:$0xff]  }
  0x66   : > { %1854 = vmatpush3.bf16.msra.mxu1 %v1994_v23  ;;  %v1042_v15 = vld [vmem:[%s2790_s7 + $0x90] sm:$0x33]  ;;  %v990_v18 = vld [vmem:[%s2403_s22] sm:$0xff]  ;;  %v2055_v21 = vld [vmem:[%s2790_s7 + $0x98] ss:$0 sps:$4 sm:$0x33]  }
  0x67   : > { %654 = vmatpush1.bf16.msra.mxu0 %v1993_v22  ;;  %1855 = vmatprep.subr.bf16.mxu1 %v2233_v3  ;;  %v1802_v19 = vcombine.high %v1042_v15, %v1042_v15  ;;  %v1801_v20 = vcombine.low %v1042_v15, %v1042_v15  ;;  %v1046_v22 = vpack.c.bf16 %v990_v18, %v990_v18  ;;  %v2059_v27 = vld [vmem:[%s2790_s7 + $0x80] ss:$12 sps:$4 sm:$0xff]   ;;  %v2062_v28 = vld [vmem:[%s2790_s7 + $0x64] ss:$12 sps:$4 sm:$0xff]   ;;  %v2064_v31 = vld [vmem:[%s2790_s7 + $0x48] ss:$12 sps:$4 sm:$0xff]  }
  0x68   : > { %655 = vmatprep.subr.bf16.mxu0 %v1995_v24  ;;  %v1391_v24 = vsel %vm631_vm1, %v2055_v21, 0  ;;  %v2060_v29 = vld [vmem:[%s2790_s7 + $0x60] ss:$12 sps:$4 sm:$0xff]   ;;  %v1017_v18 = vld [vmem:[#allocation6] sm:$0x7]  ;;  %s2237_s14 = smov 72  }
  0x69   : > { %v1385_v23 = vsel %vm631_vm1, %v1801_v20, 0  ;;  %s2238_s16 = smov 28   ;;  %s2239_s19 = smov 100   ;;  %vm976_vm5 = vcmask 228352   ;;  %vm1546_vm6 = vcmask 1048352   ;;  %vm1554_vm7 = vcmask 588800  }
  0x6a   : > { %1856 = vmatpush3.bf16.msra.mxu1 %v1998_v26  ;;  %v2056_v26 = vld [vmem:[%s2790_s7 + $0x78] ss:$12 sps:$4 sm:$0xff]   ;;  %vm1574_vm8 = vcmask 811008  }
  0x6b   : > { %656 = vmatpush1.bf16.msra.mxu0 %v1997_v25  ;;  %1861 = vmatprep.subr.bf16.mxu1 %v2233_v3  ;;  %v2058_v25 = vld [vmem:[%s2790_s7 + $0x7c] ss:$12 sps:$4 sm:$0xff]  }
  0x6c   : > { %1754 = vmatprep.subr.msk.bf16.mxu0 %vm631_vm1, %v1752_v30  ;;  %v2063_v30 = vld [vmem:[%s2790_s7 + $0x68] ss:$12 sps:$4 sm:$0xff]  }
  0x6d   : > { %1858 = vmatmul.mubr.msk.bf16.vlgmr.msra.gmra.mxu1 %vm627_vm3, %v506_v32 }
  0x6e   : > { %1731 = vmatmul.mubr.msk.bf16.vlgmr.msra.gmra.mxu0 %vm627_vm3, %v506_v32  ;;  %1862 = vmatpush3.bf16.msra.mxu1 %v853_v34  ;;  %v2067_v32 = vld [vmem:[%s2790_s7 + $0x50] ss:$12 sps:$4 sm:$0xff]  }
  0x6f   : > { %858 = vmatpush1.bf16.msra.mxu0 %v847_v33  ;;  %1863 = vmatprep.subr.bf16.mxu1 %v2233_v3  ;;  %v2070_v33 = vld [vmem:[%s2790_s7 + $0x34] ss:$12 sps:$4 sm:$0xff]   ;;  %v2068_v34 = vld [vmem:[%s2790_s7 + $0x30] ss:$12 sps:$4 sm:$0xff]  }
  0x70   : > { %859 = vmatprep.subr.bf16.mxu0 %v2004_v35  ;;  %887 = vmatprep.mubr.bf16.mxu0 %v2234_v7  ;;  %v2071_v35 = vld [vmem:[%s2790_s7 + $0x38] ss:$12 sps:$4 sm:$0xff]  }
  0x71   : > { %1875 = vmatprep.mubr.msk.bf16.mxu1 %vm2235_vm2, %v2233_v3 }
  0x72   : > { %1864 = vmatpush3.bf16.msra.mxu1 %v2005_v37  ;;  %v2072_v37 = vld [vmem:[%s2790_s7 + $0x18] ss:$12 sps:$4 sm:$0xff]  }
  0x73   : > { %860 = vmatpush1.bf16.msra.mxu0 %v2002_v36  ;;  %1865 = vmatprep.subr.bf16.mxu1 %v2233_v3  ;;  %v2074_v36 = vld [vmem:[%s2790_s7 + $0x1c] ss:$12 sps:$4 sm:$0xff]  }
  0x74   : > { %861 = vmatprep.subr.bf16.mxu0 %v2008_v38  ;;  %v2075_v38 = vld [vmem:[%s2790_s7 + $0x20] ss:$12 sps:$4 sm:$0xff]  }
  0x76   : > { %1866 = vmatpush3.bf16.msra.mxu1 %v2009_v40  ;;  %v2076_v40 = vld [vmem:[%s2790_s7] ss:$12 sps:$4 sm:$0xff]  }
  0x77   : > { %862 = vmatpush1.bf16.msra.mxu0 %v2006_v39  ;;  %1867 = vmatprep.subr.bf16.mxu1 %v2233_v3  ;;  %v2078_v39 = vld [vmem:[%s2790_s7 + $0x4] ss:$12 sps:$4 sm:$0xff]  }
  0x78   : > { %863 = vmatprep.subr.bf16.mxu0 %v2012_v41  ;;  %v2079_v41 = vld [vmem:[%s2790_s7 + $0x8] ss:$12 sps:$4 sm:$0xff]  }
  0x7a   : > { %1868 = vmatpush3.bf16.msra.mxu1 %v2013_v43 }
  0x7b   : > { %864 = vmatpush1.bf16.msra.mxu0 %v2010_v42  ;;  %1869 = vmatprep.subr.bf16.mxu1 %v2233_v3  ;;  %v2710_v42 = vld [vmem:[#allocation3] sm:$0xff] }
  0x7c   : > { %865 = vmatprep.subr.bf16.mxu0 %v2016_v44  ;;  %v1260_v43 = vpack.c.bf16 %v2710_v42, %v2710_v42  ;;  %v508_v44 = vlaneseq }
  0x7e   : > { %1870 = vmatpush3.bf16.msra.mxu1 %v2017_v46 }
  0x7f   : > { %866 = vmatpush1.bf16.msra.mxu0 %v2014_v45  ;;  %1871 = vmatprep.subr.bf16.mxu1 %v2233_v3  ;;  %v509_v45 = vshrl.u32 %v508_v44, 7 }
  0x80   : > { %867 = vmatprep.subr.bf16.mxu0 %v2020_v47 }
  0x81   : > { %v2717_v46 = vsub.s32 2, %v509_v45  ;;  %v514_v47 = vsub.s32 1, %v509_v45 }
  0x82   : > { %1872 = vmatpush3.bf16.msra.mxu1 %v2021_v49 }
  0x83   : > { %868 = vmatpush1.bf16.msra.mxu0 %v2018_v48  ;;  %1873 = vmatprep.subr.bf16.mxu1 %v2233_v3  ;;  %v477_v48 = vld [vmem:[#allocation4] sm:$0x7]  ;;  %v1055_v20 = vrot.slane %v1017_v18, %v514_v47 }
  0x84   : > { %869 = vmatprep.subr.bf16.mxu0 %v2024_v50  ;;  %v519_v49 = vrot.slane %v477_v48, %v2717_v46  ;;  %v515_v50 = vrot.slane %v477_v48, %v514_v47 }
  0x86   : > { %1874 = vmatpush3.bf16.msra.mxu1 %v2025_v53 }
  0x87   : > { %870 = vmatpush1.bf16.msra.mxu0 %v2022_v52  ;;  %1879 = vmatprep.subr.bf16.mxu1 %v2233_v3 }
  0x88   : > { %1780 = vmatprep.subr.msk.bf16.mxu0 %vm631_vm1, %v1778_v55 }
  0x89   : > { %1876 = vmatmul.mubr.msk.bf16.vlgmr.msra.gmra.mxu1 %vm627_vm3, %v722_v58 }
  0x8a   : > { %1755 = vmatmul.mubr.msk.bf16.vlgmr.msra.gmra.mxu0 %vm627_vm3, %v722_v58  ;;  %1880 = vmatpush3.bf16.msra.mxu1 %v1177_v60 }
  0x8b   : > { %1182 = vmatpush1.bf16.msra.mxu0 %v1171_v59  ;;  %1881 = vmatprep.subr.bf16.mxu1 %v2233_v3 }
  0x8c   : > { %1183 = vmatprep.subr.bf16.mxu0 %v2031_v61  ;;  %1211 = vmatprep.mubr.bf16.mxu0 %v2234_v7  ;;  %v510_v61 = vsub.s32 0, %v509_v45 }
  0x8d   : > { %1893 = vmatprep.mubr.msk.bf16.mxu1 %vm2235_vm2, %v2233_v3 }
  0x8e   : > { %1882 = vmatpush3.bf16.msra.mxu1 %v2032_v63  ;;  %v511_v63 = vrot.slane %v477_v48, %v510_v61 }
  0x8f   : > { %1184 = vmatpush1.bf16.msra.mxu0 %v2029_v62  ;;  %1883 = vmatprep.subr.bf16.mxu1 %v2233_v3  ;;  %v504_v62 = vld [vmem:[#allocation8] sm:$0x7] }
  0x90   : > { %1185 = vmatprep.subr.bf16.mxu0 %v2035_v0  ;;  %v727_v0 = vrot.slane %v504_v62, %v510_v61 }
  0x92   : > { %1884 = vmatpush3.bf16.msra.mxu1 %v2036_v2 }
  0x93   : > { %1186 = vmatpush1.bf16.msra.mxu0 %v2033_v1  ;;  %1885 = vmatprep.subr.bf16.mxu1 %v2233_v3  ;;  %v731_v1 = vrot.slane %v504_v62, %v514_v47 }
  0x94   : > { %1187 = vmatprep.subr.bf16.mxu0 %v2039_v4 }
  0x96   : > { %1886 = vmatpush3.bf16.msra.mxu1 %v2040_v6 }
  0x97   : > { %1188 = vmatpush1.bf16.msra.mxu0 %v2037_v5  ;;  %1887 = vmatprep.subr.bf16.mxu1 %v2233_v3 }
  0x98   : > { %1189 = vmatprep.subr.bf16.mxu0 %v2043_v8  ;;  %v735_v8 = vrot.slane %v504_v62, %v2717_v46 }
  0x9a   : > { %1888 = vmatpush3.bf16.msra.mxu1 %v2044_v10 }
  0x9b   : > { %1190 = vmatpush1.bf16.msra.mxu0 %v2041_v9  ;;  %1889 = vmatprep.subr.bf16.mxu1 %v2233_v3 }
  0x9c   : > { %1191 = vmatprep.subr.bf16.mxu0 %v2047_v11 }
  0x9e   : > { %1890 = vmatpush3.bf16.msra.mxu1 %v2048_v13 }
  0x9f   : > { %1192 = vmatpush1.bf16.msra.mxu0 %v2045_v12  ;;  %1891 = vmatprep.subr.bf16.mxu1 %v2233_v3 }
  0xa0   : > { %1193 = vmatprep.subr.bf16.mxu0 %v2051_v14 }
  0xa2   : > { %1892 = vmatpush3.bf16.msra.mxu1 %v2052_v17 }
  0xa3   : > { %1194 = vmatpush1.bf16.msra.mxu0 %v2049_v16  ;;  %1897 = vmatprep.subr.bf16.mxu1 %v2233_v3 }
  0xa4   : > { %1804 = vmatprep.subr.msk.bf16.mxu0 %vm631_vm1, %v1802_v19  ;;  %v1059_v19 = vrot.slane %v1017_v18, %v2717_v46 }
  0xa5   : > { %1894 = vmatmul.mubr.msk.bf16.vlgmr.msra.gmra.mxu1 %vm627_vm3, %v1046_v22 }
  0xa6   : > { %1781 = vmatmul.mubr.msk.bf16.vlgmr.msra.gmra.mxu0 %vm627_vm3, %v1046_v22  ;;  %1898 = vmatpush3.bf16.msra.mxu1 %v1391_v24 }
  0xa7   : > { %1396 = vmatpush1.bf16.msra.mxu0 %v1385_v23  ;;  %1899 = vmatprep.subr.bf16.mxu1 %v2233_v3 }
  0xa8   : > { %1397 = vmatprep.subr.bf16.mxu0 %v2058_v25  ;;  %1425 = vmatprep.mubr.bf16.mxu0 %v2234_v7  ;;  %v2066_v7 = vld [vmem:[%s2790_s7 + $0x4c] ss:$12 sps:$4 sm:$0xff]  }
  0xa9   : > { %1911 = vmatprep.mubr.msk.bf16.mxu1 %vm2235_vm2, %v2233_v3 }
  0xaa   : > { %1900 = vmatpush3.bf16.msra.mxu1 %v2059_v27 }
  0xab   : > { %1398 = vmatpush1.bf16.msra.mxu0 %v2056_v26  ;;  %1901 = vmatprep.subr.bf16.mxu1 %v2233_v3 }
  0xac   : > { %1399 = vmatprep.subr.bf16.mxu0 %v2062_v28 }
  0xae   : > { %1902 = vmatpush3.bf16.msra.mxu1 %v2063_v30 }
  0xaf   : > { %1400 = vmatpush1.bf16.msra.mxu0 %v2060_v29  ;;  %1903 = vmatprep.subr.bf16.mxu1 %v2233_v3 }
  0xb0   : > { %1401 = vmatprep.subr.bf16.mxu0 %v2066_v7  ;;  %v1044_v7 = vld [vmem:[#allocation9] sm:$0x7] }
  0xb2   : > { %1904 = vmatpush3.bf16.msra.mxu1 %v2067_v32  ;;  %v1265_v32 = vrot.slane %v1044_v7, %v510_v61 }
  0xb3   : > { %1402 = vmatpush1.bf16.msra.mxu0 %v2064_v31  ;;  %1905 = vmatprep.subr.bf16.mxu1 %v2233_v3  ;;  %v1051_v31 = vrot.slane %v1017_v18, %v510_v61 }
  0xb4   : > { %1403 = vmatprep.subr.bf16.mxu0 %v2070_v33  ;;  %v1269_v33 = vrot.slane %v1044_v7, %v514_v47 }
  0xb6   : > { %1906 = vmatpush3.bf16.msra.mxu1 %v2071_v35 }
  0xb7   : > { %1404 = vmatpush1.bf16.msra.mxu0 %v2068_v34  ;;  %1907 = vmatprep.subr.bf16.mxu1 %v2233_v3 }
  0xb8   : > { %1405 = vmatprep.subr.bf16.mxu0 %v2074_v36 }
  0xba   : > { %1908 = vmatpush3.bf16.msra.mxu1 %v2075_v38  ;;  %v1273_v38 = vrot.slane %v1044_v7, %v2717_v46 }
  0xbb   : > { %1406 = vmatpush1.bf16.msra.mxu0 %v2072_v37  ;;  %1909 = vmatprep.subr.bf16.mxu1 %v2233_v3 }
  0xbc   : > { %1407 = vmatprep.subr.bf16.mxu0 %v2078_v39 }
  0xbe   : > { %1910 = vmatpush3.bf16.msra.mxu1 %v2079_v41 }
  0xbf   : > { %1408 = vmatpush1.bf16.msra.mxu0 %v2076_v40 }
  0xc1   : > { %1912 = vmatmul.mubr.msk.bf16.vlgmr.msra.gmra.mxu1 %vm627_vm3, %v1260_v43 }
  0xc2   : > { %1805 = vmatmul.mubr.msk.bf16.vlgmr.msra.gmra.mxu0 %vm627_vm3, %v1260_v43 }
 0x12d   : > { %v716_v3 = vpop.f32.mrf.mxu1 }
 0x12e   : > { %v675_v51 = vpop.f32.mrf.mxu0  ;;  %v2720_v52 = vadd.f32 %v716_v3, %v519_v49 }
 0x12f   : > { %v1859_v55 = vpop.f32.mrf.mxu1  ;;  %v676_v5 = vadd.f32 %v675_v51, %v511_v63 }
 0x130   : > { %v677_v53 = vpop.f32.mrf.mxu0 }
 0x131   : > { %v2722_v56 = vadd.f32 %v677_v53, %v515_v50  ;;  %v719_v58 = vpop.f32.mrf.mxu1 }
 0x132   : > { %v679_v57 = vpop.f32.mrf.mxu0 }
 0x133   : > { %v1860_v60 = vpop.f32.mrf.mxu1 }
 0x134   : > { %v680_v59 = vpop.f32.mrf.mxu0 }
 0x149   : > { %v930_v4 = vpop.f32.mrf.mxu1 }
 0x14a   : > { %v889_v2 = vpop.f32.mrf.mxu0  ;;  %v931_v15 = vadd.f32 %v930_v4, %v735_v8 }
 0x14b   : > { %v890_v6 = vadd.f32 %v889_v2, %v727_v0  ;;  %v1877_v10 = vpop.f32.mrf.mxu1 }
 0x14c   : > { %v891_v9 = vpop.f32.mrf.mxu0 }
 0x14d   : > { %v936_v11 = vadd.f32 %v890_v6, %v676_v5  ;;  %v2725_v12 = vadd.f32 %v891_v9, %v731_v1  ;;  %v933_v14 = vpop.f32.mrf.mxu1 }
 0x14e   : > { %v893_v13 = vpop.f32.mrf.mxu0 }
 0x14f   : > { %952 = vrot.lane.b32.xlu0 %v2725_v12, %s2236_s13  ;;  %v1878_v17 = vpop.f32.mrf.mxu1  ;;  %v1757_v47 = vmul.f32 -1.442695, %v936_v11 }
 0x150   : > { %v894_v16 = vpop.f32.mrf.mxu0 }
 0x151   : > { %2080 = vpow2.f32 %v1757_v47 }
 0x153   : > { %954 = vrot.lane.b32.xlu0 %v931_v15, %s2236_s13 }
 0x15e   : > { %v2081_v51 = vpop.eup %2080 }
 0x15f   : > { %v940_v3 = vadd.f32 1.0, %v2081_v51 }
 0x161   : > { %2082 = vrcp.f32 %v940_v3 }
 0x165   : > { %v1254_v22 = vpop.f32.mrf.mxu1 }
 0x166   : > { %v1213_v21 = vpop.f32.mrf.mxu0  ;;  %v2731_v23 = vadd.f32 %v1254_v22, %v1059_v19 }
 0x167   : > { %v1895_v25 = vpop.f32.mrf.mxu1  ;;  %v1214_v36 = vadd.f32 %v1213_v21, %v1051_v31 }
 0x168   : > { %v1215_v24 = vpop.f32.mrf.mxu0 }
 0x169   : > { %v2733_v26 = vadd.f32 %v1215_v24, %v1055_v20  ;;  %v1257_v28 = vpop.f32.mrf.mxu1 }
 0x16a   : > { %v1217_v27 = vpop.f32.mrf.mxu0 }
 0x16b   : > { %v1896_v30 = vpop.f32.mrf.mxu1 }
 0x16c   : > { %v1218_v29 = vpop.f32.mrf.mxu0 }
 0x16e   : > { %v2738_v55 = vpop.eup %2082 }
 0x181   : > { %v1468_v35 = vpop.f32.mrf.mxu1 }
 0x182   : > { %v1427_v34 = vpop.f32.mrf.mxu0  ;;  %v1469_v48 = vadd.f32 %v1468_v35, %v1273_v38 }
 0x183   : > { %v1428_v37 = vadd.f32 %v1427_v34, %v1265_v32  ;;  %v1913_v40 = vpop.f32.mrf.mxu1 }
 0x184   : > { %v1429_v39 = vpop.f32.mrf.mxu0 }
 0x185   : > { %v1474_v41 = vadd.f32 %v1428_v37, %v1214_v36  ;;  %v1430_v43 = vadd.f32 %v1429_v39, %v1269_v33  ;;  %v1471_v45 = vpop.f32.mrf.mxu1 }
 0x186   : > { %v1431_v44 = vpop.f32.mrf.mxu0 }
 0x187   : > { %1490 = vrot.lane.b32.xlu1 %v1430_v43, %s2236_s13  ;;  %v1914_v50 = vpop.f32.mrf.mxu1  ;;  %v1807_v59 = vmul.f32 -1.442695, %v1474_v41  ;;  %v1481_v16 = vadd.f32 %v1430_v43, %v2733_v26 }
 0x188   : > { %v1432_v49 = vpop.f32.mrf.mxu0 }
 0x189   : > { %2084 = vpow2.f32 %v1807_v59  ;;  %v1808_v18 = vmul.f32 -1.442695, %v1481_v16 }
 0x18b   : > { %1492 = vrot.lane.b32.xlu1 %v1469_v48, %s2236_s13 }
 0x196   : > { %v2085_v60 = vpop.eup %2084 }
 0x197   : > { %v1478_v61 = vadd.f32 1.0, %v2085_v60 }
 0x199   : > { %2086 = vrcp.f32 %v1478_v61 }
 0x1a6   : > { %v2087_v0 = vpop.eup %2086 }
 0x1a7   : > { %v1505_v29 = vsub.f32 1.0, %v2087_v0 }
 0x1c1   : > { %v953_v53 = vpop.permute.xlu0 %952 }
 0x1c5   : > { %v955_v46 = vpop.permute.xlu0 %954 }
 0x1c6   : > { %v957_v57 = vsel %vm956_vm4, %v953_v53, %v955_v46 }
 0x1c7   : > { %v959_v58 = vmul.f32 %v2738_v55, %v957_v57 }
 0x1c9   : > { %961 = vrot.lane.b32.xlu0 %v959_v58, %s2237_s14 }
 0x1f9   : > { %v1491_v62 = vpop.permute.xlu1 %1490 }
 0x1fd   : > { %v1493_v63 = vpop.permute.xlu1 %1492 }
 0x1fe   : > { %v1494_v1 = vsel %vm956_vm4, %v1491_v62, %v1493_v63 }
 0x1ff   : > { %v1496_v2 = vmul.f32 %v2087_v0, %v1494_v1 }
 0x201   : > { %1498 = vrot.lane.b32.xlu1 %v1496_v2, %s2237_s14 }
 0x23b   : > { %v962_v4 = vpop.permute.xlu0 %961 }
 0x23c   : > { %v964_v5 = vadd.f32 %v962_v4, %v2722_v56  ;;  %v965_v6 = vadd.f32 %v962_v4, %v2720_v52  ;;  %v943_v52 = vadd.f32 %v2725_v12, %v2722_v56  ;;  %v968_v12 = vsub.f32 1.0, %v2738_v55 }
 0x23e   : > { %2088 = vtanh.f32 %v964_v5  ;;  %v1758_v17 = vmul.f32 -1.442695, %v943_v52 }
 0x23f   : > { %2090 = vtanh.f32 %v965_v6 }
 0x24b   : > { %v2089_v8 = vpop.eup %2088 }
 0x24c   : > { %v2091_v9 = vpop.eup %2090  ;;  %972 = vrot.lane.b32.xlu0 %v2089_v8, %s2238_s16 }
 0x24d   : > { %974 = vrot.lane.b32.xlu1 %v2091_v9, %s2238_s16 }
 0x273   : > { %v1499_v10 = vpop.permute.xlu1 %1498 }
 0x274   : > { %v1501_v11 = vadd.f32 %v1499_v10, %v2733_v26  ;;  %v1502_v13 = vadd.f32 %v1499_v10, %v2731_v23 }
 0x276   : > { %2092 = vtanh.f32 %v1501_v11 }
 0x277   : > { %2094 = vtanh.f32 %v1502_v13 }
 0x278   : > { %2096 = vpow2.f32 %v1758_v17 }
 0x279   : > { %2098 = vpow2.f32 %v1808_v18 }
 0x283   : > { %v2093_v14 = vpop.eup %2092 }
 0x284   : > { %v2095_v15 = vpop.eup %2094  ;;  %1509 = vrot.lane.b32.xlu0 %v2093_v14, %s2238_s16 }
 0x285   : > { %1511 = vrot.lane.b32.xlu1 %v2095_v15, %s2238_s16  ;;  %v2097_v19 = vpop.eup %2096 }
 0x286   : > { %v2099_v20 = vpop.eup %2098  ;;  %v947_v21 = vadd.f32 1.0, %v2097_v19 }
 0x287   : > { %v1485_v22 = vadd.f32 1.0, %v2099_v20 }
 0x288   : > { %983 = vrot.lane.b32.xlu0 %v2558_v54, %s2239_s19  ;;  %2100 = vrcp.f32 %v947_v21 }
 0x289   : > { %1519 = vrot.lane.b32.xlu1 %v2710_v42, %s2239_s19  ;;  %2102 = vrcp.f32 %v1485_v22 }
 0x295   : > { %v2101_v54 = vpop.eup %2100 }
 0x296   : > { %v2103_v25 = vpop.eup %2102  ;;  %v969_v26 = vsub.f32 1.0, %v2101_v54 }
 0x297   : > { %v1506_v30 = vsub.f32 1.0, %v2103_v25 }
 0x2be   : > { %v973_v23 = vpop.permute.xlu0 %972 }
 0x2bf   : > { %v975_v24 = vpop.permute.xlu1 %974  ;;  %v980_v31 = vmul.f32 %v973_v23, %v968_v12 }
 0x2c0   : > { %v977_v56 = vsel %vm976_vm5, %v973_v23, %v975_v24 }
 0x2c1   : > { %v981_v32 = vmul.f32 %v977_v56, %v969_v26 }
 0x2f6   : > { %v1510_v42 = vpop.permute.xlu0 %1509 }
 0x2f7   : > { %v1512_v27 = vpop.permute.xlu1 %1511  ;;  %v1516_v36 = vmul.f32 %v1510_v42, %v1505_v29 }
 0x2f8   : > { %v1513_v28 = vsel %vm976_vm5, %v1510_v42, %v1512_v27 }
 0x2f9   : > { %v1517_v37 = vmul.f32 %v1513_v28, %v1506_v30 }
 0x2fa   : > { %v984_v7 = vpop.permute.xlu0 %983 }
 0x2fb   : > { %v1520_v33 = vpop.permute.xlu1 %1519  ;;  %v986_v34 = vmul.f32 %v2738_v55, %v984_v7  ;;  %v987_v35 = vmul.f32 %v2101_v54, %v984_v7 }
 0x2fc   : > { %v1522_v38 = vmul.f32 %v2087_v0, %v1520_v33  ;;  %v1523_v39 = vmul.f32 %v2103_v25, %v1520_v33 }
 0x2fd   : > { %v988_v40 = vadd.f32 %v986_v34, %v980_v31  ;;  %v989_v41 = vadd.f32 %v987_v35, %v981_v32 }
 0x2fe   : > { %v1524_v43 = vadd.f32 %v1522_v38, %v1516_v36  ;;  %v1525_v44 = vadd.f32 %v1523_v39, %v1517_v37 }
 0x2ff   : > { %v1544_v45 = vmax.f32 %v988_v40, 0.0  ;;  %v1545_v48 = vmax.f32 %v989_v41, 0.0  ;;  %1530 = vrot.lane.b32.xlu1 %v989_v41, %s2238_s16  ;;  %1528 = vrot.lane.b32.xlu0 %v988_v40, %s2238_s16 }
 0x300   : > { %v1576_v49 = vmax.f32 %v1524_v43, 0.0  ;;  %v1577_v50 = vmax.f32 %v1525_v44, 0.0 }
 0x301   : > { %v1547_v47 = vsel %vm1546_vm6, %v1544_v45, 0.0  ;;  %v1555_v51 = vsel %vm1554_vm7, %v1545_v48, 0.0 }
 0x302   : > { %v1578_v3 = vsel %vm1546_vm6, %v1576_v49, 0.0  ;;  %v1585_v53 = vsel %vm1554_vm7, %v1577_v50, 0.0  ;;  %v1548_v46 = vrot.slane %v1547_v47, 4  ;;  %v1556_v55 = vrot.slane %v1555_v51, 4 }
 0x303   : > { %v1579_v57 = vrot.slane %v1578_v3, 4  ;;  %v1586_v58 = vrot.slane %v1585_v53, 4 }
 0x304   : > { %v1557_v59 = vadd.f32 %v1556_v55, %v1555_v51  ;;  %v1549_v60 = vadd.f32 %v1548_v46, %v1547_v47 }
 0x305   : > { %v1587_v61 = vadd.f32 %v1586_v58, %v1585_v53  ;;  %v1580_v62 = vadd.f32 %v1579_v57, %v1578_v3 }
 0x306   : > { %v1558_v63 = vrot.slane %v1557_v59, 2  ;;  %v1550_v0 = vrot.slane %v1549_v60, 2 }
 0x307   : > { %v1588_v1 = vrot.slane %v1587_v61, 2  ;;  %v1581_v2 = vrot.slane %v1580_v62, 2 }
 0x308   : > { %v1559_v4 = vadd.f32 %v1558_v63, %v1557_v59  ;;  %v1551_v5 = vadd.f32 %v1550_v0, %v1549_v60 }
 0x309   : > { %v1589_v9 = vadd.f32 %v1588_v1, %v1587_v61  ;;  %v1582_v10 = vadd.f32 %v1581_v2, %v1580_v62 }
 0x30a   : > { %v1560_v6 = vrot.slane %v1559_v4, 1  ;;  %v1552_v8 = vrot.slane %v1551_v5, 1 }
 0x30b   : > { %v1590_v52 = vrot.slane %v1589_v9, 1  ;;  %v1583_v16 = vrot.slane %v1582_v10, 1 }
 0x30c   : > { %v1561_v11 = vadd.f32 %v1560_v6, %v1559_v4  ;;  %v1553_v13 = vadd.f32 %v1552_v8, %v1551_v5 }
 0x30d   : > { %v1591_v17 = vadd.f32 %v1590_v52, %v1589_v9  ;;  %v1584_v18 = vadd.f32 %v1583_v16, %v1582_v10 }
 0x30e   : > { %v1564_v14 = vmul.f32 0.125, %v1561_v11  ;;  %v1563_v15 = vmul.f32 0.125, %v1553_v13 }
 0x30f   : > { %v1593_v19 = vmul.f32 0.125, %v1591_v17  ;;  %v1592_v20 = vmul.f32 0.125, %v1584_v18 }
 0x310   : > { %1569 = vrot.lane.b32.xlu1 %v1564_v14, %s2238_s16  ;;  %1567 = vrot.lane.b32.xlu0 %v1563_v15, %s2238_s16 }
 0x314   : > { %1539 = vrot.lane.b32.xlu1 %v1525_v44, %s2238_s16  ;;  %1537 = vrot.lane.b32.xlu0 %v1524_v43, %s2238_s16 }
 0x318   : > { %1599 = vrot.lane.b32.xlu1 %v1593_v19, %s2238_s16  ;;  %1597 = vrot.lane.b32.xlu0 %v1592_v20, %s2238_s16 }
 0x371   : > { %v1531_v21 = vpop.permute.xlu1 %1530  ;;  %v1529_v22 = vpop.permute.xlu0 %1528 }
 0x372   : > { %v1532_v23 = vsel %vm976_vm5, %v1529_v22, %v1531_v21 }
 0x373   : > { %1534 = vst.msk [vmem:[#allocation2] sm:$0xff] %vm627_vm3, %v1532_v23 }
 0x382   : > { %v1570_v24 = vpop.permute.xlu1 %1569  ;;  %v1568_v54 = vpop.permute.xlu0 %1567 }
 0x383   : > { %v1571_v42 = vsel %vm976_vm5, %v1568_v54, %v1570_v24 }
 0x384   : > { %1575 = vst.msk [vmem:[%s1573_s27] sm:$0x1] %vm1574_vm8, %v1571_v42 }
 0x386   : > { %v1540_v25 = vpop.permute.xlu1 %1539  ;;  %v1538_v27 = vpop.permute.xlu0 %1537 }
 0x387   : > { %v1541_v56 = vsel %vm976_vm5, %v1538_v27, %v1540_v25 }
 0x388   : > { %1543 = vst.msk [vmem:[#allocation3] sm:$0xff] %vm627_vm3, %v1541_v56 }
 0x38a   : > { %v1600_v12 = vpop.permute.xlu1 %1599  ;;  %v1598_v26 = vpop.permute.xlu0 %1597 }
 0x38b   : > { %v1601_v28 = vsel %vm976_vm5, %v1598_v26, %v1600_v12 }
 0x38c   : > { %1604 = vst.msk [vmem:[%s1603_s29] sm:$0x1] %vm1574_vm8, %v1601_v28 }
 0x38d PF: > { %s25_s17 = sadd.s32 1, %s2226_s17  }
 0x38e   : > { %p22_p9 = scmp.ge.s32.totalorder %s25_s17, 4  }
 0x390   :  { %24 = sbr.rel (!%p22_p9) target bundleno = 3 (0x3), region = 120 }
 0x395   :  { %1622 = vsyncpa [#allocation5], 1 }
 0x396   :  { %1624 = vsyncpa [#allocation5 + $0x1], 1 }
 0x397   :  { %1625 = vsyncpa [#allocation7], 1 }
 0x398   :  { %1626 = vsyncpa [#allocation10], 1 }

// kernel: ginconvnet_forward.8
= control target key start
LH: loop header
LB: loop body
LE: loop exit
PB: predicated region body
PF: predicated region fallthrough
CT: control target
= control target key end

     0   :  { %s2511_s6 = smov 1   ;;  %s2512_s10 = smov 2   ;;  %s2909_s0 = inlined_call_operand.smem [shape: u32[36], index: -1, kind: input, shape index: {}] }
   0x1   :  { %s2583_s5 = sld [smem:[%s2909_s0]]   ;;  %s2513_s14 = smov 3  }
   0x2   :  { %s2588_s9 = sld [smem:[%s2909_s0 + %s2511_s6]]   ;;  %s2514_s18 = smov 4  }
   0x3   :  { %s2593_s13 = sld [smem:[%s2909_s0 + %s2512_s10]]   ;;  %s2515_s22 = smov 5  }
   0x4   :  { %s2598_s17 = sld [smem:[%s2909_s0 + %s2513_s14]]   ;;  %s2516_s26 = smov 6  }
   0x5   :  { %s2603_s21 = sld [smem:[%s2909_s0 + %s2514_s18]]   ;;  %s2517_s30 = smov 7  }
   0x6   :  { %s2608_s25 = sld [smem:[%s2909_s0 + %s2515_s22]]   ;;  %s2518_s4 = smov 8  }
   0x7   :  { %2917 = sst [smem:[#allocation53_spill]] %s2583_s5  ;;  %s2519_s10 = smov 9  }
   0x8   :  { %2918 = sst [smem:[#allocation54_spill]] %s2588_s9  ;;  %s2520_s15 = smov 10  }
   0x9   :  { %2919 = sst [smem:[#allocation55_spill]] %s2593_s13  ;;  %s2521_s20 = smov 11  }
   0xa   :  { %2920 = sst [smem:[#allocation56_spill]] %s2598_s17  ;;  %s2523_s1 = smov 13  }
   0xb   :  { %2921 = sst [smem:[#allocation57_spill]] %s2603_s21  ;;  %s2524_s7 = smov 14  }
   0xc   :  { %2922 = sst [smem:[#allocation58_spill]] %s2608_s25  ;;  %s2526_s22 = smov 16  }
   0xd   :  { %s2613_s29 = sld [smem:[%s2909_s0 + %s2516_s26]]   ;;  %s2522_s26 = smov 12  }
   0xe   :  { %s2618_s3 = sld [smem:[%s2909_s0 + %s2517_s30]]   ;;  %s2527_s28 = smov 17  }
   0xf   :  { %s2623_s8 = sld [smem:[%s2909_s0 + %s2518_s4]]  }
  0x10   :  { %s2628_s14 = sld [smem:[%s2909_s0 + %s2519_s10]]  }
  0x11   :  { %s2633_s19 = sld [smem:[%s2909_s0 + %s2520_s15]]   ;;  %s2525_s15 = smov 15  }
  0x12   :  { %s2638_s24 = sld [smem:[%s2909_s0 + %s2521_s20]]  }
  0x13   :  { %s2643_s30 = sld [smem:[%s2909_s0 + %s2522_s26]]  }
  0x14   :  { %s2648_s6 = sld [smem:[%s2909_s0 + %s2523_s1]]  }
  0x15   :  { %s2653_s12 = sld [smem:[%s2909_s0 + %s2524_s7]]   ;;  %s2528_s7 = smov 18  }
  0x16   :  { %2923 = sst [smem:[#allocation59_spill]] %s2628_s14 }
  0x17   :  { %s2658_s20 = sld [smem:[%s2909_s0 + %s2525_s15]]   ;;  %s2529_s15 = smov 19  }
  0x18   :  { %2924 = sst [smem:[#allocation60_spill]] %s2638_s24 }
  0x19   :  { %s2663_s27 = sld [smem:[%s2909_s0 + %s2526_s22]]   ;;  %s2530_s22 = smov 20  }
  0x1a   :  { %s2668_s4 = sld [smem:[%s2909_s0 + %s2527_s28]]   ;;  %s2531_s28 = smov 21  }
  0x1b   :  { %2925 = sst [smem:[#allocation61_spill]] %s2653_s12 }
  0x1c   :  { %s2673_s13 = sld [smem:[%s2909_s0 + %s2528_s7]]   ;;  %s2532_s7 = smov 22  }
  0x1d   :  { %2926 = sst [smem:[#allocation62_spill]] %s2658_s20 }
  0x1e   :  { %s2678_s20 = sld [smem:[%s2909_s0 + %s2529_s15]]   ;;  %s2533_s15 = smov 23  }
  0x1f   :  { %s2683_s24 = sld [smem:[%s2909_s0 + %s2530_s22]]   ;;  %s2534_s22 = smov 24  }
  0x20   :  { %2927 = sst [smem:[#allocation63_spill]] %s2668_s4 }
  0x21   :  { %s2688_s4 = sld [smem:[%s2909_s0 + %s2531_s28]]   ;;  %s2535_s28 = smov 25  }
  0x22   :  { %2928 = sst [smem:[#allocation64_spill]] %s2673_s13 }
  0x23   :  { %s2693_s14 = sld [smem:[%s2909_s0 + %s2532_s7]]   ;;  %s2536_s7 = smov 26  }
  0x24   :  { %s2698_s21 = sld [smem:[%s2909_s0 + %s2533_s15]]   ;;  %s2537_s15 = smov 27  }
  0x25   :  { %2929 = sst [smem:[#allocation65_spill]] %s2683_s24 }
  0x26   :  { %s2703_s25 = sld [smem:[%s2909_s0 + %s2534_s22]]   ;;  %s2538_s22 = smov 28  }
  0x27   :  { %s2708_s17 = sld [smem:[%s2909_s0 + %s2535_s28]]   ;;  %s2539_s28 = smov 29  }
  0x28   :  { %s2713_s9 = sld [smem:[%s2909_s0 + %s2536_s7]]   ;;  %s2540_s7 = smov 30  }
  0x29   :  { %2930 = sst [smem:[#allocation66_spill]] %s2693_s14 }
  0x2a   :  { %s2718_s5 = sld [smem:[%s2909_s0 + %s2537_s15]]   ;;  %s2541_s15 = smov 31  }
  0x2b   :  { %s2728_s14 = sld [smem:[%s2909_s0 + %s2539_s28]]   ;;  %s2543_s28 = smov 33  }
  0x2c   :  { %2931 = sst [smem:[#allocation67_spill]] %s2703_s25 }
  0x2d   :  { %s2723_s25 = sld [smem:[%s2909_s0 + %s2538_s22]]   ;;  %s2542_s22 = smov 32  }
  0x2e   :  { %2932 = sst [smem:[#allocation68_spill]] %s2713_s9 }
  0x2f   :  { %s2733_s9 = sld [smem:[%s2909_s0 + %s2540_s7]]   ;;  %s2544_s7 = smov 34  }
  0x30   :  { %s2738_s24 = sld [smem:[%s2909_s0 + %s2541_s15]]   ;;  %s2545_s15 = smov 35  }
  0x31   :  { %s2748_s13 = sld [smem:[%s2909_s0 + %s2543_s28]]  }
  0x32   :  { %s2758_s12 = sld [smem:[%s2909_s0 + %s2545_s15]]  }
  0x33   :  { %2933 = sst [smem:[#allocation69_spill]] %s2723_s25 }
  0x34   :  { %s2743_s25 = sld [smem:[%s2909_s0 + %s2542_s22]]  }
  0x35   :  { %2934 = sst [smem:[#allocation70_spill]] %s2733_s9 }
  0x36   :  { %s2753_s9 = sld [smem:[%s2909_s0 + %s2544_s7]]  }
  0x37   :  { %76 = vsyncpa [#allocation3], 0 }
  0x38   :  { %77 = vsyncpa [#allocation5], 0 }
  0x39   :  { %78 = vsyncpa [#allocation8], 0 }
  0x3a   :  { %79 = vsyncpa [#allocation11], 0 }
  0x3b   :  { %80 = vsyncpa [#allocation14], 0 }
  0x3c   :  { %81 = vsyncpa [#allocation17], 0 }
  0x3d   :  { %82 = vsyncpa [#allocation20], 0 }
  0x3e   :  { %83 = vsyncpa [#allocation23], 0 }
  0x3f   :  { %84 = vsyncpa [#allocation26], 0 }
  0x40   :  { %85 = vsyncpa [#allocation29], 0 }
  0x41   :  { %86 = vsyncpa [#allocation32], 0 }
  0x42   :  { %87 = vsyncpa [#allocation35], 0 }
  0x43   :  { %88 = vsyncpa [#allocation38], 0  ;;  %s2546_s22 = smov [#allocation4]   ;;  %s2547_s26 = smov [#allocation7]  }
  0x44   :  { %s117_s23 = sshll.u32 %s2546_s22, 4  ;;  %s139_s28 = sshll.u32 %s2547_s26, 4  ;;  %s118_s23 = int_to_ptr.vmem [resolvable:$true] %s117_s23  ;;  %s140_s28 = int_to_ptr.vmem [resolvable:$true] %s139_s28 }
  0x45   :  { %s1993_s0 = scalar_lea.vmem %s118_s23, 16  ;;  %s1997_s1 = scalar_lea.vmem %s118_s23, 32 }
  0x46   :  { %p1994_p0 = scmp.ne.s32.totalorder %s118_s23, %s1993_s0  ;;  %p1998_p1 = scmp.lt.s32.totalorder %s118_s23, %s118_s23 }
  0x47   :  { %p1999_p2 = scmp.lt.s32.totalorder %s1997_s1, %s1993_s0 }
  0x49   :  { %p2000_p3 = por %p1999_p2, %p1998_p1 }
  0x4b   :  { %p2001_p4 = pnand %p2000_p3, %p1994_p0 }
  0x4d   :  { %2004 = shalt.err (!%p2001_p4)
}
  0x4e   :  { %120 = dma.hbm_to_vmem [thread:$0]  %s2618_s3, 16, %s118_s23, [#allocation5]  }
  0x4f   :  { %s2013_s2 = scalar_lea.vmem %s140_s28, 16  ;;  %s2017_s7 = scalar_lea.vmem %s140_s28, 32 }
  0x50   :  { %p2014_p5 = scmp.ne.s32.totalorder %s140_s28, %s2013_s2  ;;  %p2018_p6 = scmp.lt.s32.totalorder %s140_s28, %s140_s28 }
  0x51   :  { %p2019_p7 = scmp.lt.s32.totalorder %s2017_s7, %s2013_s2 }
  0x53   :  { %p2020_p8 = por %p2019_p7, %p2018_p6 }
  0x55   :  { %p2021_p9 = pnand %p2020_p8, %p2014_p5 }
  0x57   :  { %2024 = shalt.err (!%p2021_p9)
}
  0x58   :  { %142 = dma.hbm_to_vmem [thread:$0]  %s2633_s19, 16, %s140_s28, [#allocation8]  }
  0x59   :  { %s2548_s10 = smov [#allocation10]   ;;  %s2549_s15 = smov [#allocation13]  }
  0x5a   :  { %s161_s11 = sshll.u32 %s2548_s10, 4  ;;  %s183_s16 = sshll.u32 %s2549_s15, 4  ;;  %s162_s11 = int_to_ptr.vmem [resolvable:$true] %s161_s11  ;;  %s184_s16 = int_to_ptr.vmem [resolvable:$true] %s183_s16 }
  0x5b   :  { %s2033_s18 = scalar_lea.vmem %s162_s11, 16  ;;  %s2037_s22 = scalar_lea.vmem %s162_s11, 32 }
  0x5c   :  { %p2034_p10 = scmp.ne.s32.totalorder %s162_s11, %s2033_s18  ;;  %p2038_p11 = scmp.lt.s32.totalorder %s162_s11, %s162_s11 }
  0x5d   :  { %p2039_p12 = scmp.lt.s32.totalorder %s2037_s22, %s2033_s18 }
  0x5f   :  { %p2040_p13 = por %p2039_p12, %p2038_p11 }
  0x61   :  { %p2041_p0 = pnand %p2040_p13, %p2034_p10 }
  0x63   :  { %2044 = shalt.err (!%p2041_p0)
}
  0x64   :  { %164 = dma.hbm_to_vmem [thread:$0]  %s2648_s6, 16, %s162_s11, [#allocation11]  }
  0x65   :  { %s2053_s3 = scalar_lea.vmem %s184_s16, 16  ;;  %s2057_s23 = scalar_lea.vmem %s184_s16, 32 }
  0x66   :  { %p2054_p1 = scmp.ne.s32.totalorder %s184_s16, %s2053_s3  ;;  %p2058_p2 = scmp.lt.s32.totalorder %s184_s16, %s184_s16 }
  0x67   :  { %p2059_p3 = scmp.lt.s32.totalorder %s2057_s23, %s2053_s3 }
  0x69   :  { %p2060_p4 = por %p2059_p3, %p2058_p2 }
  0x6b   :  { %p2061_p5 = pnand %p2060_p4, %p2054_p1 }
  0x6d   :  { %2064 = shalt.err (!%p2061_p5)
}
  0x6e   :  { %186 = dma.hbm_to_vmem [thread:$0]  %s2663_s27, 16, %s184_s16, [#allocation14]  }
  0x6f   :  { %s2550_s19 = smov [#allocation16]   ;;  %s2551_s28 = smov [#allocation19]  }
  0x70   :  { %s205_s26 = sshll.u32 %s2550_s19, 4  ;;  %s224_s0 = sshll.u32 %s2551_s28, 4  ;;  %s206_s26 = int_to_ptr.vmem [resolvable:$true] %s205_s26  ;;  %s225_s0 = int_to_ptr.vmem [resolvable:$true] %s224_s0 }
  0x71   :  { %s2073_s1 = scalar_lea.vmem %s206_s26, 16  ;;  %s2077_s2 = scalar_lea.vmem %s206_s26, 32 }
  0x72   :  { %p2074_p6 = scmp.ne.s32.totalorder %s206_s26, %s2073_s1  ;;  %p2078_p7 = scmp.lt.s32.totalorder %s206_s26, %s206_s26 }
  0x73   :  { %p2079_p8 = scmp.lt.s32.totalorder %s2077_s2, %s2073_s1 }
  0x75   :  { %p2080_p9 = por %p2079_p8, %p2078_p7 }
  0x77   :  { %p2081_p10 = pnand %p2080_p9, %p2074_p6 }
  0x79   :  { %2084 = shalt.err (!%p2081_p10)
}
  0x7a   :  { %208 = dma.hbm_to_vmem [thread:$0]  %s2678_s20, 16, %s206_s26, [#allocation17]  }
  0x7b   :  { %s2093_s6 = scalar_lea.vmem %s225_s0, 256  ;;  %p2098_p12 = scmp.lt.s32.totalorder %s225_s0, %s225_s0 }
  0x7c   :  { %p2094_p11 = scmp.ne.s32.totalorder %s225_s0, %s2093_s6  ;;  %p2099_p13 = scmp.lt.s32.totalorder %s2093_s6, %s2093_s6 }
  0x7e   :  { %p2100_p0 = por %p2099_p13, %p2098_p12 }
  0x80   :  { %p2101_p1 = pnand %p2100_p0, %p2094_p11 }
  0x82   :  { %2104 = shalt.err (!%p2101_p1)
}
  0x83   :  { %s2552_s27 = smov 64   ;;  %s2553_s7 = smov 4  }
  0x84   :  { %230 = dma.hbm_to_vmem [thread:$0]  %s2688_s4, 256, %s225_s0, [#allocation20], %s2552_s27, %s2552_s27, %s2553_s7  }
  0x85   :  { %s2554_s10 = smov [#allocation22]   ;;  %s2555_s15 = smov [#allocation25]  }
  0x86   :  { %s246_s11 = sshll.u32 %s2554_s10, 4  ;;  %s269_s16 = sshll.u32 %s2555_s15, 4  ;;  %s247_s11 = int_to_ptr.vmem [resolvable:$true] %s246_s11  ;;  %s270_s16 = int_to_ptr.vmem [resolvable:$true] %s269_s16 }
  0x87   :  { %s2113_s20 = scalar_lea.vmem %s247_s11, 256  ;;  %p2118_p3 = scmp.lt.s32.totalorder %s247_s11, %s247_s11 }
  0x88   :  { %p2114_p2 = scmp.ne.s32.totalorder %s247_s11, %s2113_s20  ;;  %p2119_p4 = scmp.lt.s32.totalorder %s2113_s20, %s2113_s20 }
  0x8a   :  { %p2120_p5 = por %p2119_p4, %p2118_p3 }
  0x8c   :  { %p2121_p6 = pnand %p2120_p5, %p2114_p2 }
  0x8e   :  { %2124 = shalt.err (!%p2121_p6)
}
  0x8f   :  { %252 = dma.hbm_to_vmem [thread:$0]  %s2698_s21, 256, %s247_s11, [#allocation23], %s2552_s27, %s2552_s27, %s2553_s7  }
  0x90   :  { %s2133_s18 = scalar_lea.vmem %s270_s16, 16  ;;  %s2137_s4 = scalar_lea.vmem %s270_s16, 32 }
  0x91   :  { %p2134_p7 = scmp.ne.s32.totalorder %s270_s16, %s2133_s18  ;;  %p2138_p8 = scmp.lt.s32.totalorder %s270_s16, %s270_s16 }
  0x92   :  { %p2139_p9 = scmp.lt.s32.totalorder %s2137_s4, %s2133_s18 }
  0x94   :  { %p2140_p10 = por %p2139_p9, %p2138_p8 }
  0x96   :  { %p2141_p11 = pnand %p2140_p10, %p2134_p7 }
  0x98   :  { %2144 = shalt.err (!%p2141_p11)
}
  0x99   :  { %272 = dma.hbm_to_vmem [thread:$0]  %s2708_s17, 16, %s270_s16, [#allocation26]  }
  0x9a   :  { %s2556_s22 = smov [#allocation28]   ;;  %s2557_s23 = smov [#allocation31]  }
  0x9b   :  { %s288_s3 = sshll.u32 %s2556_s22, 4  ;;  %s310_s19 = sshll.u32 %s2557_s23, 4  ;;  %s289_s3 = int_to_ptr.vmem [resolvable:$true] %s288_s3  ;;  %s311_s19 = int_to_ptr.vmem [resolvable:$true] %s310_s19 }
  0x9c   :  { %s2153_s26 = scalar_lea.vmem %s289_s3, 256  ;;  %p2158_p13 = scmp.lt.s32.totalorder %s289_s3, %s289_s3 }
  0x9d   :  { %p2154_p12 = scmp.ne.s32.totalorder %s289_s3, %s2153_s26  ;;  %p2159_p0 = scmp.lt.s32.totalorder %s2153_s26, %s2153_s26 }
  0x9f   :  { %p2160_p1 = por %p2159_p0, %p2158_p13 }
  0xa1   :  { %p2161_p2 = pnand %p2160_p1, %p2154_p12 }
  0xa3   :  { %2164 = shalt.err (!%p2161_p2)
}
  0xa4   :  { %294 = dma.hbm_to_vmem [thread:$0]  %s2718_s5, 256, %s289_s3, [#allocation29], %s2552_s27, %s2552_s27, %s2553_s7  }
  0xa5   :  { %s2173_s21 = scalar_lea.vmem %s311_s19, 256  ;;  %p2178_p4 = scmp.lt.s32.totalorder %s311_s19, %s311_s19 }
  0xa6   :  { %p2174_p3 = scmp.ne.s32.totalorder %s311_s19, %s2173_s21  ;;  %p2179_p5 = scmp.lt.s32.totalorder %s2173_s21, %s2173_s21 }
  0xa8   :  { %p2180_p6 = por %p2179_p5, %p2178_p4 }
  0xaa   :  { %p2181_p7 = pnand %p2180_p6, %p2174_p3 }
  0xac   :  { %2184 = shalt.err (!%p2181_p7)
}
  0xad   :  { %316 = dma.hbm_to_vmem [thread:$0]  %s2728_s14, 256, %s311_s19, [#allocation32], %s2552_s27, %s2552_s27, %s2553_s7  }
  0xae   :  { %s2558_s17 = smov [#allocation34]   ;;  %s2559_s0 = smov [#allocation37]  }
  0xaf   :  { %s333_s28 = sshll.u32 %s2558_s17, 4  ;;  %s352_s1 = sshll.u32 %s2559_s0, 4  ;;  %s334_s28 = int_to_ptr.vmem [resolvable:$true] %s333_s28  ;;  %s353_s1 = int_to_ptr.vmem [resolvable:$true] %s352_s1 }
  0xb0   :  { %s2193_s2 = scalar_lea.vmem %s334_s28, 16  ;;  %s2197_s5 = scalar_lea.vmem %s334_s28, 32 }
  0xb1   :  { %p2194_p8 = scmp.ne.s32.totalorder %s334_s28, %s2193_s2  ;;  %p2198_p9 = scmp.lt.s32.totalorder %s334_s28, %s334_s28 }
  0xb2   :  { %p2199_p10 = scmp.lt.s32.totalorder %s2197_s5, %s2193_s2 }
  0xb4   :  { %p2200_p11 = por %p2199_p10, %p2198_p9 }
  0xb6   :  { %p2201_p12 = pnand %p2200_p11, %p2194_p8 }
  0xb8   :  { %2204 = shalt.err (!%p2201_p12)
}
  0xb9   :  { %336 = dma.hbm_to_vmem [thread:$0]  %s2738_s24, 16, %s334_s28, [#allocation35]  }
  0xba   :  { %s2213_s6 = scalar_lea.vmem %s353_s1, 256  ;;  %p2218_p0 = scmp.lt.s32.totalorder %s353_s1, %s353_s1 }
  0xbb   :  { %p2214_p13 = scmp.ne.s32.totalorder %s353_s1, %s2213_s6  ;;  %p2219_p1 = scmp.lt.s32.totalorder %s2213_s6, %s2213_s6 }
  0xbd   :  { %p2220_p2 = por %p2219_p1, %p2218_p0 }
  0xbf   :  { %p2221_p3 = pnand %p2220_p2, %p2214_p13 }
  0xc1   :  { %2224 = shalt.err (!%p2221_p3)
}
  0xc2   :  { %358 = dma.hbm_to_vmem [thread:$0]  %s2748_s13, 256, %s353_s1, [#allocation38], %s2552_s27, %s2552_s27, %s2553_s7  }
  0xc3   :  { %s2560_s14 = smov [#allocation2]   ;;  %s2561_s11 = smov [#allocation6]  }
  0xc4   :  { %s107_s10 = sshll.u32 %s2560_s14, 4  ;;  %s127_s15 = sshll.u32 %s2561_s11, 4  ;;  %s108_s10 = int_to_ptr.vmem [resolvable:$true] %s107_s10  ;;  %s128_s15 = int_to_ptr.vmem [resolvable:$true] %s127_s15 }
  0xc5   :  { %s2233_s16 = scalar_lea.vmem %s108_s10, 16  ;;  %s2237_s24 = scalar_lea.vmem %s108_s10, 32 }
  0xc6   :  { %p2234_p4 = scmp.ne.s32.totalorder %s108_s10, %s2233_s16  ;;  %p2238_p5 = scmp.lt.s32.totalorder %s108_s10, %s108_s10 }
  0xc7   :  { %p2239_p6 = scmp.lt.s32.totalorder %s2237_s24, %s2233_s16 }
  0xc9   :  { %p2240_p7 = por %p2239_p6, %p2238_p5 }
  0xcb   :  { %p2241_p8 = pnand %p2240_p7, %p2234_p4 }
  0xcd   :  { %2244 = shalt.err (!%p2241_p8)
}
  0xce   :  { %110 = dma.hbm_to_vmem [thread:$0]  %s2613_s29, 16, %s108_s10, [#allocation3]  }
  0xcf   :  { %s2253_s20 = scalar_lea.vmem %s128_s15, 16  ;;  %s2257_s18 = scalar_lea.vmem %s128_s15, 32 }
  0xd0   :  { %p2254_p9 = scmp.ne.s32.totalorder %s128_s15, %s2253_s20  ;;  %p2258_p10 = scmp.lt.s32.totalorder %s128_s15, %s128_s15 }
  0xd1   :  { %p2259_p11 = scmp.lt.s32.totalorder %s2257_s18, %s2253_s20 }
  0xd3   :  { %p2260_p12 = por %p2259_p11, %p2258_p10 }
  0xd5   :  { %p2261_p13 = pnand %p2260_p12, %p2254_p9 }
  0xd7   :  { %2264 = shalt.err (!%p2261_p13)
}
  0xd8   :  { %130 = dma.hbm_to_vmem [thread:$0]  %s2623_s8, 16, %s128_s15, [#allocation5]  }
  0xd9   :  { %s2562_s13 = smov [#allocation9]   ;;  %s2563_s7 = smov [#allocation12]  }
  0xda   :  { %s151_s27 = sshll.u32 %s2562_s13, 4  ;;  %s171_s4 = sshll.u32 %s2563_s7, 4  ;;  %s152_s27 = int_to_ptr.vmem [resolvable:$true] %s151_s27  ;;  %s172_s4 = int_to_ptr.vmem [resolvable:$true] %s171_s4 }
  0xdb   :  { %s2273_s22 = scalar_lea.vmem %s152_s27, 16  ;;  %s2277_s3 = scalar_lea.vmem %s152_s27, 32 }
  0xdc   :  { %p2274_p0 = scmp.ne.s32.totalorder %s152_s27, %s2273_s22  ;;  %p2278_p1 = scmp.lt.s32.totalorder %s152_s27, %s152_s27 }
  0xdd   :  { %p2279_p2 = scmp.lt.s32.totalorder %s2277_s3, %s2273_s22 }
  0xdf   :  { %p2280_p3 = por %p2279_p2, %p2278_p1 }
  0xe1   :  { %p2281_p4 = pnand %p2280_p3, %p2274_p0 }
  0xe3   :  { %2284 = shalt.err (!%p2281_p4)
}
  0xe4   :  { %154 = dma.hbm_to_vmem [thread:$0]  %s2643_s30, 16, %s152_s27, [#allocation8]  }
  0xe5   :  { %s2293_s29 = scalar_lea.vmem %s172_s4, 16  ;;  %s2297_s23 = scalar_lea.vmem %s172_s4, 32 }
  0xe6   :  { %p2294_p5 = scmp.ne.s32.totalorder %s172_s4, %s2293_s29  ;;  %p2298_p6 = scmp.lt.s32.totalorder %s172_s4, %s172_s4 }
  0xe7   :  { %p2299_p7 = scmp.lt.s32.totalorder %s2297_s23, %s2293_s29 }
  0xe9   :  { %p2300_p8 = por %p2299_p7, %p2298_p6 }
  0xeb   :  { %p2301_p9 = pnand %p2300_p8, %p2294_p5 }
  0xed   :  { %2304 = shalt.err (!%p2301_p9)
}
  0xee   :  { %s2935_s8 = sld [smem:[#allocation61_spill]]  ;;  %s2564_s19 = smov [#allocation15]  }
  0xef   :  { %s195_s26 = sshll.u32 %s2564_s19, 4  ;;  %s2565_s21 = smov [#allocation18]   ;;  %s196_s26 = int_to_ptr.vmem [resolvable:$true] %s195_s26 }
  0xf0   :  { %s215_s17 = sshll.u32 %s2565_s21, 4  ;;  %s2313_s28 = scalar_lea.vmem %s196_s26, 16  ;;  %s216_s17 = int_to_ptr.vmem [resolvable:$true] %s215_s17 }
  0xf1   :  { %p2314_p10 = scmp.ne.s32.totalorder %s196_s26, %s2313_s28  ;;  %s2317_s0 = scalar_lea.vmem %s196_s26, 32 }
  0xf2   :  { %p2318_p11 = scmp.lt.s32.totalorder %s196_s26, %s196_s26  ;;  %p2319_p12 = scmp.lt.s32.totalorder %s2317_s0, %s2313_s28 }
  0xf4   :  { %174 = dma.hbm_to_vmem [thread:$0]  %s2935_s8, 16, %s172_s4, [#allocation11]  }
  0xf5   :  { %p2320_p13 = por %p2319_p12, %p2318_p11 }
  0xf7   :  { %p2321_p0 = pnand %p2320_p13, %p2314_p10 }
  0xf9   :  { %2324 = shalt.err (!%p2321_p0)
}
  0xfa   :  { %s2936_s30 = sld [smem:[#allocation64_spill]]  ;;  %s2333_s1 = scalar_lea.vmem %s216_s17, 16 }
  0xfb   :  { %p2334_p1 = scmp.ne.s32.totalorder %s216_s17, %s2333_s1  ;;  %s2337_s2 = scalar_lea.vmem %s216_s17, 32 }
  0xfc   :  { %p2338_p2 = scmp.lt.s32.totalorder %s216_s17, %s216_s17  ;;  %p2339_p3 = scmp.lt.s32.totalorder %s2337_s2, %s2333_s1 }
  0xfe   :  { %p2340_p4 = por %p2339_p3, %p2338_p2 }
 0x100   :  { %198 = dma.hbm_to_vmem [thread:$0]  %s2936_s30, 16, %s196_s26, [#allocation14]  }
 0x101   :  { %p2341_p5 = pnand %p2340_p4, %p2334_p1 }
 0x103   :  { %2344 = shalt.err (!%p2341_p5)
}
 0x104   :  { %s2937_s5 = sld [smem:[#allocation65_spill]]  ;;  %s2566_s6 = smov [#allocation21]  }
 0x105   :  { %s237_s14 = sshll.u32 %s2566_s6, 4  ;;  %s2567_s10 = smov [#allocation24]   ;;  %s238_s14 = int_to_ptr.vmem [resolvable:$true] %s237_s14 }
 0x106   :  { %s259_s11 = sshll.u32 %s2567_s10, 4  ;;  %s2353_s15 = scalar_lea.vmem %s238_s14, 16  ;;  %s260_s11 = int_to_ptr.vmem [resolvable:$true] %s259_s11 }
 0x107   :  { %p2354_p6 = scmp.ne.s32.totalorder %s238_s14, %s2353_s15  ;;  %s2357_s16 = scalar_lea.vmem %s238_s14, 32 }
 0x108   :  { %p2358_p7 = scmp.lt.s32.totalorder %s238_s14, %s238_s14  ;;  %p2359_p8 = scmp.lt.s32.totalorder %s2357_s16, %s2353_s15 }
 0x10a   :  { %218 = dma.hbm_to_vmem [thread:$0]  %s2937_s5, 16, %s216_s17, [#allocation17]  }
 0x10b   :  { %p2360_p9 = por %p2359_p8, %p2358_p7 }
 0x10d   :  { %p2361_p10 = pnand %p2360_p9, %p2354_p6 }
 0x10f   :  { %2364 = shalt.err (!%p2361_p10)
}
 0x110   :  { %s2938_s24 = sld [smem:[#allocation66_spill]]  ;;  %s2373_s20 = scalar_lea.vmem %s260_s11, 16 }
 0x111   :  { %p2374_p11 = scmp.ne.s32.totalorder %s260_s11, %s2373_s20  ;;  %s2377_s18 = scalar_lea.vmem %s260_s11, 32 }
 0x112   :  { %p2378_p12 = scmp.lt.s32.totalorder %s260_s11, %s260_s11  ;;  %p2379_p13 = scmp.lt.s32.totalorder %s2377_s18, %s2373_s20 }
 0x114   :  { %p2380_p0 = por %p2379_p13, %p2378_p12 }
 0x116   :  { %240 = dma.hbm_to_vmem [thread:$0]  %s2938_s24, 16, %s238_s14, [#allocation20]  }
 0x117   :  { %p2381_p1 = pnand %p2380_p0, %p2374_p11 }
 0x119   :  { %2384 = shalt.err (!%p2381_p1)
}
 0x11a   :  { %s2939_s13 = sld [smem:[#allocation67_spill]]  ;;  %s2568_s27 = smov [#allocation27]  }
 0x11b   :  { %s279_s7 = sshll.u32 %s2568_s27, 4  ;;  %s2569_s4 = smov [#allocation30]   ;;  %s280_s7 = int_to_ptr.vmem [resolvable:$true] %s279_s7 }
 0x11c   :  { %s301_s22 = sshll.u32 %s2569_s4, 4  ;;  %s2393_s3 = scalar_lea.vmem %s280_s7, 16  ;;  %s302_s22 = int_to_ptr.vmem [resolvable:$true] %s301_s22 }
 0x11d   :  { %p2394_p2 = scmp.ne.s32.totalorder %s280_s7, %s2393_s3  ;;  %s2397_s29 = scalar_lea.vmem %s280_s7, 32 }
 0x11e   :  { %p2398_p3 = scmp.lt.s32.totalorder %s280_s7, %s280_s7  ;;  %p2399_p4 = scmp.lt.s32.totalorder %s2397_s29, %s2393_s3 }
 0x120   :  { %262 = dma.hbm_to_vmem [thread:$0]  %s2939_s13, 16, %s260_s11, [#allocation23]  }
 0x121   :  { %p2400_p5 = por %p2399_p4, %p2398_p3 }
 0x123   :  { %p2401_p6 = pnand %p2400_p5, %p2394_p2 }
 0x125   :  { %2404 = shalt.err (!%p2401_p6)
}
 0x126   :  { %s2940_s23 = sld [smem:[#allocation68_spill]]  ;;  %s2413_s8 = scalar_lea.vmem %s302_s22, 16 }
 0x127   :  { %p2414_p7 = scmp.ne.s32.totalorder %s302_s22, %s2413_s8  ;;  %s2417_s19 = scalar_lea.vmem %s302_s22, 32 }
 0x128   :  { %p2418_p8 = scmp.lt.s32.totalorder %s302_s22, %s302_s22  ;;  %p2419_p9 = scmp.lt.s32.totalorder %s2417_s19, %s2413_s8 }
 0x12a   :  { %p2420_p10 = por %p2419_p9, %p2418_p8 }
 0x12c   :  { %282 = dma.hbm_to_vmem [thread:$0]  %s2940_s23, 16, %s280_s7, [#allocation26]  }
 0x12d   :  { %p2421_p11 = pnand %p2420_p10, %p2414_p7 }
 0x12f   :  { %2424 = shalt.err (!%p2421_p11)
}
 0x130   :  { %s2941_s26 = sld [smem:[#allocation69_spill]]  ;;  %s2570_s21 = smov [#allocation33]  }
 0x131   :  { %s323_s17 = sshll.u32 %s2570_s21, 4  ;;  %s2571_s28 = smov [#allocation36]   ;;  %s324_s17 = int_to_ptr.vmem [resolvable:$true] %s323_s17 }
 0x132   :  { %s343_s0 = sshll.u32 %s2571_s28, 4  ;;  %s2433_s30 = scalar_lea.vmem %s324_s17, 16  ;;  %s344_s0 = int_to_ptr.vmem [resolvable:$true] %s343_s0 }
 0x133   :  { %p2434_p12 = scmp.ne.s32.totalorder %s324_s17, %s2433_s30  ;;  %s2437_s1 = scalar_lea.vmem %s324_s17, 32 }
 0x134   :  { %p2438_p13 = scmp.lt.s32.totalorder %s324_s17, %s324_s17  ;;  %p2439_p0 = scmp.lt.s32.totalorder %s2437_s1, %s2433_s30 }
 0x136   :  { %304 = dma.hbm_to_vmem [thread:$0]  %s2941_s26, 16, %s302_s22, [#allocation29]  }
 0x137   :  { %p2440_p1 = por %p2439_p0, %p2438_p13 }
 0x139   :  { %p2441_p2 = pnand %p2440_p1, %p2434_p12 }
 0x13b   :  { %2444 = shalt.err (!%p2441_p2)
}
 0x13c   :  { %s2942_s2 = sld [smem:[#allocation70_spill]]  ;;  %s2453_s5 = scalar_lea.vmem %s344_s0, 16 }
 0x13d   :  { %p2454_p3 = scmp.ne.s32.totalorder %s344_s0, %s2453_s5  ;;  %s2457_s6 = scalar_lea.vmem %s344_s0, 32 }
 0x13e   :  { %p2458_p4 = scmp.lt.s32.totalorder %s344_s0, %s344_s0  ;;  %p2459_p5 = scmp.lt.s32.totalorder %s2457_s6, %s2453_s5 }
 0x140   :  { %p2460_p6 = por %p2459_p5, %p2458_p4 }
 0x142   :  { %326 = dma.hbm_to_vmem [thread:$0]  %s2942_s2, 16, %s324_s17, [#allocation32]  }
 0x143   :  { %p2461_p7 = pnand %p2460_p6, %p2454_p3 }
 0x145   :  { %2464 = shalt.err (!%p2461_p7)
}
 0x146   :  { %346 = dma.hbm_to_vmem [thread:$0]  %s2743_s25, 16, %s344_s0, [#allocation35]  }
 0x147   :  { %s2572_s14 = smov [#allocation39]  }
 0x148   :  { %s365_s10 = sshll.u32 %s2572_s14, 4  ;;  %s366_s10 = int_to_ptr.vmem [resolvable:$true] %s365_s10 }
 0x149   :  { %s2473_s11 = scalar_lea.vmem %s366_s10, 16  ;;  %s2477_s15 = scalar_lea.vmem %s366_s10, 32 }
 0x14a   :  { %p2474_p8 = scmp.ne.s32.totalorder %s366_s10, %s2473_s11  ;;  %p2478_p9 = scmp.lt.s32.totalorder %s366_s10, %s366_s10 }
 0x14b   :  { %p2479_p10 = scmp.lt.s32.totalorder %s2477_s15, %s2473_s11 }
 0x14d   :  { %p2480_p11 = por %p2479_p10, %p2478_p9 }
 0x14f   :  { %p2481_p12 = pnand %p2480_p11, %p2474_p8 }
 0x151   :  { %2484 = shalt.err (!%p2481_p12)
}
 0x152   :  { %368 = dma.hbm_to_vmem [thread:$0]  %s2753_s9, 16, %s366_s10, [#allocation38]  }
 0x153   :  { %2485 = dma.done.wait [#allocation3], 16  }
 0x154   :  { %2486 = vsyncadd [#allocation3], 4294967280 }
 0x155   :  { %2487 = dma.done.wait [#allocation5], 32  }
 0x156   :  { %2488 = vsyncadd [#allocation5], 4294967264 }
 0x157   :  { %2489 = dma.done.wait [#allocation8], 32  }
 0x158   :  { %2490 = vsyncadd [#allocation8], 4294967264 }
 0x159   :  { %2491 = dma.done.wait [#allocation11], 32  }
 0x15a   :  { %2492 = vsyncadd [#allocation11], 4294967264 }
 0x15b   :  { %2493 = dma.done.wait [#allocation14], 32  }
 0x15c   :  { %2494 = vsyncadd [#allocation14], 4294967264 }
 0x15d   :  { %2495 = dma.done.wait [#allocation17], 32  }
 0x15e   :  { %2496 = vsyncadd [#allocation17], 4294967264 }
 0x15f   :  { %2497 = dma.done.wait [#allocation20], 272  }
 0x160   :  { %2498 = vsyncadd [#allocation20], 4294967024 }
 0x161   :  { %2499 = dma.done.wait [#allocation23], 272  }
 0x162   :  { %2500 = vsyncadd [#allocation23], 4294967024 }
 0x163   :  { %2501 = dma.done.wait [#allocation26], 32  }
 0x164   :  { %2502 = vsyncadd [#allocation26], 4294967264 }
 0x165   :  { %2503 = dma.done.wait [#allocation29], 272  }
 0x166   :  { %2504 = vsyncadd [#allocation29], 4294967024 }
 0x167   :  { %2505 = dma.done.wait [#allocation32], 272  }
 0x168   :  { %2506 = vsyncadd [#allocation32], 4294967024 }
 0x169   :  { %2507 = dma.done.wait [#allocation35], 32  }
 0x16a   :  { %2508 = vsyncadd [#allocation35], 4294967264 }
 0x16b   :  { %2509 = dma.done.wait [#allocation38], 272  }
 0x16c   :  { %2510 = vsyncadd [#allocation38], 4294967024  ;;  %s2943_s9 = sld [smem:[#allocation53_spill]]  ;;  %v2573_v0 = vmov 0.0   ;;  %vm2574_vm0 = vmmov 0   ;;  %vm551_vm1 = vcmask 1046528  }
 0x16d   :  { %s2944_s25 = sld [smem:[#allocation54_spill]]  ;;  %1765 = vmatprep.subr.bf16.mxu1 %v2573_v0  ;;  %1767 = vmatprep.mubr.msk.bf16.mxu1 %vm2574_vm0, %v2573_v0  ;;  %vm455_vm2 = vcmask 130048   ;;  %vm547_vm3 = vcmask 637952   ;;  %vm622_vm4 = vcmask 261120   ;;  %v1662_v28 = vld [vmem:[#allocation2] ss:$0 sm:$0xff] }
 0x16e   :  { %s2945_s16 = sld [smem:[#allocation56_spill]]  ;;  %1785 = vmatprep.subr.bf16.mxu0 %v2573_v0  ;;  %1789 = vmatprep.mubr.msk.bf16.mxu0 %vm2574_vm0, %v2573_v0  ;;  %v1666_v33 = vld [vmem:[#allocation4] ss:$0 sm:$0xff]  ;;  %v1667_v39 = vld [vmem:[#allocation6] ss:$0 sm:$0xff] }
 0x16f   :  { %s2946_s24 = sld [smem:[#allocation58_spill]]  ;;  %v1669_v53 = vld [vmem:[#allocation7] ss:$0 sm:$0xff]  ;;  %v1673_v63 = vld [vmem:[#allocation9] ss:$0 sm:$0xff] }
 0x170   :  { %s2947_s20 = sld [smem:[#allocation57_spill]] }
 0x171   :  { %s2948_s18 = sld [smem:[#allocation59_spill]] }
 0x172   :  { %v447_v1 = vld [vmem:[%s2943_s9] sm:$0xff]  ;;  %v448_v2 = vld [vmem:[%s2943_s9 + $0x8] sm:$0xff]  ;;  %s2949_s13 = sld [smem:[#allocation60_spill]] }
 0x173   :  { %v449_v3 = vpack.c.bf16 %v448_v2, %v447_v1  ;;  %v2809_v4 = vld [vmem:[%s2944_s25] sm:$0xff]   ;;  %s2950_s27 = sld [smem:[#allocation62_spill]] }
 0x174   :  { %v1960_v5 = vld [vmem:[%s2945_s16 + $0x20] sm:$0x7f]   ;;  %v1961_v7 = vld [vmem:[%s2945_s16 + $0x18] sm:$0xff]   ;;  %v1962_v8 = vld [vmem:[%s2945_s16 + $0x10] sm:$0xff]   ;;  %s2951_s7 = sld [smem:[#allocation63_spill]] }
 0x175   :  { %1766 = vmatpush3.bf16.msra.mxu1 %v449_v3  ;;  %v553_v6 = vsel %vm551_vm1, %v1960_v5, 0  ;;  %v1963_v9 = vld [vmem:[%s2945_s16 + $0x8] sm:$0xff]   ;;  %v1964_v10 = vld [vmem:[%s2945_s16] sm:$0xff]   ;;  %s2952_s4 = sld [smem:[#allocation55_spill]] }
 0x176   :  { %1771 = vmatprep.subr.bf16.mxu1 %v2573_v0  ;;  %v1965_v16 = vld [vmem:[%s2946_s24 + $0x8] sm:$0xff]   ;;  %v1966_v17 = vld [vmem:[%s2946_s24] sm:$0xff]  }
 0x177   :  { %1786 = vmatpush3.bf16.msra.mxu0 %v1965_v16  ;;  %v1655_v18 = vld [vmem:[%s2947_s20] ss:$0 sm:$0xff]  ;;  %v1967_v44 = vld [vmem:[%s2948_s18 + $0x8] sm:$0xff]  }
 0x178   :  { %1768 = vmatmul.mubr.msk.bf16.vlgmr.msra.gmra.mxu1 %vm455_vm2, %v2809_v4  ;;  %1787 = vmatprep.subr.bf16.mxu0 %v2573_v0  ;;  %v1968_v45 = vld [vmem:[%s2948_s18] sm:$0xff]   ;;  %v1969_v51 = vld [vmem:[%s2949_s13 + $0x8] sm:$0xff]  }
 0x179   :  { %1772 = vmatpush3.bf16.msra.mxu1 %v553_v6  ;;  %1781 = vmatprep.mubr.msk.bf16.mxu1 %vm2574_vm0, %v2573_v0  ;;  %v1970_v52 = vld [vmem:[%s2949_s13] sm:$0xff]   ;;  %v1677_v6 = vld [vmem:[#allocation10] ss:$0 sm:$0xff] }
 0x17a   :  { %1773 = vmatprep.subr.bf16.mxu1 %v2573_v0 }
 0x17b   :  { %1788 = vmatpush3.bf16.msra.mxu0 %v1966_v17  ;;  %v1971_v17 = vld [vmem:[%s2950_s27 + $0x8] sm:$0xff]  }
 0x17c   :  { %1793 = vmatprep.subr.bf16.mxu0 %v2573_v0 }
 0x17d   :  { %1774 = vmatpush3.bf16.msra.mxu1 %v1961_v7 }
 0x17e   :  { %1775 = vmatprep.subr.bf16.mxu1 %v2573_v0 }
 0x181   :  { %1776 = vmatpush3.bf16.msra.mxu1 %v1962_v8 }
 0x182   :  { %1777 = vmatprep.subr.bf16.mxu1 %v2573_v0 }
 0x185   :  { %1778 = vmatpush3.bf16.msra.mxu1 %v1963_v9 }
 0x186   :  { %1779 = vmatprep.subr.bf16.mxu1 %v2573_v0 }
 0x189   :  { %1780 = vmatpush3.bf16.msra.mxu1 %v1964_v10 }
 0x18a   :  { %1807 = vmatprep.subr.bf16.mxu1 %v2573_v0 }
 0x238   :  { %v493_v11 = vpop.f32.mrf.mxu1 }
 0x23a   :  { %v1769_v12 = vpop.f32.mrf.mxu1 }
 0x23b   :  { %v1678_v12 = vld [vmem:[#allocation12] ss:$0 sm:$0xff] }
 0x23c   :  { %v496_v13 = vpop.f32.mrf.mxu1 }
 0x23d   :  { %v500_v14 = vpack.c.bf16 %v496_v13, %v493_v11 }
 0x23e   :  { %v1770_v15 = vpop.f32.mrf.mxu1 }
 0x23f   :  { %1782 = vmatmul.mubr.msk.bf16.vlgmr.msra.gmra.mxu1 %vm547_vm3, %v500_v14 }
 0x240   :  { %1811 = vmatprep.mubr.msk.bf16.mxu1 %vm2574_vm0, %v2573_v0  ;;  %1808 = vmatpush3.bf16.msra.mxu1 %v1969_v51 }
 0x241   :  { %1809 = vmatprep.subr.bf16.mxu1 %v2573_v0 }
 0x244   :  { %1810 = vmatpush3.bf16.msra.mxu1 %v1970_v52  ;;  %v1975_v52 = vld [vmem:[#allocation19 + $0x8] sm:$0xff]  }
 0x245   :  { %1821 = vmatprep.subr.bf16.mxu1 %v2573_v0 }
 0x2ff   :  { %v589_v19 = vpop.f32.mrf.mxu1 }
 0x300   :  { %v590_v21 = vadd.f32 %v1655_v18, %v589_v19 }
 0x301   :  { %v1783_v20 = vpop.f32.mrf.mxu1 }
 0x302   :  { %v596_v25 = vmax.f32 %v590_v21, 0.0 }
 0x303   :  { %v592_v22 = vpop.f32.mrf.mxu1 }
 0x304   :  { %v593_v23 = vadd.f32 %v1655_v18, %v592_v22  ;;  %v1972_v18 = vld [vmem:[%s2950_s27] sm:$0xff]  }
 0x305   :  { %v1784_v24 = vpop.f32.mrf.mxu1 }
 0x306   :  { %v597_v26 = vmax.f32 %v593_v23, 0.0  ;;  %v1973_v24 = vld [vmem:[%s2951_s7 + $0x8] sm:$0xff]  }
 0x308   :  { %v598_v27 = vpack.c.bf16 %v597_v26, %v596_v25  ;;  %v1974_v25 = vld [vmem:[%s2951_s7] sm:$0xff]   ;;  %v1680_v26 = vld [vmem:[#allocation13] ss:$0 sm:$0xff] }
 0x30a   :  { %1790 = vmatmul.mubr.msk.bf16.vlgmr.msra.gmra.mxu0 %vm622_vm4, %v598_v27 }
 0x30b   :  { %1795 = vmatprep.mubr.msk.bf16.mxu0 %vm2574_vm0, %v2573_v0 }
 0x3ca   :  { %v660_v29 = vpop.f32.mrf.mxu0 }
 0x3cb   :  { %v661_v30 = vadd.f32 %v1662_v28, %v660_v29 }
 0x3cc   :  { %v1791_v31 = vpop.f32.mrf.mxu0 }
 0x3cd   :  { %v667_v32 = vmax.f32 %v661_v30, 0.0 }
 0x3ce   :  { %v663_v34 = vpop.f32.mrf.mxu0 }
 0x3cf   :  { %v664_v35 = vadd.f32 %v1662_v28, %v663_v34  ;;  %v676_v37 = vmul.f32 %v1666_v33, %v667_v32 }
 0x3d0   :  { %v1792_v36 = vpop.f32.mrf.mxu0 }
 0x3d1   :  { %v668_v38 = vmax.f32 %v664_v35, 0.0  ;;  %v685_v41 = vadd.f32 %v1667_v39, %v676_v37  ;;  %v1684_v36 = vld [vmem:[#allocation15] ss:$0 sm:$0xff] }
 0x3d3   :  { %v677_v40 = vmul.f32 %v1666_v33, %v668_v38 }
 0x3d5   :  { %v686_v42 = vadd.f32 %v1667_v39, %v677_v40 }
 0x3d7   :  { %v687_v43 = vpack.c.bf16 %v686_v42, %v685_v41  ;;  %v1688_v41 = vld [vmem:[#allocation16] ss:$0 sm:$0xff] }
 0x3d9   :  { %1794 = vmatpush3.bf16.msra.mxu0 %v687_v43 }
 0x3da   :  { %1799 = vmatprep.subr.bf16.mxu0 %v2573_v0 }
 0x3dc   :  { %1796 = vmatmul.mubr.msk.bf16.vlgmr.msra.gmra.mxu0 %vm455_vm2, %v2809_v4 }
 0x3dd   :  { %1803 = vmatprep.mubr.msk.bf16.mxu0 %vm2574_vm0, %v2573_v0  ;;  %1800 = vmatpush3.bf16.msra.mxu0 %v1967_v44 }
 0x3de   :  { %1801 = vmatprep.subr.bf16.mxu0 %v2573_v0 }
 0x3e1   :  { %1802 = vmatpush3.bf16.msra.mxu0 %v1968_v45 }
 0x3e2   :  { %1815 = vmatprep.subr.bf16.mxu0 %v2573_v0 }
 0x49c   :  { %v722_v46 = vpop.f32.mrf.mxu0 }
 0x49e   :  { %v1797_v47 = vpop.f32.mrf.mxu0 }
 0x49f   :  { %v1689_v47 = vld [vmem:[#allocation18] ss:$0 sm:$0xff] }
 0x4a0   :  { %v725_v48 = vpop.f32.mrf.mxu0 }
 0x4a1   :  { %v729_v49 = vpack.c.bf16 %v725_v48, %v722_v46 }
 0x4a2   :  { %v1798_v50 = vpop.f32.mrf.mxu0 }
 0x4a3   :  { %1804 = vmatmul.mubr.msk.bf16.vlgmr.msra.gmra.mxu0 %vm622_vm4, %v729_v49 }
 0x4a4   :  { %1817 = vmatprep.mubr.msk.bf16.mxu0 %vm2574_vm0, %v2573_v0 }
 0x563   :  { %v790_v54 = vpop.f32.mrf.mxu0 }
 0x564   :  { %v791_v56 = vadd.f32 %v1669_v53, %v790_v54 }
 0x565   :  { %v1805_v55 = vpop.f32.mrf.mxu0 }
 0x566   :  { %v797_v60 = vmax.f32 %v791_v56, 0.0 }
 0x567   :  { %v793_v57 = vpop.f32.mrf.mxu0 }
 0x568   :  { %v794_v58 = vadd.f32 %v1669_v53, %v793_v57  ;;  %v1976_v53 = vld [vmem:[#allocation19] sm:$0xff]  }
 0x569   :  { %v1806_v59 = vpop.f32.mrf.mxu0 }
 0x56a   :  { %v798_v61 = vmax.f32 %v794_v58, 0.0  ;;  %v1977_v59 = vld [vmem:[#allocation22 + $0x8] sm:$0xff]  }
 0x56c   :  { %v799_v62 = vpack.c.bf16 %v798_v61, %v797_v60  ;;  %v1978_v60 = vld [vmem:[#allocation22] sm:$0xff]   ;;  %v1691_v61 = vld [vmem:[#allocation21] ss:$0 sm:$0xff] }
 0x56e   :  { %1812 = vmatmul.mubr.msk.bf16.vlgmr.msra.gmra.mxu1 %vm622_vm4, %v799_v62 }
 0x56f   :  { %1825 = vmatprep.mubr.msk.bf16.mxu1 %vm2574_vm0, %v2573_v0  ;;  %1822 = vmatpush3.bf16.msra.mxu1 %v1971_v17 }
 0x570   :  { %1823 = vmatprep.subr.bf16.mxu1 %v2573_v0 }
 0x573   :  { %1824 = vmatpush3.bf16.msra.mxu1 %v1972_v18 }
 0x574   :  { %1837 = vmatprep.subr.bf16.mxu1 %v2573_v0 }
 0x62e   :  { %v860_v1 = vpop.f32.mrf.mxu1 }
 0x62f   :  { %v861_v2 = vadd.f32 %v1673_v63, %v860_v1 }
 0x630   :  { %v1813_v3 = vpop.f32.mrf.mxu1 }
 0x631   :  { %v867_v5 = vmax.f32 %v861_v2, 0.0 }
 0x632   :  { %v863_v7 = vpop.f32.mrf.mxu1 }
 0x633   :  { %v864_v8 = vadd.f32 %v1673_v63, %v863_v7  ;;  %v876_v10 = vmul.f32 %v1677_v6, %v867_v5 }
 0x634   :  { %v1814_v9 = vpop.f32.mrf.mxu1 }
 0x635   :  { %v868_v11 = vmax.f32 %v864_v8, 0.0  ;;  %v885_v14 = vadd.f32 %v1678_v12, %v876_v10  ;;  %v1695_v9 = vld [vmem:[#allocation24] ss:$0 sm:$0xff] }
 0x637   :  { %v877_v13 = vmul.f32 %v1677_v6, %v868_v11 }
 0x639   :  { %v886_v15 = vadd.f32 %v1678_v12, %v877_v13 }
 0x63b   :  { %v887_v16 = vpack.c.bf16 %v886_v15, %v885_v14  ;;  %v1699_v14 = vld [vmem:[#allocation25] ss:$0 sm:$0xff] }
 0x63d   :  { %1816 = vmatpush3.bf16.msra.mxu0 %v887_v16 }
 0x63e   :  { %1829 = vmatprep.subr.bf16.mxu0 %v2573_v0 }
 0x640   :  { %1818 = vmatmul.mubr.msk.bf16.vlgmr.msra.gmra.mxu0 %vm455_vm2, %v2809_v4 }
 0x641   :  { %1833 = vmatprep.mubr.msk.bf16.mxu0 %vm2574_vm0, %v2573_v0  ;;  %1830 = vmatpush3.bf16.msra.mxu0 %v1973_v24 }
 0x642   :  { %1831 = vmatprep.subr.bf16.mxu0 %v2573_v0 }
 0x645   :  { %1832 = vmatpush3.bf16.msra.mxu0 %v1974_v25  ;;  %v1979_v25 = vld [vmem:[#allocation28 + $0x8] sm:$0xff]  }
 0x646   :  { %1843 = vmatprep.subr.bf16.mxu0 %v2573_v0 }
 0x700   :  { %v922_v19 = vpop.f32.mrf.mxu0 }
 0x702   :  { %v1819_v20 = vpop.f32.mrf.mxu0 }
 0x703   :  { %v1700_v20 = vld [vmem:[#allocation27] ss:$0 sm:$0xff] }
 0x704   :  { %v925_v21 = vpop.f32.mrf.mxu0 }
 0x705   :  { %v929_v22 = vpack.c.bf16 %v925_v21, %v922_v19 }
 0x706   :  { %v1820_v23 = vpop.f32.mrf.mxu0 }
 0x707   :  { %1826 = vmatmul.mubr.msk.bf16.vlgmr.msra.gmra.mxu1 %vm622_vm4, %v929_v22 }
 0x708   :  { %1839 = vmatprep.mubr.msk.bf16.mxu1 %vm2574_vm0, %v2573_v0 }
 0x7c7   :  { %v990_v27 = vpop.f32.mrf.mxu1 }
 0x7c8   :  { %v991_v29 = vadd.f32 %v1680_v26, %v990_v27 }
 0x7c9   :  { %v1827_v28 = vpop.f32.mrf.mxu1 }
 0x7ca   :  { %v997_v33 = vmax.f32 %v991_v29, 0.0 }
 0x7cb   :  { %v993_v30 = vpop.f32.mrf.mxu1 }
 0x7cc   :  { %v994_v31 = vadd.f32 %v1680_v26, %v993_v30  ;;  %v1980_v26 = vld [vmem:[#allocation28] sm:$0xff]  }
 0x7cd   :  { %v1828_v32 = vpop.f32.mrf.mxu1 }
 0x7ce   :  { %v998_v34 = vmax.f32 %v994_v31, 0.0  ;;  %v1982_v32 = vld [vmem:[#allocation31] sm:$0xff]  }
 0x7d0   :  { %v999_v35 = vpack.c.bf16 %v998_v34, %v997_v33  ;;  %v1702_v33 = vld [vmem:[#allocation30] ss:$0 sm:$0xff] }
 0x7d2   :  { %1834 = vmatmul.mubr.msk.bf16.vlgmr.msra.gmra.mxu0 %vm622_vm4, %v999_v35 }
 0x7d3   :  { %1847 = vmatprep.mubr.msk.bf16.mxu0 %vm2574_vm0, %v2573_v0  ;;  %1844 = vmatpush3.bf16.msra.mxu0 %v1975_v52 }
 0x7d4   :  { %1845 = vmatprep.subr.bf16.mxu0 %v2573_v0 }
 0x7d7   :  { %1846 = vmatpush3.bf16.msra.mxu0 %v1976_v53 }
 0x7d8   :  { %1859 = vmatprep.subr.bf16.mxu0 %v2573_v0 }
 0x892   :  { %v1060_v37 = vpop.f32.mrf.mxu0 }
 0x893   :  { %v1061_v38 = vadd.f32 %v1684_v36, %v1060_v37 }
 0x894   :  { %v1835_v39 = vpop.f32.mrf.mxu0 }
 0x895   :  { %v1067_v40 = vmax.f32 %v1061_v38, 0.0 }
 0x896   :  { %v1063_v42 = vpop.f32.mrf.mxu0 }
 0x897   :  { %v1064_v43 = vadd.f32 %v1684_v36, %v1063_v42  ;;  %v1076_v45 = vmul.f32 %v1688_v41, %v1067_v40 }
 0x898   :  { %v1836_v44 = vpop.f32.mrf.mxu0 }
 0x899   :  { %v1068_v46 = vmax.f32 %v1064_v43, 0.0  ;;  %v1085_v49 = vadd.f32 %v1689_v47, %v1076_v45  ;;  %v1983_v43 = vld [vmem:[#allocation37 + $0x8] sm:$0xff]   ;;  %v1706_v44 = vld [vmem:[#allocation33] ss:$0 sm:$0xff] }
 0x89b   :  { %v1077_v48 = vmul.f32 %v1688_v41, %v1068_v46 }
 0x89d   :  { %v1086_v50 = vadd.f32 %v1689_v47, %v1077_v48 }
 0x89f   :  { %v1087_v51 = vpack.c.bf16 %v1086_v50, %v1085_v49  ;;  %v1710_v49 = vld [vmem:[#allocation34] ss:$0 sm:$0xff] }
 0x8a1   :  { %1838 = vmatpush3.bf16.msra.mxu1 %v1087_v51 }
 0x8a2   :  { %1851 = vmatprep.subr.bf16.mxu1 %v2573_v0 }
 0x8a4   :  { %1840 = vmatmul.mubr.msk.bf16.vlgmr.msra.gmra.mxu1 %vm455_vm2, %v2809_v4 }
 0x8a5   :  { %1855 = vmatprep.mubr.msk.bf16.mxu1 %vm2574_vm0, %v2573_v0  ;;  %1852 = vmatpush3.bf16.msra.mxu1 %v1977_v59 }
 0x8a6   :  { %1853 = vmatprep.subr.bf16.mxu1 %v2573_v0 }
 0x8a9   :  { %1854 = vmatpush3.bf16.msra.mxu1 %v1978_v60  ;;  %v1487_v60 = vld [vmem:[%s2952_s4] sm:$0x1] }
 0x8aa   :  { %1865 = vmatprep.subr.bf16.mxu1 %v2573_v0 }
 0x964   :  { %v1122_v54 = vpop.f32.mrf.mxu1 }
 0x966   :  { %v1841_v55 = vpop.f32.mrf.mxu1 }
 0x967   :  { %v1711_v55 = vld [vmem:[#allocation36] ss:$0 sm:$0xff] }
 0x968   :  { %v1125_v56 = vpop.f32.mrf.mxu1 }
 0x969   :  { %v1129_v57 = vpack.c.bf16 %v1125_v56, %v1122_v54 }
 0x96a   :  { %v1842_v58 = vpop.f32.mrf.mxu1 }
 0x96b   :  { %1848 = vmatmul.mubr.msk.bf16.vlgmr.msra.gmra.mxu0 %vm622_vm4, %v1129_v57 }
 0x96c   :  { %1861 = vmatprep.mubr.msk.bf16.mxu0 %vm2574_vm0, %v2573_v0 }
 0xa2b   :  { %v1190_v62 = vpop.f32.mrf.mxu0 }
 0xa2c   :  { %v1191_v1 = vadd.f32 %v1691_v61, %v1190_v62 }
 0xa2d   :  { %v1849_v63 = vpop.f32.mrf.mxu0 }
 0xa2e   :  { %v1197_v6 = vmax.f32 %v1191_v1, 0.0 }
 0xa2f   :  { %v1193_v2 = vpop.f32.mrf.mxu0 }
 0xa30   :  { %v1194_v3 = vadd.f32 %v1691_v61, %v1193_v2 }
 0xa31   :  { %v1850_v5 = vpop.f32.mrf.mxu0 }
 0xa32   :  { %v1198_v7 = vmax.f32 %v1194_v3, 0.0  ;;  %v1713_v3 = vld [vmem:[#allocation39] ss:$0 sm:$0xff] }
 0xa34   :  { %v1199_v8 = vpack.c.bf16 %v1198_v7, %v1197_v6 }
 0xa36   :  { %1856 = vmatmul.mubr.msk.bf16.vlgmr.msra.gmra.mxu1 %vm622_vm4, %v1199_v8 }
 0xa37   :  { %1869 = vmatprep.mubr.msk.bf16.mxu1 %vm2574_vm0, %v2573_v0  ;;  %1866 = vmatpush3.bf16.msra.mxu1 %v1979_v25 }
 0xa38   :  { %1867 = vmatprep.subr.bf16.mxu1 %v2573_v0 }
 0xa3b   :  { %1868 = vmatpush3.bf16.msra.mxu1 %v1980_v26 }
 0xa3c   :  { %1881 = vmatprep.subr.bf16.mxu1 %v2573_v0 }
 0xaf6   :  { %v1260_v10 = vpop.f32.mrf.mxu1 }
 0xaf7   :  { %v1261_v11 = vadd.f32 %v1695_v9, %v1260_v10 }
 0xaf8   :  { %v1857_v12 = vpop.f32.mrf.mxu1 }
 0xaf9   :  { %v1267_v13 = vmax.f32 %v1261_v11, 0.0 }
 0xafa   :  { %v1263_v15 = vpop.f32.mrf.mxu1 }
 0xafb   :  { %v1264_v16 = vadd.f32 %v1695_v9, %v1263_v15  ;;  %v1276_v18 = vmul.f32 %v1699_v14, %v1267_v13 }
 0xafc   :  { %v1858_v17 = vpop.f32.mrf.mxu1 }
 0xafd   :  { %v1268_v19 = vmax.f32 %v1264_v16, 0.0  ;;  %v1285_v22 = vadd.f32 %v1700_v20, %v1276_v18 }
 0xaff   :  { %v1277_v21 = vmul.f32 %v1699_v14, %v1268_v19 }
 0xb01   :  { %v1286_v23 = vadd.f32 %v1700_v20, %v1277_v21 }
 0xb03   :  { %v1287_v24 = vpack.c.bf16 %v1286_v23, %v1285_v22 }
 0xb05   :  { %1860 = vmatpush3.bf16.msra.mxu0 %v1287_v24 }
 0xb06   :  { %1873 = vmatprep.subr.bf16.mxu0 %v2573_v0 }
 0xb08   :  { %1862 = vmatmul.mubr.msk.bf16.vlgmr.msra.gmra.mxu0 %vm455_vm2, %v2809_v4  ;;  %v1981_v4 = vld [vmem:[#allocation31 + $0x8] sm:$0xff]  }
 0xb09   :  { %1877 = vmatprep.mubr.msk.bf16.mxu0 %vm2574_vm0, %v2573_v0  ;;  %1874 = vmatpush3.bf16.msra.mxu0 %v1981_v4 }
 0xb0a   :  { %1875 = vmatprep.subr.bf16.mxu0 %v2573_v0 }
 0xb0d   :  { %1876 = vmatpush3.bf16.msra.mxu0 %v1982_v32 }
 0xb0e   :  { %1887 = vmatprep.subr.bf16.mxu0 %v2573_v0 }
 0xbc8   :  { %v1322_v27 = vpop.f32.mrf.mxu0 }
 0xbca   :  { %v1863_v28 = vpop.f32.mrf.mxu0 }
 0xbcc   :  { %v1325_v29 = vpop.f32.mrf.mxu0 }
 0xbcd   :  { %v1329_v30 = vpack.c.bf16 %v1325_v29, %v1322_v27 }
 0xbce   :  { %v1864_v31 = vpop.f32.mrf.mxu0 }
 0xbcf   :  { %1870 = vmatmul.mubr.msk.bf16.vlgmr.msra.gmra.mxu1 %vm622_vm4, %v1329_v30 }
 0xbd0   :  { %1883 = vmatprep.mubr.msk.bf16.mxu1 %vm2574_vm0, %v2573_v0 }
 0xc8f   :  { %v1390_v34 = vpop.f32.mrf.mxu1 }
 0xc90   :  { %v1391_v36 = vadd.f32 %v1702_v33, %v1390_v34 }
 0xc91   :  { %v1871_v35 = vpop.f32.mrf.mxu1 }
 0xc92   :  { %v1397_v40 = vmax.f32 %v1391_v36, 0.0 }
 0xc93   :  { %v1393_v37 = vpop.f32.mrf.mxu1 }
 0xc94   :  { %v1394_v38 = vadd.f32 %v1702_v33, %v1393_v37 }
 0xc95   :  { %v1872_v39 = vpop.f32.mrf.mxu1 }
 0xc96   :  { %v1398_v41 = vmax.f32 %v1394_v38, 0.0 }
 0xc98   :  { %v1399_v42 = vpack.c.bf16 %v1398_v41, %v1397_v40 }
 0xc9a   :  { %1878 = vmatmul.mubr.msk.bf16.vlgmr.msra.gmra.mxu0 %vm622_vm4, %v1399_v42 }
 0xc9b   :  { %1891 = vmatprep.mubr.msk.bf16.mxu0 %vm2574_vm0, %v2573_v0  ;;  %1888 = vmatpush3.bf16.msra.mxu0 %v1983_v43 }
 0xc9c   :  { %1889 = vmatprep.subr.bf16.mxu0 %v2573_v0  ;;  %v1984_v0 = vld [vmem:[#allocation37] sm:$0xff]  }
 0xc9f   :  { %1890 = vmatpush3.bf16.msra.mxu0 %v1984_v0 }
 0xd5a   :  { %v1460_v45 = vpop.f32.mrf.mxu0 }
 0xd5b   :  { %v1461_v46 = vadd.f32 %v1706_v44, %v1460_v45 }
 0xd5c   :  { %v1879_v47 = vpop.f32.mrf.mxu0 }
 0xd5d   :  { %v1467_v48 = vmax.f32 %v1461_v46, 0.0 }
 0xd5e   :  { %v1463_v50 = vpop.f32.mrf.mxu0 }
 0xd5f   :  { %v1464_v51 = vadd.f32 %v1706_v44, %v1463_v50  ;;  %v1476_v53 = vmul.f32 %v1710_v49, %v1467_v48 }
 0xd60   :  { %v1880_v52 = vpop.f32.mrf.mxu0 }
 0xd61   :  { %v1468_v54 = vmax.f32 %v1464_v51, 0.0  ;;  %v1485_v57 = vadd.f32 %v1711_v55, %v1476_v53 }
 0xd63   :  { %v1477_v56 = vmul.f32 %v1710_v49, %v1468_v54 }
 0xd65   :  { %v1486_v58 = vadd.f32 %v1711_v55, %v1477_v56 }
 0xd67   :  { %v1488_v59 = vpack.c.bf16 %v1486_v58, %v1485_v57 }
 0xd69   :  { %1882 = vmatpush3.bf16.msra.mxu1 %v1488_v59 }
 0xd6c   :  { %1884 = vmatmul.mubr.msk.bf16.vlgmr.msra.gmra.mxu1 %vm455_vm2, %v1487_v60 }
 0xe2c   :  { %v1526_v61 = vpop.f32.mrf.mxu1 }
 0xe2d   :  { %v1532_v62 = vpack.c.bf16 %v1526_v61, %v1526_v61 }
 0xe2e   :  { %v1885_v63 = vpop.f32.mrf.mxu1 }
 0xe2f   :  { %1892 = vmatmul.mubr.msk.bf16.vlgmr.msra.gmra.mxu0 %vm622_vm4, %v1532_v62 }
 0xe30   :  { %v1529_v1 = vpop.f32.mrf.mxu1 }
 0xe32   :  { %v1886_v2 = vpop.f32.mrf.mxu1 }
 0xeef   :  { %v1593_v5 = vpop.f32.mrf.mxu0 }
 0xef0   :  { %v1594_v6 = vadd.f32 %v1713_v3, %v1593_v5 }
 0xef1   :  { %v1893_v7 = vpop.f32.mrf.mxu0 }
 0xef2   :  { %v1599_v8 = vmax.f32 %v1594_v6, 0.0 }
 0xef3   :  { %v1596_v9 = vpop.f32.mrf.mxu0 }
 0xef4   :  { %1600 = vst [vmem:[%s2758_s12] sm:$0x3] %v1599_v8 }
 0xef5   :  { %v1894_v10 = vpop.f32.mrf.mxu0 }
 0xef6   :  { %1605 = vsyncpa [#allocation3], 1 }
 0xef7   :  { %1606 = vsyncpa [#allocation5], 1 }
 0xef8   :  { %1607 = vsyncpa [#allocation8], 1 }
 0xef9   :  { %1608 = vsyncpa [#allocation11], 1 }
 0xefa   :  { %1609 = vsyncpa [#allocation14], 1 }
 0xefb   :  { %1610 = vsyncpa [#allocation17], 1 }
 0xefc   :  { %1611 = vsyncpa [#allocation20], 1 }
 0xefd   :  { %1612 = vsyncpa [#allocation23], 1 }
 0xefe   :  { %1613 = vsyncpa [#allocation26], 1 }
 0xeff   :  { %1614 = vsyncpa [#allocation29], 1 }
 0xf00   :  { %1615 = vsyncpa [#allocation32], 1 }
 0xf01   :  { %1616 = vsyncpa [#allocation35], 1 }
 0xf02   :  { %1617 = vsyncpa [#allocation38], 1 }

// kernel: ginconvnet_forward.13
= control target key start
LH: loop header
LB: loop body
LE: loop exit
PB: predicated region body
PF: predicated region fallthrough
CT: control target
= control target key end

     0   :  { %s7365_s0 = inlined_call_operand.vmem [shape: f32[2,520], index: 0, kind: input, shape index: {}]   ;;  %s7366_s1 = inlined_call_operand.vmem [shape: bf16[520,1024], index: 1, kind: input, shape index: {}]   ;;  %s7367_s2 = inlined_call_operand.vmem [shape: f32[1,1024], index: 2, kind: input, shape index: {}]   ;;  %s7368_s3 = inlined_call_operand.vmem [shape: bf16[1024,512], index: 3, kind: input, shape index: {}]   ;;  %s7369_s4 = inlined_call_operand.hbm [shape: f32[1,512], index: 4, kind: input, shape index: {}]   ;;  %s7370_s5 = inlined_call_operand.vmem [shape: bf16[512,1], index: 5, kind: input, shape index: {}]   ;;  %s7371_s6 = inlined_call_operand.<no memory space> [shape: f32[1,1], index: 6, kind: input, shape index: {}]   ;;  %s7372_s7 = inlined_call_operand.vmem [shape: f32[2,1], index: 7, kind: output, shape index: {}]  }
   0x1   :  { %v12_v0 = vstv %s7371_s6 }
   0x2   :  { %13 = vst [vmem:[#allocation2] sm:$0x1] %v12_v0 }
   0x3   :  { %14 = vsyncpa [#allocation4], 0  ;;  %s5518_s26 = smov [#allocation3]  }
   0x4   :  { %s29_s27 = sshll.u32 %s5518_s26, 4  ;;  %s30_s27 = int_to_ptr.vmem [resolvable:$true] %s29_s27 }
   0x5   :  { %s5504_s28 = scalar_lea.vmem %s30_s27, 64  ;;  %p5509_p1 = scmp.lt.s32.totalorder %s30_s27, %s30_s27 }
   0x6   :  { %p5505_p0 = scmp.ne.s32.totalorder %s30_s27, %s5504_s28  ;;  %p5510_p2 = scmp.lt.s32.totalorder %s5504_s28, %s5504_s28 }
   0x8   :  { %p5511_p3 = por %p5510_p2, %p5509_p1 }
   0xa   :  { %p5512_p4 = pnand %p5511_p3, %p5505_p0 }
   0xc   :  { %5515 = shalt.err (!%p5512_p4)
}
   0xd   :  { %32 = dma.hbm_to_vmem [thread:$0]  %s7369_s4, 64, %s30_s27, [#allocation4]  }
   0xe   :  { %5516 = dma.done.wait [#allocation4], 64  }
   0xf   :  { %5517 = vsyncadd [#allocation4], 4294967232  ;;  %v135_v1 = vld [vmem:[%s7366_s1 + $0x1c0] sm:$0xff]  ;;  %v5519_v33 = vmov 1983009808   ;;  %v49_v35 = vlaneseq  ;;  %vm1685_vm0 = vcmask 1043456  }
  0x10   :  { %v139_v2 = vld [vmem:[%s7366_s1 + $0x1e0] sm:$0xff]  ;;  %v47_v34 = vunpack.c.l.s4 %v5519_v33  ;;  %vm1681_vm1 = vcmask 64512   ;;  %vm4455_vm2 = vcmask 1024  }
  0x11   :  { %v263_v3 = vld [vmem:[%s7366_s1 + $0x5c0] sm:$0xff]  ;;  %v4520_v4 = vcombine.high %v135_v1, %v139_v2  ;;  %v4519_v6 = vcombine.low %v135_v1, %v139_v2  ;;  %v5633_v45 = vshrl.u32 %v49_v35, 7 }
  0x12   :  { %v267_v5 = vld [vmem:[%s7366_s1 + $0x5e0] sm:$0xff]  ;;  %v48_v44 = vunpack.c.0.s8 %v47_v34 }
  0x13   :  { %v127_v7 = vld [vmem:[%s7366_s1 + $0x180] sm:$0xff]  ;;  %v4648_v9 = vcombine.high %v263_v3, %v267_v5  ;;  %v4647_v10 = vcombine.low %v263_v3, %v267_v5  ;;  %1710 = vmatprep.subr.bf16.mxu0 %v4520_v4 }
  0x14   :  { %v131_v8 = vld [vmem:[%s7366_s1 + $0x1a0] sm:$0xff]  ;;  %1711 = vmatpush1.bf16.msra.mxu0 %v4519_v6  ;;  %v51_v54 = vsub.s32 %v48_v44, %v5633_v45 }
  0x15   :  { %v4512_v11 = vcombine.high %v127_v7, %v131_v8  ;;  %v255_v12 = vld [vmem:[%s7366_s1 + $0x580] sm:$0xff]  ;;  %1751 = vmatprep.subr.bf16.mxu1 %v4648_v9  ;;  %v4511_v19 = vcombine.low %v127_v7, %v131_v8 }
  0x16   :  { %v259_v13 = vld [vmem:[%s7366_s1 + $0x5a0] sm:$0xff]  ;;  %1752 = vmatpush1.bf16.msra.mxu1 %v4647_v10 }
  0x17   :  { %v119_v14 = vld [vmem:[%s7366_s1 + $0x140] sm:$0xff]  ;;  %v4640_v15 = vcombine.high %v255_v12, %v259_v13  ;;  %1712 = vmatprep.subr.bf16.mxu0 %v4512_v11  ;;  %v4639_v20 = vcombine.low %v255_v12, %v259_v13 }
  0x18   :  { %v123_v16 = vld [vmem:[%s7366_s1 + $0x160] sm:$0xff]  ;;  %1713 = vmatpush1.bf16.msra.mxu0 %v4511_v19 }
  0x19   :  { %v247_v17 = vld [vmem:[%s7366_s1 + $0x540] sm:$0xff]  ;;  %v4504_v21 = vcombine.high %v119_v14, %v123_v16  ;;  %1753 = vmatprep.subr.bf16.mxu1 %v4640_v15  ;;  %v4503_v27 = vcombine.low %v119_v14, %v123_v16 }
  0x1a   :  { %v251_v18 = vld [vmem:[%s7366_s1 + $0x560] sm:$0xff]  ;;  %1754 = vmatpush1.bf16.msra.mxu1 %v4639_v20 }
  0x1b   :  { %v4632_v22 = vcombine.high %v247_v17, %v251_v18  ;;  %v111_v23 = vld [vmem:[%s7366_s1 + $0x100] sm:$0xff]  ;;  %1714 = vmatprep.subr.bf16.mxu0 %v4504_v21  ;;  %v4631_v28 = vcombine.low %v247_v17, %v251_v18 }
  0x1c   :  { %v115_v24 = vld [vmem:[%s7366_s1 + $0x120] sm:$0xff]  ;;  %1715 = vmatpush1.bf16.msra.mxu0 %v4503_v27 }
  0x1d   :  { %v239_v25 = vld [vmem:[%s7366_s1 + $0x500] sm:$0xff]  ;;  %v4496_v29 = vcombine.high %v111_v23, %v115_v24  ;;  %1755 = vmatprep.subr.bf16.mxu1 %v4632_v22  ;;  %v4495_v38 = vcombine.low %v111_v23, %v115_v24 }
  0x1e   :  { %v243_v26 = vld [vmem:[%s7366_s1 + $0x520] sm:$0xff]  ;;  %1756 = vmatpush1.bf16.msra.mxu1 %v4631_v28 }
  0x1f   :  { %v4624_v30 = vcombine.high %v239_v25, %v243_v26  ;;  %v103_v31 = vld [vmem:[%s7366_s1 + $0xc0] sm:$0xff]  ;;  %1716 = vmatprep.subr.bf16.mxu0 %v4496_v29  ;;  %v4623_v39 = vcombine.low %v239_v25, %v243_v26 }
  0x20   :  { %v107_v32 = vld [vmem:[%s7366_s1 + $0xe0] sm:$0xff]  ;;  %1717 = vmatpush1.bf16.msra.mxu0 %v4495_v38 }
  0x21   :  { %v231_v36 = vld [vmem:[%s7366_s1 + $0x4c0] sm:$0xff]  ;;  %v4488_v40 = vcombine.high %v103_v31, %v107_v32  ;;  %1757 = vmatprep.subr.bf16.mxu1 %v4624_v30  ;;  %v4487_v48 = vcombine.low %v103_v31, %v107_v32 }
  0x22   :  { %v235_v37 = vld [vmem:[%s7366_s1 + $0x4e0] sm:$0xff]  ;;  %1758 = vmatpush1.bf16.msra.mxu1 %v4623_v39 }
  0x23   :  { %v4616_v41 = vcombine.high %v231_v36, %v235_v37  ;;  %v95_v42 = vld [vmem:[%s7366_s1 + $0x80] sm:$0xff]  ;;  %1718 = vmatprep.subr.bf16.mxu0 %v4488_v40  ;;  %v4615_v49 = vcombine.low %v231_v36, %v235_v37 }
  0x24   :  { %v99_v43 = vld [vmem:[%s7366_s1 + $0xa0] sm:$0xff]  ;;  %1719 = vmatpush1.bf16.msra.mxu0 %v4487_v48 }
  0x25   :  { %v223_v46 = vld [vmem:[%s7366_s1 + $0x480] sm:$0xff]  ;;  %v4480_v50 = vcombine.high %v95_v42, %v99_v43  ;;  %1759 = vmatprep.subr.bf16.mxu1 %v4616_v41  ;;  %v4479_v57 = vcombine.low %v95_v42, %v99_v43 }
  0x26   :  { %v227_v47 = vld [vmem:[%s7366_s1 + $0x4a0] sm:$0xff]  ;;  %1760 = vmatpush1.bf16.msra.mxu1 %v4615_v49 }
  0x27   :  { %v4608_v51 = vcombine.high %v223_v46, %v227_v47  ;;  %v87_v52 = vld [vmem:[%s7366_s1 + $0x40] sm:$0xff]  ;;  %1720 = vmatprep.subr.bf16.mxu0 %v4480_v50  ;;  %v4607_v58 = vcombine.low %v223_v46, %v227_v47 }
  0x28   :  { %v91_v53 = vld [vmem:[%s7366_s1 + $0x60] sm:$0xff]  ;;  %1721 = vmatpush1.bf16.msra.mxu0 %v4479_v57 }
  0x29   :  { %v215_v55 = vld [vmem:[%s7366_s1 + $0x440] sm:$0xff]  ;;  %v4472_v59 = vcombine.high %v87_v52, %v91_v53  ;;  %1761 = vmatprep.subr.bf16.mxu1 %v4608_v51  ;;  %v4471_v4 = vcombine.low %v87_v52, %v91_v53 }
  0x2a   :  { %v219_v56 = vld [vmem:[%s7366_s1 + $0x460] sm:$0xff]  ;;  %1762 = vmatpush1.bf16.msra.mxu1 %v4607_v58 }
  0x2b   :  { %v41_v60 = vld [vmem:[%s7365_s0] sm:$0xff]  ;;  %v4600_v61 = vcombine.high %v215_v55, %v219_v56  ;;  %1722 = vmatprep.subr.bf16.mxu0 %v4472_v59  ;;  %v4599_v7 = vcombine.low %v215_v55, %v219_v56 }
  0x2c   :  { %v79_v62 = vld [vmem:[%s7366_s1] sm:$0xff]  ;;  %v5663_v0 = vrot.slane %v41_v60, %v51_v54  ;;  %v45_v1 = vcombine.high %v41_v60, %v41_v60  ;;  %1723 = vmatpush1.bf16.msra.mxu0 %v4471_v4 }
  0x2d   :  { %v83_v63 = vld [vmem:[%s7366_s1 + $0x20] sm:$0xff]  ;;  %1763 = vmatprep.subr.bf16.mxu1 %v4600_v61 }
  0x2e   :  { %v207_v2 = vld [vmem:[%s7366_s1 + $0x400] sm:$0xff]  ;;  %v60_v5 = vcombine.high %v5663_v0, %v5663_v0  ;;  %v5673_v6 = vrot.slane %v45_v1, %v51_v54  ;;  %v4464_v8 = vcombine.high %v79_v62, %v83_v63  ;;  %v4463_v16 = vcombine.low %v79_v62, %v83_v63  ;;  %1764 = vmatpush1.bf16.msra.mxu1 %v4599_v7 }
  0x2f   :  { %v211_v3 = vld [vmem:[%s7366_s1 + $0x420] sm:$0xff] }
  0x30   :  { %v4592_v9 = vcombine.high %v207_v2, %v211_v3  ;;  %v199_v10 = vld [vmem:[%s7366_s1 + $0x3c0] sm:$0xff]  ;;  %v5681_v12 = vpack.c.bf16 %v60_v5, %v60_v5  ;;  %v61_v13 = vcombine.high %v5673_v6, %v5673_v6  ;;  %1724 = vmatprep.subr.bf16.mxu0 %v4464_v8  ;;  %v4591_v18 = vcombine.low %v207_v2, %v211_v3 }
  0x31   :  { %v203_v11 = vld [vmem:[%s7366_s1 + $0x3e0] sm:$0xff]  ;;  %1725 = vmatpush1.bf16.msra.mxu0 %v4463_v16 }
  0x32   :  { %v327_v14 = vld [vmem:[%s7366_s1 + $0x7c0] sm:$0xff]  ;;  %1742 = vmatprep.mubr.bf16.mxu0 %v5681_v12  ;;  %v5692_v17 = vpack.c.bf16 %v61_v13, %v61_v13  ;;  %v4584_v19 = vcombine.high %v199_v10, %v203_v11  ;;  %1765 = vmatprep.subr.bf16.mxu1 %v4592_v9  ;;  %v4583_v25 = vcombine.low %v199_v10, %v203_v11 }
  0x33   :  { %v331_v15 = vld [vmem:[%s7366_s1 + $0x7e0] sm:$0xff]  ;;  %1766 = vmatpush1.bf16.msra.mxu1 %v4591_v18 }
  0x34   :  { %v4712_v20 = vcombine.high %v327_v14, %v331_v15  ;;  %v191_v21 = vld [vmem:[%s7366_s1 + $0x380] sm:$0xff]  ;;  %1783 = vmatprep.mubr.bf16.mxu1 %v5692_v17  ;;  %1726 = vmatprep.subr.bf16.mxu0 %v4584_v19  ;;  %v4711_v26 = vcombine.low %v327_v14, %v331_v15  ;;  %v136_v19 = vld [vmem:[%s7366_s1 + $0x1c8] sm:$0xff] }
  0x35   :  { %v195_v22 = vld [vmem:[%s7366_s1 + $0x3a0] sm:$0xff]  ;;  %1727 = vmatpush2.bf16.msra.mxu0 %v4583_v25  ;;  %v128_v25 = vld [vmem:[%s7366_s1 + $0x188] sm:$0xff] }
  0x36   :  { %v319_v23 = vld [vmem:[%s7366_s1 + $0x780] sm:$0xff]  ;;  %v4576_v27 = vcombine.high %v191_v21, %v195_v22  ;;  %1767 = vmatprep.subr.bf16.mxu1 %v4712_v20  ;;  %v4575_v33 = vcombine.low %v191_v21, %v195_v22  ;;  %v140_v20 = vld [vmem:[%s7366_s1 + $0x1e8] sm:$0xff] }
  0x37   :  { %v323_v24 = vld [vmem:[%s7366_s1 + $0x7a0] sm:$0xff]  ;;  %1768 = vmatpush2.bf16.msra.mxu1 %v4711_v26  ;;  %v132_v26 = vld [vmem:[%s7366_s1 + $0x1a8] sm:$0xff] }
  0x38   :  { %v4704_v28 = vcombine.high %v319_v23, %v323_v24  ;;  %v183_v29 = vld [vmem:[%s7366_s1 + $0x340] sm:$0xff]  ;;  %1728 = vmatprep.subr.bf16.mxu0 %v4576_v27  ;;  %v4703_v34 = vcombine.low %v319_v23, %v323_v24  ;;  %v4522_v27 = vcombine.high %v136_v19, %v140_v20 }
  0x39   :  { %v187_v30 = vld [vmem:[%s7366_s1 + $0x360] sm:$0xff]  ;;  %1729 = vmatpush2.bf16.msra.mxu0 %v4575_v33 }
  0x3a   :  { %v311_v31 = vld [vmem:[%s7366_s1 + $0x740] sm:$0xff]  ;;  %v4568_v35 = vcombine.high %v183_v29, %v187_v30  ;;  %1769 = vmatprep.subr.bf16.mxu1 %v4704_v28  ;;  %v4567_v41 = vcombine.low %v183_v29, %v187_v30  ;;  %v264_v28 = vld [vmem:[%s7366_s1 + $0x5c8] sm:$0xff]  ;;  %v5802_v30 = vpack.c.bf16 %v5663_v0, %v5663_v0 }
  0x3b   :  { %v315_v32 = vld [vmem:[%s7366_s1 + $0x760] sm:$0xff]  ;;  %1770 = vmatpush2.bf16.msra.mxu1 %v4703_v34  ;;  %v268_v29 = vld [vmem:[%s7366_s1 + $0x5e8] sm:$0xff] }
  0x3c   :  { %v4696_v36 = vcombine.high %v311_v31, %v315_v32  ;;  %v175_v37 = vld [vmem:[%s7366_s1 + $0x300] sm:$0xff]  ;;  %1730 = vmatprep.subr.bf16.mxu0 %v4568_v35  ;;  %v4695_v42 = vcombine.low %v311_v31, %v315_v32  ;;  %v5806_v31 = vpack.c.bf16 %v5673_v6, %v5673_v6  ;;  %v4521_v32 = vcombine.low %v136_v19, %v140_v20  ;;  %v120_v34 = vld [vmem:[%s7366_s1 + $0x148] sm:$0xff] }
  0x3d   :  { %v179_v38 = vld [vmem:[%s7366_s1 + $0x320] sm:$0xff]  ;;  %1731 = vmatpush2.bf16.msra.mxu0 %v4567_v41  ;;  %v4514_v35 = vcombine.high %v128_v25, %v132_v26  ;;  %v4462_v0 = vld.sshfl [vmem:[%s7365_s0 + $0x8] sm:$0x3 pattern:$0x76325410] }
  0x3e   :  { %v303_v39 = vld [vmem:[%s7366_s1 + $0x700] sm:$0xff]  ;;  %v4560_v43 = vcombine.high %v175_v37, %v179_v38  ;;  %1771 = vmatprep.subr.bf16.mxu1 %v4696_v36  ;;  %v4559_v50 = vcombine.low %v175_v37, %v179_v38  ;;  %v4650_v36 = vcombine.high %v264_v28, %v268_v29  ;;  %v124_v6 = vld [vmem:[%s7366_s1 + $0x168] sm:$0xff]  ;;  %v4513_v37 = vcombine.low %v128_v25, %v132_v26 }
  0x3f   :  { %v307_v40 = vld [vmem:[%s7366_s1 + $0x720] sm:$0xff]  ;;  %1772 = vmatpush2.bf16.msra.mxu1 %v4695_v42  ;;  %v5520_v38 = vmov 0   ;;  %v112_v41 = vld [vmem:[%s7366_s1 + $0x108] sm:$0xff]  ;;  %v4506_v42 = vcombine.high %v120_v34, %v124_v6 }
  0x40   :  { %v4688_v44 = vcombine.high %v303_v39, %v307_v40  ;;  %v167_v46 = vld [vmem:[%s7366_s1 + $0x2c0] sm:$0xff]  ;;  %1732 = vmatprep.subr.bf16.mxu0 %v4560_v43  ;;  %v4687_v51 = vcombine.low %v303_v39, %v307_v40  ;;  %v256_v39 = vld [vmem:[%s7366_s1 + $0x588] sm:$0xff] }
  0x41   :  { %v171_v47 = vld [vmem:[%s7366_s1 + $0x2e0] sm:$0xff]  ;;  %1733 = vmatpush2.bf16.msra.mxu0 %v4559_v50  ;;  %v260_v40 = vld [vmem:[%s7366_s1 + $0x5a8] sm:$0xff] }
  0x42   :  { %v295_v48 = vld [vmem:[%s7366_s1 + $0x6c0] sm:$0xff]  ;;  %v4552_v52 = vcombine.high %v167_v46, %v171_v47  ;;  %1773 = vmatprep.subr.bf16.mxu1 %v4688_v44  ;;  %v4551_v58 = vcombine.low %v167_v46, %v171_v47  ;;  %v116_v43 = vld [vmem:[%s7366_s1 + $0x128] sm:$0xff]  ;;  %v5834_v44 = vpack.c.bf16 %v4462_v0, %v4462_v0  ;;  %v4649_v46 = vcombine.low %v264_v28, %v268_v29 }
  0x43   :  { %v299_v49 = vld [vmem:[%s7366_s1 + $0x6e0] sm:$0xff]  ;;  %1774 = vmatpush2.bf16.msra.mxu1 %v4687_v51  ;;  %v248_v47 = vld [vmem:[%s7366_s1 + $0x548] sm:$0xff]  ;;  %v4642_v50 = vcombine.high %v256_v39, %v260_v40 }
  0x44   :  { %v4680_v53 = vcombine.high %v295_v48, %v299_v49  ;;  %v159_v54 = vld [vmem:[%s7366_s1 + $0x280] sm:$0xff]  ;;  %1734 = vmatprep.subr.bf16.mxu0 %v4552_v52  ;;  %v4679_v59 = vcombine.low %v295_v48, %v299_v49  ;;  %v252_v48 = vld [vmem:[%s7366_s1 + $0x568] sm:$0xff]  ;;  %v4505_v49 = vcombine.low %v120_v34, %v124_v6 }
  0x45   :  { %v163_v55 = vld [vmem:[%s7366_s1 + $0x2a0] sm:$0xff]  ;;  %1735 = vmatpush2.bf16.msra.mxu0 %v4551_v58  ;;  %v104_v51 = vld [vmem:[%s7366_s1 + $0xc8] sm:$0xff]  ;;  %v4634_v58 = vcombine.high %v248_v47, %v252_v48 }
  0x46   :  { %v287_v56 = vld [vmem:[%s7366_s1 + $0x680] sm:$0xff]  ;;  %v4544_v60 = vcombine.high %v159_v54, %v163_v55  ;;  %1775 = vmatprep.subr.bf16.mxu1 %v4680_v53  ;;  %v4543_v3 = vcombine.low %v159_v54, %v163_v55  ;;  %v108_v52 = vld [vmem:[%s7366_s1 + $0xe8] sm:$0xff]  ;;  %v4498_v53 = vcombine.high %v112_v41, %v116_v43  ;;  %v4641_v54 = vcombine.low %v256_v39, %v260_v40 }
  0x47   :  { %v291_v57 = vld [vmem:[%s7366_s1 + $0x6a0] sm:$0xff]  ;;  %1776 = vmatpush2.bf16.msra.mxu1 %v4679_v59  ;;  %v240_v55 = vld [vmem:[%s7366_s1 + $0x508] sm:$0xff] }
  0x48   :  { %v4672_v61 = vcombine.high %v287_v56, %v291_v57  ;;  %v151_v62 = vld [vmem:[%s7366_s1 + $0x240] sm:$0xff]  ;;  %1736 = vmatprep.subr.bf16.mxu0 %v4544_v60  ;;  %v4671_v4 = vcombine.low %v287_v56, %v291_v57  ;;  %v244_v56 = vld [vmem:[%s7366_s1 + $0x528] sm:$0xff]  ;;  %v4497_v57 = vcombine.low %v112_v41, %v116_v43 }
  0x49   :  { %v155_v63 = vld [vmem:[%s7366_s1 + $0x260] sm:$0xff]  ;;  %1737 = vmatpush2.bf16.msra.mxu0 %v4543_v3  ;;  %v96_v59 = vld [vmem:[%s7366_s1 + $0x88] sm:$0xff]  ;;  %v4626_v3 = vcombine.high %v240_v55, %v244_v56 }
  0x4a   :  { %v279_v1 = vld [vmem:[%s7366_s1 + $0x640] sm:$0xff]  ;;  %v4536_v5 = vcombine.high %v151_v62, %v155_v63  ;;  %1777 = vmatprep.subr.bf16.mxu1 %v4672_v61  ;;  %v4535_v13 = vcombine.low %v151_v62, %v155_v63  ;;  %v100_v60 = vld [vmem:[%s7366_s1 + $0xa8] sm:$0xff]  ;;  %v4490_v61 = vcombine.high %v104_v51, %v108_v52  ;;  %v4633_v62 = vcombine.low %v248_v47, %v252_v48 }
  0x4b   :  { %v283_v2 = vld [vmem:[%s7366_s1 + $0x660] sm:$0xff]  ;;  %1778 = vmatpush2.bf16.msra.mxu1 %v4671_v4  ;;  %v232_v63 = vld [vmem:[%s7366_s1 + $0x4c8] sm:$0xff] }
  0x4c   :  { %v4664_v7 = vcombine.high %v279_v1, %v283_v2  ;;  %v143_v8 = vld [vmem:[%s7366_s1 + $0x200] sm:$0xff]  ;;  %1738 = vmatprep.subr.bf16.mxu0 %v4536_v5  ;;  %v4663_v14 = vcombine.low %v279_v1, %v283_v2  ;;  %v236_v1 = vld [vmem:[%s7366_s1 + $0x4e8] sm:$0xff]  ;;  %v4489_v2 = vcombine.low %v104_v51, %v108_v52 }
  0x4d   :  { %v147_v9 = vld [vmem:[%s7366_s1 + $0x220] sm:$0xff]  ;;  %1739 = vmatpush2.bf16.msra.mxu0 %v4535_v13  ;;  %v88_v4 = vld [vmem:[%s7366_s1 + $0x48] sm:$0xff]  ;;  %v4618_v13 = vcombine.high %v232_v63, %v236_v1 }
  0x4e   :  { %v271_v10 = vld [vmem:[%s7366_s1 + $0x600] sm:$0xff]  ;;  %v4528_v15 = vcombine.high %v143_v8, %v147_v9  ;;  %1779 = vmatprep.subr.bf16.mxu1 %v4664_v7  ;;  %v4527_v21 = vcombine.low %v143_v8, %v147_v9  ;;  %v92_v5 = vld [vmem:[%s7366_s1 + $0x68] sm:$0xff]  ;;  %v4482_v7 = vcombine.high %v96_v59, %v100_v60  ;;  %v4625_v8 = vcombine.low %v240_v55, %v244_v56 }
  0x4f   :  { %v275_v11 = vld [vmem:[%s7366_s1 + $0x620] sm:$0xff]  ;;  %1780 = vmatpush2.bf16.msra.mxu1 %v4663_v14  ;;  %v224_v9 = vld [vmem:[%s7366_s1 + $0x488] sm:$0xff] }
  0x50   :  { %v4656_v16 = vcombine.high %v271_v10, %v275_v11  ;;  %v335_v18 = vld [vmem:[%s7366_s1 + $0x800] sm:$0xff]  ;;  %1740 = vmatprep.subr.bf16.mxu0 %v4528_v15  ;;  %v4655_v22 = vcombine.low %v271_v10, %v275_v11  ;;  %v228_v10 = vld [vmem:[%s7366_s1 + $0x4a8] sm:$0xff]  ;;  %v4481_v11 = vcombine.low %v96_v59, %v100_v60 }
  0x51   :  { %v4720_v23 = vcombine.high %v335_v18, %v335_v18  ;;  %v4719_v24 = vcombine.low %v335_v18, %v335_v18  ;;  %1741 = vmatpush2.bf16.msra.mxu0 %v4527_v21  ;;  %v80_v14 = vld [vmem:[%s7366_s1 + $0x8] sm:$0xff]  ;;  %v4617_v18 = vcombine.low %v232_v63, %v236_v1  ;;  %v4473_v21 = vcombine.low %v88_v4, %v92_v5 }
  0x52   :  { %1781 = vmatprep.subr.bf16.mxu1 %v4656_v16  ;;  %v84_v15 = vld [vmem:[%s7366_s1 + $0x28] sm:$0xff]  ;;  %v4474_v16 = vcombine.high %v88_v4, %v92_v5  ;;  %v4609_v26 = vcombine.low %v224_v9, %v228_v10 }
  0x53   :  { %1782 = vmatpush2.bf16.msra.mxu1 %v4655_v22  ;;  %4727 = vmatprep.subr.msk.bf16.mxu0 %vm1685_vm0, %v4720_v23  ;;  %v1687_v33 = vsel %vm1685_vm0, %v4719_v24, 0  ;;  %v216_v19 = vld [vmem:[%s7366_s1 + $0x448] sm:$0xff]  ;;  %v4610_v22 = vcombine.high %v224_v9, %v228_v10  ;;  %v4466_v25 = vcombine.high %v80_v14, %v84_v15  ;;  %v4465_v29 = vcombine.low %v80_v14, %v84_v15 }
  0x54   :  { %1833 = vmatprep.subr.bf16.mxu1 %v4522_v27  ;;  %1743 = vmatmul.mubr.bf16.vlgmr.msra.gmra.mxu0 %v5802_v30  ;;  %v220_v20 = vld [vmem:[%s7366_s1 + $0x468] sm:$0xff] }
  0x55   :  { %1807 = vmatpush1.bf16.msra.mxu0 %v1687_v33  ;;  %1824 = vmatprep.mubr.bf16.mxu0 %v5520_v38  ;;  %v200_v23 = vld [vmem:[%s7366_s1 + $0x3c8] sm:$0xff] }
  0x56   :  { %1784 = vmatmul.mubr.bf16.vlgmr.msra.gmra.mxu1 %v5806_v31  ;;  %1874 = vmatprep.subr.bf16.mxu0 %v4650_v36  ;;  %v204_v24 = vld [vmem:[%s7366_s1 + $0x3e8] sm:$0xff]  ;;  %v4601_v36 = vcombine.low %v216_v19, %v220_v20 }
  0x57   :  { %1834 = vmatpush1.bf16.msra.mxu1 %v4521_v32  ;;  %1865 = vmatprep.mubr.bf16.mxu1 %v5681_v12  ;;  %v208_v27 = vld [vmem:[%s7366_s1 + $0x408] sm:$0xff]  ;;  %v4602_v32 = vcombine.high %v216_v19, %v220_v20 }
  0x58   :  { %1835 = vmatprep.subr.bf16.mxu1 %v4514_v35  ;;  %v212_v28 = vld [vmem:[%s7366_s1 + $0x428] sm:$0xff]  ;;  %v4586_v35 = vcombine.high %v200_v23, %v204_v24 }
  0x59   :  { %v192_v33 = vld [vmem:[%s7366_s1 + $0x388] sm:$0xff]  ;;  %v4594_v39 = vcombine.high %v208_v27, %v212_v28  ;;  %v4593_v43 = vcombine.low %v208_v27, %v212_v28 }
  0x5a   :  { %v196_v34 = vld [vmem:[%s7366_s1 + $0x3a8] sm:$0xff] }
  0x5b   :  { %1836 = vmatpush1.bf16.msra.mxu1 %v4513_v37  ;;  %v328_v0 = vld [vmem:[%s7366_s1 + $0x7c8] sm:$0xff]  ;;  %v4585_v37 = vcombine.low %v200_v23, %v204_v24  ;;  %v4577_v48 = vcombine.low %v192_v33, %v196_v34 }
  0x5c   :  { %1837 = vmatprep.subr.bf16.mxu1 %v4506_v42  ;;  %4728 = vmatmul.mubr.msk.bf16.vlgmr.msra.gmra.mxu0 %vm1681_vm1, %v5834_v44  ;;  %v332_v6 = vld [vmem:[%s7366_s1 + $0x7e8] sm:$0xff]  ;;  %v4578_v42 = vcombine.high %v192_v33, %v196_v34 }
  0x5d   :  { %1875 = vmatpush1.bf16.msra.mxu0 %v4649_v46  ;;  %1906 = vmatprep.mubr.bf16.mxu0 %v5692_v17  ;;  %v184_v40 = vld [vmem:[%s7366_s1 + $0x348] sm:$0xff] }
  0x5e   :  { %1876 = vmatprep.subr.bf16.mxu0 %v4642_v50  ;;  %v188_v41 = vld [vmem:[%s7366_s1 + $0x368] sm:$0xff] }
  0x5f   :  { %1838 = vmatpush1.bf16.msra.mxu1 %v4505_v49  ;;  %v320_v46 = vld [vmem:[%s7366_s1 + $0x788] sm:$0xff]  ;;  %v4714_v49 = vcombine.high %v328_v0, %v332_v6  ;;  %v4570_v52 = vcombine.high %v184_v40, %v188_v41  ;;  %v4569_v56 = vcombine.low %v184_v40, %v188_v41 }
  0x60   :  { %1839 = vmatprep.subr.bf16.mxu1 %v4498_v53  ;;  %v324_v47 = vld [vmem:[%s7366_s1 + $0x7a8] sm:$0xff]  ;;  %v4713_v53 = vcombine.low %v328_v0, %v332_v6 }
  0x61   :  { %1877 = vmatpush1.bf16.msra.mxu0 %v4641_v54  ;;  %v176_v50 = vld [vmem:[%s7366_s1 + $0x308] sm:$0xff] }
  0x62   :  { %1878 = vmatprep.subr.bf16.mxu0 %v4634_v58  ;;  %v180_v51 = vld [vmem:[%s7366_s1 + $0x328] sm:$0xff] }
  0x63   :  { %1840 = vmatpush1.bf16.msra.mxu1 %v4497_v57  ;;  %v312_v54 = vld [vmem:[%s7366_s1 + $0x748] sm:$0xff]  ;;  %v4706_v57 = vcombine.high %v320_v46, %v324_v47  ;;  %v4562_v60 = vcombine.high %v176_v50, %v180_v51  ;;  %v4561_v1 = vcombine.low %v176_v50, %v180_v51  ;;  %v129_v51 = vld [vmem:[%s7366_s1 + $0x190] sm:$0xff] }
  0x64   :  { %1841 = vmatprep.subr.bf16.mxu1 %v4490_v61  ;;  %v316_v55 = vld [vmem:[%s7366_s1 + $0x768] sm:$0xff]  ;;  %v4705_v61 = vcombine.low %v320_v46, %v324_v47  ;;  %v137_v46 = vld [vmem:[%s7366_s1 + $0x1d0] sm:$0xff] }
  0x65   :  { %1879 = vmatpush1.bf16.msra.mxu0 %v4633_v62  ;;  %v168_v58 = vld [vmem:[%s7366_s1 + $0x2c8] sm:$0xff]  ;;  %v141_v47 = vld [vmem:[%s7366_s1 + $0x1f0] sm:$0xff] }
  0x66   :  { %1880 = vmatprep.subr.bf16.mxu0 %v4626_v3  ;;  %v172_v59 = vld [vmem:[%s7366_s1 + $0x2e8] sm:$0xff] }
  0x67   :  { %1842 = vmatpush1.bf16.msra.mxu1 %v4489_v2  ;;  %v304_v62 = vld [vmem:[%s7366_s1 + $0x708] sm:$0xff]  ;;  %v4698_v2 = vcombine.high %v312_v54, %v316_v55  ;;  %v4554_v5 = vcombine.high %v168_v58, %v172_v59  ;;  %v4553_v10 = vcombine.low %v168_v58, %v172_v59  ;;  %v125_v58 = vld [vmem:[%s7366_s1 + $0x170] sm:$0xff] }
  0x68   :  { %1843 = vmatprep.subr.bf16.mxu1 %v4482_v7  ;;  %v308_v63 = vld [vmem:[%s7366_s1 + $0x728] sm:$0xff]  ;;  %v4697_v7 = vcombine.low %v312_v54, %v316_v55  ;;  %v257_v54 = vld [vmem:[%s7366_s1 + $0x590] sm:$0xff] }
  0x69   :  { %1881 = vmatpush1.bf16.msra.mxu0 %v4625_v8  ;;  %v160_v3 = vld [vmem:[%s7366_s1 + $0x288] sm:$0xff]  ;;  %v261_v55 = vld [vmem:[%s7366_s1 + $0x5b0] sm:$0xff] }
  0x6a   :  { %1882 = vmatprep.subr.bf16.mxu0 %v4618_v13  ;;  %v164_v4 = vld [vmem:[%s7366_s1 + $0x2a8] sm:$0xff] }
  0x6b   :  { %1844 = vmatpush1.bf16.msra.mxu1 %v4481_v11  ;;  %v296_v8 = vld [vmem:[%s7366_s1 + $0x6c8] sm:$0xff]  ;;  %v4690_v11 = vcombine.high %v304_v62, %v308_v63  ;;  %v4546_v15 = vcombine.high %v160_v3, %v164_v4  ;;  %v4545_v20 = vcombine.low %v160_v3, %v164_v4  ;;  %v117_v3 = vld [vmem:[%s7366_s1 + $0x130] sm:$0xff]  ;;  %v4643_v4 = vcombine.low %v257_v54, %v261_v55 }
  0x6c   :  { %1845 = vmatprep.subr.bf16.mxu1 %v4474_v16  ;;  %v300_v9 = vld [vmem:[%s7366_s1 + $0x6e8] sm:$0xff]  ;;  %v4689_v16 = vcombine.low %v304_v62, %v308_v63  ;;  %v253_v62 = vld [vmem:[%s7366_s1 + $0x570] sm:$0xff]  ;;  %v4644_v63 = vcombine.high %v257_v54, %v261_v55 }
  0x6d   :  { %1883 = vmatpush1.bf16.msra.mxu0 %v4617_v18  ;;  %v152_v13 = vld [vmem:[%s7366_s1 + $0x248] sm:$0xff]  ;;  %v333_v54 = vld [vmem:[%s7366_s1 + $0x7f0] sm:$0xff] }
  0x6e   :  { %1884 = vmatprep.subr.bf16.mxu0 %v4610_v22  ;;  %v156_v14 = vld [vmem:[%s7366_s1 + $0x268] sm:$0xff] }
  0x6f   :  { %1846 = vmatpush1.bf16.msra.mxu1 %v4473_v21  ;;  %v288_v18 = vld [vmem:[%s7366_s1 + $0x688] sm:$0xff]  ;;  %v4682_v21 = vcombine.high %v296_v8, %v300_v9  ;;  %v4538_v24 = vcombine.high %v152_v13, %v156_v14  ;;  %v4537_v27 = vcombine.low %v152_v13, %v156_v14  ;;  %v109_v13 = vld [vmem:[%s7366_s1 + $0xf0] sm:$0xff] }
  0x70   :  { %1847 = vmatprep.subr.bf16.mxu1 %v4466_v25  ;;  %v292_v19 = vld [vmem:[%s7366_s1 + $0x6a8] sm:$0xff]  ;;  %v4681_v25 = vcombine.low %v296_v8, %v300_v9  ;;  %v245_v8 = vld [vmem:[%s7366_s1 + $0x530] sm:$0xff] }
  0x71   :  { %1885 = vmatpush1.bf16.msra.mxu0 %v4609_v26  ;;  %v144_v22 = vld [vmem:[%s7366_s1 + $0x208] sm:$0xff]  ;;  %v4674_v28 = vcombine.high %v288_v18, %v292_v19  ;;  %v4673_v34 = vcombine.low %v288_v18, %v292_v19  ;;  %v237_v19 = vld [vmem:[%s7366_s1 + $0x4f0] sm:$0xff] }
  0x72   :  { %1886 = vmatprep.subr.bf16.mxu0 %v4602_v32  ;;  %v148_v23 = vld [vmem:[%s7366_s1 + $0x228] sm:$0xff] }
  0x73   :  { %1848 = vmatpush1.bf16.msra.mxu1 %v4465_v29  ;;  %v280_v26 = vld [vmem:[%s7366_s1 + $0x648] sm:$0xff]  ;;  %v4530_v33 = vcombine.high %v144_v22, %v148_v23  ;;  %v4529_v0 = vcombine.low %v144_v22, %v148_v23  ;;  %v97_v23 = vld [vmem:[%s7366_s1 + $0x90] sm:$0xff] }
  0x74   :  { %1849 = vmatprep.subr.bf16.mxu1 %v4586_v35  ;;  %v284_v29 = vld [vmem:[%s7366_s1 + $0x668] sm:$0xff] }
  0x75   :  { %1887 = vmatpush1.bf16.msra.mxu0 %v4601_v36  ;;  %v336_v32 = vld [vmem:[%s7366_s1 + $0x808] sm:$0xff]  ;;  %v4666_v6 = vcombine.high %v280_v26, %v284_v29 }
  0x76   :  { %1888 = vmatprep.subr.bf16.mxu0 %v4594_v39  ;;  %v272_v35 = vld [vmem:[%s7366_s1 + $0x608] sm:$0xff]  ;;  %v269_v39 = vld [vmem:[%s7366_s1 + $0x5f0] sm:$0xff]  ;;  %v4722_v40 = vcombine.high %v336_v32, %v336_v32  ;;  %v4721_v41 = vcombine.low %v336_v32, %v336_v32 }
  0x77   :  { %1850 = vmatpush2.bf16.msra.mxu1 %v4585_v37  ;;  %v276_v36 = vld [vmem:[%s7366_s1 + $0x628] sm:$0xff]  ;;  %v265_v37 = vld [vmem:[%s7366_s1 + $0x5d0] sm:$0xff] }
  0x78   :  { %1851 = vmatprep.subr.bf16.mxu1 %v4578_v42  ;;  %v4665_v42 = vcombine.low %v280_v26, %v284_v29  ;;  %v4657_v50 = vcombine.low %v272_v35, %v276_v36  ;;  %v4651_v59 = vcombine.low %v265_v37, %v269_v39  ;;  %v225_v26 = vld [vmem:[%s7366_s1 + $0x490] sm:$0xff] }
  0x79   :  { %1889 = vmatpush1.bf16.msra.mxu0 %v4593_v43  ;;  %v4658_v43 = vcombine.high %v272_v35, %v276_v36  ;;  %v89_v29 = vld [vmem:[%s7366_s1 + $0x50] sm:$0xff] }
  0x7a   :  { %1890 = vmatprep.subr.bf16.mxu0 %v4714_v49  ;;  %v4652_v49 = vcombine.high %v265_v37, %v269_v39  ;;  %v93_v32 = vld [vmem:[%s7366_s1 + $0x70] sm:$0xff] }
  0x7b   :  { %1852 = vmatpush2.bf16.msra.mxu1 %v4577_v48  ;;  %v1693_v48 = vsel %vm1685_vm0, %v4721_v41, 0  ;;  %v217_v36 = vld [vmem:[%s7366_s1 + $0x450] sm:$0xff]  ;;  %v4476_v41 = vcombine.high %v89_v29, %v93_v32 }
  0x7c   :  { %1853 = vmatprep.subr.bf16.mxu1 %v4570_v52  ;;  %v133_v52 = vld [vmem:[%s7366_s1 + $0x1b0] sm:$0xff] }
  0x7d   :  { %1891 = vmatpush2.bf16.msra.mxu0 %v4713_v53  ;;  %v4524_v53 = vcombine.high %v137_v46, %v141_v47  ;;  %v81_v37 = vld [vmem:[%s7366_s1 + $0x10] sm:$0xff] }
  0x7e   :  { %1892 = vmatprep.subr.bf16.mxu0 %v4706_v57  ;;  %v121_v57 = vld [vmem:[%s7366_s1 + $0x150] sm:$0xff] }
  0x7f   :  { %1854 = vmatpush2.bf16.msra.mxu1 %v4569_v56  ;;  %v4523_v56 = vcombine.low %v137_v46, %v141_v47  ;;  %v85_v39 = vld [vmem:[%s7366_s1 + $0x30] sm:$0xff]  ;;  %v4475_v47 = vcombine.low %v89_v29, %v93_v32 }
  0x80   :  { %1855 = vmatprep.subr.bf16.mxu1 %v4562_v60  ;;  %v4516_v60 = vcombine.high %v129_v51, %v133_v52  ;;  %v213_v46 = vld [vmem:[%s7366_s1 + $0x430] sm:$0xff]  ;;  %v4467_v55 = vcombine.low %v81_v37, %v85_v39 }
  0x81   :  { %1893 = vmatpush2.bf16.msra.mxu0 %v4705_v61  ;;  %v249_v61 = vld [vmem:[%s7366_s1 + $0x550] sm:$0xff] }
  0x82   :  { %1894 = vmatprep.subr.bf16.mxu0 %v4698_v2  ;;  %v113_v2 = vld [vmem:[%s7366_s1 + $0x110] sm:$0xff]  ;;  %v4636_v9 = vcombine.high %v249_v61, %v253_v62  ;;  %v4635_v14 = vcombine.low %v249_v61, %v253_v62 }
  0x83   :  { %1856 = vmatpush2.bf16.msra.mxu1 %v4561_v1  ;;  %v4515_v1 = vcombine.low %v129_v51, %v133_v52  ;;  %v4468_v51 = vcombine.high %v81_v37, %v85_v39  ;;  %v321_v61 = vld [vmem:[%s7366_s1 + $0x790] sm:$0xff] }
  0x84   :  { %1857 = vmatprep.subr.bf16.mxu1 %v4554_v5  ;;  %v4508_v5 = vcombine.high %v121_v57, %v125_v58  ;;  %v325_v62 = vld [vmem:[%s7366_s1 + $0x7b0] sm:$0xff] }
  0x85   :  { %1895 = vmatpush2.bf16.msra.mxu0 %v4697_v7  ;;  %v241_v7 = vld [vmem:[%s7366_s1 + $0x510] sm:$0xff] }
  0x86   :  { %1896 = vmatprep.subr.bf16.mxu0 %v4690_v11  ;;  %v105_v11 = vld [vmem:[%s7366_s1 + $0xd0] sm:$0xff]  ;;  %v4628_v18 = vcombine.high %v241_v7, %v245_v8 }
  0x87   :  { %1858 = vmatpush2.bf16.msra.mxu1 %v4553_v10  ;;  %v4507_v10 = vcombine.low %v121_v57, %v125_v58  ;;  %v4492_v22 = vcombine.high %v105_v11, %v109_v13  ;;  %v197_v57 = vld [vmem:[%s7366_s1 + $0x3b0] sm:$0xff] }
  0x88   :  { %1859 = vmatprep.subr.bf16.mxu1 %v4546_v15  ;;  %v4500_v15 = vcombine.high %v113_v2, %v117_v3  ;;  %v165_v29 = vld [vmem:[%s7366_s1 + $0x2b0] sm:$0xff] }
  0x89   :  { %1897 = vmatpush2.bf16.msra.mxu0 %v4689_v16  ;;  %v233_v16 = vld [vmem:[%s7366_s1 + $0x4d0] sm:$0xff] }
  0x8a   :  { %1898 = vmatprep.subr.bf16.mxu0 %v4682_v21  ;;  %v4627_v21 = vcombine.low %v241_v7, %v245_v8  ;;  %v313_v7 = vld [vmem:[%s7366_s1 + $0x750] sm:$0xff] }
  0x8b   :  { %1860 = vmatpush2.bf16.msra.mxu1 %v4545_v20  ;;  %v4499_v20 = vcombine.low %v113_v2, %v117_v3  ;;  %v189_v2 = vld [vmem:[%s7366_s1 + $0x370] sm:$0xff] }
  0x8c   :  { %1861 = vmatprep.subr.bf16.mxu1 %v4538_v24  ;;  %v101_v24 = vld [vmem:[%s7366_s1 + $0xb0] sm:$0xff] }
  0x8d   :  { %1899 = vmatpush2.bf16.msra.mxu0 %v4681_v25  ;;  %v4620_v25 = vcombine.high %v233_v16, %v237_v19  ;;  %v317_v8 = vld [vmem:[%s7366_s1 + $0x770] sm:$0xff] }
  0x8e   :  { %1900 = vmatprep.subr.bf16.mxu0 %v4674_v28  ;;  %v4491_v28 = vcombine.low %v105_v11, %v109_v13  ;;  %v181_v11 = vld [vmem:[%s7366_s1 + $0x330] sm:$0xff]  ;;  %v4707_v13 = vcombine.low %v321_v61, %v325_v62 }
  0x8f   :  { %1862 = vmatpush2.bf16.msra.mxu1 %v4537_v27  ;;  %v229_v27 = vld [vmem:[%s7366_s1 + $0x4b0] sm:$0xff] }
  0x90   :  { %1863 = vmatprep.subr.bf16.mxu1 %v4530_v33  ;;  %v4619_v33 = vcombine.low %v233_v16, %v237_v19  ;;  %v4612_v35 = vcombine.high %v225_v26, %v229_v27  ;;  %v305_v16 = vld [vmem:[%s7366_s1 + $0x710] sm:$0xff] }
  0x91   :  { %1901 = vmatpush2.bf16.msra.mxu0 %v4673_v34  ;;  %v4484_v34 = vcombine.high %v97_v23, %v101_v24  ;;  %v157_v37 = vld [vmem:[%s7366_s1 + $0x270] sm:$0xff] }
  0x92   :  { %1902 = vmatprep.subr.bf16.mxu0 %v4666_v6  ;;  %v4483_v6 = vcombine.low %v97_v23, %v101_v24 }
  0x93   :  { %1864 = vmatpush2.bf16.msra.mxu1 %v4529_v0  ;;  %v221_v0 = vld [vmem:[%s7366_s1 + $0x470] sm:$0xff] }
  0x94   :  { %4729 = vmatprep.subr.msk.bf16.mxu1 %vm1685_vm0, %v4722_v40  ;;  %v4611_v40 = vcombine.low %v225_v26, %v229_v27  ;;  %v301_v26 = vld [vmem:[%s7366_s1 + $0x6f0] sm:$0xff] }
  0x95   :  { %1903 = vmatpush2.bf16.msra.mxu0 %v4665_v42  ;;  %v4604_v42 = vcombine.high %v217_v36, %v221_v0 }
  0x96   :  { %1866 = vmatmul.mubr.bf16.vlgmr.msra.gmra.mxu1 %v5802_v30  ;;  %1904 = vmatprep.subr.bf16.mxu0 %v4658_v43  ;;  %v209_v43 = vld [vmem:[%s7366_s1 + $0x410] sm:$0xff] }
  0x97   :  { %1930 = vmatpush1.bf16.msra.mxu1 %v1693_v48  ;;  %1947 = vmatprep.mubr.bf16.mxu1 %v5520_v38  ;;  %v201_v48 = vld [vmem:[%s7366_s1 + $0x3d0] sm:$0xff]  ;;  %v4596_v52 = vcombine.high %v209_v43, %v213_v46  ;;  %v4595_v58 = vcombine.low %v209_v43, %v213_v46 }
  0x98   :  { %1997 = vmatprep.subr.bf16.mxu1 %v4652_v49  ;;  %v205_v49 = vld [vmem:[%s7366_s1 + $0x3f0] sm:$0xff] }
  0x99   :  { %1905 = vmatpush2.bf16.msra.mxu0 %v4657_v50  ;;  %v4603_v50 = vcombine.low %v217_v36, %v221_v0  ;;  %v293_v36 = vld [vmem:[%s7366_s1 + $0x6b0] sm:$0xff] }
  0x9a   :  { %1956 = vmatprep.subr.bf16.mxu0 %v4524_v53  ;;  %v329_v53 = vld [vmem:[%s7366_s1 + $0x7d0] sm:$0xff] }
  0x9b   :  { %v4715_v3 = vcombine.low %v329_v53, %v333_v54  ;;  %v285_v43 = vld [vmem:[%s7366_s1 + $0x670] sm:$0xff] }
  0x9c   :  { %1907 = vmatmul.mubr.bf16.vlgmr.msra.gmra.mxu0 %v5806_v31 }
  0x9d   :  { %1957 = vmatpush1.bf16.msra.mxu0 %v4523_v56  ;;  %1988 = vmatprep.mubr.bf16.mxu0 %v5681_v12  ;;  %v193_v56 = vld [vmem:[%s7366_s1 + $0x390] sm:$0xff] }
  0x9e   :  { %4730 = vmatmul.mubr.msk.bf16.vlgmr.msra.gmra.mxu1 %vm1681_vm1, %v5834_v44  ;;  %1958 = vmatprep.subr.bf16.mxu0 %v4516_v60  ;;  %v4716_v60 = vcombine.high %v329_v53, %v333_v54  ;;  %v277_v53 = vld [vmem:[%s7366_s1 + $0x630] sm:$0xff] }
  0x9f   :  { %1998 = vmatpush1.bf16.msra.mxu1 %v4651_v59  ;;  %2029 = vmatprep.mubr.bf16.mxu1 %v5692_v17  ;;  %v4588_v59 = vcombine.high %v201_v48, %v205_v49 }
  0xa0   :  { %1999 = vmatprep.subr.bf16.mxu1 %v4644_v63  ;;  %v4587_v63 = vcombine.low %v201_v48, %v205_v49  ;;  %v149_v48 = vld [vmem:[%s7366_s1 + $0x230] sm:$0xff] }
  0xa1   :  { %1959 = vmatpush1.bf16.msra.mxu0 %v4515_v1  ;;  %v185_v1 = vld [vmem:[%s7366_s1 + $0x350] sm:$0xff] }
  0xa2   :  { %1960 = vmatprep.subr.bf16.mxu0 %v4508_v5  ;;  %v4708_v5 = vcombine.high %v321_v61, %v325_v62  ;;  %v4571_v19 = vcombine.low %v185_v1, %v189_v2 }
  0xa3   :  { %2000 = vmatpush1.bf16.msra.mxu1 %v4643_v4  ;;  %v4580_v4 = vcombine.high %v193_v56, %v197_v57 }
  0xa4   :  { %2001 = vmatprep.subr.bf16.mxu1 %v4636_v9  ;;  %v4579_v9 = vcombine.low %v193_v56, %v197_v57 }
  0xa5   :  { %1961 = vmatpush1.bf16.msra.mxu0 %v4507_v10  ;;  %v177_v10 = vld [vmem:[%s7366_s1 + $0x310] sm:$0xff] }
  0xa6   :  { %1962 = vmatprep.subr.bf16.mxu0 %v4500_v15  ;;  %v4700_v15 = vcombine.high %v313_v7, %v317_v8  ;;  %v4564_v23 = vcombine.high %v177_v10, %v181_v11  ;;  %v4563_v27 = vcombine.low %v177_v10, %v181_v11 }
  0xa7   :  { %2002 = vmatpush1.bf16.msra.mxu1 %v4635_v14  ;;  %v4572_v14 = vcombine.high %v185_v1, %v189_v2  ;;  %v130_v2 = vld [vmem:[%s7366_s1 + $0x198] sm:$0xff] }
  0xa8   :  { %2003 = vmatprep.subr.bf16.mxu1 %v4628_v18  ;;  %v309_v18 = vld [vmem:[%s7366_s1 + $0x730] sm:$0xff] }
  0xa9   :  { %1963 = vmatpush1.bf16.msra.mxu0 %v4499_v20  ;;  %v169_v20 = vld [vmem:[%s7366_s1 + $0x2d0] sm:$0xff]  ;;  %v4692_v24 = vcombine.high %v305_v16, %v309_v18  ;;  %v4691_v32 = vcombine.low %v305_v16, %v309_v18  ;;  %v258_v16 = vld [vmem:[%s7366_s1 + $0x598] sm:$0xff] }
  0xaa   :  { %1964 = vmatprep.subr.bf16.mxu0 %v4492_v22  ;;  %v4699_v22 = vcombine.low %v313_v7, %v317_v8  ;;  %v270_v7 = vld [vmem:[%s7366_s1 + $0x5f8] sm:$0xff] }
  0xab   :  { %2004 = vmatpush1.bf16.msra.mxu1 %v4627_v21  ;;  %v173_v21 = vld [vmem:[%s7366_s1 + $0x2f0] sm:$0xff] }
  0xac   :  { %2005 = vmatprep.subr.bf16.mxu1 %v4620_v25  ;;  %v297_v25 = vld [vmem:[%s7366_s1 + $0x6d0] sm:$0xff]  ;;  %v4555_v0 = vcombine.low %v169_v20, %v173_v21 }
  0xad   :  { %1965 = vmatpush1.bf16.msra.mxu0 %v4491_v28  ;;  %v161_v28 = vld [vmem:[%s7366_s1 + $0x290] sm:$0xff]  ;;  %v4683_v39 = vcombine.low %v297_v25, %v301_v26 }
  0xae   :  { %1966 = vmatprep.subr.bf16.mxu0 %v4484_v34  ;;  %v4684_v34 = vcombine.high %v297_v25, %v301_v26  ;;  %v4547_v46 = vcombine.low %v161_v28, %v165_v29 }
  0xaf   :  { %2006 = vmatpush1.bf16.msra.mxu1 %v4619_v33  ;;  %v4556_v33 = vcombine.high %v169_v20, %v173_v21  ;;  %v114_v20 = vld [vmem:[%s7366_s1 + $0x118] sm:$0xff] }
  0xb0   :  { %2007 = vmatprep.subr.bf16.mxu1 %v4612_v35  ;;  %v289_v35 = vld [vmem:[%s7366_s1 + $0x690] sm:$0xff]  ;;  %v118_v21 = vld [vmem:[%s7366_s1 + $0x138] sm:$0xff] }
  0xb1   :  { %1967 = vmatpush1.bf16.msra.mxu0 %v4483_v6  ;;  %v153_v6 = vld [vmem:[%s7366_s1 + $0x250] sm:$0xff]  ;;  %v4675_v49 = vcombine.low %v289_v35, %v293_v36 }
  0xb2   :  { %1968 = vmatprep.subr.bf16.mxu0 %v4476_v41  ;;  %v4676_v41 = vcombine.high %v289_v35, %v293_v36  ;;  %v4539_v54 = vcombine.low %v153_v6, %v157_v37 }
  0xb3   :  { %2008 = vmatpush1.bf16.msra.mxu1 %v4611_v40  ;;  %v4548_v40 = vcombine.high %v161_v28, %v165_v29  ;;  %v106_v28 = vld [vmem:[%s7366_s1 + $0xd8] sm:$0xff] }
  0xb4   :  { %2009 = vmatprep.subr.bf16.mxu1 %v4604_v42  ;;  %v281_v42 = vld [vmem:[%s7366_s1 + $0x650] sm:$0xff] }
  0xb5   :  { %1969 = vmatpush1.bf16.msra.mxu0 %v4475_v47  ;;  %v145_v47 = vld [vmem:[%s7366_s1 + $0x210] sm:$0xff] }
  0xb6   :  { %1970 = vmatprep.subr.bf16.mxu0 %v4468_v51  ;;  %v4668_v51 = vcombine.high %v281_v42, %v285_v43  ;;  %v4532_v56 = vcombine.high %v145_v47, %v149_v48  ;;  %v4531_v61 = vcombine.low %v145_v47, %v149_v48 }
  0xb7   :  { %2010 = vmatpush1.bf16.msra.mxu1 %v4603_v50  ;;  %v4540_v50 = vcombine.high %v153_v6, %v157_v37  ;;  %v102_v6 = vld [vmem:[%s7366_s1 + $0xb8] sm:$0xff] }
  0xb8   :  { %2011 = vmatprep.subr.bf16.mxu1 %v4596_v52  ;;  %v273_v52 = vld [vmem:[%s7366_s1 + $0x610] sm:$0xff] }
  0xb9   :  { %1971 = vmatpush1.bf16.msra.mxu0 %v4467_v55  ;;  %v4667_v55 = vcombine.low %v281_v42, %v285_v43  ;;  %v4660_v57 = vcombine.high %v273_v52, %v277_v53  ;;  %v4659_v62 = vcombine.low %v273_v52, %v277_v53  ;;  %v238_v42 = vld [vmem:[%s7366_s1 + $0x4f8] sm:$0xff] }
  0xba   :  { %1972 = vmatprep.subr.bf16.mxu0 %v4588_v59  ;;  %v138_v59 = vld [vmem:[%s7366_s1 + $0x1d8] sm:$0xff] }
  0xbb   :  { %2012 = vmatpush1.bf16.msra.mxu1 %v4595_v58  ;;  %v337_v58 = vld [vmem:[%s7366_s1 + $0x810] sm:$0xff]  ;;  %v90_v43 = vld [vmem:[%s7366_s1 + $0x58] sm:$0xff] }
  0xbc   :  { %2013 = vmatprep.subr.bf16.mxu1 %v4716_v60  ;;  %v142_v60 = vld [vmem:[%s7366_s1 + $0x1f8] sm:$0xff]  ;;  %v4723_v1 = vcombine.low %v337_v58, %v337_v58 }
  0xbd   :  { %1973 = vmatpush2.bf16.msra.mxu0 %v4587_v63  ;;  %v4724_v63 = vcombine.high %v337_v58, %v337_v58  ;;  %v4525_v8 = vcombine.low %v138_v59, %v142_v60  ;;  %v230_v52 = vld [vmem:[%s7366_s1 + $0x4b8] sm:$0xff] }
  0xbe   :  { %1974 = vmatprep.subr.bf16.mxu0 %v4580_v4  ;;  %v134_v4 = vld [vmem:[%s7366_s1 + $0x1b8] sm:$0xff] }
  0xbf   :  { %2014 = vmatpush2.bf16.msra.mxu1 %v4715_v3  ;;  %v4526_v3 = vcombine.high %v138_v59, %v142_v60  ;;  %v4518_v10 = vcombine.high %v130_v2, %v134_v4  ;;  %v82_v53 = vld [vmem:[%s7366_s1 + $0x18] sm:$0xff] }
  0xc0   :  { %2015 = vmatprep.subr.bf16.mxu1 %v4708_v5  ;;  %v266_v5 = vld [vmem:[%s7366_s1 + $0x5d8] sm:$0xff] }
  0xc1   :  { %1975 = vmatpush2.bf16.msra.mxu0 %v4579_v9  ;;  %v1699_v9 = vsel %vm1685_vm0, %v4723_v1, 0  ;;  %v4654_v11 = vcombine.high %v266_v5, %v270_v7  ;;  %v218_v59 = vld [vmem:[%s7366_s1 + $0x458] sm:$0xff] }
  0xc2   :  { %1976 = vmatprep.subr.bf16.mxu0 %v4572_v14  ;;  %v126_v14 = vld [vmem:[%s7366_s1 + $0x178] sm:$0xff] }
  0xc3   :  { %2016 = vmatpush2.bf16.msra.mxu1 %v4707_v13  ;;  %v122_v13 = vld [vmem:[%s7366_s1 + $0x158] sm:$0xff] }
  0xc4   :  { %2017 = vmatprep.subr.bf16.mxu1 %v4700_v15  ;;  %v4517_v15 = vcombine.low %v130_v2, %v134_v4  ;;  %v4510_v18 = vcombine.high %v122_v13, %v126_v14  ;;  %v4509_v25 = vcombine.low %v122_v13, %v126_v14  ;;  %v222_v60 = vld [vmem:[%s7366_s1 + $0x478] sm:$0xff] }
  0xc5   :  { %1977 = vmatpush2.bf16.msra.mxu0 %v4571_v19  ;;  %v262_v19 = vld [vmem:[%s7366_s1 + $0x5b8] sm:$0xff]  ;;  %v4606_v2 = vcombine.high %v218_v59, %v222_v60 }
  0xc6   :  { %1978 = vmatprep.subr.bf16.mxu0 %v4564_v23  ;;  %v250_v23 = vld [vmem:[%s7366_s1 + $0x558] sm:$0xff]  ;;  %v4646_v26 = vcombine.high %v258_v16, %v262_v19  ;;  %v4645_v29 = vcombine.low %v258_v16, %v262_v19 }
  0xc7   :  { %2018 = vmatpush2.bf16.msra.mxu1 %v4699_v22  ;;  %v4653_v22 = vcombine.low %v266_v5, %v270_v7  ;;  %v210_v4 = vld [vmem:[%s7366_s1 + $0x418] sm:$0xff] }
  0xc8   :  { %2019 = vmatprep.subr.bf16.mxu1 %v4692_v24  ;;  %v254_v24 = vld [vmem:[%s7366_s1 + $0x578] sm:$0xff] }
  0xc9   :  { %1979 = vmatpush2.bf16.msra.mxu0 %v4563_v27  ;;  %v4502_v27 = vcombine.high %v114_v20, %v118_v21  ;;  %v4638_v35 = vcombine.high %v250_v23, %v254_v24  ;;  %v4637_v37 = vcombine.low %v250_v23, %v254_v24  ;;  %v214_v5 = vld [vmem:[%s7366_s1 + $0x438] sm:$0xff] }
  0xca   :  { %1980 = vmatprep.subr.bf16.mxu0 %v4556_v33  ;;  %v246_v33 = vld [vmem:[%s7366_s1 + $0x538] sm:$0xff]  ;;  %v4597_v19 = vcombine.low %v210_v4, %v214_v5 }
  0xcb   :  { %2020 = vmatpush2.bf16.msra.mxu1 %v4691_v32  ;;  %v242_v32 = vld [vmem:[%s7366_s1 + $0x518] sm:$0xff] }
  0xcc   :  { %2021 = vmatprep.subr.bf16.mxu1 %v4684_v34  ;;  %v4501_v34 = vcombine.low %v114_v20, %v118_v21  ;;  %v4629_v47 = vcombine.low %v242_v32, %v246_v33  ;;  %v194_v7 = vld [vmem:[%s7366_s1 + $0x398] sm:$0xff] }
  0xcd   :  { %1981 = vmatpush2.bf16.msra.mxu0 %v4555_v0  ;;  %v98_v0 = vld [vmem:[%s7366_s1 + $0x98] sm:$0xff] }
  0xce   :  { %1982 = vmatprep.subr.bf16.mxu0 %v4548_v40  ;;  %v4486_v40 = vcombine.high %v98_v0, %v102_v6  ;;  %v4485_v48 = vcombine.low %v98_v0, %v102_v6  ;;  %v330_v14 = vld [vmem:[%s7366_s1 + $0x7d8] sm:$0xff] }
  0xcf   :  { %2022 = vmatpush2.bf16.msra.mxu1 %v4683_v39  ;;  %v186_v16 = vld [vmem:[%s7366_s1 + $0x358] sm:$0xff] }
  0xd0   :  { %2023 = vmatprep.subr.bf16.mxu1 %v4676_v41  ;;  %v234_v41 = vld [vmem:[%s7366_s1 + $0x4d8] sm:$0xff] }
  0xd1   :  { %1983 = vmatpush2.bf16.msra.mxu0 %v4547_v46  ;;  %v94_v46 = vld [vmem:[%s7366_s1 + $0x78] sm:$0xff] }
  0xd2   :  { %1984 = vmatprep.subr.bf16.mxu0 %v4540_v50  ;;  %v4478_v50 = vcombine.high %v90_v43, %v94_v46  ;;  %v322_v23 = vld [vmem:[%s7366_s1 + $0x798] sm:$0xff] }
  0xd3   :  { %2024 = vmatpush2.bf16.msra.mxu1 %v4675_v49  ;;  %v4622_v49 = vcombine.high %v234_v41, %v238_v42  ;;  %v326_v24 = vld [vmem:[%s7366_s1 + $0x7b8] sm:$0xff] }
  0xd4   :  { %2025 = vmatprep.subr.bf16.mxu1 %v4668_v51  ;;  %v226_v51 = vld [vmem:[%s7366_s1 + $0x498] sm:$0xff] }
  0xd5   :  { %1985 = vmatpush2.bf16.msra.mxu0 %v4539_v54  ;;  %v86_v54 = vld [vmem:[%s7366_s1 + $0x38] sm:$0xff] }
  0xd6   :  { %1986 = vmatprep.subr.bf16.mxu0 %v4532_v56  ;;  %v4477_v56 = vcombine.low %v90_v43, %v94_v46  ;;  %v4470_v58 = vcombine.high %v82_v53, %v86_v54  ;;  %v4469_v1 = vcombine.low %v82_v53, %v86_v54  ;;  %v343_v53 = vsub.s32 0, %v5633_v45 }
  0xd7   :  { %2026 = vmatpush2.bf16.msra.mxu1 %v4667_v55  ;;  %v4621_v55 = vcombine.low %v234_v41, %v238_v42  ;;  %v166_v41 = vld [vmem:[%s7366_s1 + $0x2b8] sm:$0xff] }
  0xd8   :  { %2027 = vmatprep.subr.bf16.mxu1 %v4660_v57  ;;  %v4614_v57 = vcombine.high %v226_v51, %v230_v52 }
  0xd9   :  { %1987 = vmatpush2.bf16.msra.mxu0 %v4531_v61  ;;  %v202_v61 = vld [vmem:[%s7366_s1 + $0x3d8] sm:$0xff] }
  0xda   :  { %4731 = vmatprep.subr.msk.bf16.mxu0 %vm1685_vm0, %v4724_v63  ;;  %v4613_v63 = vcombine.low %v226_v51, %v230_v52  ;;  %v158_v51 = vld [vmem:[%s7366_s1 + $0x278] sm:$0xff] }
  0xdb   :  { %2028 = vmatpush2.bf16.msra.mxu1 %v4659_v62  ;;  %v206_v62 = vld [vmem:[%s7366_s1 + $0x3f8] sm:$0xff] }
  0xdc   :  { %2079 = vmatprep.subr.bf16.mxu1 %v4526_v3  ;;  %1989 = vmatmul.mubr.bf16.vlgmr.msra.gmra.mxu0 %v5802_v30  ;;  %v4590_v3 = vcombine.high %v202_v61, %v206_v62 }
  0xdd   :  { %2053 = vmatpush1.bf16.msra.mxu0 %v1699_v9  ;;  %2070 = vmatprep.mubr.bf16.mxu0 %v5520_v38  ;;  %v4605_v9 = vcombine.low %v218_v59, %v222_v60  ;;  %v294_v59 = vld [vmem:[%s7366_s1 + $0x6b8] sm:$0xff] }
  0xde   :  { %2030 = vmatmul.mubr.bf16.vlgmr.msra.gmra.mxu1 %v5806_v31  ;;  %2120 = vmatprep.subr.bf16.mxu0 %v4654_v11  ;;  %v4598_v11 = vcombine.high %v210_v4, %v214_v5  ;;  %v146_v60 = vld [vmem:[%s7366_s1 + $0x218] sm:$0xff] }
  0xdf   :  { %2080 = vmatpush1.bf16.msra.mxu1 %v4525_v8  ;;  %2111 = vmatprep.mubr.bf16.mxu1 %v5681_v12  ;;  %v110_v12 = vld [vmem:[%s7366_s1 + $0xf8] sm:$0xff] }
  0xe0   :  { %2081 = vmatprep.subr.bf16.mxu1 %v4518_v10  ;;  %v4494_v36 = vcombine.high %v106_v28, %v110_v12  ;;  %v4493_v39 = vcombine.low %v106_v28, %v110_v12  ;;  %v198_v8 = vld [vmem:[%s7366_s1 + $0x3b8] sm:$0xff]  ;;  %v4589_v10 = vcombine.low %v202_v61, %v206_v62  ;;  %v4710_v12 = vcombine.high %v322_v23, %v326_v24 }
  0xe1   :  { %v4582_v13 = vcombine.high %v194_v7, %v198_v8  ;;  %v4581_v20 = vcombine.low %v194_v7, %v198_v8  ;;  %v150_v61 = vld [vmem:[%s7366_s1 + $0x238] sm:$0xff] }
  0xe2   :  { %v4534_v4 = vcombine.high %v146_v60, %v150_v61  ;;  %v282_v5 = vld [vmem:[%s7366_s1 + $0x658] sm:$0xff] }
  0xe3   :  { %2082 = vmatpush1.bf16.msra.mxu1 %v4517_v15  ;;  %v334_v15 = vld [vmem:[%s7366_s1 + $0x7f8] sm:$0xff] }
  0xe4   :  { %2083 = vmatprep.subr.bf16.mxu1 %v4510_v18  ;;  %4732 = vmatmul.mubr.msk.bf16.vlgmr.msra.gmra.mxu0 %vm1681_vm1, %v5834_v44  ;;  %v190_v18 = vld [vmem:[%s7366_s1 + $0x378] sm:$0xff]  ;;  %v4718_v21 = vcombine.high %v330_v14, %v334_v15 }
  0xe5   :  { %2121 = vmatpush1.bf16.msra.mxu0 %v4653_v22  ;;  %2152 = vmatprep.mubr.bf16.mxu0 %v5692_v17  ;;  %v4630_v17 = vcombine.high %v242_v32, %v246_v33  ;;  %v4574_v22 = vcombine.high %v186_v16, %v190_v18  ;;  %v4573_v28 = vcombine.low %v186_v16, %v190_v18  ;;  %v314_v32 = vld [vmem:[%s7366_s1 + $0x758] sm:$0xff] }
  0xe6   :  { %2122 = vmatprep.subr.bf16.mxu0 %v4646_v26  ;;  %v182_v26 = vld [vmem:[%s7366_s1 + $0x338] sm:$0xff]  ;;  %v4533_v16 = vcombine.low %v146_v60, %v150_v61  ;;  %v5101_v60 = vld [vmem:[%s7368_s3 + $0x60] ss:$16 sps:$4 sm:$0xff]   ;;  %v5109_v61 = vld [vmem:[%s7368_s3 + $0x44] ss:$16 sps:$4 sm:$0xff]  }
  0xe7   :  { %2084 = vmatpush1.bf16.msra.mxu1 %v4509_v25  ;;  %v178_v25 = vld [vmem:[%s7366_s1 + $0x318] sm:$0xff] }
  0xe8   :  { %2085 = vmatprep.subr.bf16.mxu1 %v4502_v27  ;;  %v4717_v27 = vcombine.low %v330_v14, %v334_v15  ;;  %v318_v33 = vld [vmem:[%s7366_s1 + $0x778] sm:$0xff]  ;;  %v4565_v0 = vcombine.low %v178_v25, %v182_v26 }
  0xe9   :  { %2123 = vmatpush1.bf16.msra.mxu0 %v4645_v29  ;;  %v4566_v29 = vcombine.high %v178_v25, %v182_v26  ;;  %v4702_v6 = vcombine.high %v314_v32, %v318_v33  ;;  %v4701_v42 = vcombine.low %v314_v32, %v318_v33  ;;  %v286_v7 = vld [vmem:[%s7366_s1 + $0x678] sm:$0xff] }
  0xea   :  { %2124 = vmatprep.subr.bf16.mxu0 %v4638_v35  ;;  %v174_v35 = vld [vmem:[%s7366_s1 + $0x2f8] sm:$0xff]  ;;  %v4670_v18 = vcombine.high %v282_v5, %v286_v7 }
  0xeb   :  { %2086 = vmatpush1.bf16.msra.mxu1 %v4501_v34  ;;  %v170_v34 = vld [vmem:[%s7366_s1 + $0x2d8] sm:$0xff] }
  0xec   :  { %2087 = vmatprep.subr.bf16.mxu1 %v4494_v36  ;;  %v4709_v36 = vcombine.low %v322_v23, %v326_v24  ;;  %v4557_v43 = vcombine.low %v170_v34, %v174_v35  ;;  %v274_v23 = vld [vmem:[%s7366_s1 + $0x618] sm:$0xff] }
  0xed   :  { %2125 = vmatpush1.bf16.msra.mxu0 %v4637_v37  ;;  %v4558_v37 = vcombine.high %v170_v34, %v174_v35  ;;  %v278_v24 = vld [vmem:[%s7366_s1 + $0x638] sm:$0xff]  ;;  %v5088_v34 = vld [vmem:[%s7368_s3 + $0x2e4] ss:$16 sps:$4 sm:$0xff]  }
  0xee   :  { %2126 = vmatprep.subr.bf16.mxu0 %v4630_v17  ;;  %v310_v17 = vld [vmem:[%s7366_s1 + $0x738] sm:$0xff] }
  0xef   :  { %2088 = vmatpush1.bf16.msra.mxu1 %v4493_v39  ;;  %v306_v39 = vld [vmem:[%s7366_s1 + $0x718] sm:$0xff] }
  0xf0   :  { %2089 = vmatprep.subr.bf16.mxu1 %v4486_v40  ;;  %v162_v40 = vld [vmem:[%s7366_s1 + $0x298] sm:$0xff]  ;;  %v4694_v46 = vcombine.high %v306_v39, %v310_v17  ;;  %v4693_v52 = vcombine.low %v306_v39, %v310_v17  ;;  %v5082_v39 = vld [vmem:[%s7368_s3 + $0xe4] ss:$16 sps:$4 sm:$0xff]  }
  0xf1   :  { %2127 = vmatpush1.bf16.msra.mxu0 %v4629_v47  ;;  %v4550_v47 = vcombine.high %v162_v40, %v166_v41  ;;  %v4549_v54 = vcombine.low %v162_v40, %v166_v41 }
  0xf2   :  { %2128 = vmatprep.subr.bf16.mxu0 %v4622_v49  ;;  %v302_v49 = vld [vmem:[%s7366_s1 + $0x6f8] sm:$0xff] }
  0xf3   :  { %2090 = vmatpush1.bf16.msra.mxu1 %v4485_v48  ;;  %v298_v48 = vld [vmem:[%s7366_s1 + $0x6d8] sm:$0xff] }
  0xf4   :  { %2091 = vmatprep.subr.bf16.mxu1 %v4478_v50  ;;  %v154_v50 = vld [vmem:[%s7366_s1 + $0x258] sm:$0xff]  ;;  %v4685_v62 = vcombine.low %v298_v48, %v302_v49 }
  0xf5   :  { %2129 = vmatpush1.bf16.msra.mxu0 %v4621_v55  ;;  %v4686_v55 = vcombine.high %v298_v48, %v302_v49  ;;  %v5083_v48 = vld [vmem:[%s7368_s3 + $0xc0] ss:$16 sps:$4 sm:$0xff]   ;;  %v5091_v49 = vld [vmem:[%s7368_s3 + $0xa4] ss:$16 sps:$4 sm:$0xff]  }
  0xf6   :  { %2130 = vmatprep.subr.bf16.mxu0 %v4614_v57  ;;  %v4542_v57 = vcombine.high %v154_v50, %v158_v51 }
  0xf7   :  { %2092 = vmatpush1.bf16.msra.mxu1 %v4477_v56  ;;  %v6384_v56 = vld [vmem:[%s7367_s2] sm:$0xff] }
  0xf8   :  { %2093 = vmatprep.subr.bf16.mxu1 %v4470_v58  ;;  %v290_v58 = vld [vmem:[%s7366_s1 + $0x698] sm:$0xff] }
  0xf9   :  { %2131 = vmatpush1.bf16.msra.mxu0 %v4613_v63  ;;  %v344_v63 = vrot.slane %v6384_v56, %v343_v53  ;;  %v4677_v14 = vcombine.low %v290_v58, %v294_v59 }
  0xfa   :  { %2132 = vmatprep.subr.bf16.mxu0 %v4606_v2  ;;  %v4541_v2 = vcombine.low %v154_v50, %v158_v51  ;;  %v5089_v50 = vld [vmem:[%s7368_s3 + $0xa0] ss:$16 sps:$4 sm:$0xff]   ;;  %v5097_v51 = vld [vmem:[%s7368_s3 + $0x84] ss:$16 sps:$4 sm:$0xff]  }
  0xfb   :  { %2094 = vmatpush1.bf16.msra.mxu1 %v4469_v1  ;;  %v347_v1 = vsub.s32 1, %v5633_v45 }
  0xfc   :  { %2095 = vmatprep.subr.bf16.mxu1 %v4590_v3  ;;  %v4678_v3 = vcombine.high %v290_v58, %v294_v59  ;;  %v5104_v58 = vld [vmem:[%s7368_s3 + $0x280] ss:$16 sps:$4 sm:$0xff]   ;;  %v5112_v59 = vld [vmem:[%s7368_s3 + $0x264] ss:$16 sps:$4 sm:$0xff]  }
  0xfd   :  { %2133 = vmatpush1.bf16.msra.mxu0 %v4605_v9  ;;  %v338_v9 = vld [vmem:[%s7366_s1 + $0x818] sm:$0xff] }
  0xfe   :  { %2134 = vmatprep.subr.bf16.mxu0 %v4598_v11 }
  0xff   :  { %2096 = vmatpush2.bf16.msra.mxu1 %v4589_v10 }
 0x100   :  { %2097 = vmatprep.subr.bf16.mxu1 %v4582_v13  ;;  %v348_v13 = vrot.slane %v6384_v56, %v347_v1 }
 0x101   :  { %2135 = vmatpush1.bf16.msra.mxu0 %v4597_v19 }
 0x102   :  { %2136 = vmatprep.subr.bf16.mxu0 %v4718_v21  ;;  %v4726_v21 = vcombine.high %v338_v9, %v338_v9 }
 0x103   :  { %2098 = vmatpush2.bf16.msra.mxu1 %v4581_v20 }
 0x104   :  { %2099 = vmatprep.subr.bf16.mxu1 %v4574_v22  ;;  %v4725_v22 = vcombine.low %v338_v9, %v338_v9  ;;  %v5122_v9 = vld [vmem:[%s7368_s3 + $0x220] ss:$16 sps:$4 sm:$0xff]  }
 0x105   :  { %2137 = vmatpush2.bf16.msra.mxu0 %v4717_v27 }
 0x106   :  { %2138 = vmatprep.subr.bf16.mxu0 %v4710_v12  ;;  %v1705_v33 = vsel %vm1685_vm0, %v4725_v22, 0  ;;  %v5139_v22 = vld [vmem:[%s7368_s3 + $0x1a4] ss:$16 sps:$4 sm:$0xff]  }
 0x107   :  { %2100 = vmatpush2.bf16.msra.mxu1 %v4573_v28  ;;  %v4669_v28 = vcombine.low %v282_v5, %v286_v7  ;;  %v5124_v5 = vld [vmem:[%s7368_s3 + $0x224] ss:$16 sps:$4 sm:$0xff]   ;;  %v5113_v7 = vld [vmem:[%s7368_s3 + $0x20] ss:$16 sps:$4 sm:$0xff]  }
 0x108   :  { %2101 = vmatprep.subr.bf16.mxu1 %v4566_v29  ;;  %v4662_v29 = vcombine.high %v274_v23, %v278_v24 }
 0x109   :  { %2139 = vmatpush2.bf16.msra.mxu0 %v4709_v36 }
 0x10a   :  { %2140 = vmatprep.subr.bf16.mxu0 %v4702_v6  ;;  %v4661_v6 = vcombine.low %v274_v23, %v278_v24  ;;  %v5140_v23 = vld [vmem:[%s7368_s3 + $0x3c0] ss:$16 sps:$4 sm:$0xff]   ;;  %v5148_v24 = vld [vmem:[%s7368_s3 + $0x3a4] ss:$16 sps:$4 sm:$0xff]  }
 0x10b   :  { %2102 = vmatpush2.bf16.msra.mxu1 %v4565_v0 }
 0x10c   :  { %2103 = vmatprep.subr.bf16.mxu1 %v4558_v37 }
 0x10d   :  { %2141 = vmatpush2.bf16.msra.mxu0 %v4701_v42 }
 0x10e   :  { %2142 = vmatprep.subr.bf16.mxu0 %v4694_v46 }
 0x10f   :  { %2104 = vmatpush2.bf16.msra.mxu1 %v4557_v43  ;;  %v5085_v43 = vld [vmem:[%s7368_s3 + $0xc4] ss:$16 sps:$4 sm:$0xff]  }
 0x110   :  { %2105 = vmatprep.subr.bf16.mxu1 %v4550_v47  ;;  %v5094_v47 = vld [vmem:[%s7368_s3 + $0x2c4] ss:$16 sps:$4 sm:$0xff]  }
 0x111   :  { %2143 = vmatpush2.bf16.msra.mxu0 %v4693_v52  ;;  %v5098_v52 = vld [vmem:[%s7368_s3 + $0x2a0] ss:$16 sps:$4 sm:$0xff]  }
 0x112   :  { %2144 = vmatprep.subr.bf16.mxu0 %v4686_v55  ;;  %v5095_v55 = vld [vmem:[%s7368_s3 + $0x80] ss:$16 sps:$4 sm:$0xff]  }
 0x113   :  { %2106 = vmatpush2.bf16.msra.mxu1 %v4549_v54  ;;  %v5106_v54 = vld [vmem:[%s7368_s3 + $0x284] ss:$16 sps:$4 sm:$0xff]  }
 0x114   :  { %2107 = vmatprep.subr.bf16.mxu1 %v4542_v57  ;;  %v1744_v8 = vpop.f32.mrf.mxu0  ;;  %v5103_v57 = vld [vmem:[%s7368_s3 + $0x64] ss:$16 sps:$4 sm:$0xff]  }
 0x115   :  { %2145 = vmatpush2.bf16.msra.mxu0 %v4685_v62  ;;  %v1745_v10 = vadd.f32 %v1744_v8, %v344_v63  ;;  %v5110_v62 = vld [vmem:[%s7368_s3 + $0x260] ss:$16 sps:$4 sm:$0xff]   ;;  %v5118_v63 = vld [vmem:[%s7368_s3 + $0x244] ss:$16 sps:$4 sm:$0xff]  }
 0x116   :  { %v1785_v11 = vpop.f32.mrf.mxu1  ;;  %v1746_v15 = vpop.f32.mrf.mxu0  ;;  %2146 = vmatprep.subr.bf16.mxu0 %v4678_v3  ;;  %v5115_v3 = vld [vmem:[%s7368_s3 + $0x24] ss:$16 sps:$4 sm:$0xff]  }
 0x117   :  { %2108 = vmatpush2.bf16.msra.mxu1 %v4541_v2  ;;  %v1786_v19 = vadd.f32 %v1785_v11, %v1745_v10  ;;  %v1747_v26 = vadd.f32 %v1746_v15, %v348_v13  ;;  %v5107_v2 = vld [vmem:[%s7368_s3 + $0x40] ss:$16 sps:$4 sm:$0xff]   ;;  %v5121_v8 = vld [vmem:[%s7368_s3 + $0x4] ss:$16 sps:$4 sm:$0xff]  }
 0x118   :  { %v1787_v20 = vpop.f32.mrf.mxu1  ;;  %2109 = vmatprep.subr.bf16.mxu1 %v4534_v4  ;;  %v1748_v25 = vpop.f32.mrf.mxu0  ;;  %v5116_v4 = vld [vmem:[%s7368_s3 + $0x240] ss:$16 sps:$4 sm:$0xff]   ;;  %v5130_v10 = vld [vmem:[%s7368_s3 + $0x204] ss:$16 sps:$4 sm:$0xff]  }
 0x119   :  { %2147 = vmatpush2.bf16.msra.mxu0 %v4677_v14  ;;  %v1788_v36 = vadd.f32 %v1787_v20, %v1747_v26  ;;  %v5119_v11 = vld [vmem:[%s7368_s3] ss:$16 sps:$4 sm:$0xff]   ;;  %v5127_v13 = vld [vmem:[%s7368_s3 + $0x1e4] ss:$16 sps:$4 sm:$0xff]  }
 0x11a   :  { %v1789_v27 = vpop.f32.mrf.mxu1  ;;  %v1749_v12 = vpop.f32.mrf.mxu0  ;;  %2148 = vmatprep.subr.bf16.mxu0 %v4670_v18  ;;  %v5128_v14 = vld [vmem:[%s7368_s3 + $0x200] ss:$16 sps:$4 sm:$0xff]   ;;  %v5136_v15 = vld [vmem:[%s7368_s3 + $0x3e4] ss:$16 sps:$4 sm:$0xff]  }
 0x11b   :  { %2110 = vmatpush2.bf16.msra.mxu1 %v4533_v16  ;;  %v5125_v16 = vld [vmem:[%s7368_s3 + $0x1e0] ss:$16 sps:$4 sm:$0xff]   ;;  %v5133_v18 = vld [vmem:[%s7368_s3 + $0x1c4] ss:$16 sps:$4 sm:$0xff]  }
 0x11c   :  { %v1790_v32 = vpop.f32.mrf.mxu1  ;;  %4733 = vmatprep.subr.msk.bf16.mxu1 %vm1685_vm0, %v4726_v21  ;;  %v1826_v35 = vpop.f32.mrf.mxu0  ;;  %v5142_v20 = vld [vmem:[%s7368_s3 + $0x3c4] ss:$16 sps:$4 sm:$0xff]   ;;  %v5131_v21 = vld [vmem:[%s7368_s3 + $0x1c0] ss:$16 sps:$4 sm:$0xff]  }
 0x11d   :  { %2149 = vmatpush2.bf16.msra.mxu0 %v4669_v28  ;;  %v6426_v0 = vadd.f32 %v1826_v35, %v1786_v19  ;;  %v5134_v19 = vld [vmem:[%s7368_s3 + $0x3e0] ss:$16 sps:$4 sm:$0xff]   ;;  %v5145_v26 = vld [vmem:[%s7368_s3 + $0x184] ss:$16 sps:$4 sm:$0xff]  }
 0x11e   :  { %2112 = vmatmul.mubr.bf16.vlgmr.msra.gmra.mxu1 %v5802_v30  ;;  %v1828_v37 = vpop.f32.mrf.mxu0  ;;  %2150 = vmatprep.subr.bf16.mxu0 %v4662_v29  ;;  %v5080_v30 = vld [vmem:[%s7368_s3 + $0xe0] ss:$16 sps:$4 sm:$0xff]   ;;  %v5154_v28 = vld [vmem:[%s7368_s3 + $0x384] ss:$16 sps:$4 sm:$0xff]  }
 0x11f   :  { %2176 = vmatpush1.bf16.msra.mxu1 %v1705_v33  ;;  %v1829_v17 = vadd.f32 %v1828_v37, %v1788_v36  ;;  %2193 = vmatprep.mubr.bf16.mxu1 %v5520_v38  ;;  %v5086_v38 = vld [vmem:[%s7368_s3 + $0x2e0] ss:$16 sps:$4 sm:$0xff]   ;;  %v5151_v29 = vld [vmem:[%s7368_s3 + $0x164] ss:$16 sps:$4 sm:$0xff]   ;;  %v351_v36 = vsub.s32 2, %v5633_v45 }
 0x120   :  { %3817 = vmatprep.subr.bf16.mxu1 %v5088_v34  ;;  %v1830_v40 = vpop.f32.mrf.mxu0  ;;  %v5137_v25 = vld [vmem:[%s7368_s3 + $0x1a0] ss:$16 sps:$4 sm:$0xff]   ;;  %v5160_v33 = vld [vmem:[%s7368_s3 + $0x364] ss:$16 sps:$4 sm:$0xff]  }
 0x121   :  { %v2203_v41 = vmax.f32 %v1829_v17, 0.0  ;;  %2151 = vmatpush2.bf16.msra.mxu0 %v4661_v6  ;;  %v5146_v27 = vld [vmem:[%s7368_s3 + $0x3a0] ss:$16 sps:$4 sm:$0xff]   ;;  %v5157_v35 = vld [vmem:[%s7368_s3 + $0x144] ss:$16 sps:$4 sm:$0xff]   ;;  %v355_v17 = vsub.s32 3, %v5633_v45 }
 0x122   :  { %v1831_v42 = vpop.f32.mrf.mxu0  ;;  %3776 = vmatprep.subr.bf16.mxu0 %v5082_v39  ;;  %v5143_v12 = vld [vmem:[%s7368_s3 + $0x180] ss:$16 sps:$4 sm:$0xff]   ;;  %v5166_v37 = vld [vmem:[%s7368_s3 + $0x344] ss:$16 sps:$4 sm:$0xff]  }
 0x123   :  { %v6438_v46 = vpack.c.bf16 %v2203_v41, %v2203_v41  ;;  %v5152_v32 = vld [vmem:[%s7368_s3 + $0x380] ss:$16 sps:$4 sm:$0xff]   ;;  %v5163_v41 = vld [vmem:[%s7368_s3 + $0x124] ss:$16 sps:$4 sm:$0xff]  }
 0x124   :  { %2153 = vmatmul.mubr.bf16.vlgmr.msra.gmra.mxu0 %v5806_v31  ;;  %v5092_v31 = vld [vmem:[%s7368_s3 + $0x2c0] ss:$16 sps:$4 sm:$0xff]  }
 0x125   :  { %3777 = vmatpush1.bf16.msra.mxu0 %v5080_v30  ;;  %3808 = vmatprep.mubr.bf16.mxu0 %v6438_v46  ;;  %v5149_v34 = vld [vmem:[%s7368_s3 + $0x160] ss:$16 sps:$4 sm:$0xff]   ;;  %v352_v30 = vrot.slane %v6384_v56, %v351_v36 }
 0x126   :  { %4734 = vmatmul.mubr.msk.bf16.vlgmr.msra.gmra.mxu1 %vm1681_vm1, %v5834_v44  ;;  %3778 = vmatprep.subr.bf16.mxu0 %v5085_v43  ;;  %v5100_v44 = vld [vmem:[%s7368_s3 + $0x2a4] ss:$16 sps:$4 sm:$0xff]   ;;  %v5158_v6 = vld [vmem:[%s7368_s3 + $0x360] ss:$16 sps:$4 sm:$0xff]  }
 0x127   :  { %3818 = vmatpush1.bf16.msra.mxu1 %v5086_v38  ;;  %v5155_v40 = vld [vmem:[%s7368_s3 + $0x140] ss:$16 sps:$4 sm:$0xff]   ;;  %v5172_v38 = vld [vmem:[%s7368_s3 + $0x324] ss:$16 sps:$4 sm:$0xff]  }
 0x128   :  { %3819 = vmatprep.subr.bf16.mxu1 %v5094_v47  ;;  %v5164_v43 = vld [vmem:[%s7368_s3 + $0x340] ss:$16 sps:$4 sm:$0xff]   ;;  %v356_v47 = vrot.slane %v6384_v56, %v355_v17 }
 0x129   :  { %3779 = vmatpush1.bf16.msra.mxu0 %v5083_v48 }
 0x12a   :  { %3780 = vmatprep.subr.bf16.mxu0 %v5091_v49  ;;  %v5161_v49 = vld [vmem:[%s7368_s3 + $0x120] ss:$16 sps:$4 sm:$0xff]  }
 0x12b   :  { %3820 = vmatpush1.bf16.msra.mxu1 %v5092_v31  ;;  %v5169_v31 = vld [vmem:[%s7368_s3 + $0x104] ss:$16 sps:$4 sm:$0xff]  }
 0x12c   :  { %3821 = vmatprep.subr.bf16.mxu1 %v5100_v44 }
 0x12d   :  { %3781 = vmatpush1.bf16.msra.mxu0 %v5089_v50 }
 0x12e   :  { %3782 = vmatprep.subr.bf16.mxu0 %v5097_v51  ;;  %v5170_v51 = vld [vmem:[%s7368_s3 + $0x320] ss:$16 sps:$4 sm:$0xff]  }
 0x12f   :  { %3822 = vmatpush1.bf16.msra.mxu1 %v5098_v52 }
 0x130   :  { %3823 = vmatprep.subr.bf16.mxu1 %v5106_v54  ;;  %v5175_v54 = vld [vmem:[%s7368_s3 + $0x304] ss:$16 sps:$4 sm:$0xff]  }
 0x131   :  { %3783 = vmatpush1.bf16.msra.mxu0 %v5095_v55 }
 0x132   :  { %3784 = vmatprep.subr.bf16.mxu0 %v5103_v57 }
 0x133   :  { %3824 = vmatpush1.bf16.msra.mxu1 %v5104_v58 }
 0x134   :  { %3825 = vmatprep.subr.bf16.mxu1 %v5112_v59  ;;  %v5167_v59 = vld [vmem:[%s7368_s3 + $0x100] ss:$16 sps:$4 sm:$0xff]  }
 0x135   :  { %3785 = vmatpush1.bf16.msra.mxu0 %v5101_v60  ;;  %v2202_v60 = vmax.f32 %v6426_v0, 0.0  ;;  %v5229_v0 = vld [vmem:[%s7368_s3 + $0x6e4] ss:$16 sps:$4 sm:$0xff]  }
 0x136   :  { %3786 = vmatprep.subr.bf16.mxu0 %v5109_v61 }
 0x137   :  { %3826 = vmatpush1.bf16.msra.mxu1 %v5110_v62  ;;  %v5178_v62 = vld [vmem:[%s7368_s3 + $0x4e4] ss:$16 sps:$4 sm:$0xff]  }
 0x138   :  { %3827 = vmatprep.subr.bf16.mxu1 %v5118_v63 }
 0x139   :  { %3787 = vmatpush1.bf16.msra.mxu0 %v5107_v2 }
 0x13a   :  { %3788 = vmatprep.subr.bf16.mxu0 %v5115_v3 }
 0x13b   :  { %3828 = vmatpush1.bf16.msra.mxu1 %v5116_v4  ;;  %v5173_v4 = vld [vmem:[%s7368_s3 + $0x300] ss:$16 sps:$4 sm:$0xff]  }
 0x13c   :  { %3829 = vmatprep.subr.bf16.mxu1 %v5124_v5 }
 0x13d   :  { %3789 = vmatpush1.bf16.msra.mxu0 %v5113_v7 }
 0x13e   :  { %3790 = vmatprep.subr.bf16.mxu0 %v5121_v8 }
 0x13f   :  { %3830 = vmatpush1.bf16.msra.mxu1 %v5122_v9  ;;  %v5176_v9 = vld [vmem:[%s7368_s3 + $0x4e0] ss:$16 sps:$4 sm:$0xff]  }
 0x140   :  { %3831 = vmatprep.subr.bf16.mxu1 %v5130_v10  ;;  %v6642_v10 = vpack.c.bf16 %v2202_v60, %v2202_v60  ;;  %v5281_v60 = vld [vmem:[%s7368_s3 + $0x7c0] ss:$16 sps:$4 sm:$0xff]  }
 0x141   :  { %3791 = vmatpush1.bf16.msra.mxu0 %v5119_v11 }
 0x142   :  { %3792 = vmatprep.subr.bf16.mxu0 %v5127_v13 }
 0x143   :  { %3832 = vmatpush1.bf16.msra.mxu1 %v5128_v14  ;;  %v5181_v14 = vld [vmem:[%s7368_s3 + $0x4c4] ss:$16 sps:$4 sm:$0xff]  }
 0x144   :  { %3833 = vmatprep.subr.bf16.mxu1 %v5136_v15 }
 0x145   :  { %3793 = vmatpush2.bf16.msra.mxu0 %v5125_v16 }
 0x146   :  { %3794 = vmatprep.subr.bf16.mxu0 %v5133_v18 }
 0x147   :  { %3834 = vmatpush2.bf16.msra.mxu1 %v5134_v19  ;;  %v5179_v19 = vld [vmem:[%s7368_s3 + $0x4c0] ss:$16 sps:$4 sm:$0xff]  }
 0x148   :  { %3835 = vmatprep.subr.bf16.mxu1 %v5142_v20  ;;  %v5227_v20 = vld [vmem:[%s7368_s3 + $0x6e0] ss:$16 sps:$4 sm:$0xff]  }
 0x149   :  { %3795 = vmatpush2.bf16.msra.mxu0 %v5131_v21 }
 0x14a   :  { %3796 = vmatprep.subr.bf16.mxu0 %v5139_v22  ;;  %v5184_v22 = vld [vmem:[%s7368_s3 + $0x4a4] ss:$16 sps:$4 sm:$0xff]  }
 0x14b   :  { %3836 = vmatpush2.bf16.msra.mxu1 %v5140_v23  ;;  %v5235_v23 = vld [vmem:[%s7368_s3 + $0x6c4] ss:$16 sps:$4 sm:$0xff]  }
 0x14c   :  { %3837 = vmatprep.subr.bf16.mxu1 %v5148_v24  ;;  %v5182_v24 = vld [vmem:[%s7368_s3 + $0x4a0] ss:$16 sps:$4 sm:$0xff]  }
 0x14d   :  { %3797 = vmatpush2.bf16.msra.mxu0 %v5137_v25  ;;  %v5233_v25 = vld [vmem:[%s7368_s3 + $0x6c0] ss:$16 sps:$4 sm:$0xff]  }
 0x14e   :  { %3798 = vmatprep.subr.bf16.mxu0 %v5145_v26  ;;  %v5187_v26 = vld [vmem:[%s7368_s3 + $0x484] ss:$16 sps:$4 sm:$0xff]  }
 0x14f   :  { %3838 = vmatpush2.bf16.msra.mxu1 %v5146_v27  ;;  %v5241_v27 = vld [vmem:[%s7368_s3 + $0x6a4] ss:$16 sps:$4 sm:$0xff]  }
 0x150   :  { %3839 = vmatprep.subr.bf16.mxu1 %v5154_v28  ;;  %v5185_v28 = vld [vmem:[%s7368_s3 + $0x480] ss:$16 sps:$4 sm:$0xff]  }
 0x151   :  { %3799 = vmatpush2.bf16.msra.mxu0 %v5143_v12  ;;  %v5239_v12 = vld [vmem:[%s7368_s3 + $0x6a0] ss:$16 sps:$4 sm:$0xff]  }
 0x152   :  { %3800 = vmatprep.subr.bf16.mxu0 %v5151_v29  ;;  %v5190_v29 = vld [vmem:[%s7368_s3 + $0x464] ss:$16 sps:$4 sm:$0xff]  }
 0x153   :  { %3840 = vmatpush2.bf16.msra.mxu1 %v5152_v32  ;;  %v5247_v32 = vld [vmem:[%s7368_s3 + $0x684] ss:$16 sps:$4 sm:$0xff]  }
 0x154   :  { %3841 = vmatprep.subr.bf16.mxu1 %v5160_v33  ;;  %v5188_v33 = vld [vmem:[%s7368_s3 + $0x460] ss:$16 sps:$4 sm:$0xff]  }
 0x155   :  { %3801 = vmatpush2.bf16.msra.mxu0 %v5149_v34  ;;  %v5245_v34 = vld [vmem:[%s7368_s3 + $0x680] ss:$16 sps:$4 sm:$0xff]  }
 0x156   :  { %v1867_v39 = vpop.f32.mrf.mxu1  ;;  %3802 = vmatprep.subr.bf16.mxu0 %v5157_v35  ;;  %v5193_v35 = vld [vmem:[%s7368_s3 + $0x444] ss:$16 sps:$4 sm:$0xff]  }
 0x157   :  { %3842 = vmatpush2.bf16.msra.mxu1 %v5158_v6  ;;  %v1868_v44 = vadd.f32 %v1867_v39, %v352_v30  ;;  %v5253_v6 = vld [vmem:[%s7368_s3 + $0x664] ss:$16 sps:$4 sm:$0xff]   ;;  %v5251_v39 = vld [vmem:[%s7368_s3 + $0x660] ss:$16 sps:$4 sm:$0xff]  }
 0x158   :  { %v1869_v42 = vpop.f32.mrf.mxu1  ;;  %3843 = vmatprep.subr.bf16.mxu1 %v5166_v37  ;;  %v5191_v37 = vld [vmem:[%s7368_s3 + $0x440] ss:$16 sps:$4 sm:$0xff]  }
 0x159   :  { %3803 = vmatpush2.bf16.msra.mxu0 %v5155_v40  ;;  %v1870_v55 = vadd.f32 %v1869_v42, %v356_v47  ;;  %v5196_v40 = vld [vmem:[%s7368_s3 + $0x424] ss:$16 sps:$4 sm:$0xff]   ;;  %v5194_v30 = vld [vmem:[%s7368_s3 + $0x420] ss:$16 sps:$4 sm:$0xff]  }
 0x15a   :  { %v1871_v48 = vpop.f32.mrf.mxu1  ;;  %3804 = vmatprep.subr.bf16.mxu0 %v5163_v41  ;;  %v5259_v41 = vld [vmem:[%s7368_s3 + $0x644] ss:$16 sps:$4 sm:$0xff]   ;;  %v5257_v42 = vld [vmem:[%s7368_s3 + $0x640] ss:$16 sps:$4 sm:$0xff]  }
 0x15b   :  { %3844 = vmatpush2.bf16.msra.mxu1 %v5164_v43  ;;  %v5199_v43 = vld [vmem:[%s7368_s3 + $0x404] ss:$16 sps:$4 sm:$0xff]   ;;  %v5197_v47 = vld [vmem:[%s7368_s3 + $0x400] ss:$16 sps:$4 sm:$0xff]  }
 0x15c   :  { %v1872_v50 = vpop.f32.mrf.mxu1  ;;  %v1908_v52 = vpop.f32.mrf.mxu0  ;;  %3845 = vmatprep.subr.bf16.mxu1 %v5172_v38  ;;  %v5265_v38 = vld [vmem:[%s7368_s3 + $0x624] ss:$16 sps:$4 sm:$0xff]   ;;  %v5263_v48 = vld [vmem:[%s7368_s3 + $0x620] ss:$16 sps:$4 sm:$0xff]  }
 0x15d   :  { %v1909_v57 = vadd.f32 %v1908_v52, %v1868_v44  ;;  %3805 = vmatpush2.bf16.msra.mxu0 %v5161_v49  ;;  %v5202_v49 = vld [vmem:[%s7368_s3 + $0x5e4] ss:$16 sps:$4 sm:$0xff]   ;;  %v5200_v44 = vld [vmem:[%s7368_s3 + $0x5e0] ss:$16 sps:$4 sm:$0xff]  }
 0x15e   :  { %v1949_v58 = vpop.f32.mrf.mxu1  ;;  %v1910_v61 = vpop.f32.mrf.mxu0  ;;  %3806 = vmatprep.subr.bf16.mxu0 %v5169_v31  ;;  %v5271_v31 = vld [vmem:[%s7368_s3 + $0x604] ss:$16 sps:$4 sm:$0xff]   ;;  %v5269_v50 = vld [vmem:[%s7368_s3 + $0x600] ss:$16 sps:$4 sm:$0xff]  }
 0x15f   :  { %v1950_v63 = vadd.f32 %v1949_v58, %v1909_v57  ;;  %v1911_v2 = vadd.f32 %v1910_v61, %v1870_v55  ;;  %3846 = vmatpush2.bf16.msra.mxu1 %v5170_v51  ;;  %v5205_v51 = vld [vmem:[%s7368_s3 + $0x5c4] ss:$16 sps:$4 sm:$0xff]   ;;  %v5275_v55 = vld [vmem:[%s7368_s3 + $0x7e0] ss:$16 sps:$4 sm:$0xff]  }
 0x160   :  { %v1951_v3 = vpop.f32.mrf.mxu1  ;;  %v1912_v5 = vpop.f32.mrf.mxu0  ;;  %3847 = vmatprep.subr.bf16.mxu1 %v5175_v54  ;;  %v5277_v52 = vld [vmem:[%s7368_s3 + $0x7e4] ss:$16 sps:$4 sm:$0xff]   ;;  %v5203_v54 = vld [vmem:[%s7368_s3 + $0x5c0] ss:$16 sps:$4 sm:$0xff]  }
 0x161   :  { %v1952_v7 = vadd.f32 %v1951_v3, %v1911_v2  ;;  %3807 = vmatpush2.bf16.msra.mxu0 %v5167_v59  ;;  %v2204_v11 = vmax.f32 %v1950_v63, 0.0  ;;  %v5208_v57 = vld [vmem:[%s7368_s3 + $0x5a4] ss:$16 sps:$4 sm:$0xff]   ;;  %v5206_v59 = vld [vmem:[%s7368_s3 + $0x5a0] ss:$16 sps:$4 sm:$0xff]  }
 0x162   :  { %v1953_v8 = vpop.f32.mrf.mxu1  ;;  %v1913_v13 = vpop.f32.mrf.mxu0  ;;  %3858 = vmatprep.subr.bf16.mxu0 %v5178_v62  ;;  %v5283_v58 = vld [vmem:[%s7368_s3 + $0x7c4] ss:$16 sps:$4 sm:$0xff]   ;;  %v5209_v63 = vld [vmem:[%s7368_s3 + $0x580] ss:$16 sps:$4 sm:$0xff]  }
 0x163   :  { %v2205_v15 = vmax.f32 %v1952_v7, 0.0  ;;  %3848 = vmatpush2.bf16.msra.mxu1 %v5173_v4  ;;  %v6656_v21 = vpack.c.bf16 %v2204_v11, %v2204_v11  ;;  %v5211_v61 = vld [vmem:[%s7368_s3 + $0x584] ss:$16 sps:$4 sm:$0xff]   ;;  %v5287_v2 = vld [vmem:[%s7368_s3 + $0x7a0] ss:$16 sps:$4 sm:$0xff]  }
 0x164   :  { %v1954_v16 = vpop.f32.mrf.mxu1  ;;  %3809 = vmatmul.mubr.bf16.vlgmr.msra.gmra.mxu0 %v6642_v10  ;;  %3899 = vmatprep.subr.bf16.mxu1 %v5229_v0  ;;  %v5289_v62 = vld [vmem:[%s7368_s3 + $0x7a4] ss:$16 sps:$4 sm:$0xff]   ;;  %v5212_v5 = vld [vmem:[%s7368_s3 + $0x560] ss:$16 sps:$4 sm:$0xff]  }
 0x165   :  { %v6648_v18 = vpack.c.bf16 %v2205_v15, %v2205_v15  ;;  %3859 = vmatpush1.bf16.msra.mxu0 %v5176_v9  ;;  %v5214_v3 = vld [vmem:[%s7368_s3 + $0x564] ss:$16 sps:$4 sm:$0xff]   ;;  %v5293_v0 = vld [vmem:[%s7368_s3 + $0x780] ss:$16 sps:$4 sm:$0xff]   ;;  %v359_v15 = vsub.s32 4, %v5633_v45  ;;  %v363_v16 = vsub.s32 5, %v5633_v45 }
 0x166   :  { %3860 = vmatprep.subr.bf16.mxu0 %v5181_v14  ;;  %v5295_v4 = vld [vmem:[%s7368_s3 + $0x784] ss:$16 sps:$4 sm:$0xff]   ;;  %v5215_v9 = vld [vmem:[%s7368_s3 + $0x540] ss:$16 sps:$4 sm:$0xff]  }
 0x167   :  { %3849 = vmatprep.mubr.bf16.mxu1 %v6648_v18  ;;  %v5217_v7 = vld [vmem:[%s7368_s3 + $0x544] ss:$16 sps:$4 sm:$0xff]   ;;  %v5299_v11 = vld [vmem:[%s7368_s3 + $0x760] ss:$16 sps:$4 sm:$0xff]  }
 0x168   :  { %3850 = vmatmul.mubr.bf16.vlgmr.msra.gmra.mxu1 %v6656_v21  ;;  %v5301_v8 = vld [vmem:[%s7368_s3 + $0x764] ss:$16 sps:$4 sm:$0xff]  }
 0x169   :  { %3861 = vmatpush1.bf16.msra.mxu0 %v5179_v19  ;;  %3900 = vmatpush1.bf16.msra.mxu1 %v5227_v20  ;;  %v5220_v13 = vld [vmem:[%s7368_s3 + $0x524] ss:$16 sps:$4 sm:$0xff]   ;;  %v5218_v19 = vld [vmem:[%s7368_s3 + $0x520] ss:$16 sps:$4 sm:$0xff]  }
 0x16a   :  { %3862 = vmatprep.subr.bf16.mxu0 %v5184_v22  ;;  %3901 = vmatprep.subr.bf16.mxu1 %v5235_v23  ;;  %v5307_v14 = vld [vmem:[%s7368_s3 + $0x744] ss:$16 sps:$4 sm:$0xff]   ;;  %v5305_v20 = vld [vmem:[%s7368_s3 + $0x740] ss:$16 sps:$4 sm:$0xff]  }
 0x16b   :  { %v5223_v22 = vld [vmem:[%s7368_s3 + $0x504] ss:$16 sps:$4 sm:$0xff]  }
 0x16c   :  { %v5313_v23 = vld [vmem:[%s7368_s3 + $0x724] ss:$16 sps:$4 sm:$0xff]  }
 0x16d   :  { %3863 = vmatpush1.bf16.msra.mxu0 %v5182_v24  ;;  %3902 = vmatpush1.bf16.msra.mxu1 %v5233_v25  ;;  %v360_v24 = vrot.slane %v6384_v56, %v359_v15  ;;  %v5286_v15 = vld [vmem:[%s7368_s3 + $0x1ac] ss:$16 sps:$4 sm:$0xff]  }
 0x16e   :  { %3864 = vmatprep.subr.bf16.mxu0 %v5187_v26  ;;  %3903 = vmatprep.subr.bf16.mxu1 %v5241_v27  ;;  %v364_v27 = vrot.slane %v6384_v56, %v363_v16  ;;  %v5284_v16 = vld [vmem:[%s7368_s3 + $0x1a8] ss:$16 sps:$4 sm:$0xff]  }
 0x171   :  { %3865 = vmatpush1.bf16.msra.mxu0 %v5185_v28  ;;  %3904 = vmatpush1.bf16.msra.mxu1 %v5239_v12  ;;  %v5221_v28 = vld [vmem:[%s7368_s3 + $0x500] ss:$16 sps:$4 sm:$0xff]  }
 0x172   :  { %3866 = vmatprep.subr.bf16.mxu0 %v5190_v29  ;;  %3905 = vmatprep.subr.bf16.mxu1 %v5247_v32  ;;  %v5311_v12 = vld [vmem:[%s7368_s3 + $0x720] ss:$16 sps:$4 sm:$0xff]   ;;  %v5226_v32 = vld [vmem:[%s7368_s3 + $0xec] ss:$16 sps:$4 sm:$0xff]  }
 0x175   :  { %3867 = vmatpush1.bf16.msra.mxu0 %v5188_v33  ;;  %3906 = vmatpush1.bf16.msra.mxu1 %v5245_v34  ;;  %v5319_v33 = vld [vmem:[%s7368_s3 + $0x704] ss:$16 sps:$4 sm:$0xff]  }
 0x176   :  { %3868 = vmatprep.subr.bf16.mxu0 %v5193_v35  ;;  %3907 = vmatprep.subr.bf16.mxu1 %v5253_v6 }
 0x179   :  { %3869 = vmatpush1.bf16.msra.mxu0 %v5191_v37  ;;  %3908 = vmatpush1.bf16.msra.mxu1 %v5251_v39 }
 0x17a   :  { %3870 = vmatprep.subr.bf16.mxu0 %v5196_v40  ;;  %3909 = vmatprep.subr.bf16.mxu1 %v5259_v41  ;;  %v5317_v40 = vld [vmem:[%s7368_s3 + $0x700] ss:$16 sps:$4 sm:$0xff]  }
 0x17d   :  { %3871 = vmatpush1.bf16.msra.mxu0 %v5194_v30  ;;  %3910 = vmatpush1.bf16.msra.mxu1 %v5257_v42  ;;  %v5325_v30 = vld [vmem:[%s7368_s3 + $0x2ec] ss:$16 sps:$4 sm:$0xff]  }
 0x17e   :  { %3872 = vmatprep.subr.bf16.mxu0 %v5199_v43  ;;  %3911 = vmatprep.subr.bf16.mxu1 %v5265_v38 }
 0x181   :  { %3873 = vmatpush1.bf16.msra.mxu0 %v5197_v47  ;;  %3912 = vmatpush1.bf16.msra.mxu1 %v5263_v48 }
 0x182   :  { %3874 = vmatprep.subr.bf16.mxu0 %v5202_v49  ;;  %3913 = vmatprep.subr.bf16.mxu1 %v5271_v31 }
 0x185   :  { %3875 = vmatpush2.bf16.msra.mxu0 %v5200_v44  ;;  %3914 = vmatpush1.bf16.msra.mxu1 %v5269_v50 }
 0x186   :  { %3876 = vmatprep.subr.bf16.mxu0 %v5205_v51  ;;  %3915 = vmatprep.subr.bf16.mxu1 %v5277_v52 }
 0x189   :  { %3877 = vmatpush2.bf16.msra.mxu0 %v5203_v54  ;;  %3916 = vmatpush2.bf16.msra.mxu1 %v5275_v55  ;;  %v5224_v55 = vld [vmem:[%s7368_s3 + $0xe8] ss:$16 sps:$4 sm:$0xff]  }
 0x18a   :  { %3878 = vmatprep.subr.bf16.mxu0 %v5208_v57  ;;  %3917 = vmatprep.subr.bf16.mxu1 %v5283_v58  ;;  %v5232_v58 = vld [vmem:[%s7368_s3 + $0xcc] ss:$16 sps:$4 sm:$0xff]  }
 0x18d   :  { %3879 = vmatpush2.bf16.msra.mxu0 %v5206_v59  ;;  %3918 = vmatpush2.bf16.msra.mxu1 %v5281_v60  ;;  %v5230_v59 = vld [vmem:[%s7368_s3 + $0xc8] ss:$16 sps:$4 sm:$0xff]   ;;  %v5238_v60 = vld [vmem:[%s7368_s3 + $0xac] ss:$16 sps:$4 sm:$0xff]  }
 0x18e   :  { %3880 = vmatprep.subr.bf16.mxu0 %v5211_v61  ;;  %3919 = vmatprep.subr.bf16.mxu1 %v5289_v62  ;;  %v5236_v61 = vld [vmem:[%s7368_s3 + $0xa8] ss:$16 sps:$4 sm:$0xff]   ;;  %v5244_v62 = vld [vmem:[%s7368_s3 + $0x8c] ss:$16 sps:$4 sm:$0xff]  }
 0x191   :  { %3881 = vmatpush2.bf16.msra.mxu0 %v5209_v63  ;;  %3920 = vmatpush2.bf16.msra.mxu1 %v5287_v2  ;;  %v5250_v63 = vld [vmem:[%s7368_s3 + $0x6c] ss:$16 sps:$4 sm:$0xff]   ;;  %v5248_v2 = vld [vmem:[%s7368_s3 + $0x68] ss:$16 sps:$4 sm:$0xff]  }
 0x192   :  { %3882 = vmatprep.subr.bf16.mxu0 %v5214_v3  ;;  %3921 = vmatprep.subr.bf16.mxu1 %v5295_v4  ;;  %v5256_v3 = vld [vmem:[%s7368_s3 + $0x4c] ss:$16 sps:$4 sm:$0xff]   ;;  %v5254_v4 = vld [vmem:[%s7368_s3 + $0x48] ss:$16 sps:$4 sm:$0xff]  }
 0x195   :  { %3883 = vmatpush2.bf16.msra.mxu0 %v5212_v5  ;;  %3922 = vmatpush2.bf16.msra.mxu1 %v5293_v0  ;;  %v5262_v5 = vld [vmem:[%s7368_s3 + $0x2c] ss:$16 sps:$4 sm:$0xff]   ;;  %v5260_v0 = vld [vmem:[%s7368_s3 + $0x28] ss:$16 sps:$4 sm:$0xff]  }
 0x196   :  { %3884 = vmatprep.subr.bf16.mxu0 %v5217_v7  ;;  %3923 = vmatprep.subr.bf16.mxu1 %v5301_v8  ;;  %v5268_v7 = vld [vmem:[%s7368_s3 + $0xc] ss:$16 sps:$4 sm:$0xff]   ;;  %v5266_v8 = vld [vmem:[%s7368_s3 + $0x8] ss:$16 sps:$4 sm:$0xff]  }
 0x199   :  { %3885 = vmatpush2.bf16.msra.mxu0 %v5215_v9  ;;  %3924 = vmatpush2.bf16.msra.mxu1 %v5299_v11  ;;  %v5274_v9 = vld [vmem:[%s7368_s3 + $0x1ec] ss:$16 sps:$4 sm:$0xff]   ;;  %v5272_v11 = vld [vmem:[%s7368_s3 + $0x1e8] ss:$16 sps:$4 sm:$0xff]  }
 0x19a   :  { %3886 = vmatprep.subr.bf16.mxu0 %v5220_v13  ;;  %3925 = vmatprep.subr.bf16.mxu1 %v5307_v14  ;;  %v5280_v13 = vld [vmem:[%s7368_s3 + $0x1cc] ss:$16 sps:$4 sm:$0xff]   ;;  %v5278_v14 = vld [vmem:[%s7368_s3 + $0x1c8] ss:$16 sps:$4 sm:$0xff]  }
 0x19c   :  { %v1990_v25 = vpop.f32.mrf.mxu0 }
 0x19d   :  { %3887 = vmatpush2.bf16.msra.mxu0 %v5218_v19  ;;  %3926 = vmatpush2.bf16.msra.mxu1 %v5305_v20  ;;  %v1991_v34 = vadd.f32 %v1990_v25, %v360_v24  ;;  %v5292_v19 = vld [vmem:[%s7368_s3 + $0x18c] ss:$16 sps:$4 sm:$0xff]   ;;  %v5290_v20 = vld [vmem:[%s7368_s3 + $0x188] ss:$16 sps:$4 sm:$0xff]  }
 0x19e   :  { %v2031_v26 = vpop.f32.mrf.mxu1  ;;  %v1992_v29 = vpop.f32.mrf.mxu0  ;;  %3888 = vmatprep.subr.bf16.mxu0 %v5223_v22  ;;  %3927 = vmatprep.subr.bf16.mxu1 %v5313_v23  ;;  %v5298_v22 = vld [vmem:[%s7368_s3 + $0x16c] ss:$16 sps:$4 sm:$0xff]   ;;  %v367_v23 = vsub.s32 6, %v5633_v45  ;;  %v5296_v24 = vld [vmem:[%s7368_s3 + $0x168] ss:$16 sps:$4 sm:$0xff]  }
 0x19f   :  { %v1993_v37 = vadd.f32 %v1992_v29, %v364_v27  ;;  %v2032_v42 = vadd.f32 %v2031_v26, %v1991_v34  ;;  %v5304_v25 = vld [vmem:[%s7368_s3 + $0x14c] ss:$16 sps:$4 sm:$0xff]   ;;  %v371_v27 = vsub.s32 7, %v5633_v45  ;;  %v5302_v29 = vld [vmem:[%s7368_s3 + $0x148] ss:$16 sps:$4 sm:$0xff]  }
 0x1a0   :  { %v2033_v35 = vpop.f32.mrf.mxu1  ;;  %v1994_v6 = vpop.f32.mrf.mxu0 }
 0x1a1   :  { %3889 = vmatpush2.bf16.msra.mxu0 %v5221_v28  ;;  %3928 = vmatpush2.bf16.msra.mxu1 %v5311_v12  ;;  %v2034_v47 = vadd.f32 %v2033_v35, %v1993_v37  ;;  %v368_v28 = vrot.slane %v6384_v56, %v367_v23  ;;  %v5308_v37 = vld [vmem:[%s7368_s3 + $0x128] ss:$16 sps:$4 sm:$0xff]   ;;  %v5361_v23 = vld [vmem:[%s7368_s3 + $0x22c] ss:$16 sps:$4 sm:$0xff]  }
 0x1a2   :  { %v2035_v39 = vpop.f32.mrf.mxu1  ;;  %v1995_v41 = vpop.f32.mrf.mxu0  ;;  %3940 = vmatprep.subr.bf16.mxu0 %v5226_v32  ;;  %3929 = vmatprep.subr.bf16.mxu1 %v5319_v33  ;;  %v5310_v32 = vld [vmem:[%s7368_s3 + $0x12c] ss:$16 sps:$4 sm:$0xff]   ;;  %v372_v33 = vrot.slane %v6384_v56, %v371_v27 }
 0x1a3   :  { %v5367_v27 = vld [vmem:[%s7368_s3 + $0x20c] ss:$16 sps:$4 sm:$0xff]  }
 0x1a4   :  { %v2036_v43 = vpop.f32.mrf.mxu1  ;;  %v2072_v38 = vpop.f32.mrf.mxu0 }
 0x1a5   :  { %v2073_v48 = vadd.f32 %v2072_v38, %v2032_v42  ;;  %3930 = vmatpush2.bf16.msra.mxu1 %v5317_v40  ;;  %v5316_v40 = vld [vmem:[%s7368_s3 + $0x10c] ss:$16 sps:$4 sm:$0xff]  }
 0x1a6   :  { %v2074_v49 = vpop.f32.mrf.mxu0  ;;  %3981 = vmatprep.subr.bf16.mxu1 %v5325_v30 }
 0x1a7   :  { %v2075_v31 = vadd.f32 %v2074_v49, %v2034_v47  ;;  %v2206_v44 = vmax.f32 %v2073_v48, 0.0  ;;  %v5314_v48 = vld [vmem:[%s7368_s3 + $0x108] ss:$16 sps:$4 sm:$0xff]  }
 0x1a8   :  { %v2076_v50 = vpop.f32.mrf.mxu0 }
 0x1a9   :  { %v2207_v51 = vmax.f32 %v2075_v31, 0.0  ;;  %v6849_v57 = vpack.c.bf16 %v2206_v44, %v2206_v44  ;;  %v5322_v31 = vld [vmem:[%s7368_s3 + $0x4ec] ss:$16 sps:$4 sm:$0xff]  }
 0x1aa   :  { %v2077_v52 = vpop.f32.mrf.mxu0 }
 0x1ab   :  { %v6844_v54 = vpack.c.bf16 %v2207_v51, %v2207_v51 }
 0x1ad   :  { %3890 = vmatprep.mubr.bf16.mxu0 %v6844_v54 }
 0x1ae   :  { %3891 = vmatmul.mubr.bf16.vlgmr.msra.gmra.mxu0 %v6849_v57 }
 0x1af   :  { %3941 = vmatpush1.bf16.msra.mxu0 %v5224_v55  ;;  %3972 = vmatprep.mubr.bf16.mxu0 %v6438_v46  ;;  %v5242_v46 = vld [vmem:[%s7368_s3 + $0x88] ss:$16 sps:$4 sm:$0xff]  }
 0x1b0   :  { %3942 = vmatprep.subr.bf16.mxu0 %v5232_v58 }
 0x1b3   :  { %3943 = vmatpush1.bf16.msra.mxu0 %v5230_v59  ;;  %v5320_v59 = vld [vmem:[%s7368_s3 + $0x4e8] ss:$16 sps:$4 sm:$0xff]  }
 0x1b4   :  { %3944 = vmatprep.subr.bf16.mxu0 %v5238_v60 }
 0x1b7   :  { %3945 = vmatpush1.bf16.msra.mxu0 %v5236_v61  ;;  %v5323_v61 = vld [vmem:[%s7368_s3 + $0x2e8] ss:$16 sps:$4 sm:$0xff]  }
 0x1b8   :  { %3946 = vmatprep.subr.bf16.mxu0 %v5244_v62 }
 0x1bb   :  { %3947 = vmatpush1.bf16.msra.mxu0 %v5242_v46  ;;  %v5328_v46 = vld [vmem:[%s7368_s3 + $0x4cc] ss:$16 sps:$4 sm:$0xff]  }
 0x1bc   :  { %3948 = vmatprep.subr.bf16.mxu0 %v5250_v63  ;;  %v5331_v63 = vld [vmem:[%s7368_s3 + $0x2cc] ss:$16 sps:$4 sm:$0xff]  }
 0x1bf   :  { %3949 = vmatpush1.bf16.msra.mxu0 %v5248_v2  ;;  %v5326_v2 = vld [vmem:[%s7368_s3 + $0x4c8] ss:$16 sps:$4 sm:$0xff]  }
 0x1c0   :  { %3950 = vmatprep.subr.bf16.mxu0 %v5256_v3  ;;  %v5329_v3 = vld [vmem:[%s7368_s3 + $0x2c8] ss:$16 sps:$4 sm:$0xff]  }
 0x1c3   :  { %3951 = vmatpush1.bf16.msra.mxu0 %v5254_v4  ;;  %v5337_v4 = vld [vmem:[%s7368_s3 + $0x2ac] ss:$16 sps:$4 sm:$0xff]  }
 0x1c4   :  { %3952 = vmatprep.subr.bf16.mxu0 %v5262_v5  ;;  %v5335_v5 = vld [vmem:[%s7368_s3 + $0x2a8] ss:$16 sps:$4 sm:$0xff]  }
 0x1c7   :  { %3953 = vmatpush1.bf16.msra.mxu0 %v5260_v0  ;;  %v5343_v0 = vld [vmem:[%s7368_s3 + $0x28c] ss:$16 sps:$4 sm:$0xff]  }
 0x1c8   :  { %3954 = vmatprep.subr.bf16.mxu0 %v5268_v7  ;;  %v5338_v7 = vld [vmem:[%s7368_s3 + $0x488] ss:$16 sps:$4 sm:$0xff]  }
 0x1cb   :  { %3955 = vmatpush1.bf16.msra.mxu0 %v5266_v8  ;;  %v5346_v8 = vld [vmem:[%s7368_s3 + $0x46c] ss:$16 sps:$4 sm:$0xff]  }
 0x1cc   :  { %3956 = vmatprep.subr.bf16.mxu0 %v5274_v9  ;;  %v5341_v9 = vld [vmem:[%s7368_s3 + $0x288] ss:$16 sps:$4 sm:$0xff]  }
 0x1cf   :  { %3957 = vmatpush2.bf16.msra.mxu0 %v5272_v11  ;;  %v5349_v11 = vld [vmem:[%s7368_s3 + $0x26c] ss:$16 sps:$4 sm:$0xff]  }
 0x1d0   :  { %3958 = vmatprep.subr.bf16.mxu0 %v5280_v13  ;;  %v5344_v13 = vld [vmem:[%s7368_s3 + $0x468] ss:$16 sps:$4 sm:$0xff]  }
 0x1d3   :  { %3959 = vmatpush2.bf16.msra.mxu0 %v5278_v14  ;;  %v5352_v14 = vld [vmem:[%s7368_s3 + $0x44c] ss:$16 sps:$4 sm:$0xff]  }
 0x1d4   :  { %3960 = vmatprep.subr.bf16.mxu0 %v5286_v15  ;;  %v5347_v15 = vld [vmem:[%s7368_s3 + $0x268] ss:$16 sps:$4 sm:$0xff]  }
 0x1d7   :  { %3961 = vmatpush2.bf16.msra.mxu0 %v5284_v16  ;;  %v5355_v16 = vld [vmem:[%s7368_s3 + $0x24c] ss:$16 sps:$4 sm:$0xff]  }
 0x1d8   :  { %3962 = vmatprep.subr.bf16.mxu0 %v5292_v19  ;;  %v5350_v19 = vld [vmem:[%s7368_s3 + $0x448] ss:$16 sps:$4 sm:$0xff]  }
 0x1db   :  { %3963 = vmatpush2.bf16.msra.mxu0 %v5290_v20  ;;  %v5358_v20 = vld [vmem:[%s7368_s3 + $0x42c] ss:$16 sps:$4 sm:$0xff]  }
 0x1dc   :  { %3964 = vmatprep.subr.bf16.mxu0 %v5298_v22  ;;  %v5353_v22 = vld [vmem:[%s7368_s3 + $0x248] ss:$16 sps:$4 sm:$0xff]  }
 0x1de   :  { %v2113_v26 = vpop.f32.mrf.mxu1 }
 0x1df   :  { %3965 = vmatpush2.bf16.msra.mxu0 %v5296_v24  ;;  %v2114_v35 = vadd.f32 %v2113_v26, %v368_v28  ;;  %v5356_v24 = vld [vmem:[%s7368_s3 + $0x428] ss:$16 sps:$4 sm:$0xff]  }
 0x1e0   :  { %v2115_v12 = vpop.f32.mrf.mxu1  ;;  %3966 = vmatprep.subr.bf16.mxu0 %v5304_v25  ;;  %v5364_v25 = vld [vmem:[%s7368_s3 + $0x40c] ss:$16 sps:$4 sm:$0xff]   ;;  %v5359_v26 = vld [vmem:[%s7368_s3 + $0x228] ss:$16 sps:$4 sm:$0xff]  }
 0x1e1   :  { %v2116_v41 = vadd.f32 %v2115_v12, %v372_v33  ;;  %v5362_v28 = vld [vmem:[%s7368_s3 + $0x408] ss:$16 sps:$4 sm:$0xff]   ;;  %v5370_v12 = vld [vmem:[%s7368_s3 + $0x5ec] ss:$16 sps:$4 sm:$0xff]  }
 0x1e2   :  { %v2117_v34 = vpop.f32.mrf.mxu1  ;;  %v5368_v33 = vld [vmem:[%s7368_s3 + $0x5e8] ss:$16 sps:$4 sm:$0xff]  }
 0x1e3   :  { %3967 = vmatpush2.bf16.msra.mxu0 %v5302_v29  ;;  %v5365_v29 = vld [vmem:[%s7368_s3 + $0x208] ss:$16 sps:$4 sm:$0xff]   ;;  %v5376_v34 = vld [vmem:[%s7368_s3 + $0x5cc] ss:$16 sps:$4 sm:$0xff]  }
 0x1e4   :  { %v2118_v6 = vpop.f32.mrf.mxu1  ;;  %v2154_v39 = vpop.f32.mrf.mxu0  ;;  %3968 = vmatprep.subr.bf16.mxu0 %v5310_v32  ;;  %v5373_v32 = vld [vmem:[%s7368_s3 + $0x3ec] ss:$16 sps:$4 sm:$0xff]  }
 0x1e5   :  { %v2155_v30 = vadd.f32 %v2154_v39, %v2114_v35  ;;  %v5371_v35 = vld [vmem:[%s7368_s3 + $0x3e8] ss:$16 sps:$4 sm:$0xff]   ;;  %v5379_v6 = vld [vmem:[%s7368_s3 + $0x3cc] ss:$16 sps:$4 sm:$0xff]  }
 0x1e6   :  { %v2195_v42 = vpop.f32.mrf.mxu1  ;;  %v2156_v43 = vpop.f32.mrf.mxu0  ;;  %v5382_v39 = vld [vmem:[%s7368_s3 + $0x5ac] ss:$16 sps:$4 sm:$0xff]  }
 0x1e7   :  { %v2196_v38 = vadd.f32 %v2195_v42, %v2155_v30  ;;  %v2157_v56 = vadd.f32 %v2156_v43, %v2116_v41  ;;  %3969 = vmatpush2.bf16.msra.mxu0 %v5308_v37  ;;  %v5374_v37 = vld [vmem:[%s7368_s3 + $0x5c8] ss:$16 sps:$4 sm:$0xff]   ;;  %v5385_v41 = vld [vmem:[%s7368_s3 + $0x3ac] ss:$16 sps:$4 sm:$0xff]  }
 0x1e8   :  { %v2197_v47 = vpop.f32.mrf.mxu1  ;;  %v2158_v49 = vpop.f32.mrf.mxu0  ;;  %3970 = vmatprep.subr.bf16.mxu0 %v5316_v40  ;;  %v5377_v40 = vld [vmem:[%s7368_s3 + $0x3c8] ss:$16 sps:$4 sm:$0xff]   ;;  %v5388_v42 = vld [vmem:[%s7368_s3 + $0x58c] ss:$16 sps:$4 sm:$0xff]  }
 0x1e9   :  { %v2198_v44 = vadd.f32 %v2197_v47, %v2157_v56  ;;  %v2208_v51 = vmax.f32 %v2196_v38, 0.0  ;;  %v5380_v30 = vld [vmem:[%s7368_s3 + $0x5a8] ss:$16 sps:$4 sm:$0xff]   ;;  %v5391_v38 = vld [vmem:[%s7368_s3 + $0x38c] ss:$16 sps:$4 sm:$0xff]  }
 0x1ea   :  { %v2199_v50 = vpop.f32.mrf.mxu1  ;;  %v2159_v52 = vpop.f32.mrf.mxu0  ;;  %v5383_v43 = vld [vmem:[%s7368_s3 + $0x3a8] ss:$16 sps:$4 sm:$0xff]   ;;  %v5394_v47 = vld [vmem:[%s7368_s3 + $0x56c] ss:$16 sps:$4 sm:$0xff]  }
 0x1eb   :  { %v2209_v55 = vmax.f32 %v2198_v44, 0.0  ;;  %3971 = vmatpush2.bf16.msra.mxu0 %v5314_v48  ;;  %v6959_v62 = vpack.c.bf16 %v2208_v51, %v2208_v51  ;;  %v5386_v56 = vld [vmem:[%s7368_s3 + $0x588] ss:$16 sps:$4 sm:$0xff]   ;;  %v5397_v49 = vld [vmem:[%s7368_s3 + $0x36c] ss:$16 sps:$4 sm:$0xff]  }
 0x1ec   :  { %v2200_v58 = vpop.f32.mrf.mxu1  ;;  %4022 = vmatprep.subr.bf16.mxu0 %v5322_v31  ;;  %v5389_v48 = vld [vmem:[%s7368_s3 + $0x388] ss:$16 sps:$4 sm:$0xff]   ;;  %v5400_v44 = vld [vmem:[%s7368_s3 + $0x54c] ss:$16 sps:$4 sm:$0xff]  }
 0x1ed   :  { %v6954_v60 = vpack.c.bf16 %v2209_v55, %v2209_v55  ;;  %v5392_v31 = vld [vmem:[%s7368_s3 + $0x568] ss:$16 sps:$4 sm:$0xff]   ;;  %v5403_v51 = vld [vmem:[%s7368_s3 + $0x34c] ss:$16 sps:$4 sm:$0xff]   ;;  %v7119_v55 = vld [vmem:[#allocation3] sm:$0xf] }
 0x1ee   :  { %3973 = vmatmul.mubr.bf16.vlgmr.msra.gmra.mxu0 %v6642_v10  ;;  %v5334_v10 = vld [vmem:[%s7368_s3 + $0x4ac] ss:$16 sps:$4 sm:$0xff]   ;;  %v5395_v50 = vld [vmem:[%s7368_s3 + $0x368] ss:$16 sps:$4 sm:$0xff]  }
 0x1ef   :  { %3931 = vmatprep.mubr.bf16.mxu1 %v6954_v60  ;;  %4023 = vmatpush1.bf16.msra.mxu0 %v5320_v59  ;;  %v5398_v52 = vld [vmem:[%s7368_s3 + $0x548] ss:$16 sps:$4 sm:$0xff]   ;;  %v5406_v58 = vld [vmem:[%s7368_s3 + $0x52c] ss:$16 sps:$4 sm:$0xff]  }
 0x1f0   :  { %4054 = vmatprep.mubr.bf16.mxu0 %v6844_v54  ;;  %3932 = vmatmul.mubr.bf16.vlgmr.msra.gmra.mxu1 %v6959_v62  ;;  %v5332_v54 = vld [vmem:[%s7368_s3 + $0x4a8] ss:$16 sps:$4 sm:$0xff]  }
 0x1f1   :  { %3982 = vmatpush1.bf16.msra.mxu1 %v5323_v61  ;;  %4013 = vmatprep.mubr.bf16.mxu1 %v6648_v18  ;;  %v5340_v18 = vld [vmem:[%s7368_s3 + $0x48c] ss:$16 sps:$4 sm:$0xff]   ;;  %v5401_v59 = vld [vmem:[%s7368_s3 + $0x348] ss:$16 sps:$4 sm:$0xff]  }
 0x1f2   :  { %4024 = vmatprep.subr.bf16.mxu0 %v5328_v46  ;;  %3983 = vmatprep.subr.bf16.mxu1 %v5331_v63  ;;  %v5409_v61 = vld [vmem:[%s7368_s3 + $0x32c] ss:$16 sps:$4 sm:$0xff]   ;;  %v2479_v46 = vrot.slane %v7119_v55, %v343_v53  ;;  %v5404_v63 = vld [vmem:[%s7368_s3 + $0x528] ss:$16 sps:$4 sm:$0xff]  }
 0x1f3   :  { %4025 = vmatpush1.bf16.msra.mxu0 %v5326_v2 }
 0x1f4   :  { %4026 = vmatprep.subr.bf16.mxu0 %v5334_v10  ;;  %v5412_v10 = vld [vmem:[%s7368_s3 + $0x50c] ss:$16 sps:$4 sm:$0xff]  }
 0x1f5   :  { %3984 = vmatpush1.bf16.msra.mxu1 %v5329_v3  ;;  %v2483_v3 = vrot.slane %v7119_v55, %v347_v1  ;;  %v5464_v1 = vld [vmem:[%s7370_s5 + $0x78] sm:$0xff]  }
 0x1f6   :  { %3985 = vmatprep.subr.bf16.mxu1 %v5337_v4  ;;  %v5407_v4 = vld [vmem:[%s7368_s3 + $0x328] ss:$16 sps:$4 sm:$0xff]  }
 0x1f7   :  { %4027 = vmatpush1.bf16.msra.mxu0 %v5332_v54  ;;  %v5415_v54 = vld [vmem:[%s7368_s3 + $0x30c] ss:$16 sps:$4 sm:$0xff]  }
 0x1f8   :  { %4028 = vmatprep.subr.bf16.mxu0 %v5340_v18 }
 0x1f9   :  { %3986 = vmatpush1.bf16.msra.mxu1 %v5335_v5  ;;  %v5410_v5 = vld [vmem:[%s7368_s3 + $0x508] ss:$16 sps:$4 sm:$0xff]  }
 0x1fa   :  { %3987 = vmatprep.subr.bf16.mxu1 %v5343_v0 }
 0x1fb   :  { %4029 = vmatpush1.bf16.msra.mxu0 %v5338_v7 }
 0x1fc   :  { %4030 = vmatprep.subr.bf16.mxu0 %v5346_v8 }
 0x1fd   :  { %3988 = vmatpush1.bf16.msra.mxu1 %v5341_v9 }
 0x1fe   :  { %3989 = vmatprep.subr.bf16.mxu1 %v5349_v11  ;;  %v5413_v11 = vld [vmem:[%s7368_s3 + $0x308] ss:$16 sps:$4 sm:$0xff]  }
 0x1ff   :  { %4031 = vmatpush1.bf16.msra.mxu0 %v5344_v13 }
 0x200   :  { %4032 = vmatprep.subr.bf16.mxu0 %v5352_v14 }
 0x201   :  { %3990 = vmatpush1.bf16.msra.mxu1 %v5347_v15  ;;  %v5418_v15 = vld [vmem:[%s7368_s3 + $0x6ec] ss:$16 sps:$4 sm:$0xff]  }
 0x202   :  { %3991 = vmatprep.subr.bf16.mxu1 %v5355_v16 }
 0x203   :  { %4033 = vmatpush1.bf16.msra.mxu0 %v5350_v19  ;;  %v5465_v19 = vld [vmem:[%s7370_s5 + $0x38] sm:$0xff]  }
 0x204   :  { %4034 = vmatprep.subr.bf16.mxu0 %v5358_v20 }
 0x205   :  { %3992 = vmatpush1.bf16.msra.mxu1 %v5353_v22  ;;  %v5466_v22 = vld [vmem:[%s7370_s5 + $0x70] sm:$0xff]  }
 0x206   :  { %3993 = vmatprep.subr.bf16.mxu1 %v5361_v23  ;;  %v5416_v23 = vld [vmem:[%s7368_s3 + $0x6e8] ss:$16 sps:$4 sm:$0xff]  }
 0x207   :  { %4035 = vmatpush1.bf16.msra.mxu0 %v5356_v24 }
 0x208   :  { %4036 = vmatprep.subr.bf16.mxu0 %v5364_v25  ;;  %v5421_v25 = vld [vmem:[%s7368_s3 + $0x6cc] ss:$16 sps:$4 sm:$0xff]  }
 0x209   :  { %3994 = vmatpush1.bf16.msra.mxu1 %v5359_v26  ;;  %v5467_v26 = vld [vmem:[%s7370_s5 + $0x30] sm:$0xff]  }
 0x20a   :  { %3995 = vmatprep.subr.bf16.mxu1 %v5367_v27  ;;  %v5468_v27 = vld [vmem:[%s7370_s5 + $0x68] sm:$0xff]  }
 0x20b   :  { %4037 = vmatpush1.bf16.msra.mxu0 %v5362_v28  ;;  %v5424_v28 = vld [vmem:[%s7368_s3 + $0x6ac] ss:$16 sps:$4 sm:$0xff]  }
 0x20c   :  { %4038 = vmatprep.subr.bf16.mxu0 %v5370_v12  ;;  %v5470_v12 = vld [vmem:[%s7370_s5 + $0x60] sm:$0xff]  }
 0x20d   :  { %3996 = vmatpush1.bf16.msra.mxu1 %v5365_v29  ;;  %v5427_v29 = vld [vmem:[%s7368_s3 + $0x68c] ss:$16 sps:$4 sm:$0xff]  }
 0x20e   :  { %3997 = vmatprep.subr.bf16.mxu1 %v5373_v32  ;;  %v5471_v32 = vld [vmem:[%s7370_s5 + $0x20] sm:$0xff]  }
 0x20f   :  { %4039 = vmatpush2.bf16.msra.mxu0 %v5368_v33  ;;  %v5472_v33 = vld [vmem:[%s7370_s5 + $0x58] sm:$0xff]  }
 0x210   :  { %4040 = vmatprep.subr.bf16.mxu0 %v5376_v34  ;;  %v5425_v34 = vld [vmem:[%s7368_s3 + $0x688] ss:$16 sps:$4 sm:$0xff]  }
 0x211   :  { %3998 = vmatpush2.bf16.msra.mxu1 %v5371_v35  ;;  %v5430_v35 = vld [vmem:[%s7368_s3 + $0x66c] ss:$16 sps:$4 sm:$0xff]  }
 0x212   :  { %3999 = vmatprep.subr.bf16.mxu1 %v5379_v6  ;;  %v5473_v6 = vld [vmem:[%s7370_s5 + $0x18] sm:$0xff]  }
 0x213   :  { %4041 = vmatpush2.bf16.msra.mxu0 %v5374_v37  ;;  %v5474_v37 = vld [vmem:[%s7370_s5 + $0x50] sm:$0xff]  }
 0x214   :  { %4042 = vmatprep.subr.bf16.mxu0 %v5382_v39  ;;  %v5428_v39 = vld [vmem:[%s7368_s3 + $0x668] ss:$16 sps:$4 sm:$0xff]  }
 0x215   :  { %4000 = vmatpush2.bf16.msra.mxu1 %v5377_v40  ;;  %v5433_v40 = vld [vmem:[%s7368_s3 + $0x64c] ss:$16 sps:$4 sm:$0xff]  }
 0x216   :  { %4001 = vmatprep.subr.bf16.mxu1 %v5385_v41  ;;  %v5475_v41 = vld [vmem:[%s7370_s5 + $0x10] sm:$0xff]  }
 0x217   :  { %4043 = vmatpush2.bf16.msra.mxu0 %v5380_v30  ;;  %v5476_v30 = vld [vmem:[%s7370_s5 + $0x48] sm:$0xff]  }
 0x218   :  { %4044 = vmatprep.subr.bf16.mxu0 %v5388_v42  ;;  %v5431_v42 = vld [vmem:[%s7368_s3 + $0x648] ss:$16 sps:$4 sm:$0xff]  }
 0x219   :  { %4002 = vmatpush2.bf16.msra.mxu1 %v5383_v43  ;;  %v5436_v43 = vld [vmem:[%s7368_s3 + $0x62c] ss:$16 sps:$4 sm:$0xff]  }
 0x21a   :  { %4003 = vmatprep.subr.bf16.mxu1 %v5391_v38  ;;  %v5477_v38 = vld [vmem:[%s7370_s5 + $0x8] sm:$0xff]  }
 0x21b   :  { %4045 = vmatpush2.bf16.msra.mxu0 %v5386_v56  ;;  %v5478_v56 = vld [vmem:[%s7370_s5 + $0x40] sm:$0xff]  }
 0x21c   :  { %4046 = vmatprep.subr.bf16.mxu0 %v5394_v47  ;;  %v5434_v47 = vld [vmem:[%s7368_s3 + $0x628] ss:$16 sps:$4 sm:$0xff]  }
 0x21d   :  { %4004 = vmatpush2.bf16.msra.mxu1 %v5389_v48  ;;  %v5439_v48 = vld [vmem:[%s7368_s3 + $0x60c] ss:$16 sps:$4 sm:$0xff]  }
 0x21e   :  { %4005 = vmatprep.subr.bf16.mxu1 %v5397_v49  ;;  %v5479_v49 = vld [vmem:[%s7370_s5] sm:$0xff]  }
 0x21f   :  { %4047 = vmatpush2.bf16.msra.mxu0 %v5392_v31  ;;  %v5437_v31 = vld [vmem:[%s7368_s3 + $0x608] ss:$16 sps:$4 sm:$0xff]  }
 0x220   :  { %4048 = vmatprep.subr.bf16.mxu0 %v5400_v44  ;;  %v5442_v44 = vld [vmem:[%s7368_s3 + $0x7ec] ss:$16 sps:$4 sm:$0xff]  }
 0x221   :  { %4006 = vmatpush2.bf16.msra.mxu1 %v5395_v50  ;;  %v5440_v50 = vld [vmem:[%s7368_s3 + $0x7e8] ss:$16 sps:$4 sm:$0xff]  }
 0x222   :  { %4007 = vmatprep.subr.bf16.mxu1 %v5403_v51  ;;  %v5445_v51 = vld [vmem:[%s7368_s3 + $0x7cc] ss:$16 sps:$4 sm:$0xff]  }
 0x223   :  { %4049 = vmatpush2.bf16.msra.mxu0 %v5398_v52  ;;  %v5443_v52 = vld [vmem:[%s7368_s3 + $0x7c8] ss:$16 sps:$4 sm:$0xff]  }
 0x224   :  { %v3810_v2 = vpop.f32.mrf.mxu0  ;;  %4050 = vmatprep.subr.bf16.mxu0 %v5406_v58  ;;  %v5448_v58 = vld [vmem:[%s7368_s3 + $0x7ac] ss:$16 sps:$4 sm:$0xff]  }
 0x225   :  { %4008 = vmatpush2.bf16.msra.mxu1 %v5401_v59  ;;  %v3811_v18 = vadd.f32 %v3810_v2, %v2479_v46  ;;  %v5446_v59 = vld [vmem:[%s7368_s3 + $0x7a8] ss:$16 sps:$4 sm:$0xff]  }
 0x226   :  { %v3812_v53 = vpop.f32.mrf.mxu0  ;;  %4009 = vmatprep.subr.bf16.mxu1 %v5409_v61  ;;  %v5451_v61 = vld [vmem:[%s7368_s3 + $0x78c] ss:$16 sps:$4 sm:$0xff]   ;;  %v5449_v46 = vld [vmem:[%s7368_s3 + $0x788] ss:$16 sps:$4 sm:$0xff]  }
 0x227   :  { %4051 = vmatpush2.bf16.msra.mxu0 %v5404_v63  ;;  %v3813_v8 = vadd.f32 %v3812_v53, %v2483_v3  ;;  %v5454_v63 = vld [vmem:[%s7368_s3 + $0x76c] ss:$16 sps:$4 sm:$0xff]   ;;  %v5452_v2 = vld [vmem:[%s7368_s3 + $0x768] ss:$16 sps:$4 sm:$0xff]  }
 0x228   :  { %v3814_v0 = vpop.f32.mrf.mxu0  ;;  %v3851_v7 = vpop.f32.mrf.mxu1  ;;  %4052 = vmatprep.subr.bf16.mxu0 %v5412_v10  ;;  %v5457_v10 = vld [vmem:[%s7368_s3 + $0x74c] ss:$16 sps:$4 sm:$0xff]   ;;  %v5455_v3 = vld [vmem:[%s7368_s3 + $0x748] ss:$16 sps:$4 sm:$0xff]  }
 0x229   :  { %4010 = vmatpush2.bf16.msra.mxu1 %v5407_v4  ;;  %v7154_v9 = vadd.f32 %v3851_v7, %v3811_v18  ;;  %v5460_v4 = vld [vmem:[%s7368_s3 + $0x72c] ss:$16 sps:$4 sm:$0xff]   ;;  %v5458_v53 = vld [vmem:[%s7368_s3 + $0x728] ss:$16 sps:$4 sm:$0xff]  }
 0x22a   :  { %v3815_v13 = vpop.f32.mrf.mxu0  ;;  %v3853_v14 = vpop.f32.mrf.mxu1  ;;  %4011 = vmatprep.subr.bf16.mxu1 %v5415_v54  ;;  %v5463_v54 = vld [vmem:[%s7368_s3 + $0x70c] ss:$16 sps:$4 sm:$0xff]   ;;  %v5461_v18 = vld [vmem:[%s7368_s3 + $0x708] ss:$16 sps:$4 sm:$0xff]  }
 0x22b   :  { %v7162_v16 = vadd.f32 %v3853_v14, %v3813_v8  ;;  %4053 = vmatpush2.bf16.msra.mxu0 %v5410_v5  ;;  %v5480_v13 = vld [vmem:[%s7370_s5 + $0xf8] sm:$0xff]  }
 0x22c   :  { %v3855_v20 = vpop.f32.mrf.mxu1  ;;  %5024 = vmatprep.subr.bf16.mxu0 %v5464_v1  ;;  %v5481_v14 = vld [vmem:[%s7370_s5 + $0xb8] sm:$0xff]  }
 0x22d   :  { %4012 = vmatpush2.bf16.msra.mxu1 %v5413_v11  ;;  %v5487_v20 = vld [vmem:[%s7370_s5 + $0xa0] sm:$0xff]  }
 0x22e   :  { %4055 = vmatmul.mubr.bf16.vlgmr.msra.gmra.mxu0 %v6849_v57  ;;  %v3856_v24 = vpop.f32.mrf.mxu1  ;;  %4063 = vmatprep.subr.bf16.mxu1 %v5418_v15  ;;  %v5419_v57 = vld [vmem:[%s7368_s3 + $0x6c8] ss:$16 sps:$4 sm:$0xff]   ;;  %v5482_v15 = vld [vmem:[%s7370_s5 + $0xf0] sm:$0xff]  }
 0x22f   :  { %5025 = vmatpush3.bf16.msra.mxu0 %v5465_v19  ;;  %v5486_v19 = vld [vmem:[%s7370_s5 + $0xe0] sm:$0xff]   ;;  %v5490_v24 = vld [vmem:[%s7370_s5 + $0xd0] sm:$0xff]  }
 0x230   :  { %4014 = vmatmul.mubr.bf16.vlgmr.msra.gmra.mxu1 %v6656_v21  ;;  %5026 = vmatprep.subr.bf16.mxu0 %v5466_v22  ;;  %v5469_v21 = vld [vmem:[%s7370_s5 + $0x28] sm:$0xff]   ;;  %v5488_v22 = vld [vmem:[%s7370_s5 + $0xd8] sm:$0xff]  }
 0x231   :  { %4064 = vmatpush1.bf16.msra.mxu1 %v5416_v23  ;;  %4095 = vmatprep.mubr.bf16.mxu1 %v6954_v60  ;;  %v5422_v60 = vld [vmem:[%s7368_s3 + $0x6a8] ss:$16 sps:$4 sm:$0xff]  }
 0x232   :  { %4065 = vmatprep.subr.bf16.mxu1 %v5421_v25  ;;  %v5489_v23 = vld [vmem:[%s7370_s5 + $0x98] sm:$0xff]   ;;  %v5491_v25 = vld [vmem:[%s7370_s5 + $0x90] sm:$0xff]  }
 0x233   :  { %5027 = vmatpush3.bf16.msra.mxu0 %v5467_v26 }
 0x234   :  { %5028 = vmatprep.subr.bf16.mxu0 %v5468_v27 }
 0x235   :  { %4066 = vmatpush1.bf16.msra.mxu1 %v5419_v57 }
 0x236   :  { %4067 = vmatprep.subr.bf16.mxu1 %v5424_v28  ;;  %v5492_v28 = vld [vmem:[%s7370_s5 + $0xc8] sm:$0xff]  }
 0x237   :  { %5029 = vmatpush3.bf16.msra.mxu0 %v5469_v21 }
 0x238   :  { %5030 = vmatprep.subr.bf16.mxu0 %v5470_v12  ;;  %v5493_v12 = vld [vmem:[%s7370_s5 + $0x88] sm:$0xff]  }
 0x239   :  { %4068 = vmatpush1.bf16.msra.mxu1 %v5422_v60 }
 0x23a   :  { %4069 = vmatprep.subr.bf16.mxu1 %v5427_v29 }
 0x23b   :  { %5031 = vmatpush3.bf16.msra.mxu0 %v5471_v32 }
 0x23c   :  { %5032 = vmatprep.subr.bf16.mxu0 %v5472_v33 }
 0x23d   :  { %4070 = vmatpush1.bf16.msra.mxu1 %v5425_v34 }
 0x23e   :  { %4071 = vmatprep.subr.bf16.mxu1 %v5430_v35 }
 0x23f   :  { %5033 = vmatpush3.bf16.msra.mxu0 %v5473_v6  ;;  %v5494_v6 = vld [vmem:[%s7370_s5 + $0xc0] sm:$0xff]  }
 0x240   :  { %5034 = vmatprep.subr.bf16.mxu0 %v5474_v37 }
 0x241   :  { %4072 = vmatpush1.bf16.msra.mxu1 %v5428_v39  ;;  %v5495_v39 = vld [vmem:[%s7370_s5 + $0x80] sm:$0xff]  }
 0x242   :  { %4073 = vmatprep.subr.bf16.mxu1 %v5433_v40 }
 0x243   :  { %5035 = vmatpush3.bf16.msra.mxu0 %v5475_v41 }
 0x244   :  { %5036 = vmatprep.subr.bf16.mxu0 %v5476_v30 }
 0x245   :  { %4074 = vmatpush1.bf16.msra.mxu1 %v5431_v42  ;;  %v2487_v42 = vrot.slane %v7119_v55, %v351_v36 }
 0x246   :  { %4075 = vmatprep.subr.bf16.mxu1 %v5436_v43  ;;  %v2491_v43 = vrot.slane %v7119_v55, %v355_v17 }
 0x247   :  { %5037 = vmatpush3.bf16.msra.mxu0 %v5477_v38 }
 0x248   :  { %5038 = vmatprep.subr.bf16.mxu0 %v5478_v56 }
 0x249   :  { %4076 = vmatpush1.bf16.msra.mxu1 %v5434_v47 }
 0x24a   :  { %4077 = vmatprep.subr.bf16.mxu1 %v5439_v48 }
 0x24b   :  { %5039 = vmatpush3.bf16.msra.mxu0 %v5479_v49 }
 0x24d   :  { %4078 = vmatpush1.bf16.msra.mxu1 %v5437_v31 }
 0x24e   :  { %4079 = vmatprep.subr.bf16.mxu1 %v5442_v44 }
 0x251   :  { %4080 = vmatpush2.bf16.msra.mxu1 %v5440_v50 }
 0x252   :  { %4081 = vmatprep.subr.bf16.mxu1 %v5445_v51 }
 0x255   :  { %4082 = vmatpush2.bf16.msra.mxu1 %v5443_v52 }
 0x256   :  { %4083 = vmatprep.subr.bf16.mxu1 %v5448_v58 }
 0x259   :  { %4084 = vmatpush2.bf16.msra.mxu1 %v5446_v59 }
 0x25a   :  { %4085 = vmatprep.subr.bf16.mxu1 %v5451_v61 }
 0x25d   :  { %4086 = vmatpush2.bf16.msra.mxu1 %v5449_v46 }
 0x25e   :  { %4087 = vmatprep.subr.bf16.mxu1 %v5454_v63 }
 0x261   :  { %4088 = vmatpush2.bf16.msra.mxu1 %v5452_v2 }
 0x262   :  { %4089 = vmatprep.subr.bf16.mxu1 %v5457_v10 }
 0x265   :  { %4090 = vmatpush2.bf16.msra.mxu1 %v5455_v3 }
 0x266   :  { %4091 = vmatprep.subr.bf16.mxu1 %v5460_v4 }
 0x269   :  { %4092 = vmatpush2.bf16.msra.mxu1 %v5458_v53 }
 0x26a   :  { %4093 = vmatprep.subr.bf16.mxu1 %v5463_v54 }
 0x26d   :  { %4094 = vmatpush2.bf16.msra.mxu1 %v5461_v18 }
 0x26e   :  { %v3892_v5 = vpop.f32.mrf.mxu0  ;;  %5046 = vmatprep.subr.bf16.mxu1 %v5480_v13 }
 0x26f   :  { %v3893_v0 = vadd.f32 %v3892_v5, %v7154_v9  ;;  %v5484_v9 = vld [vmem:[%s7370_s5 + $0xe8] sm:$0xff]  }
 0x270   :  { %4096 = vmatmul.mubr.bf16.vlgmr.msra.gmra.mxu1 %v6959_v62  ;;  %v3894_v7 = vpop.f32.mrf.mxu0  ;;  %v5483_v62 = vld [vmem:[%s7370_s5 + $0xb0] sm:$0xff]  }
 0x271   :  { %v3895_v1 = vadd.f32 %v3894_v7, %v7162_v16  ;;  %5047 = vmatpush3.bf16.msra.mxu1 %v5481_v14  ;;  %v5485_v16 = vld [vmem:[%s7370_s5 + $0xa8] sm:$0xff]  }
 0x272   :  { %v3896_v8 = vpop.f32.mrf.mxu0  ;;  %5048 = vmatprep.subr.bf16.mxu1 %v5482_v15 }
 0x274   :  { %v3897_v11 = vpop.f32.mrf.mxu0 }
 0x275   :  { %5049 = vmatpush3.bf16.msra.mxu1 %v5483_v62 }
 0x276   :  { %5050 = vmatprep.subr.bf16.mxu1 %v5484_v9 }
 0x279   :  { %5051 = vmatpush3.bf16.msra.mxu1 %v5485_v16 }
 0x27a   :  { %5052 = vmatprep.subr.bf16.mxu1 %v5486_v19 }
 0x27d   :  { %5053 = vmatpush3.bf16.msra.mxu1 %v5487_v20 }
 0x27e   :  { %5054 = vmatprep.subr.bf16.mxu1 %v5488_v22 }
 0x281   :  { %5055 = vmatpush3.bf16.msra.mxu1 %v5489_v23 }
 0x282   :  { %5056 = vmatprep.subr.bf16.mxu1 %v5490_v24 }
 0x285   :  { %5057 = vmatpush3.bf16.msra.mxu1 %v5491_v25 }
 0x286   :  { %5058 = vmatprep.subr.bf16.mxu1 %v5492_v28 }
 0x289   :  { %5059 = vmatpush3.bf16.msra.mxu1 %v5493_v12 }
 0x28a   :  { %5060 = vmatprep.subr.bf16.mxu1 %v5494_v6 }
 0x28d   :  { %5061 = vmatpush3.bf16.msra.mxu1 %v5495_v39 }
 0x2ae   :  { %v3974_v26 = vpop.f32.mrf.mxu0 }
 0x2af   :  { %v3975_v56 = vadd.f32 %v3974_v26, %v2487_v42 }
 0x2b0   :  { %v3933_v27 = vpop.f32.mrf.mxu1  ;;  %v3976_v57 = vpop.f32.mrf.mxu0 }
 0x2b1   :  { %v3934_v21 = vadd.f32 %v3933_v27, %v3893_v0  ;;  %v3977_v49 = vadd.f32 %v3976_v57, %v2491_v43 }
 0x2b2   :  { %v3935_v60 = vpop.f32.mrf.mxu1  ;;  %v3978_v29 = vpop.f32.mrf.mxu0 }
 0x2b3   :  { %v3936_v32 = vadd.f32 %v3935_v60, %v3895_v1  ;;  %v4104_v33 = vmax.f32 %v3934_v21, 0.0  ;;  %v4991_v1 = vld [vmem:[#allocation2] ss:$0 sm:$0xff] }
 0x2b4   :  { %v3937_v34 = vpop.f32.mrf.mxu1  ;;  %v3979_v35 = vpop.f32.mrf.mxu0 }
 0x2b5   :  { %v4105_v37 = vmax.f32 %v3936_v32, 0.0  ;;  %v4108_v30 = vpack.c.bf16 %v4104_v33, %v4104_v33 }
 0x2b6   :  { %v3938_v40 = vpop.f32.mrf.mxu1 }
 0x2b7   :  { %v4109_v41 = vpack.c.bf16 %v4105_v37, %v4105_v37 }
 0x2b9   :  { %4407 = vmatprep.mubr.bf16.mxu0 %v4109_v41 }
 0x2ba   :  { %4408 = vmatmul.mubr.bf16.vlgmr.msra.gmra.mxu0 %v4108_v30 }
 0x2ee   :  { %v4056_v38 = vpop.f32.mrf.mxu0 }
 0x2f0   :  { %v4015_v47 = vpop.f32.mrf.mxu1  ;;  %v4058_v48 = vpop.f32.mrf.mxu0 }
 0x2f1   :  { %v4016_v31 = vadd.f32 %v4015_v47, %v3975_v56 }
 0x2f2   :  { %v4017_v44 = vpop.f32.mrf.mxu1  ;;  %v4060_v50 = vpop.f32.mrf.mxu0 }
 0x2f3   :  { %v4018_v51 = vadd.f32 %v4017_v44, %v3977_v49  ;;  %v4057_v52 = vadd.f32 %v4056_v38, %v4016_v31 }
 0x2f4   :  { %v4019_v58 = vpop.f32.mrf.mxu1  ;;  %v4061_v59 = vpop.f32.mrf.mxu0 }
 0x2f5   :  { %v4059_v61 = vadd.f32 %v4058_v48, %v4018_v51 }
 0x2f6   :  { %v4020_v46 = vpop.f32.mrf.mxu1 }
 0x330   :  { %v4097_v63 = vpop.f32.mrf.mxu1 }
 0x331   :  { %v4098_v36 = vadd.f32 %v4097_v63, %v4057_v52 }
 0x332   :  { %v4099_v2 = vpop.f32.mrf.mxu1 }
 0x333   :  { %v4100_v45 = vadd.f32 %v4099_v2, %v4059_v61  ;;  %v4106_v10 = vmax.f32 %v4098_v36, 0.0 }
 0x334   :  { %v4101_v17 = vpop.f32.mrf.mxu1 }
 0x335   :  { %v4107_v55 = vmax.f32 %v4100_v45, 0.0  ;;  %v4110_v53 = vpack.c.bf16 %v4106_v10, %v4106_v10 }
 0x336   :  { %v4102_v3 = vpop.f32.mrf.mxu1 }
 0x337   :  { %v4111_v4 = vpack.c.bf16 %v4107_v55, %v4107_v55 }
 0x339   :  { %4447 = vmatprep.mubr.bf16.mxu1 %v4111_v4 }
 0x33a   :  { %4448 = vmatmul.mubr.bf16.vlgmr.msra.gmra.mxu1 %v4110_v53 }
 0x37a   :  { %v5040_v54 = vpop.f32.mrf.mxu0 }
 0x37c   :  { %v5041_v18 = vpop.f32.mrf.mxu0 }
 0x37d   :  { %v5042_v5 = vadd.f32 %v5041_v18, %v5040_v54 }
 0x37e   :  { %v5043_v0 = vpop.f32.mrf.mxu0 }
 0x37f   :  { %v4410_v13 = vadd.f32 %v5042_v5, %v4991_v1 }
 0x380   :  { %v5044_v7 = vpop.f32.mrf.mxu0 }
 0x3fa   :  { %v5062_v8 = vpop.f32.mrf.mxu1 }
 0x3fc   :  { %v5063_v11 = vpop.f32.mrf.mxu1 }
 0x3fd   :  { %v5064_v14 = vadd.f32 %v5063_v11, %v5062_v8 }
 0x3fe   :  { %v5065_v15 = vpop.f32.mrf.mxu1 }
 0x3ff   :  { %v4450_v62 = vadd.f32 %v5064_v14, %v4410_v13 }
 0x400   :  { %v5066_v9 = vpop.f32.mrf.mxu1 }
 0x401   :  { %4456 = vst.msk [vmem:[%s7372_s7] sm:$0x3] %vm4455_vm2, %v4450_v62 }
 0x402   :  { %4461 = vsyncpa [#allocation4], 1 }

</bundles_post_ra>
